<compile_context>
chip_gen: v7x
topology: tpu7x:2x2x1
jax: 0.10.0
libtpu: 0.0.40
codegen_flags: <defaults>
</compile_context>

<pallas_src>
import jax
import jax.numpy as jnp
from jax.experimental import pallas as pl
from jax.experimental.pallas import tpu as pltpu

# ----- config (mirrors the PyTorch config object) -----
VOCAB_SIZE = 100
EMBED_SIZE = 32
HIDDEN_SIZE = 32
NUM_LAYERS = 2
NUM_CLASS = 5
BATCH_SIZE = 2
SEQ_LEN = 8
TD_OUT = 512
FC1_OUT = 2048
BN_EPS = 1e-5

VOCAB_PAD = ((VOCAB_SIZE + 127) // 128) * 128      # 128 (lane-aligned one-hot)
NUM_CLASS_PAD = 128                                # lane-dense head output

VMEM_SPEC = pl.BlockSpec(memory_space=pltpu.MemorySpace.VMEM)


def _sigmoid(x):
    return 1.0 / (1.0 + jnp.exp(-x))


# ---------------------------------------------------------------------------
# Single fused kernel for the whole forward pass.
# ---------------------------------------------------------------------------
def _make_textrnn_kernel(batch, seq_len, num_layers):
    B, T, H = batch, seq_len, HIDDEN_SIZE
    TB = T * B

    def kernel(*refs):
        tok_ref, emb_ref, tdw_ref, tdb_ref, g2_ref, b2_ref = refs[0:6]
        lstm_refs = refs[6:6 + 3 * num_layers]
        (fc1w_ref, fc1b_ref, bng_ref, bnb_ref,
         fc2w_ref, fc2b_ref, out_ref) = refs[6 + 3 * num_layers:]

        # ---- embedding lookup fused as a one-hot matmul (table in VMEM) ----
        tok = tok_ref[...]                                            # (T*B, 1) int32, time-major
        vocab_ids = jax.lax.broadcasted_iota(jnp.int32, (TB, VOCAB_PAD), 1)
        onehot = (vocab_ids == tok).astype(jnp.float32)               # (T*B, 128)
        emb = jnp.dot(onehot, emb_ref[...],
                      preferred_element_type=jnp.float32)             # (T*B, E)

        # ---- TimeDistributed Linear + BatchNorm2d(1) (batch stats) + ReLU ----
        y = jnp.dot(emb, tdw_ref[...],
                    preferred_element_type=jnp.float32) + tdb_ref[...]  # (T*B, 512)
        inv_n = 1.0 / float(TB * TD_OUT)
        mean = jnp.sum(y) * inv_n
        var = jnp.maximum(jnp.sum(y * y) * inv_n - mean * mean, 0.0)    # one-pass, biased
        y = (y - mean) * jax.lax.rsqrt(var + BN_EPS) * g2_ref[0, 0] + b2_ref[0, 0]
        x = jnp.maximum(y, 0.0)                                         # (T*B, 512) time-major

        # ---- stacked bidirectional LSTM, both directions fused per step ----
        h_finals = []
        for layer in range(num_layers):
            wih_ref, whh_ref, bias_ref = lstm_refs[3 * layer:3 * layer + 3]

            # hoisted input projection for BOTH directions in one matmul
            ih = jnp.dot(x, wih_ref[...],
                         preferred_element_type=jnp.float32) + bias_ref[...]  # (T*B, 8H)
            ihf = ih[:, :4 * H]                                         # fwd gate inputs
            ihb = ih[:, 4 * H:]                                         # bwd gate inputs
            whh = whh_ref[...]                                          # (2H, 8H) block-diag

            h = jnp.zeros((B, 2 * H), jnp.float32)                      # [h_fwd | h_bwd]
            c_f = jnp.zeros((B, H), jnp.float32)
            c_b = jnp.zeros((B, H), jnp.float32)
            outs_f = [None] * T
            outs_b = [None] * T

            for s in range(T):                                          # fully unrolled (static T)
                tf = s                                                  # fwd time index
                tb = T - 1 - s                                          # bwd time index (in-kernel reversal)
                hh = jnp.dot(h, whh, preferred_element_type=jnp.float32)  # (B, 8H)
                gate_f = ihf[tf * B:(tf + 1) * B, :] + hh[:, :4 * H]      # (B, 4H) order i,f,g,o
                gate_b = ihb[tb * B:(tb + 1) * B, :] + hh[:, 4 * H:]
                sg_f = _sigmoid(gate_f)
                th_f = jnp.tanh(gate_f)
                sg_b = _sigmoid(gate_b)
                th_b = jnp.tanh(gate_b)
                c_f = sg_f[:, H:2 * H] * c_f + sg_f[:, :H] * th_f[:, 2 * H:3 * H]
                c_b = sg_b[:, H:2 * H] * c_b + sg_b[:, :H] * th_b[:, 2 * H:3 * H]
                h_f = sg_f[:, 3 * H:] * jnp.tanh(c_f)
                h_b = sg_b[:, 3 * H:] * jnp.tanh(c_b)
                h = jnp.concatenate([h_f, h_b], axis=-1)                # (B, 2H)
                outs_f[tf] = h_f
                outs_b[tb] = h_b

            # final hidden of this layer: [fwd@t=T-1 | bwd@t=0] == h after loop
            h_finals.append(h)

            if layer + 1 < num_layers:
                # next layer's time-major input (T*B, 2H), PyTorch bi-output order
                x = jnp.concatenate(
                    [jnp.concatenate([outs_f[t], outs_b[t]], axis=-1) for t in range(T)],
                    axis=0)
            # TODO(synk): inter-layer dropout omitted (dropout_rate = 0.0).

        # h_out.transpose(0,1).view(B,-1): [l0_f | l0_b | l1_f | l1_b] per row
        feat = jnp.concatenate(h_finals, axis=-1)                       # (B, 2*H*num_layers)

        # ---- fc1 + BatchNorm1d (batch stats) + ReLU + fc2 (lane-padded) ----
        z = jnp.dot(feat, fc1w_ref[...],
                    preferred_element_type=jnp.float32) + fc1b_ref[...]  # (B, 2048)
        mu = jnp.mean(z, axis=0, keepdims=True)
        var1 = jnp.maximum(jnp.mean(z * z, axis=0, keepdims=True) - mu * mu, 0.0)
        zn = (z - mu) * jax.lax.rsqrt(var1 + BN_EPS) * bng_ref[...] + bnb_ref[...]
        a = jnp.maximum(zn, 0.0)
        out_ref[...] = jnp.dot(a, fc2w_ref[...],
                               preferred_element_type=jnp.float32) + fc2b_ref[...]

    return kernel


# ---------------------------------------------------------------------------
# Forward wrapper: one pallas_call, tiny glue only (token transpose, out slice)
# ---------------------------------------------------------------------------
def textrnn_forward(tokens, pk):
    B, T = tokens.shape
    tokens_tm = jnp.transpose(tokens).reshape(T * B, 1).astype(jnp.int32)  # time-major rows

    args = [tokens_tm, pk['emb'], pk['td_w'], pk['td_b'],
            pk['tdbn_gamma'], pk['tdbn_beta']]
    for layer in range(NUM_LAYERS):
        lp = pk['lstm'][layer]
        args += [lp['wih'], lp['whh'], lp['b']]
    args += [pk['fc1_w'], pk['fc1_b'], pk['bn_gamma'], pk['bn_beta'],
             pk['fc2_w'], pk['fc2_b']]

    logits_pad = pl.pallas_call(
        _make_textrnn_kernel(B, T, NUM_LAYERS),
        out_shape=jax.ShapeDtypeStruct((B, NUM_CLASS_PAD), jnp.float32),
        in_specs=[VMEM_SPEC] * len(args),
        out_specs=VMEM_SPEC,
    )(*args)
    return logits_pad[:, :NUM_CLASS]


# ---------------------------------------------------------------------------
# Deterministic synthetic parameters (shapes follow the PyTorch __init__)
# ---------------------------------------------------------------------------
def init_params(key):
    ks = jax.random.split(key, 16)
    params = {}
    params['embedding'] = 0.1 * jax.random.normal(ks[0], (VOCAB_SIZE, EMBED_SIZE), jnp.float32)
    params['td_w'] = 0.05 * jax.random.normal(ks[1], (EMBED_SIZE, TD_OUT), jnp.float32)
    params['td_b'] = jnp.zeros((1, TD_OUT), jnp.float32)
    params['tdbn_gamma'] = jnp.ones((1, 1), jnp.float32)
    params['tdbn_beta'] = jnp.zeros((1, 1), jnp.float32)

    lstm = []
    kidx = 2
    for layer in range(NUM_LAYERS):
        din = TD_OUT if layer == 0 else 2 * HIDDEN_SIZE
        ld = {}
        for name in ('fwd', 'bwd'):
            k1, k2, k3 = jax.random.split(ks[kidx], 3)
            kidx += 1
            ld[name] = dict(
                wih=0.05 * jax.random.normal(k1, (din, 4 * HIDDEN_SIZE), jnp.float32),
                whh=0.05 * jax.random.normal(k2, (HIDDEN_SIZE, 4 * HIDDEN_SIZE), jnp.float32),
                # b_ih + b_hh folded into one bias row
                b=0.05 * jax.random.normal(k3, (1, 4 * HIDDEN_SIZE), jnp.float32),
            )
        lstm.append(ld)
    params['lstm'] = lstm

    params['fc1_w'] = 0.05 * jax.random.normal(
        ks[kidx], (2 * HIDDEN_SIZE * NUM_LAYERS, FC1_OUT), jnp.float32); kidx += 1
    params['fc1_b'] = jnp.zeros((1, FC1_OUT), jnp.float32)
    params['bn_gamma'] = jnp.ones((1, FC1_OUT), jnp.float32)
    params['bn_beta'] = jnp.zeros((1, FC1_OUT), jnp.float32)
    params['fc2_w'] = 0.05 * jax.random.normal(ks[kidx], (FC1_OUT, NUM_CLASS), jnp.float32); kidx += 1
    params['fc2_b'] = jnp.zeros((1, NUM_CLASS), jnp.float32)
    return params


def pack_params(params):
    """One-time packing of PyTorch-layout params into the fused-kernel layout."""
    H = HIDDEN_SIZE
    pk = {
        'emb': jnp.zeros((VOCAB_PAD, EMBED_SIZE), jnp.float32).at[:VOCAB_SIZE].set(
            params['embedding']),
        'td_w': params['td_w'], 'td_b': params['td_b'],
        'tdbn_gamma': params['tdbn_gamma'], 'tdbn_beta': params['tdbn_beta'],
        'fc1_w': params['fc1_w'], 'fc1_b': params['fc1_b'],
        'bn_gamma': params['bn_gamma'], 'bn_beta': params['bn_beta'],
        'fc2_w': jnp.zeros((FC1_OUT, NUM_CLASS_PAD), jnp.float32).at[:, :NUM_CLASS].set(
            params['fc2_w']),
        'fc2_b': jnp.zeros((1, NUM_CLASS_PAD), jnp.float32).at[:, :NUM_CLASS].set(
            params['fc2_b']),
        'lstm': [],
    }
    for layer in range(NUM_LAYERS):
        lp = params['lstm'][layer]
        wih = jnp.concatenate([lp['fwd']['wih'], lp['bwd']['wih']], axis=1)   # (Din, 8H)
        whh = (jnp.zeros((2 * H, 8 * H), jnp.float32)
               .at[:H, :4 * H].set(lp['fwd']['whh'])
               .at[H:, 4 * H:].set(lp['bwd']['whh']))                         # block-diag
        b = jnp.concatenate([lp['fwd']['b'], lp['bwd']['b']], axis=1)         # (1, 8H)
        pk['lstm'].append(dict(wih=wih, whh=whh, b=b))
    return pk


# ---------------------------------------------------------------------------
# Pure-JAX reference of the PyTorch forward (train-mode BN batch stats)
# ---------------------------------------------------------------------------
def reference_forward(tokens, params):
    B, T = tokens.shape
    H = HIDDEN_SIZE
    emb = jnp.take(params['embedding'], tokens, axis=0)                  # (B, T, E)
    y = emb.reshape(B * T, EMBED_SIZE) @ params['td_w'] + params['td_b']
    mean = jnp.mean(y)
    var = jnp.mean((y - mean) ** 2)
    y = (y - mean) * jax.lax.rsqrt(var + BN_EPS) * params['tdbn_gamma'][0, 0] \
        + params['tdbn_beta'][0, 0]
    x = jnp.maximum(y, 0.0).reshape(B, T, TD_OUT)

    h_finals = []
    for layer in range(NUM_LAYERS):
        lp = params['lstm'][layer]
        outs = []
        for name in ('fwd', 'bwd'):
            w = lp[name]
            seq = x if name == 'fwd' else x[:, ::-1, :]
            h = jnp.zeros((B, H), jnp.float32)
            c = jnp.zeros((B, H), jnp.float32)
            hs = []
            for t in range(T):
                g = seq[:, t, :] @ w['wih'] + h @ w['whh'] + w['b']
                i = _sigmoid(g[:, :H])
                f = _sigmoid(g[:, H:2 * H])
                gg = jnp.tanh(g[:, 2 * H:3 * H])
                o = _sigmoid(g[:, 3 * H:])
                c = f * c + i * gg
                h = o * jnp.tanh(c)
                hs.append(h)
            out = jnp.stack(hs, axis=1)                                  # (B, T, H)
            if name == 'bwd':
                out = out[:, ::-1, :]
            outs.append(out)
            h_finals.append(h)                                           # l0_f, l0_b, l1_f, l1_b
        x = jnp.concatenate(outs, axis=-1)                               # (B, T, 2H)

    feat = jnp.concatenate(h_finals, axis=-1)                            # (B, 2*H*L)
    z = feat @ params['fc1_w'] + params['fc1_b']
    mu = jnp.mean(z, axis=0, keepdims=True)
    v = jnp.mean((z - mu) ** 2, axis=0, keepdims=True)
    a = jnp.maximum((z - mu) * jax.lax.rsqrt(v + BN_EPS) * params['bn_gamma']
                    + params['bn_beta'], 0.0)
    return a @ params['fc2_w'] + params['fc2_b']


if __name__ == "__main__":
    key = jax.random.PRNGKey(0)
    k_params, k_tokens = jax.random.split(key)
    params = init_params(k_params)
    packed = pack_params(params)
    tokens = jax.random.randint(k_tokens, (BATCH_SIZE, SEQ_LEN), 0, VOCAB_SIZE, dtype=jnp.int32)

    logits = jax.jit(textrnn_forward)(tokens, packed)
    jax.block_until_ready(logits)
    assert logits.shape == (BATCH_SIZE, NUM_CLASS), logits.shape
    assert bool(jnp.all(jnp.isfinite(logits)))

    ref = reference_forward(tokens, params)
    assert bool(jnp.allclose(logits, ref, atol=2e-2, rtol=2e-2)), (logits, ref)
    print("KERNEL_OK")
</pallas_src>

<mosaic_0001>
module attributes {stable_mosaic.version = 11 : i64} {
  func.func @kernel(%arg0: memref<16x1xi32, #tpu.memory_space<vmem>>, %arg1: memref<128x32xf32, #tpu.memory_space<vmem>>, %arg2: memref<32x512xf32, #tpu.memory_space<vmem>>, %arg3: memref<1x512xf32, #tpu.memory_space<vmem>>, %arg4: memref<1x1xf32, #tpu.memory_space<vmem>>, %arg5: memref<1x1xf32, #tpu.memory_space<vmem>>, %arg6: memref<512x256xf32, #tpu.memory_space<vmem>>, %arg7: memref<64x256xf32, #tpu.memory_space<vmem>>, %arg8: memref<1x256xf32, #tpu.memory_space<vmem>>, %arg9: memref<64x256xf32, #tpu.memory_space<vmem>>, %arg10: memref<64x256xf32, #tpu.memory_space<vmem>>, %arg11: memref<1x256xf32, #tpu.memory_space<vmem>>, %arg12: memref<128x2048xf32, #tpu.memory_space<vmem>>, %arg13: memref<1x2048xf32, #tpu.memory_space<vmem>>, %arg14: memref<1x2048xf32, #tpu.memory_space<vmem>>, %arg15: memref<1x2048xf32, #tpu.memory_space<vmem>>, %arg16: memref<2048x128xf32, #tpu.memory_space<vmem>>, %arg17: memref<1x128xf32, #tpu.memory_space<vmem>>, %arg18: memref<2x128xf32, #tpu.memory_space<vmem>>) attributes {dimension_semantics = [], scalar_prefetch = 0 : i64, scratch_operands = 0 : i64, tpu.core_type = #tpu.core_type<tc>} {
    %c0 = arith.constant 0 : index
    %c0_0 = arith.constant 0 : index
    %0 = vector.load %arg0[%c0, %c0_0] : memref<16x1xi32, #tpu.memory_space<vmem>>, vector<16x1xi32>
    %1 = tpu.iota {dimensions = array<i32: 1>} : vector<16x128xi32>
    %2 = vector.broadcast %0 : vector<16x1xi32> to vector<16x128xi32>
    %3 = arith.cmpi eq, %1, %2 : vector<16x128xi32>
    %4 = arith.extui %3 : vector<16x128xi1> to vector<16x128xi32>
    %5 = arith.sitofp %4 : vector<16x128xi32> to vector<16x128xf32>
    %c0_1 = arith.constant 0 : index
    %c0_2 = arith.constant 0 : index
    %6 = vector.load %arg1[%c0_1, %c0_2] : memref<128x32xf32, #tpu.memory_space<vmem>>, vector<128x32xf32>
    %cst = arith.constant dense<0.000000e+00> : vector<16x32xf32>
    %7 = tpu.matmul %5, %6, %cst {dimension_numbers = #tpu.dot_dimension_numbers<[1], [0], [0], [1], [0, 0, 1, 1], [], []>} : vector<16x128xf32>, vector<128x32xf32>, vector<16x32xf32> -> vector<16x32xf32>
    %c0_3 = arith.constant 0 : index
    %c0_4 = arith.constant 0 : index
    %8 = vector.load %arg2[%c0_3, %c0_4] : memref<32x512xf32, #tpu.memory_space<vmem>>, vector<32x512xf32>
    %cst_5 = arith.constant dense<0.000000e+00> : vector<16x512xf32>
    %9 = tpu.matmul %7, %8, %cst_5 {dimension_numbers = #tpu.dot_dimension_numbers<[1], [0], [0], [1], [0, 0, 1, 1], [], []>} : vector<16x32xf32>, vector<32x512xf32>, vector<16x512xf32> -> vector<16x512xf32>
    %c0_6 = arith.constant 0 : index
    %c0_7 = arith.constant 0 : index
    %10 = vector.load %arg3[%c0_6, %c0_7] : memref<1x512xf32, #tpu.memory_space<vmem>>, vector<1x512xf32>
    %11 = vector.broadcast %10 : vector<1x512xf32> to vector<16x512xf32>
    %12 = arith.addf %9, %11 : vector<16x512xf32>
    %13 = vector.shape_cast %12 : vector<16x512xf32> to vector<1x16x512xf32>
    %cst_8 = arith.constant dense<0.000000e+00> : vector<1xf32>
    %14 = vector.multi_reduction <add>, %13, %cst_8 [1, 2] : vector<1x16x512xf32> to vector<1xf32>
    %15 = vector.shape_cast %14 : vector<1xf32> to vector<1x1x1xf32>
    %16 = vector.extract %15[0, 0, 0] : f32 from vector<1x1x1xf32>
    %cst_9 = arith.constant 1.22070313E-4 : f32
    %17 = arith.mulf %16, %cst_9 : f32
    %18 = arith.mulf %12, %12 : vector<16x512xf32>
    %19 = vector.shape_cast %18 : vector<16x512xf32> to vector<1x16x512xf32>
    %cst_10 = arith.constant dense<0.000000e+00> : vector<1xf32>
    %20 = vector.multi_reduction <add>, %19, %cst_10 [1, 2] : vector<1x16x512xf32> to vector<1xf32>
    %21 = vector.shape_cast %20 : vector<1xf32> to vector<1x1x1xf32>
    %22 = vector.extract %21[0, 0, 0] : f32 from vector<1x1x1xf32>
    %cst_11 = arith.constant 1.22070313E-4 : f32
    %23 = arith.mulf %22, %cst_11 : f32
    %24 = arith.mulf %17, %17 : f32
    %25 = arith.subf %23, %24 : f32
    %cst_12 = arith.constant 0.000000e+00 : f32
    %26 = arith.maximumf %25, %cst_12 : f32
    %27 = vector.broadcast %17 : f32 to vector<16x512xf32>
    %28 = arith.subf %12, %27 : vector<16x512xf32>
    %cst_13 = arith.constant 9.99999974E-6 : f32
    %29 = arith.addf %26, %cst_13 : f32
    %30 = math.rsqrt %29 : f32
    %31 = vector.broadcast %30 : f32 to vector<16x512xf32>
    %32 = arith.mulf %28, %31 : vector<16x512xf32>
    %c0_14 = arith.constant 0 : index
    %c0_15 = arith.constant 0 : index
    %33 = vector.load %arg4[%c0_14, %c0_15] : memref<1x1xf32, #tpu.memory_space<vmem>>, vector<1x1xf32>
    %34 = vector.extract %33[0, 0] : f32 from vector<1x1xf32>
    %35 = vector.broadcast %34 : f32 to vector<16x512xf32>
    %36 = arith.mulf %32, %35 : vector<16x512xf32>
    %c0_16 = arith.constant 0 : index
    %c0_17 = arith.constant 0 : index
    %37 = vector.load %arg5[%c0_16, %c0_17] : memref<1x1xf32, #tpu.memory_space<vmem>>, vector<1x1xf32>
    %38 = vector.extract %37[0, 0] : f32 from vector<1x1xf32>
    %39 = vector.broadcast %38 : f32 to vector<16x512xf32>
    %40 = arith.addf %36, %39 : vector<16x512xf32>
    %cst_18 = arith.constant 0.000000e+00 : f32
    %41 = vector.broadcast %cst_18 : f32 to vector<16x512xf32>
    %42 = arith.maximumf %40, %41 : vector<16x512xf32>
    %c0_19 = arith.constant 0 : index
    %c0_20 = arith.constant 0 : index
    %43 = vector.load %arg6[%c0_19, %c0_20] : memref<512x256xf32, #tpu.memory_space<vmem>>, vector<512x256xf32>
    %cst_21 = arith.constant dense<0.000000e+00> : vector<16x256xf32>
    %44 = tpu.matmul %42, %43, %cst_21 {dimension_numbers = #tpu.dot_dimension_numbers<[1], [0], [0], [1], [0, 0, 1, 1], [], []>} : vector<16x512xf32>, vector<512x256xf32>, vector<16x256xf32> -> vector<16x256xf32>
    %c0_22 = arith.constant 0 : index
    %c0_23 = arith.constant 0 : index
    %45 = vector.load %arg8[%c0_22, %c0_23] : memref<1x256xf32, #tpu.memory_space<vmem>>, vector<1x256xf32>
    %46 = vector.broadcast %45 : vector<1x256xf32> to vector<16x256xf32>
    %47 = arith.addf %44, %46 : vector<16x256xf32>
    %48 = vector.extract_strided_slice %47 {offsets = [0, 0], sizes = [16, 128], strides = [1, 1]} : vector<16x256xf32> to vector<16x128xf32>
    %49 = vector.extract_strided_slice %47 {offsets = [0, 128], sizes = [16, 128], strides = [1, 1]} : vector<16x256xf32> to vector<16x128xf32>
    %c0_24 = arith.constant 0 : index
    %c0_25 = arith.constant 0 : index
    %50 = vector.load %arg7[%c0_24, %c0_25] : memref<64x256xf32, #tpu.memory_space<vmem>>, vector<64x256xf32>
    %cst_26 = arith.constant 0.000000e+00 : f32
    %51 = vector.broadcast %cst_26 : f32 to vector<2x64xf32>
    %cst_27 = arith.constant 0.000000e+00 : f32
    %52 = vector.broadcast %cst_27 : f32 to vector<2x32xf32>
    %cst_28 = arith.constant 0.000000e+00 : f32
    %53 = vector.broadcast %cst_28 : f32 to vector<2x32xf32>
    %cst_29 = arith.constant dense<0.000000e+00> : vector<2x256xf32>
    %54 = tpu.matmul %51, %50, %cst_29 {dimension_numbers = #tpu.dot_dimension_numbers<[1], [0], [0], [1], [0, 0, 1, 1], [], []>} : vector<2x64xf32>, vector<64x256xf32>, vector<2x256xf32> -> vector<2x256xf32>
    %55 = vector.extract_strided_slice %48 {offsets = [0, 0], sizes = [2, 128], strides = [1, 1]} : vector<16x128xf32> to vector<2x128xf32>
    %56 = vector.extract_strided_slice %54 {offsets = [0, 0], sizes = [2, 128], strides = [1, 1]} : vector<2x256xf32> to vector<2x128xf32>
    %57 = arith.addf %55, %56 : vector<2x128xf32>
    %58 = vector.extract_strided_slice %49 {offsets = [14, 0], sizes = [2, 128], strides = [1, 1]} : vector<16x128xf32> to vector<2x128xf32>
    %59 = vector.extract_strided_slice %54 {offsets = [0, 128], sizes = [2, 128], strides = [1, 1]} : vector<2x256xf32> to vector<2x128xf32>
    %60 = arith.addf %58, %59 : vector<2x128xf32>
    %cst_30 = arith.constant 0.000000e+00 : f32
    %61 = vector.broadcast %cst_30 : f32 to vector<2x128xf32>
    %62 = arith.subf %61, %57 : vector<2x128xf32>
    %63 = math.exp %62 : vector<2x128xf32>
    %cst_31 = arith.constant 1.000000e+00 : f32
    %64 = vector.broadcast %cst_31 : f32 to vector<2x128xf32>
    %65 = arith.addf %64, %63 : vector<2x128xf32>
    %cst_32 = arith.constant 1.000000e+00 : f32
    %66 = vector.broadcast %cst_32 : f32 to vector<2x128xf32>
    %67 = arith.divf %66, %65 : vector<2x128xf32>
    %68 = math.tanh %57 : vector<2x128xf32>
    %cst_33 = arith.constant 0.000000e+00 : f32
    %69 = vector.broadcast %cst_33 : f32 to vector<2x128xf32>
    %70 = arith.subf %69, %60 : vector<2x128xf32>
    %71 = math.exp %70 : vector<2x128xf32>
    %cst_34 = arith.constant 1.000000e+00 : f32
    %72 = vector.broadcast %cst_34 : f32 to vector<2x128xf32>
    %73 = arith.addf %72, %71 : vector<2x128xf32>
    %cst_35 = arith.constant 1.000000e+00 : f32
    %74 = vector.broadcast %cst_35 : f32 to vector<2x128xf32>
    %75 = arith.divf %74, %73 : vector<2x128xf32>
    %76 = math.tanh %60 : vector<2x128xf32>
    %77 = vector.extract_strided_slice %67 {offsets = [0, 32], sizes = [2, 32], strides = [1, 1]} : vector<2x128xf32> to vector<2x32xf32>
    %78 = arith.mulf %77, %52 : vector<2x32xf32>
    %79 = vector.extract_strided_slice %67 {offsets = [0, 0], sizes = [2, 32], strides = [1, 1]} : vector<2x128xf32> to vector<2x32xf32>
    %80 = vector.extract_strided_slice %68 {offsets = [0, 64], sizes = [2, 32], strides = [1, 1]} : vector<2x128xf32> to vector<2x32xf32>
    %81 = arith.mulf %79, %80 : vector<2x32xf32>
    %82 = arith.addf %78, %81 : vector<2x32xf32>
    %83 = vector.extract_strided_slice %75 {offsets = [0, 32], sizes = [2, 32], strides = [1, 1]} : vector<2x128xf32> to vector<2x32xf32>
    %84 = arith.mulf %83, %53 : vector<2x32xf32>
    %85 = vector.extract_strided_slice %75 {offsets = [0, 0], sizes = [2, 32], strides = [1, 1]} : vector<2x128xf32> to vector<2x32xf32>
    %86 = vector.extract_strided_slice %76 {offsets = [0, 64], sizes = [2, 32], strides = [1, 1]} : vector<2x128xf32> to vector<2x32xf32>
    %87 = arith.mulf %85, %86 : vector<2x32xf32>
    %88 = arith.addf %84, %87 : vector<2x32xf32>
    %89 = vector.extract_strided_slice %67 {offsets = [0, 96], sizes = [2, 32], strides = [1, 1]} : vector<2x128xf32> to vector<2x32xf32>
    %90 = math.tanh %82 : vector<2x32xf32>
    %91 = arith.mulf %89, %90 : vector<2x32xf32>
    %92 = vector.extract_strided_slice %75 {offsets = [0, 96], sizes = [2, 32], strides = [1, 1]} : vector<2x128xf32> to vector<2x32xf32>
    %93 = math.tanh %88 : vector<2x32xf32>
    %94 = arith.mulf %92, %93 : vector<2x32xf32>
    %95 = tpu.concatenate %91, %94 in 1 : vector<2x32xf32>, vector<2x32xf32> -> vector<2x64xf32>
    %cst_36 = arith.constant dense<0.000000e+00> : vector<2x256xf32>
    %96 = tpu.matmul %95, %50, %cst_36 {dimension_numbers = #tpu.dot_dimension_numbers<[1], [0], [0], [1], [0, 0, 1, 1], [], []>} : vector<2x64xf32>, vector<64x256xf32>, vector<2x256xf32> -> vector<2x256xf32>
    %97 = vector.extract_strided_slice %48 {offsets = [2, 0], sizes = [2, 128], strides = [1, 1]} : vector<16x128xf32> to vector<2x128xf32>
    %98 = vector.extract_strided_slice %96 {offsets = [0, 0], sizes = [2, 128], strides = [1, 1]} : vector<2x256xf32> to vector<2x128xf32>
    %99 = arith.addf %97, %98 : vector<2x128xf32>
    %100 = vector.extract_strided_slice %49 {offsets = [12, 0], sizes = [2, 128], strides = [1, 1]} : vector<16x128xf32> to vector<2x128xf32>
    %101 = vector.extract_strided_slice %96 {offsets = [0, 128], sizes = [2, 128], strides = [1, 1]} : vector<2x256xf32> to vector<2x128xf32>
    %102 = arith.addf %100, %101 : vector<2x128xf32>
    %cst_37 = arith.constant 0.000000e+00 : f32
    %103 = vector.broadcast %cst_37 : f32 to vector<2x128xf32>
    %104 = arith.subf %103, %99 : vector<2x128xf32>
    %105 = math.exp %104 : vector<2x128xf32>
    %cst_38 = arith.constant 1.000000e+00 : f32
    %106 = vector.broadcast %cst_38 : f32 to vector<2x128xf32>
    %107 = arith.addf %106, %105 : vector<2x128xf32>
    %cst_39 = arith.constant 1.000000e+00 : f32
    %108 = vector.broadcast %cst_39 : f32 to vector<2x128xf32>
    %109 = arith.divf %108, %107 : vector<2x128xf32>
    %110 = math.tanh %99 : vector<2x128xf32>
    %cst_40 = arith.constant 0.000000e+00 : f32
    %111 = vector.broadcast %cst_40 : f32 to vector<2x128xf32>
    %112 = arith.subf %111, %102 : vector<2x128xf32>
    %113 = math.exp %112 : vector<2x128xf32>
    %cst_41 = arith.constant 1.000000e+00 : f32
    %114 = vector.broadcast %cst_41 : f32 to vector<2x128xf32>
    %115 = arith.addf %114, %113 : vector<2x128xf32>
    %cst_42 = arith.constant 1.000000e+00 : f32
    %116 = vector.broadcast %cst_42 : f32 to vector<2x128xf32>
    %117 = arith.divf %116, %115 : vector<2x128xf32>
    %118 = math.tanh %102 : vector<2x128xf32>
    %119 = vector.extract_strided_slice %109 {offsets = [0, 32], sizes = [2, 32], strides = [1, 1]} : vector<2x128xf32> to vector<2x32xf32>
    %120 = arith.mulf %119, %82 : vector<2x32xf32>
    %121 = vector.extract_strided_slice %109 {offsets = [0, 0], sizes = [2, 32], strides = [1, 1]} : vector<2x128xf32> to vector<2x32xf32>
    %122 = vector.extract_strided_slice %110 {offsets = [0, 64], sizes = [2, 32], strides = [1, 1]} : vector<2x128xf32> to vector<2x32xf32>
    %123 = arith.mulf %121, %122 : vector<2x32xf32>
    %124 = arith.addf %120, %123 : vector<2x32xf32>
    %125 = vector.extract_strided_slice %117 {offsets = [0, 32], sizes = [2, 32], strides = [1, 1]} : vector<2x128xf32> to vector<2x32xf32>
    %126 = arith.mulf %125, %88 : vector<2x32xf32>
    %127 = vector.extract_strided_slice %117 {offsets = [0, 0], sizes = [2, 32], strides = [1, 1]} : vector<2x128xf32> to vector<2x32xf32>
    %128 = vector.extract_strided_slice %118 {offsets = [0, 64], sizes = [2, 32], strides = [1, 1]} : vector<2x128xf32> to vector<2x32xf32>
    %129 = arith.mulf %127, %128 : vector<2x32xf32>
    %130 = arith.addf %126, %129 : vector<2x32xf32>
    %131 = vector.extract_strided_slice %109 {offsets = [0, 96], sizes = [2, 32], strides = [1, 1]} : vector<2x128xf32> to vector<2x32xf32>
    %132 = math.tanh %124 : vector<2x32xf32>
    %133 = arith.mulf %131, %132 : vector<2x32xf32>
    %134 = vector.extract_strided_slice %117 {offsets = [0, 96], sizes = [2, 32], strides = [1, 1]} : vector<2x128xf32> to vector<2x32xf32>
    %135 = math.tanh %130 : vector<2x32xf32>
    %136 = arith.mulf %134, %135 : vector<2x32xf32>
    %137 = tpu.concatenate %133, %136 in 1 : vector<2x32xf32>, vector<2x32xf32> -> vector<2x64xf32>
    %cst_43 = arith.constant dense<0.000000e+00> : vector<2x256xf32>
    %138 = tpu.matmul %137, %50, %cst_43 {dimension_numbers = #tpu.dot_dimension_numbers<[1], [0], [0], [1], [0, 0, 1, 1], [], []>} : vector<2x64xf32>, vector<64x256xf32>, vector<2x256xf32> -> vector<2x256xf32>
    %139 = vector.extract_strided_slice %48 {offsets = [4, 0], sizes = [2, 128], strides = [1, 1]} : vector<16x128xf32> to vector<2x128xf32>
    %140 = vector.extract_strided_slice %138 {offsets = [0, 0], sizes = [2, 128], strides = [1, 1]} : vector<2x256xf32> to vector<2x128xf32>
    %141 = arith.addf %139, %140 : vector<2x128xf32>
    %142 = vector.extract_strided_slice %49 {offsets = [10, 0], sizes = [2, 128], strides = [1, 1]} : vector<16x128xf32> to vector<2x128xf32>
    %143 = vector.extract_strided_slice %138 {offsets = [0, 128], sizes = [2, 128], strides = [1, 1]} : vector<2x256xf32> to vector<2x128xf32>
    %144 = arith.addf %142, %143 : vector<2x128xf32>
    %cst_44 = arith.constant 0.000000e+00 : f32
    %145 = vector.broadcast %cst_44 : f32 to vector<2x128xf32>
    %146 = arith.subf %145, %141 : vector<2x128xf32>
    %147 = math.exp %146 : vector<2x128xf32>
    %cst_45 = arith.constant 1.000000e+00 : f32
    %148 = vector.broadcast %cst_45 : f32 to vector<2x128xf32>
    %149 = arith.addf %148, %147 : vector<2x128xf32>
    %cst_46 = arith.constant 1.000000e+00 : f32
    %150 = vector.broadcast %cst_46 : f32 to vector<2x128xf32>
    %151 = arith.divf %150, %149 : vector<2x128xf32>
    %152 = math.tanh %141 : vector<2x128xf32>
    %cst_47 = arith.constant 0.000000e+00 : f32
    %153 = vector.broadcast %cst_47 : f32 to vector<2x128xf32>
    %154 = arith.subf %153, %144 : vector<2x128xf32>
    %155 = math.exp %154 : vector<2x128xf32>
    %cst_48 = arith.constant 1.000000e+00 : f32
    %156 = vector.broadcast %cst_48 : f32 to vector<2x128xf32>
    %157 = arith.addf %156, %155 : vector<2x128xf32>
    %cst_49 = arith.constant 1.000000e+00 : f32
    %158 = vector.broadcast %cst_49 : f32 to vector<2x128xf32>
    %159 = arith.divf %158, %157 : vector<2x128xf32>
    %160 = math.tanh %144 : vector<2x128xf32>
    %161 = vector.extract_strided_slice %151 {offsets = [0, 32], sizes = [2, 32], strides = [1, 1]} : vector<2x128xf32> to vector<2x32xf32>
    %162 = arith.mulf %161, %124 : vector<2x32xf32>
    %163 = vector.extract_strided_slice %151 {offsets = [0, 0], sizes = [2, 32], strides = [1, 1]} : vector<2x128xf32> to vector<2x32xf32>
    %164 = vector.extract_strided_slice %152 {offsets = [0, 64], sizes = [2, 32], strides = [1, 1]} : vector<2x128xf32> to vector<2x32xf32>
    %165 = arith.mulf %163, %164 : vector<2x32xf32>
    %166 = arith.addf %162, %165 : vector<2x32xf32>
    %167 = vector.extract_strided_slice %159 {offsets = [0, 32], sizes = [2, 32], strides = [1, 1]} : vector<2x128xf32> to vector<2x32xf32>
    %168 = arith.mulf %167, %130 : vector<2x32xf32>
    %169 = vector.extract_strided_slice %159 {offsets = [0, 0], sizes = [2, 32], strides = [1, 1]} : vector<2x128xf32> to vector<2x32xf32>
    %170 = vector.extract_strided_slice %160 {offsets = [0, 64], sizes = [2, 32], strides = [1, 1]} : vector<2x128xf32> to vector<2x32xf32>
    %171 = arith.mulf %169, %170 : vector<2x32xf32>
    %172 = arith.addf %168, %171 : vector<2x32xf32>
    %173 = vector.extract_strided_slice %151 {offsets = [0, 96], sizes = [2, 32], strides = [1, 1]} : vector<2x128xf32> to vector<2x32xf32>
    %174 = math.tanh %166 : vector<2x32xf32>
    %175 = arith.mulf %173, %174 : vector<2x32xf32>
    %176 = vector.extract_strided_slice %159 {offsets = [0, 96], sizes = [2, 32], strides = [1, 1]} : vector<2x128xf32> to vector<2x32xf32>
    %177 = math.tanh %172 : vector<2x32xf32>
    %178 = arith.mulf %176, %177 : vector<2x32xf32>
    %179 = tpu.concatenate %175, %178 in 1 : vector<2x32xf32>, vector<2x32xf32> -> vector<2x64xf32>
    %cst_50 = arith.constant dense<0.000000e+00> : vector<2x256xf32>
    %180 = tpu.matmul %179, %50, %cst_50 {dimension_numbers = #tpu.dot_dimension_numbers<[1], [0], [0], [1], [0, 0, 1, 1], [], []>} : vector<2x64xf32>, vector<64x256xf32>, vector<2x256xf32> -> vector<2x256xf32>
    %181 = vector.extract_strided_slice %48 {offsets = [6, 0], sizes = [2, 128], strides = [1, 1]} : vector<16x128xf32> to vector<2x128xf32>
    %182 = vector.extract_strided_slice %180 {offsets = [0, 0], sizes = [2, 128], strides = [1, 1]} : vector<2x256xf32> to vector<2x128xf32>
    %183 = arith.addf %181, %182 : vector<2x128xf32>
    %184 = vector.extract_strided_slice %49 {offsets = [8, 0], sizes = [2, 128], strides = [1, 1]} : vector<16x128xf32> to vector<2x128xf32>
    %185 = vector.extract_strided_slice %180 {offsets = [0, 128], sizes = [2, 128], strides = [1, 1]} : vector<2x256xf32> to vector<2x128xf32>
    %186 = arith.addf %184, %185 : vector<2x128xf32>
    %cst_51 = arith.constant 0.000000e+00 : f32
    %187 = vector.broadcast %cst_51 : f32 to vector<2x128xf32>
    %188 = arith.subf %187, %183 : vector<2x128xf32>
    %189 = math.exp %188 : vector<2x128xf32>
    %cst_52 = arith.constant 1.000000e+00 : f32
    %190 = vector.broadcast %cst_52 : f32 to vector<2x128xf32>
    %191 = arith.addf %190, %189 : vector<2x128xf32>
    %cst_53 = arith.constant 1.000000e+00 : f32
    %192 = vector.broadcast %cst_53 : f32 to vector<2x128xf32>
    %193 = arith.divf %192, %191 : vector<2x128xf32>
    %194 = math.tanh %183 : vector<2x128xf32>
    %cst_54 = arith.constant 0.000000e+00 : f32
    %195 = vector.broadcast %cst_54 : f32 to vector<2x128xf32>
    %196 = arith.subf %195, %186 : vector<2x128xf32>
    %197 = math.exp %196 : vector<2x128xf32>
    %cst_55 = arith.constant 1.000000e+00 : f32
    %198 = vector.broadcast %cst_55 : f32 to vector<2x128xf32>
    %199 = arith.addf %198, %197 : vector<2x128xf32>
    %cst_56 = arith.constant 1.000000e+00 : f32
    %200 = vector.broadcast %cst_56 : f32 to vector<2x128xf32>
    %201 = arith.divf %200, %199 : vector<2x128xf32>
    %202 = math.tanh %186 : vector<2x128xf32>
    %203 = vector.extract_strided_slice %193 {offsets = [0, 32], sizes = [2, 32], strides = [1, 1]} : vector<2x128xf32> to vector<2x32xf32>
    %204 = arith.mulf %203, %166 : vector<2x32xf32>
    %205 = vector.extract_strided_slice %193 {offsets = [0, 0], sizes = [2, 32], strides = [1, 1]} : vector<2x128xf32> to vector<2x32xf32>
    %206 = vector.extract_strided_slice %194 {offsets = [0, 64], sizes = [2, 32], strides = [1, 1]} : vector<2x128xf32> to vector<2x32xf32>
    %207 = arith.mulf %205, %206 : vector<2x32xf32>
    %208 = arith.addf %204, %207 : vector<2x32xf32>
    %209 = vector.extract_strided_slice %201 {offsets = [0, 32], sizes = [2, 32], strides = [1, 1]} : vector<2x128xf32> to vector<2x32xf32>
    %210 = arith.mulf %209, %172 : vector<2x32xf32>
    %211 = vector.extract_strided_slice %201 {offsets = [0, 0], sizes = [2, 32], strides = [1, 1]} : vector<2x128xf32> to vector<2x32xf32>
    %212 = vector.extract_strided_slice %202 {offsets = [0, 64], sizes = [2, 32], strides = [1, 1]} : vector<2x128xf32> to vector<2x32xf32>
    %213 = arith.mulf %211, %212 : vector<2x32xf32>
    %214 = arith.addf %210, %213 : vector<2x32xf32>
    %215 = vector.extract_strided_slice %193 {offsets = [0, 96], sizes = [2, 32], strides = [1, 1]} : vector<2x128xf32> to vector<2x32xf32>
    %216 = math.tanh %208 : vector<2x32xf32>
    %217 = arith.mulf %215, %216 : vector<2x32xf32>
    %218 = vector.extract_strided_slice %201 {offsets = [0, 96], sizes = [2, 32], strides = [1, 1]} : vector<2x128xf32> to vector<2x32xf32>
    %219 = math.tanh %214 : vector<2x32xf32>
    %220 = arith.mulf %218, %219 : vector<2x32xf32>
    %221 = tpu.concatenate %217, %220 in 1 : vector<2x32xf32>, vector<2x32xf32> -> vector<2x64xf32>
    %cst_57 = arith.constant dense<0.000000e+00> : vector<2x256xf32>
    %222 = tpu.matmul %221, %50, %cst_57 {dimension_numbers = #tpu.dot_dimension_numbers<[1], [0], [0], [1], [0, 0, 1, 1], [], []>} : vector<2x64xf32>, vector<64x256xf32>, vector<2x256xf32> -> vector<2x256xf32>
    %223 = vector.extract_strided_slice %48 {offsets = [8, 0], sizes = [2, 128], strides = [1, 1]} : vector<16x128xf32> to vector<2x128xf32>
    %224 = vector.extract_strided_slice %222 {offsets = [0, 0], sizes = [2, 128], strides = [1, 1]} : vector<2x256xf32> to vector<2x128xf32>
    %225 = arith.addf %223, %224 : vector<2x128xf32>
    %226 = vector.extract_strided_slice %49 {offsets = [6, 0], sizes = [2, 128], strides = [1, 1]} : vector<16x128xf32> to vector<2x128xf32>
    %227 = vector.extract_strided_slice %222 {offsets = [0, 128], sizes = [2, 128], strides = [1, 1]} : vector<2x256xf32> to vector<2x128xf32>
    %228 = arith.addf %226, %227 : vector<2x128xf32>
    %cst_58 = arith.constant 0.000000e+00 : f32
    %229 = vector.broadcast %cst_58 : f32 to vector<2x128xf32>
    %230 = arith.subf %229, %225 : vector<2x128xf32>
    %231 = math.exp %230 : vector<2x128xf32>
    %cst_59 = arith.constant 1.000000e+00 : f32
    %232 = vector.broadcast %cst_59 : f32 to vector<2x128xf32>
    %233 = arith.addf %232, %231 : vector<2x128xf32>
    %cst_60 = arith.constant 1.000000e+00 : f32
    %234 = vector.broadcast %cst_60 : f32 to vector<2x128xf32>
    %235 = arith.divf %234, %233 : vector<2x128xf32>
    %236 = math.tanh %225 : vector<2x128xf32>
    %cst_61 = arith.constant 0.000000e+00 : f32
    %237 = vector.broadcast %cst_61 : f32 to vector<2x128xf32>
    %238 = arith.subf %237, %228 : vector<2x128xf32>
    %239 = math.exp %238 : vector<2x128xf32>
    %cst_62 = arith.constant 1.000000e+00 : f32
    %240 = vector.broadcast %cst_62 : f32 to vector<2x128xf32>
    %241 = arith.addf %240, %239 : vector<2x128xf32>
    %cst_63 = arith.constant 1.000000e+00 : f32
    %242 = vector.broadcast %cst_63 : f32 to vector<2x128xf32>
    %243 = arith.divf %242, %241 : vector<2x128xf32>
    %244 = math.tanh %228 : vector<2x128xf32>
    %245 = vector.extract_strided_slice %235 {offsets = [0, 32], sizes = [2, 32], strides = [1, 1]} : vector<2x128xf32> to vector<2x32xf32>
    %246 = arith.mulf %245, %208 : vector<2x32xf32>
    %247 = vector.extract_strided_slice %235 {offsets = [0, 0], sizes = [2, 32], strides = [1, 1]} : vector<2x128xf32> to vector<2x32xf32>
    %248 = vector.extract_strided_slice %236 {offsets = [0, 64], sizes = [2, 32], strides = [1, 1]} : vector<2x128xf32> to vector<2x32xf32>
    %249 = arith.mulf %247, %248 : vector<2x32xf32>
    %250 = arith.addf %246, %249 : vector<2x32xf32>
    %251 = vector.extract_strided_slice %243 {offsets = [0, 32], sizes = [2, 32], strides = [1, 1]} : vector<2x128xf32> to vector<2x32xf32>
    %252 = arith.mulf %251, %214 : vector<2x32xf32>
    %253 = vector.extract_strided_slice %243 {offsets = [0, 0], sizes = [2, 32], strides = [1, 1]} : vector<2x128xf32> to vector<2x32xf32>
    %254 = vector.extract_strided_slice %244 {offsets = [0, 64], sizes = [2, 32], strides = [1, 1]} : vector<2x128xf32> to vector<2x32xf32>
    %255 = arith.mulf %253, %254 : vector<2x32xf32>
    %256 = arith.addf %252, %255 : vector<2x32xf32>
    %257 = vector.extract_strided_slice %235 {offsets = [0, 96], sizes = [2, 32], strides = [1, 1]} : vector<2x128xf32> to vector<2x32xf32>
    %258 = math.tanh %250 : vector<2x32xf32>
    %259 = arith.mulf %257, %258 : vector<2x32xf32>
    %260 = vector.extract_strided_slice %243 {offsets = [0, 96], sizes = [2, 32], strides = [1, 1]} : vector<2x128xf32> to vector<2x32xf32>
    %261 = math.tanh %256 : vector<2x32xf32>
    %262 = arith.mulf %260, %261 : vector<2x32xf32>
    %263 = tpu.concatenate %259, %262 in 1 : vector<2x32xf32>, vector<2x32xf32> -> vector<2x64xf32>
    %cst_64 = arith.constant dense<0.000000e+00> : vector<2x256xf32>
    %264 = tpu.matmul %263, %50, %cst_64 {dimension_numbers = #tpu.dot_dimension_numbers<[1], [0], [0], [1], [0, 0, 1, 1], [], []>} : vector<2x64xf32>, vector<64x256xf32>, vector<2x256xf32> -> vector<2x256xf32>
    %265 = vector.extract_strided_slice %48 {offsets = [10, 0], sizes = [2, 128], strides = [1, 1]} : vector<16x128xf32> to vector<2x128xf32>
    %266 = vector.extract_strided_slice %264 {offsets = [0, 0], sizes = [2, 128], strides = [1, 1]} : vector<2x256xf32> to vector<2x128xf32>
    %267 = arith.addf %265, %266 : vector<2x128xf32>
    %268 = vector.extract_strided_slice %49 {offsets = [4, 0], sizes = [2, 128], strides = [1, 1]} : vector<16x128xf32> to vector<2x128xf32>
    %269 = vector.extract_strided_slice %264 {offsets = [0, 128], sizes = [2, 128], strides = [1, 1]} : vector<2x256xf32> to vector<2x128xf32>
    %270 = arith.addf %268, %269 : vector<2x128xf32>
    %cst_65 = arith.constant 0.000000e+00 : f32
    %271 = vector.broadcast %cst_65 : f32 to vector<2x128xf32>
    %272 = arith.subf %271, %267 : vector<2x128xf32>
    %273 = math.exp %272 : vector<2x128xf32>
    %cst_66 = arith.constant 1.000000e+00 : f32
    %274 = vector.broadcast %cst_66 : f32 to vector<2x128xf32>
    %275 = arith.addf %274, %273 : vector<2x128xf32>
    %cst_67 = arith.constant 1.000000e+00 : f32
    %276 = vector.broadcast %cst_67 : f32 to vector<2x128xf32>
    %277 = arith.divf %276, %275 : vector<2x128xf32>
    %278 = math.tanh %267 : vector<2x128xf32>
    %cst_68 = arith.constant 0.000000e+00 : f32
    %279 = vector.broadcast %cst_68 : f32 to vector<2x128xf32>
    %280 = arith.subf %279, %270 : vector<2x128xf32>
    %281 = math.exp %280 : vector<2x128xf32>
    %cst_69 = arith.constant 1.000000e+00 : f32
    %282 = vector.broadcast %cst_69 : f32 to vector<2x128xf32>
    %283 = arith.addf %282, %281 : vector<2x128xf32>
    %cst_70 = arith.constant 1.000000e+00 : f32
    %284 = vector.broadcast %cst_70 : f32 to vector<2x128xf32>
    %285 = arith.divf %284, %283 : vector<2x128xf32>
    %286 = math.tanh %270 : vector<2x128xf32>
    %287 = vector.extract_strided_slice %277 {offsets = [0, 32], sizes = [2, 32], strides = [1, 1]} : vector<2x128xf32> to vector<2x32xf32>
    %288 = arith.mulf %287, %250 : vector<2x32xf32>
    %289 = vector.extract_strided_slice %277 {offsets = [0, 0], sizes = [2, 32], strides = [1, 1]} : vector<2x128xf32> to vector<2x32xf32>
    %290 = vector.extract_strided_slice %278 {offsets = [0, 64], sizes = [2, 32], strides = [1, 1]} : vector<2x128xf32> to vector<2x32xf32>
    %291 = arith.mulf %289, %290 : vector<2x32xf32>
    %292 = arith.addf %288, %291 : vector<2x32xf32>
    %293 = vector.extract_strided_slice %285 {offsets = [0, 32], sizes = [2, 32], strides = [1, 1]} : vector<2x128xf32> to vector<2x32xf32>
    %294 = arith.mulf %293, %256 : vector<2x32xf32>
    %295 = vector.extract_strided_slice %285 {offsets = [0, 0], sizes = [2, 32], strides = [1, 1]} : vector<2x128xf32> to vector<2x32xf32>
    %296 = vector.extract_strided_slice %286 {offsets = [0, 64], sizes = [2, 32], strides = [1, 1]} : vector<2x128xf32> to vector<2x32xf32>
    %297 = arith.mulf %295, %296 : vector<2x32xf32>
    %298 = arith.addf %294, %297 : vector<2x32xf32>
    %299 = vector.extract_strided_slice %277 {offsets = [0, 96], sizes = [2, 32], strides = [1, 1]} : vector<2x128xf32> to vector<2x32xf32>
    %300 = math.tanh %292 : vector<2x32xf32>
    %301 = arith.mulf %299, %300 : vector<2x32xf32>
    %302 = vector.extract_strided_slice %285 {offsets = [0, 96], sizes = [2, 32], strides = [1, 1]} : vector<2x128xf32> to vector<2x32xf32>
    %303 = math.tanh %298 : vector<2x32xf32>
    %304 = arith.mulf %302, %303 : vector<2x32xf32>
    %305 = tpu.concatenate %301, %304 in 1 : vector<2x32xf32>, vector<2x32xf32> -> vector<2x64xf32>
    %cst_71 = arith.constant dense<0.000000e+00> : vector<2x256xf32>
    %306 = tpu.matmul %305, %50, %cst_71 {dimension_numbers = #tpu.dot_dimension_numbers<[1], [0], [0], [1], [0, 0, 1, 1], [], []>} : vector<2x64xf32>, vector<64x256xf32>, vector<2x256xf32> -> vector<2x256xf32>
    %307 = vector.extract_strided_slice %48 {offsets = [12, 0], sizes = [2, 128], strides = [1, 1]} : vector<16x128xf32> to vector<2x128xf32>
    %308 = vector.extract_strided_slice %306 {offsets = [0, 0], sizes = [2, 128], strides = [1, 1]} : vector<2x256xf32> to vector<2x128xf32>
    %309 = arith.addf %307, %308 : vector<2x128xf32>
    %310 = vector.extract_strided_slice %49 {offsets = [2, 0], sizes = [2, 128], strides = [1, 1]} : vector<16x128xf32> to vector<2x128xf32>
    %311 = vector.extract_strided_slice %306 {offsets = [0, 128], sizes = [2, 128], strides = [1, 1]} : vector<2x256xf32> to vector<2x128xf32>
    %312 = arith.addf %310, %311 : vector<2x128xf32>
    %cst_72 = arith.constant 0.000000e+00 : f32
    %313 = vector.broadcast %cst_72 : f32 to vector<2x128xf32>
    %314 = arith.subf %313, %309 : vector<2x128xf32>
    %315 = math.exp %314 : vector<2x128xf32>
    %cst_73 = arith.constant 1.000000e+00 : f32
    %316 = vector.broadcast %cst_73 : f32 to vector<2x128xf32>
    %317 = arith.addf %316, %315 : vector<2x128xf32>
    %cst_74 = arith.constant 1.000000e+00 : f32
    %318 = vector.broadcast %cst_74 : f32 to vector<2x128xf32>
    %319 = arith.divf %318, %317 : vector<2x128xf32>
    %320 = math.tanh %309 : vector<2x128xf32>
    %cst_75 = arith.constant 0.000000e+00 : f32
    %321 = vector.broadcast %cst_75 : f32 to vector<2x128xf32>
    %322 = arith.subf %321, %312 : vector<2x128xf32>
    %323 = math.exp %322 : vector<2x128xf32>
    %cst_76 = arith.constant 1.000000e+00 : f32
    %324 = vector.broadcast %cst_76 : f32 to vector<2x128xf32>
    %325 = arith.addf %324, %323 : vector<2x128xf32>
    %cst_77 = arith.constant 1.000000e+00 : f32
    %326 = vector.broadcast %cst_77 : f32 to vector<2x128xf32>
    %327 = arith.divf %326, %325 : vector<2x128xf32>
    %328 = math.tanh %312 : vector<2x128xf32>
    %329 = vector.extract_strided_slice %319 {offsets = [0, 32], sizes = [2, 32], strides = [1, 1]} : vector<2x128xf32> to vector<2x32xf32>
    %330 = arith.mulf %329, %292 : vector<2x32xf32>
    %331 = vector.extract_strided_slice %319 {offsets = [0, 0], sizes = [2, 32], strides = [1, 1]} : vector<2x128xf32> to vector<2x32xf32>
    %332 = vector.extract_strided_slice %320 {offsets = [0, 64], sizes = [2, 32], strides = [1, 1]} : vector<2x128xf32> to vector<2x32xf32>
    %333 = arith.mulf %331, %332 : vector<2x32xf32>
    %334 = arith.addf %330, %333 : vector<2x32xf32>
    %335 = vector.extract_strided_slice %327 {offsets = [0, 32], sizes = [2, 32], strides = [1, 1]} : vector<2x128xf32> to vector<2x32xf32>
    %336 = arith.mulf %335, %298 : vector<2x32xf32>
    %337 = vector.extract_strided_slice %327 {offsets = [0, 0], sizes = [2, 32], strides = [1, 1]} : vector<2x128xf32> to vector<2x32xf32>
    %338 = vector.extract_strided_slice %328 {offsets = [0, 64], sizes = [2, 32], strides = [1, 1]} : vector<2x128xf32> to vector<2x32xf32>
    %339 = arith.mulf %337, %338 : vector<2x32xf32>
    %340 = arith.addf %336, %339 : vector<2x32xf32>
    %341 = vector.extract_strided_slice %319 {offsets = [0, 96], sizes = [2, 32], strides = [1, 1]} : vector<2x128xf32> to vector<2x32xf32>
    %342 = math.tanh %334 : vector<2x32xf32>
    %343 = arith.mulf %341, %342 : vector<2x32xf32>
    %344 = vector.extract_strided_slice %327 {offsets = [0, 96], sizes = [2, 32], strides = [1, 1]} : vector<2x128xf32> to vector<2x32xf32>
    %345 = math.tanh %340 : vector<2x32xf32>
    %346 = arith.mulf %344, %345 : vector<2x32xf32>
    %347 = tpu.concatenate %343, %346 in 1 : vector<2x32xf32>, vector<2x32xf32> -> vector<2x64xf32>
    %cst_78 = arith.constant dense<0.000000e+00> : vector<2x256xf32>
    %348 = tpu.matmul %347, %50, %cst_78 {dimension_numbers = #tpu.dot_dimension_numbers<[1], [0], [0], [1], [0, 0, 1, 1], [], []>} : vector<2x64xf32>, vector<64x256xf32>, vector<2x256xf32> -> vector<2x256xf32>
    %349 = vector.extract_strided_slice %48 {offsets = [14, 0], sizes = [2, 128], strides = [1, 1]} : vector<16x128xf32> to vector<2x128xf32>
    %350 = vector.extract_strided_slice %348 {offsets = [0, 0], sizes = [2, 128], strides = [1, 1]} : vector<2x256xf32> to vector<2x128xf32>
    %351 = arith.addf %349, %350 : vector<2x128xf32>
    %352 = vector.extract_strided_slice %49 {offsets = [0, 0], sizes = [2, 128], strides = [1, 1]} : vector<16x128xf32> to vector<2x128xf32>
    %353 = vector.extract_strided_slice %348 {offsets = [0, 128], sizes = [2, 128], strides = [1, 1]} : vector<2x256xf32> to vector<2x128xf32>
    %354 = arith.addf %352, %353 : vector<2x128xf32>
    %cst_79 = arith.constant 0.000000e+00 : f32
    %355 = vector.broadcast %cst_79 : f32 to vector<2x128xf32>
    %356 = arith.subf %355, %351 : vector<2x128xf32>
    %357 = math.exp %356 : vector<2x128xf32>
    %cst_80 = arith.constant 1.000000e+00 : f32
    %358 = vector.broadcast %cst_80 : f32 to vector<2x128xf32>
    %359 = arith.addf %358, %357 : vector<2x128xf32>
    %cst_81 = arith.constant 1.000000e+00 : f32
    %360 = vector.broadcast %cst_81 : f32 to vector<2x128xf32>
    %361 = arith.divf %360, %359 : vector<2x128xf32>
    %362 = math.tanh %351 : vector<2x128xf32>
    %cst_82 = arith.constant 0.000000e+00 : f32
    %363 = vector.broadcast %cst_82 : f32 to vector<2x128xf32>
    %364 = arith.subf %363, %354 : vector<2x128xf32>
    %365 = math.exp %364 : vector<2x128xf32>
    %cst_83 = arith.constant 1.000000e+00 : f32
    %366 = vector.broadcast %cst_83 : f32 to vector<2x128xf32>
    %367 = arith.addf %366, %365 : vector<2x128xf32>
    %cst_84 = arith.constant 1.000000e+00 : f32
    %368 = vector.broadcast %cst_84 : f32 to vector<2x128xf32>
    %369 = arith.divf %368, %367 : vector<2x128xf32>
    %370 = math.tanh %354 : vector<2x128xf32>
    %371 = vector.extract_strided_slice %361 {offsets = [0, 32], sizes = [2, 32], strides = [1, 1]} : vector<2x128xf32> to vector<2x32xf32>
    %372 = arith.mulf %371, %334 : vector<2x32xf32>
    %373 = vector.extract_strided_slice %361 {offsets = [0, 0], sizes = [2, 32], strides = [1, 1]} : vector<2x128xf32> to vector<2x32xf32>
    %374 = vector.extract_strided_slice %362 {offsets = [0, 64], sizes = [2, 32], strides = [1, 1]} : vector<2x128xf32> to vector<2x32xf32>
    %375 = arith.mulf %373, %374 : vector<2x32xf32>
    %376 = arith.addf %372, %375 : vector<2x32xf32>
    %377 = vector.extract_strided_slice %369 {offsets = [0, 32], sizes = [2, 32], strides = [1, 1]} : vector<2x128xf32> to vector<2x32xf32>
    %378 = arith.mulf %377, %340 : vector<2x32xf32>
    %379 = vector.extract_strided_slice %369 {offsets = [0, 0], sizes = [2, 32], strides = [1, 1]} : vector<2x128xf32> to vector<2x32xf32>
    %380 = vector.extract_strided_slice %370 {offsets = [0, 64], sizes = [2, 32], strides = [1, 1]} : vector<2x128xf32> to vector<2x32xf32>
    %381 = arith.mulf %379, %380 : vector<2x32xf32>
    %382 = arith.addf %378, %381 : vector<2x32xf32>
    %383 = vector.extract_strided_slice %361 {offsets = [0, 96], sizes = [2, 32], strides = [1, 1]} : vector<2x128xf32> to vector<2x32xf32>
    %384 = math.tanh %376 : vector<2x32xf32>
    %385 = arith.mulf %383, %384 : vector<2x32xf32>
    %386 = vector.extract_strided_slice %369 {offsets = [0, 96], sizes = [2, 32], strides = [1, 1]} : vector<2x128xf32> to vector<2x32xf32>
    %387 = math.tanh %382 : vector<2x32xf32>
    %388 = arith.mulf %386, %387 : vector<2x32xf32>
    %389 = tpu.concatenate %385, %388 in 1 : vector<2x32xf32>, vector<2x32xf32> -> vector<2x64xf32>
    %390 = tpu.concatenate %91, %388 in 1 : vector<2x32xf32>, vector<2x32xf32> -> vector<2x64xf32>
    %391 = tpu.concatenate %133, %346 in 1 : vector<2x32xf32>, vector<2x32xf32> -> vector<2x64xf32>
    %392 = tpu.concatenate %175, %304 in 1 : vector<2x32xf32>, vector<2x32xf32> -> vector<2x64xf32>
    %393 = tpu.concatenate %217, %262 in 1 : vector<2x32xf32>, vector<2x32xf32> -> vector<2x64xf32>
    %394 = tpu.concatenate %259, %220 in 1 : vector<2x32xf32>, vector<2x32xf32> -> vector<2x64xf32>
    %395 = tpu.concatenate %301, %178 in 1 : vector<2x32xf32>, vector<2x32xf32> -> vector<2x64xf32>
    %396 = tpu.concatenate %343, %136 in 1 : vector<2x32xf32>, vector<2x32xf32> -> vector<2x64xf32>
    %397 = tpu.concatenate %385, %94 in 1 : vector<2x32xf32>, vector<2x32xf32> -> vector<2x64xf32>
    %398 = tpu.concatenate %390, %391, %392, %393, %394, %395, %396, %397 in 0 : vector<2x64xf32>, vector<2x64xf32>, vector<2x64xf32>, vector<2x64xf32>, vector<2x64xf32>, vector<2x64xf32>, vector<2x64xf32>, vector<2x64xf32> -> vector<16x64xf32>
    %c0_85 = arith.constant 0 : index
    %c0_86 = arith.constant 0 : index
    %399 = vector.load %arg9[%c0_85, %c0_86] : memref<64x256xf32, #tpu.memory_space<vmem>>, vector<64x256xf32>
    %cst_87 = arith.constant dense<0.000000e+00> : vector<16x256xf32>
    %400 = tpu.matmul %398, %399, %cst_87 {dimension_numbers = #tpu.dot_dimension_numbers<[1], [0], [0], [1], [0, 0, 1, 1], [], []>} : vector<16x64xf32>, vector<64x256xf32>, vector<16x256xf32> -> vector<16x256xf32>
    %c0_88 = arith.constant 0 : index
    %c0_89 = arith.constant 0 : index
    %401 = vector.load %arg11[%c0_88, %c0_89] : memref<1x256xf32, #tpu.memory_space<vmem>>, vector<1x256xf32>
    %402 = vector.broadcast %401 : vector<1x256xf32> to vector<16x256xf32>
    %403 = arith.addf %400, %402 : vector<16x256xf32>
    %404 = vector.extract_strided_slice %403 {offsets = [0, 0], sizes = [16, 128], strides = [1, 1]} : vector<16x256xf32> to vector<16x128xf32>
    %405 = vector.extract_strided_slice %403 {offsets = [0, 128], sizes = [16, 128], strides = [1, 1]} : vector<16x256xf32> to vector<16x128xf32>
    %c0_90 = arith.constant 0 : index
    %c0_91 = arith.constant 0 : index
    %406 = vector.load %arg10[%c0_90, %c0_91] : memref<64x256xf32, #tpu.memory_space<vmem>>, vector<64x256xf32>
    %cst_92 = arith.constant 0.000000e+00 : f32
    %407 = vector.broadcast %cst_92 : f32 to vector<2x64xf32>
    %cst_93 = arith.constant 0.000000e+00 : f32
    %408 = vector.broadcast %cst_93 : f32 to vector<2x32xf32>
    %cst_94 = arith.constant 0.000000e+00 : f32
    %409 = vector.broadcast %cst_94 : f32 to vector<2x32xf32>
    %cst_95 = arith.constant dense<0.000000e+00> : vector<2x256xf32>
    %410 = tpu.matmul %407, %406, %cst_95 {dimension_numbers = #tpu.dot_dimension_numbers<[1], [0], [0], [1], [0, 0, 1, 1], [], []>} : vector<2x64xf32>, vector<64x256xf32>, vector<2x256xf32> -> vector<2x256xf32>
    %411 = vector.extract_strided_slice %404 {offsets = [0, 0], sizes = [2, 128], strides = [1, 1]} : vector<16x128xf32> to vector<2x128xf32>
    %412 = vector.extract_strided_slice %410 {offsets = [0, 0], sizes = [2, 128], strides = [1, 1]} : vector<2x256xf32> to vector<2x128xf32>
    %413 = arith.addf %411, %412 : vector<2x128xf32>
    %414 = vector.extract_strided_slice %405 {offsets = [14, 0], sizes = [2, 128], strides = [1, 1]} : vector<16x128xf32> to vector<2x128xf32>
    %415 = vector.extract_strided_slice %410 {offsets = [0, 128], sizes = [2, 128], strides = [1, 1]} : vector<2x256xf32> to vector<2x128xf32>
    %416 = arith.addf %414, %415 : vector<2x128xf32>
    %cst_96 = arith.constant 0.000000e+00 : f32
    %417 = vector.broadcast %cst_96 : f32 to vector<2x128xf32>
    %418 = arith.subf %417, %413 : vector<2x128xf32>
    %419 = math.exp %418 : vector<2x128xf32>
    %cst_97 = arith.constant 1.000000e+00 : f32
    %420 = vector.broadcast %cst_97 : f32 to vector<2x128xf32>
    %421 = arith.addf %420, %419 : vector<2x128xf32>
    %cst_98 = arith.constant 1.000000e+00 : f32
    %422 = vector.broadcast %cst_98 : f32 to vector<2x128xf32>
    %423 = arith.divf %422, %421 : vector<2x128xf32>
    %424 = math.tanh %413 : vector<2x128xf32>
    %cst_99 = arith.constant 0.000000e+00 : f32
    %425 = vector.broadcast %cst_99 : f32 to vector<2x128xf32>
    %426 = arith.subf %425, %416 : vector<2x128xf32>
    %427 = math.exp %426 : vector<2x128xf32>
    %cst_100 = arith.constant 1.000000e+00 : f32
    %428 = vector.broadcast %cst_100 : f32 to vector<2x128xf32>
    %429 = arith.addf %428, %427 : vector<2x128xf32>
    %cst_101 = arith.constant 1.000000e+00 : f32
    %430 = vector.broadcast %cst_101 : f32 to vector<2x128xf32>
    %431 = arith.divf %430, %429 : vector<2x128xf32>
    %432 = math.tanh %416 : vector<2x128xf32>
    %433 = vector.extract_strided_slice %423 {offsets = [0, 32], sizes = [2, 32], strides = [1, 1]} : vector<2x128xf32> to vector<2x32xf32>
    %434 = arith.mulf %433, %408 : vector<2x32xf32>
    %435 = vector.extract_strided_slice %423 {offsets = [0, 0], sizes = [2, 32], strides = [1, 1]} : vector<2x128xf32> to vector<2x32xf32>
    %436 = vector.extract_strided_slice %424 {offsets = [0, 64], sizes = [2, 32], strides = [1, 1]} : vector<2x128xf32> to vector<2x32xf32>
    %437 = arith.mulf %435, %436 : vector<2x32xf32>
    %438 = arith.addf %434, %437 : vector<2x32xf32>
    %439 = vector.extract_strided_slice %431 {offsets = [0, 32], sizes = [2, 32], strides = [1, 1]} : vector<2x128xf32> to vector<2x32xf32>
    %440 = arith.mulf %439, %409 : vector<2x32xf32>
    %441 = vector.extract_strided_slice %431 {offsets = [0, 0], sizes = [2, 32], strides = [1, 1]} : vector<2x128xf32> to vector<2x32xf32>
    %442 = vector.extract_strided_slice %432 {offsets = [0, 64], sizes = [2, 32], strides = [1, 1]} : vector<2x128xf32> to vector<2x32xf32>
    %443 = arith.mulf %441, %442 : vector<2x32xf32>
    %444 = arith.addf %440, %443 : vector<2x32xf32>
    %445 = vector.extract_strided_slice %423 {offsets = [0, 96], sizes = [2, 32], strides = [1, 1]} : vector<2x128xf32> to vector<2x32xf32>
    %446 = math.tanh %438 : vector<2x32xf32>
    %447 = arith.mulf %445, %446 : vector<2x32xf32>
    %448 = vector.extract_strided_slice %431 {offsets = [0, 96], sizes = [2, 32], strides = [1, 1]} : vector<2x128xf32> to vector<2x32xf32>
    %449 = math.tanh %444 : vector<2x32xf32>
    %450 = arith.mulf %448, %449 : vector<2x32xf32>
    %451 = tpu.concatenate %447, %450 in 1 : vector<2x32xf32>, vector<2x32xf32> -> vector<2x64xf32>
    %cst_102 = arith.constant dense<0.000000e+00> : vector<2x256xf32>
    %452 = tpu.matmul %451, %406, %cst_102 {dimension_numbers = #tpu.dot_dimension_numbers<[1], [0], [0], [1], [0, 0, 1, 1], [], []>} : vector<2x64xf32>, vector<64x256xf32>, vector<2x256xf32> -> vector<2x256xf32>
    %453 = vector.extract_strided_slice %404 {offsets = [2, 0], sizes = [2, 128], strides = [1, 1]} : vector<16x128xf32> to vector<2x128xf32>
    %454 = vector.extract_strided_slice %452 {offsets = [0, 0], sizes = [2, 128], strides = [1, 1]} : vector<2x256xf32> to vector<2x128xf32>
    %455 = arith.addf %453, %454 : vector<2x128xf32>
    %456 = vector.extract_strided_slice %405 {offsets = [12, 0], sizes = [2, 128], strides = [1, 1]} : vector<16x128xf32> to vector<2x128xf32>
    %457 = vector.extract_strided_slice %452 {offsets = [0, 128], sizes = [2, 128], strides = [1, 1]} : vector<2x256xf32> to vector<2x128xf32>
    %458 = arith.addf %456, %457 : vector<2x128xf32>
    %cst_103 = arith.constant 0.000000e+00 : f32
    %459 = vector.broadcast %cst_103 : f32 to vector<2x128xf32>
    %460 = arith.subf %459, %455 : vector<2x128xf32>
    %461 = math.exp %460 : vector<2x128xf32>
    %cst_104 = arith.constant 1.000000e+00 : f32
    %462 = vector.broadcast %cst_104 : f32 to vector<2x128xf32>
    %463 = arith.addf %462, %461 : vector<2x128xf32>
    %cst_105 = arith.constant 1.000000e+00 : f32
    %464 = vector.broadcast %cst_105 : f32 to vector<2x128xf32>
    %465 = arith.divf %464, %463 : vector<2x128xf32>
    %466 = math.tanh %455 : vector<2x128xf32>
    %cst_106 = arith.constant 0.000000e+00 : f32
    %467 = vector.broadcast %cst_106 : f32 to vector<2x128xf32>
    %468 = arith.subf %467, %458 : vector<2x128xf32>
    %469 = math.exp %468 : vector<2x128xf32>
    %cst_107 = arith.constant 1.000000e+00 : f32
    %470 = vector.broadcast %cst_107 : f32 to vector<2x128xf32>
    %471 = arith.addf %470, %469 : vector<2x128xf32>
    %cst_108 = arith.constant 1.000000e+00 : f32
    %472 = vector.broadcast %cst_108 : f32 to vector<2x128xf32>
    %473 = arith.divf %472, %471 : vector<2x128xf32>
    %474 = math.tanh %458 : vector<2x128xf32>
    %475 = vector.extract_strided_slice %465 {offsets = [0, 32], sizes = [2, 32], strides = [1, 1]} : vector<2x128xf32> to vector<2x32xf32>
    %476 = arith.mulf %475, %438 : vector<2x32xf32>
    %477 = vector.extract_strided_slice %465 {offsets = [0, 0], sizes = [2, 32], strides = [1, 1]} : vector<2x128xf32> to vector<2x32xf32>
    %478 = vector.extract_strided_slice %466 {offsets = [0, 64], sizes = [2, 32], strides = [1, 1]} : vector<2x128xf32> to vector<2x32xf32>
    %479 = arith.mulf %477, %478 : vector<2x32xf32>
    %480 = arith.addf %476, %479 : vector<2x32xf32>
    %481 = vector.extract_strided_slice %473 {offsets = [0, 32], sizes = [2, 32], strides = [1, 1]} : vector<2x128xf32> to vector<2x32xf32>
    %482 = arith.mulf %481, %444 : vector<2x32xf32>
    %483 = vector.extract_strided_slice %473 {offsets = [0, 0], sizes = [2, 32], strides = [1, 1]} : vector<2x128xf32> to vector<2x32xf32>
    %484 = vector.extract_strided_slice %474 {offsets = [0, 64], sizes = [2, 32], strides = [1, 1]} : vector<2x128xf32> to vector<2x32xf32>
    %485 = arith.mulf %483, %484 : vector<2x32xf32>
    %486 = arith.addf %482, %485 : vector<2x32xf32>
    %487 = vector.extract_strided_slice %465 {offsets = [0, 96], sizes = [2, 32], strides = [1, 1]} : vector<2x128xf32> to vector<2x32xf32>
    %488 = math.tanh %480 : vector<2x32xf32>
    %489 = arith.mulf %487, %488 : vector<2x32xf32>
    %490 = vector.extract_strided_slice %473 {offsets = [0, 96], sizes = [2, 32], strides = [1, 1]} : vector<2x128xf32> to vector<2x32xf32>
    %491 = math.tanh %486 : vector<2x32xf32>
    %492 = arith.mulf %490, %491 : vector<2x32xf32>
    %493 = tpu.concatenate %489, %492 in 1 : vector<2x32xf32>, vector<2x32xf32> -> vector<2x64xf32>
    %cst_109 = arith.constant dense<0.000000e+00> : vector<2x256xf32>
    %494 = tpu.matmul %493, %406, %cst_109 {dimension_numbers = #tpu.dot_dimension_numbers<[1], [0], [0], [1], [0, 0, 1, 1], [], []>} : vector<2x64xf32>, vector<64x256xf32>, vector<2x256xf32> -> vector<2x256xf32>
    %495 = vector.extract_strided_slice %404 {offsets = [4, 0], sizes = [2, 128], strides = [1, 1]} : vector<16x128xf32> to vector<2x128xf32>
    %496 = vector.extract_strided_slice %494 {offsets = [0, 0], sizes = [2, 128], strides = [1, 1]} : vector<2x256xf32> to vector<2x128xf32>
    %497 = arith.addf %495, %496 : vector<2x128xf32>
    %498 = vector.extract_strided_slice %405 {offsets = [10, 0], sizes = [2, 128], strides = [1, 1]} : vector<16x128xf32> to vector<2x128xf32>
    %499 = vector.extract_strided_slice %494 {offsets = [0, 128], sizes = [2, 128], strides = [1, 1]} : vector<2x256xf32> to vector<2x128xf32>
    %500 = arith.addf %498, %499 : vector<2x128xf32>
    %cst_110 = arith.constant 0.000000e+00 : f32
    %501 = vector.broadcast %cst_110 : f32 to vector<2x128xf32>
    %502 = arith.subf %501, %497 : vector<2x128xf32>
    %503 = math.exp %502 : vector<2x128xf32>
    %cst_111 = arith.constant 1.000000e+00 : f32
    %504 = vector.broadcast %cst_111 : f32 to vector<2x128xf32>
    %505 = arith.addf %504, %503 : vector<2x128xf32>
    %cst_112 = arith.constant 1.000000e+00 : f32
    %506 = vector.broadcast %cst_112 : f32 to vector<2x128xf32>
    %507 = arith.divf %506, %505 : vector<2x128xf32>
    %508 = math.tanh %497 : vector<2x128xf32>
    %cst_113 = arith.constant 0.000000e+00 : f32
    %509 = vector.broadcast %cst_113 : f32 to vector<2x128xf32>
    %510 = arith.subf %509, %500 : vector<2x128xf32>
    %511 = math.exp %510 : vector<2x128xf32>
    %cst_114 = arith.constant 1.000000e+00 : f32
    %512 = vector.broadcast %cst_114 : f32 to vector<2x128xf32>
    %513 = arith.addf %512, %511 : vector<2x128xf32>
    %cst_115 = arith.constant 1.000000e+00 : f32
    %514 = vector.broadcast %cst_115 : f32 to vector<2x128xf32>
    %515 = arith.divf %514, %513 : vector<2x128xf32>
    %516 = math.tanh %500 : vector<2x128xf32>
    %517 = vector.extract_strided_slice %507 {offsets = [0, 32], sizes = [2, 32], strides = [1, 1]} : vector<2x128xf32> to vector<2x32xf32>
    %518 = arith.mulf %517, %480 : vector<2x32xf32>
    %519 = vector.extract_strided_slice %507 {offsets = [0, 0], sizes = [2, 32], strides = [1, 1]} : vector<2x128xf32> to vector<2x32xf32>
    %520 = vector.extract_strided_slice %508 {offsets = [0, 64], sizes = [2, 32], strides = [1, 1]} : vector<2x128xf32> to vector<2x32xf32>
    %521 = arith.mulf %519, %520 : vector<2x32xf32>
    %522 = arith.addf %518, %521 : vector<2x32xf32>
    %523 = vector.extract_strided_slice %515 {offsets = [0, 32], sizes = [2, 32], strides = [1, 1]} : vector<2x128xf32> to vector<2x32xf32>
    %524 = arith.mulf %523, %486 : vector<2x32xf32>
    %525 = vector.extract_strided_slice %515 {offsets = [0, 0], sizes = [2, 32], strides = [1, 1]} : vector<2x128xf32> to vector<2x32xf32>
    %526 = vector.extract_strided_slice %516 {offsets = [0, 64], sizes = [2, 32], strides = [1, 1]} : vector<2x128xf32> to vector<2x32xf32>
    %527 = arith.mulf %525, %526 : vector<2x32xf32>
    %528 = arith.addf %524, %527 : vector<2x32xf32>
    %529 = vector.extract_strided_slice %507 {offsets = [0, 96], sizes = [2, 32], strides = [1, 1]} : vector<2x128xf32> to vector<2x32xf32>
    %530 = math.tanh %522 : vector<2x32xf32>
    %531 = arith.mulf %529, %530 : vector<2x32xf32>
    %532 = vector.extract_strided_slice %515 {offsets = [0, 96], sizes = [2, 32], strides = [1, 1]} : vector<2x128xf32> to vector<2x32xf32>
    %533 = math.tanh %528 : vector<2x32xf32>
    %534 = arith.mulf %532, %533 : vector<2x32xf32>
    %535 = tpu.concatenate %531, %534 in 1 : vector<2x32xf32>, vector<2x32xf32> -> vector<2x64xf32>
    %cst_116 = arith.constant dense<0.000000e+00> : vector<2x256xf32>
    %536 = tpu.matmul %535, %406, %cst_116 {dimension_numbers = #tpu.dot_dimension_numbers<[1], [0], [0], [1], [0, 0, 1, 1], [], []>} : vector<2x64xf32>, vector<64x256xf32>, vector<2x256xf32> -> vector<2x256xf32>
    %537 = vector.extract_strided_slice %404 {offsets = [6, 0], sizes = [2, 128], strides = [1, 1]} : vector<16x128xf32> to vector<2x128xf32>
    %538 = vector.extract_strided_slice %536 {offsets = [0, 0], sizes = [2, 128], strides = [1, 1]} : vector<2x256xf32> to vector<2x128xf32>
    %539 = arith.addf %537, %538 : vector<2x128xf32>
    %540 = vector.extract_strided_slice %405 {offsets = [8, 0], sizes = [2, 128], strides = [1, 1]} : vector<16x128xf32> to vector<2x128xf32>
    %541 = vector.extract_strided_slice %536 {offsets = [0, 128], sizes = [2, 128], strides = [1, 1]} : vector<2x256xf32> to vector<2x128xf32>
    %542 = arith.addf %540, %541 : vector<2x128xf32>
    %cst_117 = arith.constant 0.000000e+00 : f32
    %543 = vector.broadcast %cst_117 : f32 to vector<2x128xf32>
    %544 = arith.subf %543, %539 : vector<2x128xf32>
    %545 = math.exp %544 : vector<2x128xf32>
    %cst_118 = arith.constant 1.000000e+00 : f32
    %546 = vector.broadcast %cst_118 : f32 to vector<2x128xf32>
    %547 = arith.addf %546, %545 : vector<2x128xf32>
    %cst_119 = arith.constant 1.000000e+00 : f32
    %548 = vector.broadcast %cst_119 : f32 to vector<2x128xf32>
    %549 = arith.divf %548, %547 : vector<2x128xf32>
    %550 = math.tanh %539 : vector<2x128xf32>
    %cst_120 = arith.constant 0.000000e+00 : f32
    %551 = vector.broadcast %cst_120 : f32 to vector<2x128xf32>
    %552 = arith.subf %551, %542 : vector<2x128xf32>
    %553 = math.exp %552 : vector<2x128xf32>
    %cst_121 = arith.constant 1.000000e+00 : f32
    %554 = vector.broadcast %cst_121 : f32 to vector<2x128xf32>
    %555 = arith.addf %554, %553 : vector<2x128xf32>
    %cst_122 = arith.constant 1.000000e+00 : f32
    %556 = vector.broadcast %cst_122 : f32 to vector<2x128xf32>
    %557 = arith.divf %556, %555 : vector<2x128xf32>
    %558 = math.tanh %542 : vector<2x128xf32>
    %559 = vector.extract_strided_slice %549 {offsets = [0, 32], sizes = [2, 32], strides = [1, 1]} : vector<2x128xf32> to vector<2x32xf32>
    %560 = arith.mulf %559, %522 : vector<2x32xf32>
    %561 = vector.extract_strided_slice %549 {offsets = [0, 0], sizes = [2, 32], strides = [1, 1]} : vector<2x128xf32> to vector<2x32xf32>
    %562 = vector.extract_strided_slice %550 {offsets = [0, 64], sizes = [2, 32], strides = [1, 1]} : vector<2x128xf32> to vector<2x32xf32>
    %563 = arith.mulf %561, %562 : vector<2x32xf32>
    %564 = arith.addf %560, %563 : vector<2x32xf32>
    %565 = vector.extract_strided_slice %557 {offsets = [0, 32], sizes = [2, 32], strides = [1, 1]} : vector<2x128xf32> to vector<2x32xf32>
    %566 = arith.mulf %565, %528 : vector<2x32xf32>
    %567 = vector.extract_strided_slice %557 {offsets = [0, 0], sizes = [2, 32], strides = [1, 1]} : vector<2x128xf32> to vector<2x32xf32>
    %568 = vector.extract_strided_slice %558 {offsets = [0, 64], sizes = [2, 32], strides = [1, 1]} : vector<2x128xf32> to vector<2x32xf32>
    %569 = arith.mulf %567, %568 : vector<2x32xf32>
    %570 = arith.addf %566, %569 : vector<2x32xf32>
    %571 = vector.extract_strided_slice %549 {offsets = [0, 96], sizes = [2, 32], strides = [1, 1]} : vector<2x128xf32> to vector<2x32xf32>
    %572 = math.tanh %564 : vector<2x32xf32>
    %573 = arith.mulf %571, %572 : vector<2x32xf32>
    %574 = vector.extract_strided_slice %557 {offsets = [0, 96], sizes = [2, 32], strides = [1, 1]} : vector<2x128xf32> to vector<2x32xf32>
    %575 = math.tanh %570 : vector<2x32xf32>
    %576 = arith.mulf %574, %575 : vector<2x32xf32>
    %577 = tpu.concatenate %573, %576 in 1 : vector<2x32xf32>, vector<2x32xf32> -> vector<2x64xf32>
    %cst_123 = arith.constant dense<0.000000e+00> : vector<2x256xf32>
    %578 = tpu.matmul %577, %406, %cst_123 {dimension_numbers = #tpu.dot_dimension_numbers<[1], [0], [0], [1], [0, 0, 1, 1], [], []>} : vector<2x64xf32>, vector<64x256xf32>, vector<2x256xf32> -> vector<2x256xf32>
    %579 = vector.extract_strided_slice %404 {offsets = [8, 0], sizes = [2, 128], strides = [1, 1]} : vector<16x128xf32> to vector<2x128xf32>
    %580 = vector.extract_strided_slice %578 {offsets = [0, 0], sizes = [2, 128], strides = [1, 1]} : vector<2x256xf32> to vector<2x128xf32>
    %581 = arith.addf %579, %580 : vector<2x128xf32>
    %582 = vector.extract_strided_slice %405 {offsets = [6, 0], sizes = [2, 128], strides = [1, 1]} : vector<16x128xf32> to vector<2x128xf32>
    %583 = vector.extract_strided_slice %578 {offsets = [0, 128], sizes = [2, 128], strides = [1, 1]} : vector<2x256xf32> to vector<2x128xf32>
    %584 = arith.addf %582, %583 : vector<2x128xf32>
    %cst_124 = arith.constant 0.000000e+00 : f32
    %585 = vector.broadcast %cst_124 : f32 to vector<2x128xf32>
    %586 = arith.subf %585, %581 : vector<2x128xf32>
    %587 = math.exp %586 : vector<2x128xf32>
    %cst_125 = arith.constant 1.000000e+00 : f32
    %588 = vector.broadcast %cst_125 : f32 to vector<2x128xf32>
    %589 = arith.addf %588, %587 : vector<2x128xf32>
    %cst_126 = arith.constant 1.000000e+00 : f32
    %590 = vector.broadcast %cst_126 : f32 to vector<2x128xf32>
    %591 = arith.divf %590, %589 : vector<2x128xf32>
    %592 = math.tanh %581 : vector<2x128xf32>
    %cst_127 = arith.constant 0.000000e+00 : f32
    %593 = vector.broadcast %cst_127 : f32 to vector<2x128xf32>
    %594 = arith.subf %593, %584 : vector<2x128xf32>
    %595 = math.exp %594 : vector<2x128xf32>
    %cst_128 = arith.constant 1.000000e+00 : f32
    %596 = vector.broadcast %cst_128 : f32 to vector<2x128xf32>
    %597 = arith.addf %596, %595 : vector<2x128xf32>
    %cst_129 = arith.constant 1.000000e+00 : f32
    %598 = vector.broadcast %cst_129 : f32 to vector<2x128xf32>
    %599 = arith.divf %598, %597 : vector<2x128xf32>
    %600 = math.tanh %584 : vector<2x128xf32>
    %601 = vector.extract_strided_slice %591 {offsets = [0, 32], sizes = [2, 32], strides = [1, 1]} : vector<2x128xf32> to vector<2x32xf32>
    %602 = arith.mulf %601, %564 : vector<2x32xf32>
    %603 = vector.extract_strided_slice %591 {offsets = [0, 0], sizes = [2, 32], strides = [1, 1]} : vector<2x128xf32> to vector<2x32xf32>
    %604 = vector.extract_strided_slice %592 {offsets = [0, 64], sizes = [2, 32], strides = [1, 1]} : vector<2x128xf32> to vector<2x32xf32>
    %605 = arith.mulf %603, %604 : vector<2x32xf32>
    %606 = arith.addf %602, %605 : vector<2x32xf32>
    %607 = vector.extract_strided_slice %599 {offsets = [0, 32], sizes = [2, 32], strides = [1, 1]} : vector<2x128xf32> to vector<2x32xf32>
    %608 = arith.mulf %607, %570 : vector<2x32xf32>
    %609 = vector.extract_strided_slice %599 {offsets = [0, 0], sizes = [2, 32], strides = [1, 1]} : vector<2x128xf32> to vector<2x32xf32>
    %610 = vector.extract_strided_slice %600 {offsets = [0, 64], sizes = [2, 32], strides = [1, 1]} : vector<2x128xf32> to vector<2x32xf32>
    %611 = arith.mulf %609, %610 : vector<2x32xf32>
    %612 = arith.addf %608, %611 : vector<2x32xf32>
    %613 = vector.extract_strided_slice %591 {offsets = [0, 96], sizes = [2, 32], strides = [1, 1]} : vector<2x128xf32> to vector<2x32xf32>
    %614 = math.tanh %606 : vector<2x32xf32>
    %615 = arith.mulf %613, %614 : vector<2x32xf32>
    %616 = vector.extract_strided_slice %599 {offsets = [0, 96], sizes = [2, 32], strides = [1, 1]} : vector<2x128xf32> to vector<2x32xf32>
    %617 = math.tanh %612 : vector<2x32xf32>
    %618 = arith.mulf %616, %617 : vector<2x32xf32>
    %619 = tpu.concatenate %615, %618 in 1 : vector<2x32xf32>, vector<2x32xf32> -> vector<2x64xf32>
    %cst_130 = arith.constant dense<0.000000e+00> : vector<2x256xf32>
    %620 = tpu.matmul %619, %406, %cst_130 {dimension_numbers = #tpu.dot_dimension_numbers<[1], [0], [0], [1], [0, 0, 1, 1], [], []>} : vector<2x64xf32>, vector<64x256xf32>, vector<2x256xf32> -> vector<2x256xf32>
    %621 = vector.extract_strided_slice %404 {offsets = [10, 0], sizes = [2, 128], strides = [1, 1]} : vector<16x128xf32> to vector<2x128xf32>
    %622 = vector.extract_strided_slice %620 {offsets = [0, 0], sizes = [2, 128], strides = [1, 1]} : vector<2x256xf32> to vector<2x128xf32>
    %623 = arith.addf %621, %622 : vector<2x128xf32>
    %624 = vector.extract_strided_slice %405 {offsets = [4, 0], sizes = [2, 128], strides = [1, 1]} : vector<16x128xf32> to vector<2x128xf32>
    %625 = vector.extract_strided_slice %620 {offsets = [0, 128], sizes = [2, 128], strides = [1, 1]} : vector<2x256xf32> to vector<2x128xf32>
    %626 = arith.addf %624, %625 : vector<2x128xf32>
    %cst_131 = arith.constant 0.000000e+00 : f32
    %627 = vector.broadcast %cst_131 : f32 to vector<2x128xf32>
    %628 = arith.subf %627, %623 : vector<2x128xf32>
    %629 = math.exp %628 : vector<2x128xf32>
    %cst_132 = arith.constant 1.000000e+00 : f32
    %630 = vector.broadcast %cst_132 : f32 to vector<2x128xf32>
    %631 = arith.addf %630, %629 : vector<2x128xf32>
    %cst_133 = arith.constant 1.000000e+00 : f32
    %632 = vector.broadcast %cst_133 : f32 to vector<2x128xf32>
    %633 = arith.divf %632, %631 : vector<2x128xf32>
    %634 = math.tanh %623 : vector<2x128xf32>
    %cst_134 = arith.constant 0.000000e+00 : f32
    %635 = vector.broadcast %cst_134 : f32 to vector<2x128xf32>
    %636 = arith.subf %635, %626 : vector<2x128xf32>
    %637 = math.exp %636 : vector<2x128xf32>
    %cst_135 = arith.constant 1.000000e+00 : f32
    %638 = vector.broadcast %cst_135 : f32 to vector<2x128xf32>
    %639 = arith.addf %638, %637 : vector<2x128xf32>
    %cst_136 = arith.constant 1.000000e+00 : f32
    %640 = vector.broadcast %cst_136 : f32 to vector<2x128xf32>
    %641 = arith.divf %640, %639 : vector<2x128xf32>
    %642 = math.tanh %626 : vector<2x128xf32>
    %643 = vector.extract_strided_slice %633 {offsets = [0, 32], sizes = [2, 32], strides = [1, 1]} : vector<2x128xf32> to vector<2x32xf32>
    %644 = arith.mulf %643, %606 : vector<2x32xf32>
    %645 = vector.extract_strided_slice %633 {offsets = [0, 0], sizes = [2, 32], strides = [1, 1]} : vector<2x128xf32> to vector<2x32xf32>
    %646 = vector.extract_strided_slice %634 {offsets = [0, 64], sizes = [2, 32], strides = [1, 1]} : vector<2x128xf32> to vector<2x32xf32>
    %647 = arith.mulf %645, %646 : vector<2x32xf32>
    %648 = arith.addf %644, %647 : vector<2x32xf32>
    %649 = vector.extract_strided_slice %641 {offsets = [0, 32], sizes = [2, 32], strides = [1, 1]} : vector<2x128xf32> to vector<2x32xf32>
    %650 = arith.mulf %649, %612 : vector<2x32xf32>
    %651 = vector.extract_strided_slice %641 {offsets = [0, 0], sizes = [2, 32], strides = [1, 1]} : vector<2x128xf32> to vector<2x32xf32>
    %652 = vector.extract_strided_slice %642 {offsets = [0, 64], sizes = [2, 32], strides = [1, 1]} : vector<2x128xf32> to vector<2x32xf32>
    %653 = arith.mulf %651, %652 : vector<2x32xf32>
    %654 = arith.addf %650, %653 : vector<2x32xf32>
    %655 = vector.extract_strided_slice %633 {offsets = [0, 96], sizes = [2, 32], strides = [1, 1]} : vector<2x128xf32> to vector<2x32xf32>
    %656 = math.tanh %648 : vector<2x32xf32>
    %657 = arith.mulf %655, %656 : vector<2x32xf32>
    %658 = vector.extract_strided_slice %641 {offsets = [0, 96], sizes = [2, 32], strides = [1, 1]} : vector<2x128xf32> to vector<2x32xf32>
    %659 = math.tanh %654 : vector<2x32xf32>
    %660 = arith.mulf %658, %659 : vector<2x32xf32>
    %661 = tpu.concatenate %657, %660 in 1 : vector<2x32xf32>, vector<2x32xf32> -> vector<2x64xf32>
    %cst_137 = arith.constant dense<0.000000e+00> : vector<2x256xf32>
    %662 = tpu.matmul %661, %406, %cst_137 {dimension_numbers = #tpu.dot_dimension_numbers<[1], [0], [0], [1], [0, 0, 1, 1], [], []>} : vector<2x64xf32>, vector<64x256xf32>, vector<2x256xf32> -> vector<2x256xf32>
    %663 = vector.extract_strided_slice %404 {offsets = [12, 0], sizes = [2, 128], strides = [1, 1]} : vector<16x128xf32> to vector<2x128xf32>
    %664 = vector.extract_strided_slice %662 {offsets = [0, 0], sizes = [2, 128], strides = [1, 1]} : vector<2x256xf32> to vector<2x128xf32>
    %665 = arith.addf %663, %664 : vector<2x128xf32>
    %666 = vector.extract_strided_slice %405 {offsets = [2, 0], sizes = [2, 128], strides = [1, 1]} : vector<16x128xf32> to vector<2x128xf32>
    %667 = vector.extract_strided_slice %662 {offsets = [0, 128], sizes = [2, 128], strides = [1, 1]} : vector<2x256xf32> to vector<2x128xf32>
    %668 = arith.addf %666, %667 : vector<2x128xf32>
    %cst_138 = arith.constant 0.000000e+00 : f32
    %669 = vector.broadcast %cst_138 : f32 to vector<2x128xf32>
    %670 = arith.subf %669, %665 : vector<2x128xf32>
    %671 = math.exp %670 : vector<2x128xf32>
    %cst_139 = arith.constant 1.000000e+00 : f32
    %672 = vector.broadcast %cst_139 : f32 to vector<2x128xf32>
    %673 = arith.addf %672, %671 : vector<2x128xf32>
    %cst_140 = arith.constant 1.000000e+00 : f32
    %674 = vector.broadcast %cst_140 : f32 to vector<2x128xf32>
    %675 = arith.divf %674, %673 : vector<2x128xf32>
    %676 = math.tanh %665 : vector<2x128xf32>
    %cst_141 = arith.constant 0.000000e+00 : f32
    %677 = vector.broadcast %cst_141 : f32 to vector<2x128xf32>
    %678 = arith.subf %677, %668 : vector<2x128xf32>
    %679 = math.exp %678 : vector<2x128xf32>
    %cst_142 = arith.constant 1.000000e+00 : f32
    %680 = vector.broadcast %cst_142 : f32 to vector<2x128xf32>
    %681 = arith.addf %680, %679 : vector<2x128xf32>
    %cst_143 = arith.constant 1.000000e+00 : f32
    %682 = vector.broadcast %cst_143 : f32 to vector<2x128xf32>
    %683 = arith.divf %682, %681 : vector<2x128xf32>
    %684 = math.tanh %668 : vector<2x128xf32>
    %685 = vector.extract_strided_slice %675 {offsets = [0, 32], sizes = [2, 32], strides = [1, 1]} : vector<2x128xf32> to vector<2x32xf32>
    %686 = arith.mulf %685, %648 : vector<2x32xf32>
    %687 = vector.extract_strided_slice %675 {offsets = [0, 0], sizes = [2, 32], strides = [1, 1]} : vector<2x128xf32> to vector<2x32xf32>
    %688 = vector.extract_strided_slice %676 {offsets = [0, 64], sizes = [2, 32], strides = [1, 1]} : vector<2x128xf32> to vector<2x32xf32>
    %689 = arith.mulf %687, %688 : vector<2x32xf32>
    %690 = arith.addf %686, %689 : vector<2x32xf32>
    %691 = vector.extract_strided_slice %683 {offsets = [0, 32], sizes = [2, 32], strides = [1, 1]} : vector<2x128xf32> to vector<2x32xf32>
    %692 = arith.mulf %691, %654 : vector<2x32xf32>
    %693 = vector.extract_strided_slice %683 {offsets = [0, 0], sizes = [2, 32], strides = [1, 1]} : vector<2x128xf32> to vector<2x32xf32>
    %694 = vector.extract_strided_slice %684 {offsets = [0, 64], sizes = [2, 32], strides = [1, 1]} : vector<2x128xf32> to vector<2x32xf32>
    %695 = arith.mulf %693, %694 : vector<2x32xf32>
    %696 = arith.addf %692, %695 : vector<2x32xf32>
    %697 = vector.extract_strided_slice %675 {offsets = [0, 96], sizes = [2, 32], strides = [1, 1]} : vector<2x128xf32> to vector<2x32xf32>
    %698 = math.tanh %690 : vector<2x32xf32>
    %699 = arith.mulf %697, %698 : vector<2x32xf32>
    %700 = vector.extract_strided_slice %683 {offsets = [0, 96], sizes = [2, 32], strides = [1, 1]} : vector<2x128xf32> to vector<2x32xf32>
    %701 = math.tanh %696 : vector<2x32xf32>
    %702 = arith.mulf %700, %701 : vector<2x32xf32>
    %703 = tpu.concatenate %699, %702 in 1 : vector<2x32xf32>, vector<2x32xf32> -> vector<2x64xf32>
    %cst_144 = arith.constant dense<0.000000e+00> : vector<2x256xf32>
    %704 = tpu.matmul %703, %406, %cst_144 {dimension_numbers = #tpu.dot_dimension_numbers<[1], [0], [0], [1], [0, 0, 1, 1], [], []>} : vector<2x64xf32>, vector<64x256xf32>, vector<2x256xf32> -> vector<2x256xf32>
    %705 = vector.extract_strided_slice %404 {offsets = [14, 0], sizes = [2, 128], strides = [1, 1]} : vector<16x128xf32> to vector<2x128xf32>
    %706 = vector.extract_strided_slice %704 {offsets = [0, 0], sizes = [2, 128], strides = [1, 1]} : vector<2x256xf32> to vector<2x128xf32>
    %707 = arith.addf %705, %706 : vector<2x128xf32>
    %708 = vector.extract_strided_slice %405 {offsets = [0, 0], sizes = [2, 128], strides = [1, 1]} : vector<16x128xf32> to vector<2x128xf32>
    %709 = vector.extract_strided_slice %704 {offsets = [0, 128], sizes = [2, 128], strides = [1, 1]} : vector<2x256xf32> to vector<2x128xf32>
    %710 = arith.addf %708, %709 : vector<2x128xf32>
    %cst_145 = arith.constant 0.000000e+00 : f32
    %711 = vector.broadcast %cst_145 : f32 to vector<2x128xf32>
    %712 = arith.subf %711, %707 : vector<2x128xf32>
    %713 = math.exp %712 : vector<2x128xf32>
    %cst_146 = arith.constant 1.000000e+00 : f32
    %714 = vector.broadcast %cst_146 : f32 to vector<2x128xf32>
    %715 = arith.addf %714, %713 : vector<2x128xf32>
    %cst_147 = arith.constant 1.000000e+00 : f32
    %716 = vector.broadcast %cst_147 : f32 to vector<2x128xf32>
    %717 = arith.divf %716, %715 : vector<2x128xf32>
    %718 = math.tanh %707 : vector<2x128xf32>
    %cst_148 = arith.constant 0.000000e+00 : f32
    %719 = vector.broadcast %cst_148 : f32 to vector<2x128xf32>
    %720 = arith.subf %719, %710 : vector<2x128xf32>
    %721 = math.exp %720 : vector<2x128xf32>
    %cst_149 = arith.constant 1.000000e+00 : f32
    %722 = vector.broadcast %cst_149 : f32 to vector<2x128xf32>
    %723 = arith.addf %722, %721 : vector<2x128xf32>
    %cst_150 = arith.constant 1.000000e+00 : f32
    %724 = vector.broadcast %cst_150 : f32 to vector<2x128xf32>
    %725 = arith.divf %724, %723 : vector<2x128xf32>
    %726 = math.tanh %710 : vector<2x128xf32>
    %727 = vector.extract_strided_slice %717 {offsets = [0, 32], sizes = [2, 32], strides = [1, 1]} : vector<2x128xf32> to vector<2x32xf32>
    %728 = arith.mulf %727, %690 : vector<2x32xf32>
    %729 = vector.extract_strided_slice %717 {offsets = [0, 0], sizes = [2, 32], strides = [1, 1]} : vector<2x128xf32> to vector<2x32xf32>
    %730 = vector.extract_strided_slice %718 {offsets = [0, 64], sizes = [2, 32], strides = [1, 1]} : vector<2x128xf32> to vector<2x32xf32>
    %731 = arith.mulf %729, %730 : vector<2x32xf32>
    %732 = arith.addf %728, %731 : vector<2x32xf32>
    %733 = vector.extract_strided_slice %725 {offsets = [0, 32], sizes = [2, 32], strides = [1, 1]} : vector<2x128xf32> to vector<2x32xf32>
    %734 = arith.mulf %733, %696 : vector<2x32xf32>
    %735 = vector.extract_strided_slice %725 {offsets = [0, 0], sizes = [2, 32], strides = [1, 1]} : vector<2x128xf32> to vector<2x32xf32>
    %736 = vector.extract_strided_slice %726 {offsets = [0, 64], sizes = [2, 32], strides = [1, 1]} : vector<2x128xf32> to vector<2x32xf32>
    %737 = arith.mulf %735, %736 : vector<2x32xf32>
    %738 = arith.addf %734, %737 : vector<2x32xf32>
    %739 = vector.extract_strided_slice %717 {offsets = [0, 96], sizes = [2, 32], strides = [1, 1]} : vector<2x128xf32> to vector<2x32xf32>
    %740 = math.tanh %732 : vector<2x32xf32>
    %741 = arith.mulf %739, %740 : vector<2x32xf32>
    %742 = vector.extract_strided_slice %725 {offsets = [0, 96], sizes = [2, 32], strides = [1, 1]} : vector<2x128xf32> to vector<2x32xf32>
    %743 = math.tanh %738 : vector<2x32xf32>
    %744 = arith.mulf %742, %743 : vector<2x32xf32>
    %745 = tpu.concatenate %741, %744 in 1 : vector<2x32xf32>, vector<2x32xf32> -> vector<2x64xf32>
    %746 = tpu.concatenate %389, %745 in 1 : vector<2x64xf32>, vector<2x64xf32> -> vector<2x128xf32>
    %c0_151 = arith.constant 0 : index
    %c0_152 = arith.constant 0 : index
    %747 = vector.load %arg12[%c0_151, %c0_152] : memref<128x2048xf32, #tpu.memory_space<vmem>>, vector<128x2048xf32>
    %cst_153 = arith.constant dense<0.000000e+00> : vector<2x2048xf32>
    %748 = tpu.matmul %746, %747, %cst_153 {dimension_numbers = #tpu.dot_dimension_numbers<[1], [0], [0], [1], [0, 0, 1, 1], [], []>} : vector<2x128xf32>, vector<128x2048xf32>, vector<2x2048xf32> -> vector<2x2048xf32>
    %c0_154 = arith.constant 0 : index
    %c0_155 = arith.constant 0 : index
    %749 = vector.load %arg13[%c0_154, %c0_155] : memref<1x2048xf32, #tpu.memory_space<vmem>>, vector<1x2048xf32>
    %750 = vector.broadcast %749 : vector<1x2048xf32> to vector<2x2048xf32>
    %751 = arith.addf %748, %750 : vector<2x2048xf32>
    %cst_156 = arith.constant dense<0.000000e+00> : vector<2048xf32>
    %752 = vector.multi_reduction <add>, %751, %cst_156 [0] : vector<2x2048xf32> to vector<2048xf32>
    %753 = vector.shape_cast %752 : vector<2048xf32> to vector<1x2048xf32>
    %cst_157 = arith.constant 2.000000e+00 : f32
    %754 = vector.broadcast %cst_157 : f32 to vector<1x2048xf32>
    %755 = arith.divf %753, %754 : vector<1x2048xf32>
    %756 = arith.mulf %751, %751 : vector<2x2048xf32>
    %cst_158 = arith.constant dense<0.000000e+00> : vector<2048xf32>
    %757 = vector.multi_reduction <add>, %756, %cst_158 [0] : vector<2x2048xf32> to vector<2048xf32>
    %758 = vector.shape_cast %757 : vector<2048xf32> to vector<1x2048xf32>
    %cst_159 = arith.constant 2.000000e+00 : f32
    %759 = vector.broadcast %cst_159 : f32 to vector<1x2048xf32>
    %760 = arith.divf %758, %759 : vector<1x2048xf32>
    %761 = arith.mulf %755, %755 : vector<1x2048xf32>
    %762 = arith.subf %760, %761 : vector<1x2048xf32>
    %cst_160 = arith.constant 0.000000e+00 : f32
    %763 = vector.broadcast %cst_160 : f32 to vector<1x2048xf32>
    %764 = arith.maximumf %762, %763 : vector<1x2048xf32>
    %765 = vector.broadcast %755 : vector<1x2048xf32> to vector<2x2048xf32>
    %766 = arith.subf %751, %765 : vector<2x2048xf32>
    %cst_161 = arith.constant 9.99999974E-6 : f32
    %767 = vector.broadcast %cst_161 : f32 to vector<1x2048xf32>
    %768 = arith.addf %764, %767 : vector<1x2048xf32>
    %769 = math.rsqrt %768 : vector<1x2048xf32>
    %770 = vector.broadcast %769 : vector<1x2048xf32> to vector<2x2048xf32>
    %771 = arith.mulf %766, %770 : vector<2x2048xf32>
    %c0_162 = arith.constant 0 : index
    %c0_163 = arith.constant 0 : index
    %772 = vector.load %arg14[%c0_162, %c0_163] : memref<1x2048xf32, #tpu.memory_space<vmem>>, vector<1x2048xf32>
    %773 = vector.broadcast %772 : vector<1x2048xf32> to vector<2x2048xf32>
    %774 = arith.mulf %771, %773 : vector<2x2048xf32>
    %c0_164 = arith.constant 0 : index
    %c0_165 = arith.constant 0 : index
    %775 = vector.load %arg15[%c0_164, %c0_165] : memref<1x2048xf32, #tpu.memory_space<vmem>>, vector<1x2048xf32>
    %776 = vector.broadcast %775 : vector<1x2048xf32> to vector<2x2048xf32>
    %777 = arith.addf %774, %776 : vector<2x2048xf32>
    %cst_166 = arith.constant 0.000000e+00 : f32
    %778 = vector.broadcast %cst_166 : f32 to vector<2x2048xf32>
    %779 = arith.maximumf %777, %778 : vector<2x2048xf32>
    %c0_167 = arith.constant 0 : index
    %c0_168 = arith.constant 0 : index
    %780 = vector.load %arg16[%c0_167, %c0_168] : memref<2048x128xf32, #tpu.memory_space<vmem>>, vector<2048x128xf32>
    %cst_169 = arith.constant dense<0.000000e+00> : vector<2x128xf32>
    %781 = tpu.matmul %779, %780, %cst_169 {dimension_numbers = #tpu.dot_dimension_numbers<[1], [0], [0], [1], [0, 0, 1, 1], [], []>} : vector<2x2048xf32>, vector<2048x128xf32>, vector<2x128xf32> -> vector<2x128xf32>
    %c0_170 = arith.constant 0 : index
    %c0_171 = arith.constant 0 : index
    %782 = vector.load %arg17[%c0_170, %c0_171] : memref<1x128xf32, #tpu.memory_space<vmem>>, vector<1x128xf32>
    %783 = vector.broadcast %782 : vector<1x128xf32> to vector<2x128xf32>
    %784 = arith.addf %781, %783 : vector<2x128xf32>
    %c0_172 = arith.constant 0 : index
    %c0_173 = arith.constant 0 : index
    %785 = vector.load %arg18[%c0_172, %c0_173] : memref<2x128xf32, #tpu.memory_space<vmem>>, vector<2x128xf32>
    tpu.vector_store %arg18[%c0_172, %c0_173], %784 {strides = array<i32>} : memref<2x128xf32, #tpu.memory_space<vmem>>, vector<2x128xf32>,
    return
  }
}

</mosaic_0001>

<bundles_post_ra>
// kernel: textrnn_forward.1
= control target key start
LH: loop header
LB: loop body
LE: loop exit
PB: predicated region body
PF: predicated region fallthrough
CT: control target
= control target key end

     0   :  { %s9537_s0 = inlined_call_operand.vmem [shape: s32[16,1], index: 0, kind: input, shape index: {}]   ;;  %s9538_s1 = inlined_call_operand.vmem [shape: f32[128,32], index: 1, kind: input, shape index: {}]   ;;  %s9539_s2 = inlined_call_operand.vmem [shape: f32[32,512], index: 2, kind: input, shape index: {}]   ;;  %s9540_s3 = inlined_call_operand.vmem [shape: f32[1,512], index: 3, kind: input, shape index: {}]   ;;  %s9541_s4 = inlined_call_operand.<no memory space> [shape: f32[1,1], index: 4, kind: input, shape index: {}]   ;;  %s9542_s6 = inlined_call_operand.hbm [shape: f32[512,256], index: 6, kind: input, shape index: {}]   ;;  %s9543_s7 = inlined_call_operand.hbm [shape: f32[64,256], index: 7, kind: input, shape index: {}]   ;;  %s9544_s8 = inlined_call_operand.vmem [shape: f32[1,256], index: 8, kind: input, shape index: {}]   ;;  %s9545_s9 = inlined_call_operand.hbm [shape: f32[64,256], index: 9, kind: input, shape index: {}]   ;;  %s9546_s10 = inlined_call_operand.hbm [shape: f32[64,256], index: 10, kind: input, shape index: {}]   ;;  %s9547_s11 = inlined_call_operand.vmem [shape: f32[1,256], index: 11, kind: input, shape index: {}]   ;;  %s9548_s12 = inlined_call_operand.hbm [shape: f32[128,2048], index: 12, kind: input, shape index: {}]   ;;  %s9549_s13 = inlined_call_operand.vmem [shape: f32[1,2048], index: 13, kind: input, shape index: {}]   ;;  %s9550_s14 = inlined_call_operand.vmem [shape: f32[1,2048], index: 14, kind: input, shape index: {}]   ;;  %s9551_s15 = inlined_call_operand.vmem [shape: f32[1,2048], index: 15, kind: input, shape index: {}]   ;;  %s9552_s16 = inlined_call_operand.hbm [shape: f32[2048,128], index: 16, kind: input, shape index: {}]   ;;  %s9553_s17 = inlined_call_operand.vmem [shape: f32[1,128], index: 17, kind: input, shape index: {}]   ;;  %s9554_s18 = inlined_call_operand.hbm [shape: f32[2,128], index: 18, kind: output, shape index: {}]   ;;  %s9555_s5 = inlined_call_operand.<no memory space> [shape: f32[1,1], index: 5, kind: input, shape index: {}]  }
   0x1   :  { %9643 = sst [smem:[#allocation99_spill]] %s9537_s0  ;;  %v23_v0 = vstv %s9541_s4  ;;  %v25_v1 = vstv %s9555_s5 }
   0x2   :  { %9644 = sst [smem:[#allocation100_spill]] %s9538_s1  ;;  %24 = vst [vmem:[#allocation2] sm:$0x1] %v23_v0  ;;  %26 = vst [vmem:[#allocation3] sm:$0x1] %v25_v1 }
   0x3   :  { %9645 = sst [smem:[#allocation101_spill]] %s9539_s2 }
   0x4   :  { %27 = vsyncpa [#allocation5], 0 }
   0x5   :  { %28 = vsyncpa [#allocation8], 0 }
   0x6   :  { %29 = vsyncpa [#allocation11], 0 }
   0x7   :  { %30 = vsyncpa [#allocation14], 0 }
   0x8   :  { %31 = vsyncpa [#allocation6], 0  ;;  %s7509_s0 = smov [#allocation7]   ;;  %s7510_s1 = smov [#allocation10]  }
   0x9   :  { %s61_s19 = sshll.u32 %s7509_s0, 4  ;;  %s87_s20 = sshll.u32 %s7510_s1, 4  ;;  %s62_s19 = int_to_ptr.vmem [resolvable:$true] %s61_s19  ;;  %s7628_s20 = int_to_ptr.vmem [resolvable:$true] %s87_s20 }
   0xa   :  { %s7345_s22 = scalar_lea.hbm %s9543_s7, 2048 }
   0xb   :  { %p7346_p0 = scmp.ne.s32.totalorder %s9543_s7, %s7345_s22  ;;  %p7349_p1 = scmp.lt.u32.totalorder %s7345_s22, %s9543_s7 }
   0xd   :  { %p7351_p2 = pnand %p7349_p1, %p7346_p0 }
   0xf   :  { %7354 = shalt.err (!%p7351_p2)
}
  0x10   :  { %s7355_s25 = scalar_lea.vmem %s62_s19, 2048  ;;  %p7360_p4 = scmp.lt.s32.totalorder %s62_s19, %s62_s19 }
  0x11   :  { %p7356_p3 = scmp.ne.s32.totalorder %s62_s19, %s7355_s25  ;;  %p7361_p5 = scmp.lt.s32.totalorder %s7355_s25, %s7355_s25 }
  0x13   :  { %p7362_p6 = por %p7361_p5, %p7360_p4 }
  0x15   :  { %p7363_p7 = pnand %p7362_p6, %p7356_p3 }
  0x17   :  { %7366 = shalt.err (!%p7363_p7)
}
  0x18   :  { %s7511_s26 = smov 256   ;;  %s7512_s27 = smov 16  }
  0x19   :  { %67 = dma.hbm_to_vmem [thread:$0]  %s9543_s7, 2048, %s62_s19, [#allocation8], %s7511_s26, %s7511_s26, %s7512_s27  }
  0x1a   :  { %s7367_s1 = scalar_lea.hbm %s9546_s10, 2048 }
  0x1b   :  { %p7368_p8 = scmp.ne.s32.totalorder %s9546_s10, %s7367_s1  ;;  %p7371_p9 = scmp.lt.u32.totalorder %s7367_s1, %s9546_s10 }
  0x1d   :  { %p7373_p10 = pnand %p7371_p9, %p7368_p8 }
  0x1f   :  { %7376 = shalt.err (!%p7373_p10)
}
  0x20   :  { %s7377_s5 = scalar_lea.vmem %s7628_s20, 2048  ;;  %p7382_p12 = scmp.lt.s32.totalorder %s7628_s20, %s7628_s20 }
  0x21   :  { %p7378_p11 = scmp.ne.s32.totalorder %s7628_s20, %s7377_s5  ;;  %p7383_p13 = scmp.lt.s32.totalorder %s7377_s5, %s7377_s5 }
  0x23   :  { %p7384_p0 = por %p7383_p13, %p7382_p12 }
  0x25   :  { %p7385_p1 = pnand %p7384_p0, %p7378_p11 }
  0x27   :  { %7388 = shalt.err (!%p7385_p1)
}
  0x28   :  { %93 = dma.hbm_to_vmem [thread:$0]  %s9546_s10, 2048, %s7628_s20, [#allocation11], %s7511_s26, %s7511_s26, %s7512_s27  }
  0x29   :  { %s7513_s23 = smov [#allocation4]   ;;  %s7514_s25 = smov [#allocation9]  }
  0x2a   :  { %s49_s24 = sshll.u32 %s7513_s23, 4  ;;  %s75_s28 = sshll.u32 %s7514_s25, 4  ;;  %s50_s24 = int_to_ptr.vmem [resolvable:$true] %s49_s24  ;;  %s7665_s28 = int_to_ptr.vmem [resolvable:$true] %s75_s28 }
  0x2b   :  { %s7389_s0 = scalar_lea.hbm %s9542_s6, 16384 }
  0x2c   :  { %p7390_p2 = scmp.ne.s32.totalorder %s9542_s6, %s7389_s0  ;;  %p7393_p3 = scmp.lt.u32.totalorder %s7389_s0, %s9542_s6 }
  0x2e   :  { %p7395_p4 = pnand %p7393_p3, %p7390_p2 }
  0x30   :  { %7398 = shalt.err (!%p7395_p4)
}
  0x31   :  { %s7399_s10 = scalar_lea.vmem %s50_s24, 16384  ;;  %p7404_p6 = scmp.lt.s32.totalorder %s50_s24, %s50_s24 }
  0x32   :  { %p7400_p5 = scmp.ne.s32.totalorder %s50_s24, %s7399_s10  ;;  %p7405_p7 = scmp.lt.s32.totalorder %s7399_s10, %s7399_s10 }
  0x34   :  { %p7406_p8 = por %p7405_p7, %p7404_p6 }
  0x36   :  { %p7407_p9 = pnand %p7406_p8, %p7400_p5 }
  0x38   :  { %7410 = shalt.err (!%p7407_p9)
}
  0x39   :  { %55 = dma.hbm_to_vmem [thread:$0]  %s9542_s6, 16384, %s50_s24, [#allocation5], %s7511_s26, %s7511_s26, %s7512_s27  }
  0x3a   :  { %s7411_s19 = scalar_lea.hbm %s9545_s9, 2048 }
  0x3b   :  { %p7412_p10 = scmp.ne.s32.totalorder %s9545_s9, %s7411_s19  ;;  %p7415_p11 = scmp.lt.u32.totalorder %s7411_s19, %s9545_s9 }
  0x3d   :  { %p7417_p12 = pnand %p7415_p11, %p7412_p10 }
  0x3f   :  { %7420 = shalt.err (!%p7417_p12)
}
  0x40   :  { %s7421_s0 = scalar_lea.vmem %s7665_s28, 2048  ;;  %p7426_p0 = scmp.lt.s32.totalorder %s7665_s28, %s7665_s28 }
  0x41   :  { %p7422_p13 = scmp.ne.s32.totalorder %s7665_s28, %s7421_s0  ;;  %p7427_p1 = scmp.lt.s32.totalorder %s7421_s0, %s7421_s0 }
  0x43   :  { %p7428_p2 = por %p7427_p1, %p7426_p0 }
  0x45   :  { %p7429_p3 = pnand %p7428_p2, %p7422_p13 }
  0x47   :  { %7432 = shalt.err (!%p7429_p3)
}
  0x48   :  { %81 = dma.hbm_to_vmem [thread:$0]  %s9545_s9, 2048, %s7665_s28, [#allocation8], %s7511_s26, %s7511_s26, %s7512_s27  }
  0x49   :  { %s7515_s1 = smov [#allocation12]   ;;  %s7433_s10 = scalar_lea.hbm %s9548_s12, 32768 }
  0x4a   :  { %s101_s21 = sshll.u32 %s7515_s1, 4  ;;  %p7434_p4 = scmp.ne.s32.totalorder %s9548_s12, %s7433_s10  ;;  %s102_s21 = int_to_ptr.vmem [resolvable:$true] %s101_s21 }
  0x4b   :  { %p7437_p5 = scmp.lt.u32.totalorder %s7433_s10, %s9548_s12 }
  0x4d   :  { %p7439_p6 = pnand %p7437_p5, %p7434_p4 }
  0x4f   :  { %7442 = shalt.err (!%p7439_p6)
}
  0x50   :  { %s7443_s19 = scalar_lea.vmem %s102_s21, 32768  ;;  %p7448_p8 = scmp.lt.s32.totalorder %s102_s21, %s102_s21 }
  0x51   :  { %p7444_p7 = scmp.ne.s32.totalorder %s102_s21, %s7443_s19  ;;  %p7449_p9 = scmp.lt.s32.totalorder %s7443_s19, %s7443_s19 }
  0x53   :  { %p7450_p10 = por %p7449_p9, %p7448_p8 }
  0x55   :  { %p7451_p11 = pnand %p7450_p10, %p7444_p7 }
  0x57   :  { %7454 = shalt.err (!%p7451_p11)
}
  0x58   :  { %s7516_s9 = smov 2048   ;;  %s7517_s26 = smov 128  }
  0x59   :  { %107 = dma.hbm_to_vmem [thread:$0]  %s9548_s12, 32768, %s102_s21, [#allocation11], %s7516_s9, %s7516_s9, %s7517_s26  }
  0x5a   :  { %s7518_s23 = smov [#allocation13]   ;;  %s7455_s0 = scalar_lea.hbm %s9552_s16, 32768 }
  0x5b   :  { %s119_s25 = sshll.u32 %s7518_s23, 4  ;;  %p7456_p12 = scmp.ne.s32.totalorder %s9552_s16, %s7455_s0  ;;  %s120_s25 = int_to_ptr.vmem [resolvable:$true] %s119_s25 }
  0x5c   :  { %p7459_p13 = scmp.lt.u32.totalorder %s7455_s0, %s9552_s16 }
  0x5e   :  { %p7461_p0 = pnand %p7459_p13, %p7456_p12 }
  0x60   :  { %7464 = shalt.err (!%p7461_p0)
}
  0x61   :  { %s7465_s22 = scalar_lea.vmem %s120_s25, 32768  ;;  %p7470_p2 = scmp.lt.s32.totalorder %s120_s25, %s120_s25 }
  0x62   :  { %p7466_p1 = scmp.ne.s32.totalorder %s120_s25, %s7465_s22  ;;  %p7471_p3 = scmp.lt.s32.totalorder %s7465_s22, %s7465_s22 }
  0x64   :  { %p7472_p4 = por %p7471_p3, %p7470_p2 }
  0x66   :  { %p7473_p5 = pnand %p7472_p4, %p7466_p1 }
  0x68   :  { %7476 = shalt.err (!%p7473_p5)
}
  0x69   :  { %s7519_s12 = smov 8  }
  0x6a   :  { %125 = dma.hbm_to_vmem [thread:$0]  %s9552_s16, 32768, %s120_s25, [#allocation14], %s7517_s26, %s7517_s26, %s7519_s12  }
  0x6b   :  { %7499 = dma.done.wait [#allocation5], 16384  }
  0x6c   :  { %7500 = vsyncadd [#allocation5], 4294950912 }
  0x6d   :  { %7501 = dma.done.wait [#allocation8], 4096  }
  0x6e   :  { %7502 = vsyncadd [#allocation8], 4294963200 }
  0x6f   :  { %7503 = dma.done.wait [#allocation11], 34816  }
  0x70   :  { %7504 = vsyncadd [#allocation11], 4294932480 }
  0x71   :  { %7505 = dma.done.wait [#allocation14], 32768  }
  0x72   :  { %7506 = vsyncadd [#allocation14], 4294934528  ;;  %v7520_v2 = vmov 0   ;;  %s9646_s5 = sld [smem:[#allocation99_spill]]  ;;  %s9647_s9 = sld [smem:[#allocation100_spill]]  ;;  %v148_v41 = vlaneseq  ;;  %v7521_v44 = vmov 1.0  }
  0x73   :  { %7048 = vset.pattern.permute.xlu0 %v7520_v2  ;;  %s9648_s2 = sld [smem:[#allocation101_spill]]  ;;  %v7522_v49 = vmov 0.0   ;;  %vm291_vm2 = vcmask 261120   ;;  %v269_v0 = vld [vmem:[%s9540_s3] sm:$0xf]  ;;  %s7523_s29 = smov 0.0  }
  0x74   :  { %v149_v42 = vand.u32 127, %v148_v41  ;;  %362 = vmatprep.mubr.f32.mxu1 %v7522_v49  ;;  %v7837_v61 = vshrl.u32 %v148_v41, 7  ;;  %s7525_s22 = smov 32   ;;  %vm859_vm3 = vcmask 523264   ;;  %vm2049_vm4 = vcmask 1043456  }
  0x75   :  { %vm2047_vm5 = vcmask 1041408   ;;  %vm2051_vm6 = vcmask 1045504  }
  0x76   :  { %v7840_v62 = vsub.s32 0, %v7837_v61  ;;  %v7843_v63 = vsub.s32 1, %v7837_v61 }
  0x78   :  { %v146_v3 = vld [vmem:[%s9646_s5] sm:$0xff]  ;;  %v163_v5 = vld [vmem:[%s9647_s9 + $0x8] sm:$0xff]  ;;  %v164_v6 = vld [vmem:[%s9647_s9 + $0x10] sm:$0xff]  ;;  %v274_v1 = vrot.slane %v269_v0, %v7840_v62  ;;  %v278_v2 = vrot.slane %v269_v0, %v7843_v63 }
  0x79   :  { %v162_v4 = vld [vmem:[%s9647_s9] sm:$0xff]  ;;  %151 = vperm.xlu0 %7048, %v146_v3   ;;  %v165_v7 = vld [vmem:[%s9647_s9 + $0x18] sm:$0xff]  ;;  %v147_v8 = vld [vmem:[%s9646_s5 + $0x8] sm:$0xff] }
  0x7a   :  { %v6052_v9 = vpack.c.bf16 %v163_v5, %v162_v4  ;;  %v6056_v10 = vpack.c.bf16 %v165_v7, %v164_v6  ;;  %v166_v11 = vld [vmem:[%s9647_s9 + $0x20] sm:$0xff]  ;;  %v167_v12 = vld [vmem:[%s9647_s9 + $0x28] sm:$0xff]  ;;  %v168_v13 = vld [vmem:[%s9647_s9 + $0x30] sm:$0xff]  ;;  %v7851_v5 = vsub.s32 2, %v7837_v61  ;;  %v7854_v6 = vsub.s32 3, %v7837_v61 }
  0x7b   :  { %v169_v14 = vld [vmem:[%s9647_s9 + $0x38] sm:$0xff]  ;;  %v6060_v15 = vpack.c.bf16 %v167_v12, %v166_v11  ;;  %v254_v16 = vld [vmem:[%s9648_s2 + $0x8] sm:$0xff]  ;;  %v253_v18 = vld [vmem:[%s9648_s2] sm:$0xff] }
  0x7c   :  { %6053 = vmatprep.subr.bf16.mxu0 %v6052_v9  ;;  %v258_v17 = vld [vmem:[%s9648_s2 + $0x28] sm:$0xff]  ;;  %v257_v20 = vld [vmem:[%s9648_s2 + $0x20] sm:$0xff]  ;;  %v6064_v27 = vpack.c.bf16 %v169_v14, %v168_v13  ;;  %v172_v32 = vld [vmem:[%s9647_s9 + $0x50] sm:$0xff]  ;;  %v282_v11 = vrot.slane %v269_v0, %v7851_v5  ;;  %v286_v12 = vrot.slane %v269_v0, %v7854_v6 }
  0x7d   :  { %154 = vperm.xlu0 %7048, %v147_v8   ;;  %6055 = vmatpush3.bf16.msra.mxu0 %v6052_v9  ;;  %v6084_v19 = vpack.c.bf16 %v258_v17, %v254_v16  ;;  %v262_v21 = vld [vmem:[%s9648_s2 + $0x48] sm:$0xff]  ;;  %v6086_v23 = vpack.c.bf16 %v257_v20, %v253_v18  ;;  %v261_v25 = vld [vmem:[%s9648_s2 + $0x40] sm:$0xff]  ;;  %v173_v33 = vld [vmem:[%s9647_s9 + $0x58] sm:$0xff] }
  0x7e   :  { %6057 = vmatprep.subr.bf16.mxu0 %v6056_v10  ;;  %v266_v22 = vld [vmem:[%s9648_s2 + $0x68] sm:$0xff]  ;;  %v265_v26 = vld [vmem:[%s9648_s2 + $0x60] sm:$0xff]  ;;  %v6072_v34 = vpack.c.bf16 %v173_v33, %v172_v32  ;;  %v176_v38 = vld [vmem:[%s9647_s9 + $0x70] sm:$0xff] }
  0x7f   :  { %v6088_v24 = vpack.c.bf16 %v266_v22, %v262_v21  ;;  %6085 = vmatprep.subr.bf16.mxu1 %v6084_v19  ;;  %v6090_v28 = vpack.c.bf16 %v265_v26, %v261_v25  ;;  %v170_v29 = vld [vmem:[%s9647_s9 + $0x40] sm:$0xff]  ;;  %v171_v30 = vld [vmem:[%s9647_s9 + $0x48] sm:$0xff]  ;;  %v177_v39 = vld [vmem:[%s9647_s9 + $0x78] sm:$0xff] }
  0x80   :  { %6087 = vmatpush1.bf16.msra.mxu1 %v6086_v23  ;;  %v6068_v31 = vpack.c.bf16 %v171_v30, %v170_v29  ;;  %v174_v35 = vld [vmem:[%s9647_s9 + $0x60] sm:$0xff]  ;;  %v175_v36 = vld [vmem:[%s9647_s9 + $0x68] sm:$0xff]  ;;  %v6080_v40 = vpack.c.bf16 %v177_v39, %v176_v38  ;;  %v256_v46 = vld [vmem:[%s9648_s2 + $0x18] sm:$0xff] }
  0x81   :  { %6059 = vmatpush3.bf16.msra.mxu0 %v6056_v10  ;;  %6089 = vmatprep.subr.bf16.mxu1 %v6088_v24  ;;  %v6076_v37 = vpack.c.bf16 %v175_v36, %v174_v35  ;;  %v260_v47 = vld [vmem:[%s9648_s2 + $0x38] sm:$0xff]  ;;  %v255_v50 = vld [vmem:[%s9648_s2 + $0x10] sm:$0xff]  ;;  %v557_v0 = vld [vmem:[#allocation4 + $0x40] sm:$0xff] }
  0x82   :  { %6061 = vmatprep.subr.bf16.mxu0 %v6060_v15  ;;  %v6092_v48 = vpack.c.bf16 %v260_v47, %v256_v46  ;;  %v259_v51 = vld [vmem:[%s9648_s2 + $0x30] sm:$0xff]  ;;  %v264_v52 = vld [vmem:[%s9648_s2 + $0x58] sm:$0xff]  ;;  %v549_v47 = vld [vmem:[#allocation4] sm:$0xff] }
  0x83   :  { %v268_v53 = vld [vmem:[%s9648_s2 + $0x78] sm:$0xff]  ;;  %v6094_v54 = vpack.c.bf16 %v259_v51, %v255_v50  ;;  %v263_v57 = vld [vmem:[%s9648_s2 + $0x50] sm:$0xff] }
  0x84   :  { %6091 = vmatpush1.bf16.msra.mxu1 %v6090_v28  ;;  %v6096_v56 = vpack.c.bf16 %v268_v53, %v264_v52  ;;  %v267_v58 = vld [vmem:[%s9648_s2 + $0x70] sm:$0xff]  ;;  %v552_v46 = vld [vmem:[#allocation4 + $0x18] sm:$0xff] }
  0x85   :  { %6063 = vmatpush3.bf16.msra.mxu0 %v6060_v15  ;;  %6093 = vmatprep.subr.bf16.mxu1 %v6092_v48  ;;  %v6098_v60 = vpack.c.bf16 %v267_v58, %v263_v57  ;;  %v551_v50 = vld [vmem:[#allocation4 + $0x10] sm:$0xff]  ;;  %v554_v51 = vld [vmem:[#allocation4 + $0x28] sm:$0xff]  ;;  %v556_v52 = vld [vmem:[#allocation4 + $0x38] sm:$0xff] }
  0x86   :  { %6065 = vmatprep.subr.bf16.mxu0 %v6064_v27  ;;  %v6102_v53 = vpack.c.bf16 %v551_v50, %v549_v47  ;;  %v558_v58 = vld [vmem:[#allocation4 + $0x48] sm:$0xff]  ;;  %v583_v47 = vld [vmem:[#allocation4 + $0x110] sm:$0xff]  ;;  %v588_v50 = vld [vmem:[#allocation4 + $0x138] sm:$0xff] }
  0x89   :  { %6067 = vmatpush3.bf16.msra.mxu0 %v6064_v27 }
  0x8a   :  { %6069 = vmatprep.subr.bf16.mxu0 %v6068_v31 }
  0x8d   :  { %6071 = vmatpush3.bf16.msra.mxu0 %v6068_v31 }
  0x8e   :  { %6073 = vmatprep.subr.bf16.mxu0 %v6072_v34 }
  0x91   :  { %6075 = vmatpush3.bf16.msra.mxu0 %v6072_v34 }
  0x92   :  { %6077 = vmatprep.subr.bf16.mxu0 %v6076_v37 }
  0x95   :  { %6079 = vmatpush3.bf16.msra.mxu0 %v6076_v37 }
  0x96   :  { %6081 = vmatprep.subr.bf16.mxu0 %v6080_v40 }
  0x99   :  { %6083 = vmatpush3.bf16.msra.mxu0 %v6080_v40 }
  0xf8   :  { %v152_v43 = vpop.permute.xlu0 %151 }
  0xf9   :  { %vm156_vm0 = vcmp.eq.s32.totalorder %v149_v42, %v152_v43 }
  0xfa   :  { %6049 = vmatprep.mubr.msk.f32.mxu0 %vm156_vm0, %v7521_v44 }
  0xfc   :  { %v155_v45 = vpop.permute.xlu0 %154 }
  0xfd   :  { %vm157_vm1 = vcmp.eq.s32.totalorder %v149_v42, %v155_v45  ;;  %v550_v45 = vld [vmem:[#allocation4 + $0x8] sm:$0xff] }
  0xfe   :  { %6050 = vmatmul.mubr.msk.f32.vlgmr.msra.gmra.mrb[0].mxu0 %vm157_vm1, %v7521_v44  ;;  %v6100_v48 = vpack.c.bf16 %v552_v46, %v550_v45  ;;  %v581_v46 = vld [vmem:[#allocation4 + $0x100] sm:$0xff] }
  0xff   :  { %927 = vmatprep.mubr.f32.mxu0 %v7522_v49 }
 0x1d1   :  { %v6051_v55 = vpop.f32.mrb[0].mxu0 }
 0x1d2   :  { %v244_v59 = vpop.f32.mrb[1].mxu0 }
 0x1d3   :  { %5698 = vmatmul.mubr.msk.f32.vlgmr.msra.gmra.mrb[0].mxu1 %vm291_vm2, %v244_v59 }
 0x1d4   :  { %6095 = vmatpush1.bf16.msra.mxu1 %v6094_v54  ;;  %368 = vmatprep.mubr.f32.mxu1 %v7522_v49  ;;  %v6104_v54 = vpack.c.bf16 %v556_v52, %v554_v51  ;;  %v6134_v51 = vpack.c.bf16 %v583_v47, %v581_v46  ;;  %v612_v46 = vld [vmem:[#allocation4 + $0x1f8] sm:$0xff]  ;;  %v609_v47 = vld [vmem:[#allocation4 + $0x1e0] sm:$0xff] }
 0x1d5   :  { %6097 = vmatprep.subr.bf16.mxu1 %v6096_v56  ;;  %v555_v56 = vld [vmem:[#allocation4 + $0x30] sm:$0xff] }
 0x1d7   :  { %5699 = vmatmul.mubr.msk.f32.gmra.mrb[2].mxu1 %vm291_vm2, %v6051_v55 }
 0x1d8   :  { %6099 = vmatpush1.bf16.msra.mxu1 %v6098_v60  ;;  %439 = vmatprep.mubr.f32.mxu1 %v7522_v49 }
 0x1d9   :  { %6101 = vmatprep.subr.bf16.mxu1 %v6100_v48  ;;  %v586_v48 = vld [vmem:[#allocation4 + $0x128] sm:$0xff] }
 0x1da   :  { %v6136_v52 = vpack.c.bf16 %v588_v50, %v586_v48 }
 0x1db   :  { %5700 = vmatmul.mubr.msk.f32.vlgmr.msra.gmra.mrb[4].mxu1 %vm291_vm2, %v244_v59  ;;  %v560_v59 = vld [vmem:[#allocation4 + $0x58] sm:$0xff] }
 0x1dc   :  { %445 = vmatprep.mubr.f32.mxu1 %v7522_v49  ;;  %6103 = vmatpush1.bf16.msra.mxu1 %v6102_v53  ;;  %v6108_v60 = vpack.c.bf16 %v560_v59, %v558_v58  ;;  %v585_v53 = vld [vmem:[#allocation4 + $0x120] sm:$0xff] }
 0x1dd   :  { %6105 = vmatprep.subr.bf16.mxu1 %v6104_v54  ;;  %v587_v54 = vld [vmem:[#allocation4 + $0x130] sm:$0xff]  ;;  %v589_v59 = vld [vmem:[#allocation4 + $0x140] sm:$0xff] }
 0x1df   :  { %5701 = vmatmul.mubr.msk.f32.gmra.mrb[6].mxu1 %vm291_vm2, %v6051_v55  ;;  %v553_v55 = vld [vmem:[#allocation4 + $0x20] sm:$0xff] }
 0x1e0   :  { %v6106_v57 = vpack.c.bf16 %v555_v56, %v553_v55  ;;  %v590_v55 = vld [vmem:[#allocation4 + $0x148] sm:$0xff]  ;;  %v592_v56 = vld [vmem:[#allocation4 + $0x158] sm:$0xff] }
 0x1e1   :  { %v6140_v58 = vpack.c.bf16 %v592_v56, %v590_v55  ;;  %v614_v55 = vld [vmem:[#allocation4 + $0x208] sm:$0xff]  ;;  %v616_v56 = vld [vmem:[#allocation4 + $0x218] sm:$0xff] }
 0x1e2   :  { %6107 = vmatpush1.bf16.msra.mxu1 %v6106_v57  ;;  %v6138_v57 = vpack.c.bf16 %v587_v54, %v585_v53 }
 0x1e3   :  { %6109 = vmatprep.subr.bf16.mxu1 %v6108_v60  ;;  %v591_v60 = vld [vmem:[#allocation4 + $0x150] sm:$0xff] }
 0x2a6   :  { %v364_v3 = vpop.f32.mrb[0].mxu1 }
 0x2a7   :  { %v366_v4 = vpop.f32.mrb[1].mxu1  ;;  %v7856_v7 = vadd.f32 %v364_v3, %v274_v1  ;;  %v562_v3 = vld [vmem:[#allocation4 + $0x68] sm:$0xff] }
 0x2a8   :  { %v7858_v8 = vadd.f32 %v366_v4, %v278_v2  ;;  %v564_v4 = vld [vmem:[#allocation4 + $0x78] sm:$0xff] }
 0x2a9   :  { %v469_v13 = vmul.f32 %v7856_v7, %v7856_v7 }
 0x2aa   :  { %v370_v9 = vpop.f32.mrb[2].mxu1  ;;  %v470_v14 = vmul.f32 %v7858_v8, %v7858_v8  ;;  %v452_v16 = vadd.f32 %v7858_v8, %v7856_v7 }
 0x2ab   :  { %v372_v10 = vpop.f32.mrb[3].mxu1  ;;  %v7872_v21 = vadd.f32 %v370_v9, %v274_v1  ;;  %v559_v1 = vld [vmem:[#allocation4 + $0x50] sm:$0xff]  ;;  %v561_v9 = vld [vmem:[#allocation4 + $0x60] sm:$0xff] }
 0x2ac   :  { %v477_v20 = vadd.f32 %v470_v14, %v469_v13  ;;  %v7879_v26 = vadd.f32 %v372_v10, %v278_v2  ;;  %v6110_v2 = vpack.c.bf16 %v559_v1, %v557_v0  ;;  %v6112_v10 = vpack.c.bf16 %v564_v4, %v562_v3  ;;  %v568_v13 = vld [vmem:[#allocation4 + $0x98] sm:$0xff]  ;;  %v594_v0 = vld [vmem:[#allocation4 + $0x168] sm:$0xff]  ;;  %v593_v4 = vld [vmem:[#allocation4 + $0x160] sm:$0xff] }
 0x2ad   :  { %v473_v30 = vmul.f32 %v7872_v21, %v7872_v21  ;;  %v596_v1 = vld [vmem:[#allocation4 + $0x178] sm:$0xff] }
 0x2ae   :  { %v441_v15 = vpop.f32.mrb[4].mxu1  ;;  %v474_v34 = vmul.f32 %v7879_v26, %v7879_v26  ;;  %6111 = vmatpush1.bf16.msra.mxu1 %v6110_v2  ;;  %v6142_v2 = vpack.c.bf16 %v591_v60, %v589_v59  ;;  %v6144_v3 = vpack.c.bf16 %v596_v1, %v594_v0  ;;  %v844_v59 = vld [vmem:[#allocation7 + $0x8] sm:$0xff]  ;;  %v846_v60 = vld [vmem:[#allocation7 + $0x18] sm:$0xff]  ;;  %v843_v0 = vld [vmem:[#allocation7] sm:$0xff] }
 0x2af   :  { %v7868_v17 = vadd.f32 %v441_v15, %v282_v11  ;;  %v443_v18 = vpop.f32.mrb[5].mxu1  ;;  %6113 = vmatprep.subr.bf16.mxu1 %v6112_v10  ;;  %v598_v10 = vld [vmem:[#allocation4 + $0x188] sm:$0xff]  ;;  %v845_v1 = vld [vmem:[#allocation7 + $0x10] sm:$0xff] }
 0x2b0   :  { %v7870_v19 = vadd.f32 %v443_v18, %v286_v12  ;;  %v567_v18 = vld [vmem:[#allocation4 + $0x90] sm:$0xff] }
 0x2b1   :  { %v453_v22 = vadd.f32 %v452_v16, %v7868_v17  ;;  %v471_v23 = vmul.f32 %v7868_v17, %v7868_v17  ;;  %v565_v16 = vld [vmem:[#allocation4 + $0x80] sm:$0xff] }
 0x2b2   :  { %v472_v24 = vmul.f32 %v7870_v19, %v7870_v19  ;;  %v447_v25 = vpop.f32.mrb[6].mxu1 }
 0x2b3   :  { %v478_v27 = vadd.f32 %v477_v20, %v471_v23  ;;  %v454_v28 = vadd.f32 %v453_v22, %v7870_v19  ;;  %v449_v29 = vpop.f32.mrb[7].mxu1  ;;  %v7884_v32 = vadd.f32 %v447_v25, %v282_v11  ;;  %v563_v11 = vld [vmem:[#allocation4 + $0x70] sm:$0xff]  ;;  %v570_v20 = vld [vmem:[#allocation4 + $0xa8] sm:$0xff]  ;;  %v572_v22 = vld [vmem:[#allocation4 + $0xb8] sm:$0xff]  ;;  %v6118_v23 = vpack.c.bf16 %v567_v18, %v565_v16 }
 0x2b4   :  { %v7892_v38 = vadd.f32 %v449_v29, %v286_v12  ;;  %v566_v12 = vld [vmem:[#allocation4 + $0x88] sm:$0xff]  ;;  %v6114_v14 = vpack.c.bf16 %v563_v11, %v561_v9  ;;  %v569_v25 = vld [vmem:[#allocation4 + $0xa0] sm:$0xff]  ;;  %v576_v29 = vld [vmem:[#allocation4 + $0xd8] sm:$0xff] }
 0x2b5   :  { %v479_v31 = vadd.f32 %v478_v27, %v472_v24  ;;  %v455_v33 = vadd.f32 %v454_v28, %v7872_v21  ;;  %v475_v37 = vmul.f32 %v7884_v32, %v7884_v32  ;;  %v6116_v15 = vpack.c.bf16 %v568_v13, %v566_v12  ;;  %v571_v27 = vld [vmem:[#allocation4 + $0xb0] sm:$0xff]  ;;  %v574_v28 = vld [vmem:[#allocation4 + $0xc8] sm:$0xff]  ;;  %v600_v11 = vld [vmem:[#allocation4 + $0x198] sm:$0xff] }
 0x2b6   :  { %v476_v43 = vmul.f32 %v7892_v38, %v7892_v38  ;;  %6115 = vmatpush1.bf16.msra.mxu1 %v6114_v14  ;;  %v6120_v24 = vpack.c.bf16 %v572_v22, %v570_v20  ;;  %v595_v9 = vld [vmem:[#allocation4 + $0x170] sm:$0xff]  ;;  %v6148_v13 = vpack.c.bf16 %v600_v11, %v598_v10  ;;  %v597_v14 = vld [vmem:[#allocation4 + $0x180] sm:$0xff]  ;;  %v602_v16 = vld [vmem:[#allocation4 + $0x1a8] sm:$0xff] }
 0x2b7   :  { %v456_v35 = vadd.f32 %v455_v33, %v7879_v26  ;;  %v480_v36 = vadd.f32 %v479_v31, %v473_v30  ;;  %6117 = vmatprep.subr.bf16.mxu1 %v6116_v15  ;;  %v6122_v30 = vpack.c.bf16 %v571_v27, %v569_v25  ;;  %v6124_v31 = vpack.c.bf16 %v576_v29, %v574_v28  ;;  %v573_v33 = vld [vmem:[#allocation4 + $0xc0] sm:$0xff]  ;;  %v599_v15 = vld [vmem:[#allocation4 + $0x190] sm:$0xff]  ;;  %v604_v18 = vld [vmem:[#allocation4 + $0x1b8] sm:$0xff] }
 0x2b8   :  { %v6146_v12 = vpack.c.bf16 %v595_v9, %v593_v4  ;;  %v6150_v20 = vpack.c.bf16 %v599_v15, %v597_v14  ;;  %v6152_v22 = vpack.c.bf16 %v604_v18, %v602_v16  ;;  %v848_v4 = vld [vmem:[#allocation7 + $0x28] sm:$0xff]  ;;  %v850_v9 = vld [vmem:[#allocation7 + $0x38] sm:$0xff]  ;;  %v847_v11 = vld [vmem:[#allocation7 + $0x20] sm:$0xff] }
 0x2b9   :  { %v457_v39 = vadd.f32 %v456_v35, %v7884_v32  ;;  %v481_v40 = vadd.f32 %v480_v36, %v474_v34  ;;  %v575_v34 = vld [vmem:[#allocation4 + $0xd0] sm:$0xff]  ;;  %v578_v35 = vld [vmem:[#allocation4 + $0xe8] sm:$0xff]  ;;  %v580_v36 = vld [vmem:[#allocation4 + $0xf8] sm:$0xff]  ;;  %v7908_v10 = vpack.c.bf16 %v850_v9, %v848_v4 }
 0x2ba   :  { %6119 = vmatpush1.bf16.msra.mxu1 %v6118_v23  ;;  %v601_v23 = vld [vmem:[#allocation4 + $0x1a0] sm:$0xff]  ;;  %v852_v14 = vld [vmem:[#allocation7 + $0x48] sm:$0xff]  ;;  %v854_v15 = vld [vmem:[#allocation7 + $0x58] sm:$0xff] }
 0x2bb   :  { %v458_v41 = vadd.f32 %v457_v39, %v7892_v38  ;;  %v482_v42 = vadd.f32 %v481_v40, %v475_v37  ;;  %6121 = vmatprep.subr.bf16.mxu1 %v6120_v24  ;;  %v6126_v37 = vpack.c.bf16 %v575_v34, %v573_v33  ;;  %v6128_v39 = vpack.c.bf16 %v580_v36, %v578_v35  ;;  %v577_v40 = vld [vmem:[#allocation4 + $0xe0] sm:$0xff]  ;;  %v603_v24 = vld [vmem:[#allocation4 + $0x1b0] sm:$0xff]  ;;  %v606_v34 = vld [vmem:[#allocation4 + $0x1c8] sm:$0xff] }
 0x2bc   :  { %v6154_v28 = vpack.c.bf16 %v603_v24, %v601_v23  ;;  %v608_v35 = vld [vmem:[#allocation4 + $0x1d8] sm:$0xff]  ;;  %v7914_v18 = vpack.c.bf16 %v854_v15, %v852_v14  ;;  %v856_v24 = vld [vmem:[#allocation7 + $0x68] sm:$0xff] }
 0x2bd   :  { %459 = vadd.xlane.f32.xlu1 %v458_v41  ;;  %v483_v44 = vadd.f32 %v482_v42, %v476_v43  ;;  %v579_v41 = vld [vmem:[#allocation4 + $0xf0] sm:$0xff]  ;;  %v582_v42 = vld [vmem:[#allocation4 + $0x108] sm:$0xff]  ;;  %v584_v43 = vld [vmem:[#allocation4 + $0x118] sm:$0xff] }
 0x2be   :  { %6123 = vmatpush1.bf16.msra.mxu1 %v6122_v30  ;;  %v6132_v45 = vpack.c.bf16 %v584_v43, %v582_v42 }
 0x2bf   :  { %6125 = vmatprep.subr.bf16.mxu1 %v6124_v31 }
 0x2c1   :  { %484 = vadd.xlane.f32.xlu1 %v483_v44  ;;  %v6130_v44 = vpack.c.bf16 %v579_v41, %v577_v40  ;;  %v605_v40 = vld [vmem:[#allocation4 + $0x1c0] sm:$0xff]  ;;  %v607_v41 = vld [vmem:[#allocation4 + $0x1d0] sm:$0xff] }
 0x2c2   :  { %6127 = vmatpush1.bf16.msra.mxu1 %v6126_v37  ;;  %v6158_v42 = vpack.c.bf16 %v607_v41, %v605_v40 }
 0x2c3   :  { %6129 = vmatprep.subr.bf16.mxu1 %v6128_v39  ;;  %v6156_v39 = vpack.c.bf16 %v608_v35, %v606_v34  ;;  %v530_v34 = vld [vmem:[#allocation3] sm:$0x1] }
 0x2c6   :  { %6131 = vmatpush1.bf16.msra.mxu1 %v6130_v44 }
 0x2c7   :  { %6133 = vmatprep.subr.bf16.mxu1 %v6132_v45  ;;  %v610_v45 = vld [vmem:[#allocation4 + $0x1e8] sm:$0xff] }
 0x2ca   :  { %6135 = vmatpush1.bf16.msra.mxu1 %v6134_v51  ;;  %v6160_v51 = vpack.c.bf16 %v612_v46, %v610_v45 }
 0x2cb   :  { %6137 = vmatprep.subr.bf16.mxu1 %v6136_v52  ;;  %v611_v52 = vld [vmem:[#allocation4 + $0x1f0] sm:$0xff] }
 0x2cc   :  { %v6162_v53 = vpack.c.bf16 %v611_v52, %v609_v47 }
 0x2ce   :  { %6139 = vmatpush1.bf16.msra.mxu1 %v6138_v57 }
 0x2cf   :  { %6141 = vmatprep.subr.bf16.mxu1 %v6140_v58  ;;  %v6164_v58 = vpack.c.bf16 %v616_v56, %v614_v55  ;;  %v615_v55 = vld [vmem:[#allocation4 + $0x210] sm:$0xff] }
 0x2d2   :  { %6143 = vmatpush1.bf16.msra.mxu1 %v6142_v2  ;;  %v7902_v2 = vpack.c.bf16 %v846_v60, %v844_v59  ;;  %v618_v60 = vld [vmem:[#allocation4 + $0x228] sm:$0xff] }
 0x2d3   :  { %6145 = vmatprep.subr.bf16.mxu1 %v6144_v3  ;;  %v7904_v3 = vpack.c.bf16 %v845_v1, %v843_v0  ;;  %v620_v0 = vld [vmem:[#allocation4 + $0x238] sm:$0xff] }
 0x2d4   :  { %6229 = vmatprep.subr.bf16.mxu0 %v7902_v2 }
 0x2d5   :  { %6231 = vmatpush1.bf16.msra.mxu0 %v7904_v3 }
 0x2d6   :  { %6147 = vmatpush1.bf16.msra.mxu1 %v6146_v12  ;;  %v849_v12 = vld [vmem:[#allocation7 + $0x30] sm:$0xff]  ;;  %6233 = vmatprep.subr.bf16.mxu0 %v7908_v10 }
 0x2d7   :  { %6149 = vmatprep.subr.bf16.mxu1 %v6148_v13  ;;  %v7910_v13 = vpack.c.bf16 %v849_v12, %v847_v11 }
 0x2d9   :  { %6235 = vmatpush1.bf16.msra.mxu0 %v7910_v13 }
 0x2da   :  { %6151 = vmatpush1.bf16.msra.mxu1 %v6150_v20  ;;  %v851_v20 = vld [vmem:[#allocation7 + $0x40] sm:$0xff]  ;;  %6237 = vmatprep.subr.bf16.mxu0 %v7914_v18 }
 0x2db   :  { %6153 = vmatprep.subr.bf16.mxu1 %v6152_v22  ;;  %v853_v22 = vld [vmem:[#allocation7 + $0x50] sm:$0xff] }
 0x2dc   :  { %v7916_v23 = vpack.c.bf16 %v853_v22, %v851_v20  ;;  %v617_v22 = vld [vmem:[#allocation4 + $0x220] sm:$0xff] }
 0x2de   :  { %6155 = vmatpush1.bf16.msra.mxu1 %v6154_v28  ;;  %6239 = vmatpush1.bf16.msra.mxu0 %v7916_v23  ;;  %v855_v28 = vld [vmem:[#allocation7 + $0x60] sm:$0xff] }
 0x2df   :  { %6157 = vmatprep.subr.bf16.mxu1 %v6156_v39 }
 0x2e2   :  { %6159 = vmatpush1.bf16.msra.mxu1 %v6158_v42 }
 0x2e3   :  { %6161 = vmatprep.subr.bf16.mxu1 %v6160_v51 }
 0x2e6   :  { %6163 = vmatpush1.bf16.msra.mxu1 %v6162_v53 }
 0x2e7   :  { %6165 = vmatprep.subr.bf16.mxu1 %v6164_v58 }
 0x34a   :  { %v460_v25 = vpop.xlane.xlu1 %459 }
 0x34b   :  { %v461_v27 = vrot.slane %v460_v25, 4 }
 0x34d   :  { %v462_v29 = vadd.f32 %v461_v27, %v460_v25  ;;  %v858_v25 = vld [vmem:[#allocation7 + $0x78] sm:$0xff] }
 0x34e   :  { %v485_v30 = vpop.xlane.xlu1 %484  ;;  %v7920_v27 = vpack.c.bf16 %v858_v25, %v856_v24  ;;  %v619_v24 = vld [vmem:[#allocation4 + $0x230] sm:$0xff] }
 0x34f   :  { %v486_v31 = vrot.slane %v485_v30, 4  ;;  %v463_v33 = vrot.slane %v462_v29, 2 }
 0x350   :  { %6241 = vmatprep.subr.bf16.mxu0 %v7920_v27 }
 0x351   :  { %v487_v36 = vadd.f32 %v486_v31, %v485_v30  ;;  %v464_v37 = vadd.f32 %v463_v33, %v462_v29  ;;  %v857_v29 = vld [vmem:[#allocation7 + $0x70] sm:$0xff]  ;;  %v519_v31 = vld [vmem:[#allocation2] sm:$0x1] }
 0x352   :  { %v7922_v30 = vpack.c.bf16 %v857_v29, %v855_v28 }
 0x353   :  { %v465_v43 = vrot.slane %v464_v37, 1  ;;  %v488_v44 = vrot.slane %v487_v36, 2 }
 0x354   :  { %6243 = vmatpush1.bf16.msra.mxu0 %v7922_v30 }
 0x355   :  { %v466_v48 = vadd.f32 %v465_v43, %v464_v37  ;;  %v489_v50 = vadd.f32 %v488_v44, %v487_v36  ;;  %6245 = vmatprep.subr.bf16.mxu0 %v7902_v2 }
 0x357   :  { %7020 = vpush %v466_v48  ;;  %v490_v54 = vrot.slane %v489_v50, 1  ;;  %928 = vmatmul.mubr.f32.vlgmr.msra.gmra.mrb[2].mxu0 %v7522_v49 }
 0x358   :  { %6247 = vmatpush1.bf16.msra.mxu0 %v7904_v3  ;;  %1064 = vmatprep.mubr.f32.mxu0 %v7522_v49 }
 0x359   :  { %v491_v57 = vadd.f32 %v490_v54, %v489_v50  ;;  %6249 = vmatprep.subr.bf16.mxu0 %v7908_v10  ;;  %v613_v54 = vld [vmem:[#allocation4 + $0x200] sm:$0xff] }
 0x35a   :  { %v6166_v14 = vpack.c.bf16 %v615_v55, %v613_v54  ;;  %v635_v54 = vld [vmem:[#allocation4 + $0x2b0] sm:$0xff]  ;;  %v638_v55 = vld [vmem:[#allocation4 + $0x2c8] sm:$0xff] }
 0x35b   :  { %7022 = vpush %v491_v57 }
 0x35c   :  { %6251 = vmatpush1.bf16.msra.mxu0 %v7910_v13 }
 0x35d   :  { %6253 = vmatprep.subr.bf16.mxu0 %v7914_v18 }
 0x360   :  { %6255 = vmatpush1.bf16.msra.mxu0 %v7916_v23 }
 0x361   :  { %6257 = vmatprep.subr.bf16.mxu0 %v7920_v27 }
 0x364   :  { %6259 = vmatpush1.bf16.msra.mxu0 %v7922_v30 }
 0x365   :  { %6261 = vmatprep.subr.bf16.mxu0 %v7902_v2 }
 0x388   :  { %s7021_s3 = spop %7020 }
 0x389   :  { %s7898_s26 = smul.f32 0.00012207031, %s7021_s3 }
 0x38b   :  { %s494_s27 = smul.f32 %s7898_s26, %s7898_s26  ;;  %v497_v35 = vstv %s7898_s26 }
 0x38c   :  { %s7023_s28 = spop %7022  ;;  %v499_v36 = vsub.f32 %v7858_v8, %v497_v35  ;;  %v498_v37 = vsub.f32 %v7856_v7, %v497_v35  ;;  %v503_v39 = vsub.f32 %v7879_v26, %v497_v35  ;;  %v502_v40 = vsub.f32 %v7872_v21, %v497_v35 }
 0x38d   :  { %s493_s23 = smul.f32 0.00012207031, %s7023_s28  ;;  %v501_v41 = vsub.f32 %v7870_v19, %v497_v35  ;;  %v500_v43 = vsub.f32 %v7868_v17, %v497_v35  ;;  %v505_v44 = vsub.f32 %v7892_v38, %v497_v35  ;;  %v504_v45 = vsub.f32 %v7884_v32, %v497_v35 }
 0x38f   :  { %s495_s25 = ssub.f32 %s493_s23, %s494_s27 }
 0x391   :  { %s496_s30 = smax.f32 %s7523_s29, %s495_s25 }
 0x392   :  { %s506_s9 = sadd.f32 1e-05, %s496_s30 }
 0x394   :  { %v507_v16 = vstv %s506_s9 }
 0x395   :  { %7054 = vrsqrt.f32 %v507_v16  ;;  %v6168_v16 = vpack.c.bf16 %v620_v0, %v618_v60 }
 0x39f   :  { %v7055_v33 = vpop.eup %7054 }
 0x3a0   :  { %7024 = vpush %v7055_v33  ;;  %v624_v33 = vld [vmem:[#allocation4 + $0x258] sm:$0xff] }
 0x3a1   :  { %7026 = vpush %v519_v31  ;;  %v622_v31 = vld [vmem:[#allocation4 + $0x248] sm:$0xff] }
 0x3a2   :  { %7028 = vpush %v530_v34  ;;  %v6170_v34 = vpack.c.bf16 %v619_v24, %v617_v22  ;;  %v647_v22 = vld [vmem:[#allocation4 + $0x310] sm:$0xff]  ;;  %v650_v24 = vld [vmem:[#allocation4 + $0x328] sm:$0xff] }
 0x3d1   :  { %s7025_s0 = spop %7024 }
 0x3d2   :  { %v510_v42 = vstv %s7025_s0  ;;  %s7027_s6 = spop %7026 }
 0x3d3   :  { %v521_v46 = vstv %s7027_s6  ;;  %s7029_s24 = spop %7028  ;;  %v512_v8 = vmul.f32 %v510_v42, %v499_v36  ;;  %v511_v47 = vmul.f32 %v510_v42, %v498_v37  ;;  %v516_v48 = vmul.f32 %v510_v42, %v503_v39  ;;  %v621_v37 = vld [vmem:[#allocation4 + $0x240] sm:$0xff]  ;;  %v623_v39 = vld [vmem:[#allocation4 + $0x250] sm:$0xff] }
 0x3d4   :  { %v532_v7 = vstv %s7029_s24  ;;  %v515_v50 = vmul.f32 %v510_v42, %v502_v40  ;;  %v514_v26 = vmul.f32 %v510_v42, %v501_v41  ;;  %v513_v51 = vmul.f32 %v510_v42, %v500_v43  ;;  %v626_v41 = vld [vmem:[#allocation4 + $0x268] sm:$0xff] }
 0x3d5   :  { %v523_v21 = vmul.f32 %v521_v46, %v512_v8  ;;  %v522_v52 = vmul.f32 %v521_v46, %v511_v47  ;;  %v527_v19 = vmul.f32 %v521_v46, %v516_v48  ;;  %v518_v53 = vmul.f32 %v510_v42, %v505_v44  ;;  %v630_v8 = vld [vmem:[#allocation4 + $0x288] sm:$0xff]  ;;  %v632_v47 = vld [vmem:[#allocation4 + $0x298] sm:$0xff] }
 0x3d6   :  { %v526_v17 = vmul.f32 %v521_v46, %v515_v50  ;;  %v525_v56 = vmul.f32 %v521_v46, %v514_v26  ;;  %v524_v38 = vmul.f32 %v521_v46, %v513_v51  ;;  %v517_v57 = vmul.f32 %v510_v42, %v504_v45  ;;  %v628_v42 = vld [vmem:[#allocation4 + $0x278] sm:$0xff]  ;;  %v625_v45 = vld [vmem:[#allocation4 + $0x260] sm:$0xff]  ;;  %v631_v26 = vld [vmem:[#allocation4 + $0x290] sm:$0xff] }
 0x3d7   :  { %v534_v32 = vadd.f32 %v532_v7, %v523_v21  ;;  %v533_v58 = vadd.f32 %v532_v7, %v522_v52  ;;  %v538_v59 = vadd.f32 %v532_v7, %v527_v19  ;;  %v529_v1 = vmul.f32 %v521_v46, %v518_v53  ;;  %v629_v50 = vld [vmem:[#allocation4 + $0x280] sm:$0xff]  ;;  %v634_v51 = vld [vmem:[#allocation4 + $0x2a8] sm:$0xff]  ;;  %v636_v21 = vld [vmem:[#allocation4 + $0x2b8] sm:$0xff] }
 0x3d8   :  { %v7946_v4 = vadd.f32 %v532_v7, %v524_v38  ;;  %v528_v9 = vmul.f32 %v521_v46, %v517_v57  ;;  %v537_v20 = vadd.f32 %v532_v7, %v526_v17  ;;  %v536_v29 = vadd.f32 %v532_v7, %v525_v56  ;;  %v627_v46 = vld [vmem:[#allocation4 + $0x270] sm:$0xff]  ;;  %v633_v53 = vld [vmem:[#allocation4 + $0x2a0] sm:$0xff]  ;;  %v640_v17 = vld [vmem:[#allocation4 + $0x2d8] sm:$0xff] }
 0x3d9   :  { %v542_v11 = vmax.f32 %v534_v32, 0.0  ;;  %v541_v12 = vmax.f32 %v533_v58, 0.0  ;;  %v7948_v15 = vadd.f32 %v532_v7, %v529_v1  ;;  %v546_v28 = vmax.f32 %v538_v59, 0.0  ;;  %v637_v57 = vld [vmem:[#allocation4 + $0x2c0] sm:$0xff]  ;;  %v639_v32 = vld [vmem:[#allocation4 + $0x2d0] sm:$0xff]  ;;  %v642_v58 = vld [vmem:[#allocation4 + $0x2e8] sm:$0xff] }
 0x3da   :  { %v7950_v25 = vadd.f32 %v532_v7, %v528_v9  ;;  %v545_v35 = vmax.f32 %v537_v20, 0.0  ;;  %v6172_v36 = vpack.c.bf16 %v624_v33, %v622_v31  ;;  %v544_v40 = vmax.f32 %v536_v29, 0.0  ;;  %v644_v59 = vld [vmem:[#allocation4 + $0x2f8] sm:$0xff]  ;;  %v641_v1 = vld [vmem:[#allocation4 + $0x2e0] sm:$0xff]  ;;  %v643_v9 = vld [vmem:[#allocation4 + $0x2f0] sm:$0xff] }
 0x3db   :  { %753 = vmatprep.mubr.f32.mxu1 %v542_v11  ;;  %v6174_v43 = vpack.c.bf16 %v623_v39, %v621_v37  ;;  %v6176_v44 = vpack.c.bf16 %v628_v42, %v626_v41  ;;  %v6178_v48 = vpack.c.bf16 %v627_v46, %v625_v45  ;;  %v6180_v7 = vpack.c.bf16 %v632_v47, %v630_v8  ;;  %v646_v11 = vld [vmem:[#allocation4 + $0x308] sm:$0xff]  ;;  %v645_v20 = vld [vmem:[#allocation4 + $0x300] sm:$0xff]  ;;  %v655_v41 = vld [vmem:[#allocation4 + $0x350] sm:$0xff] }
 0x3dc   :  { %754 = vmatmul.mubr.f32.vlgmr.msra.gmra.mrb[8].mxu1 %v541_v12  ;;  %v6182_v52 = vpack.c.bf16 %v631_v26, %v629_v50  ;;  %v6184_v19 = vpack.c.bf16 %v636_v21, %v634_v51  ;;  %v6186_v56 = vpack.c.bf16 %v635_v54, %v633_v53  ;;  %v6188_v38 = vpack.c.bf16 %v640_v17, %v638_v55  ;;  %v648_v12 = vld [vmem:[#allocation4 + $0x318] sm:$0xff]  ;;  %v649_v33 = vld [vmem:[#allocation4 + $0x320] sm:$0xff]  ;;  %v658_v42 = vld [vmem:[#allocation4 + $0x368] sm:$0xff] }
 0x3dd   :  { %6167 = vmatpush1.bf16.msra.mxu1 %v6166_v14  ;;  %759 = vmatprep.mubr.f32.mxu1 %v546_v28  ;;  %v6190_v60 = vpack.c.bf16 %v639_v32, %v637_v57  ;;  %v6192_v0 = vpack.c.bf16 %v644_v59, %v642_v58  ;;  %v6194_v14 = vpack.c.bf16 %v643_v9, %v641_v1  ;;  %v652_v28 = vld [vmem:[#allocation4 + $0x338] sm:$0xff]  ;;  %v657_v46 = vld [vmem:[#allocation4 + $0x360] sm:$0xff]  ;;  %v659_v8 = vld [vmem:[#allocation4 + $0x370] sm:$0xff] }
 0x3de   :  { %6169 = vmatprep.subr.bf16.mxu1 %v6168_v16  ;;  %v6196_v16 = vpack.c.bf16 %v648_v12, %v646_v11  ;;  %v6198_v29 = vpack.c.bf16 %v647_v22, %v645_v20  ;;  %v6200_v31 = vpack.c.bf16 %v652_v28, %v650_v24  ;;  %v662_v47 = vld [vmem:[#allocation4 + $0x388] sm:$0xff]  ;;  %v661_v26 = vld [vmem:[#allocation4 + $0x380] sm:$0xff]  ;;  %v663_v51 = vld [vmem:[#allocation4 + $0x390] sm:$0xff]  ;;  %v547_v20 = vmax.f32 %v7950_v25, 0.0 }
 0x3df   :  { %v666_v21 = vld [vmem:[#allocation4 + $0x3a8] sm:$0xff]  ;;  %v665_v54 = vld [vmem:[#allocation4 + $0x3a0] sm:$0xff]  ;;  %v667_v55 = vld [vmem:[#allocation4 + $0x3b0] sm:$0xff] }
 0x3e0   :  { %760 = vmatmul.mubr.f32.gmra.mrb[10].mxu1 %v545_v35  ;;  %v654_v35 = vld [vmem:[#allocation4 + $0x348] sm:$0xff]  ;;  %v669_v32 = vld [vmem:[#allocation4 + $0x3c0] sm:$0xff]  ;;  %v671_v58 = vld [vmem:[#allocation4 + $0x3d0] sm:$0xff] }
 0x3e1   :  { %6171 = vmatpush1.bf16.msra.mxu1 %v6170_v34  ;;  %830 = vmatprep.mubr.f32.mxu1 %v544_v40  ;;  %v651_v34 = vld [vmem:[#allocation4 + $0x330] sm:$0xff]  ;;  %v653_v40 = vld [vmem:[#allocation4 + $0x340] sm:$0xff]  ;;  %v670_v17 = vld [vmem:[#allocation4 + $0x3c8] sm:$0xff] }
 0x3e2   :  { %6173 = vmatprep.subr.bf16.mxu1 %v6172_v36  ;;  %v656_v36 = vld [vmem:[#allocation4 + $0x358] sm:$0xff]  ;;  %v6202_v37 = vpack.c.bf16 %v651_v34, %v649_v33  ;;  %v674_v59 = vld [vmem:[#allocation4 + $0x3e8] sm:$0xff]  ;;  %v673_v9 = vld [vmem:[#allocation4 + $0x3e0] sm:$0xff] }
 0x3e3   :  { %v6204_v39 = vpack.c.bf16 %v656_v36, %v654_v35  ;;  %v675_v11 = vld [vmem:[#allocation4 + $0x3f0] sm:$0xff]  ;;  %v677_v28 = vld [vmem:[%s9544_s8] sm:$0x3]  ;;  %s7524_s8 = smov 64  }
 0x3e4   :  { %v6226_v12 = vpack.c.bf16 %v675_v11, %v673_v9 }
 0x3e5   :  { %6175 = vmatpush1.bf16.msra.mxu1 %v6174_v43  ;;  %v660_v43 = vld [vmem:[#allocation4 + $0x378] sm:$0xff] }
 0x3e6   :  { %6177 = vmatprep.subr.bf16.mxu1 %v6176_v44  ;;  %v6206_v44 = vpack.c.bf16 %v655_v41, %v653_v40  ;;  %v6208_v45 = vpack.c.bf16 %v660_v43, %v658_v42 }
 0x3e9   :  { %6179 = vmatpush1.bf16.msra.mxu1 %v6178_v48  ;;  %v664_v48 = vld [vmem:[#allocation4 + $0x398] sm:$0xff] }
 0x3ea   :  { %6181 = vmatprep.subr.bf16.mxu1 %v6180_v7  ;;  %v6210_v7 = vpack.c.bf16 %v659_v8, %v657_v46  ;;  %v6212_v50 = vpack.c.bf16 %v664_v48, %v662_v47 }
 0x3ed   :  { %6183 = vmatpush1.bf16.msra.mxu1 %v6182_v52  ;;  %v668_v52 = vld [vmem:[#allocation4 + $0x3b8] sm:$0xff] }
 0x3ee   :  { %6185 = vmatprep.subr.bf16.mxu1 %v6184_v19  ;;  %v6214_v19 = vpack.c.bf16 %v663_v51, %v661_v26  ;;  %v6216_v53 = vpack.c.bf16 %v668_v52, %v666_v21 }
 0x3f1   :  { %6187 = vmatpush1.bf16.msra.mxu1 %v6186_v56  ;;  %v672_v56 = vld [vmem:[#allocation4 + $0x3d8] sm:$0xff] }
 0x3f2   :  { %6189 = vmatprep.subr.bf16.mxu1 %v6188_v38  ;;  %v6218_v38 = vpack.c.bf16 %v667_v55, %v665_v54  ;;  %v6220_v57 = vpack.c.bf16 %v672_v56, %v670_v17 }
 0x3f5   :  { %6191 = vmatpush1.bf16.msra.mxu1 %v6190_v60  ;;  %v676_v60 = vld [vmem:[#allocation4 + $0x3f8] sm:$0xff] }
 0x3f6   :  { %6193 = vmatprep.subr.bf16.mxu1 %v6192_v0  ;;  %v6222_v0 = vpack.c.bf16 %v671_v58, %v669_v32  ;;  %v6224_v1 = vpack.c.bf16 %v676_v60, %v674_v59 }
 0x3f9   :  { %6195 = vmatpush1.bf16.msra.mxu1 %v6194_v14  ;;  %v543_v14 = vmax.f32 %v7946_v4, 0.0 }
 0x3fa   :  { %6197 = vmatprep.subr.bf16.mxu1 %v6196_v16  ;;  %v548_v16 = vmax.f32 %v7948_v15, 0.0 }
 0x3fd   :  { %6199 = vmatpush1.bf16.msra.mxu1 %v6198_v29  ;;  %v682_v29 = vrot.slane %v677_v28, %v7840_v62 }
 0x3fe   :  { %6201 = vmatprep.subr.bf16.mxu1 %v6200_v31  ;;  %v686_v31 = vrot.slane %v677_v28, %v7843_v63 }
 0x401   :  { %6203 = vmatpush1.bf16.msra.mxu1 %v6202_v37 }
 0x402   :  { %6205 = vmatprep.subr.bf16.mxu1 %v6204_v39 }
 0x405   :  { %6207 = vmatpush1.bf16.msra.mxu1 %v6206_v44 }
 0x406   :  { %6209 = vmatprep.subr.bf16.mxu1 %v6208_v45 }
 0x409   :  { %6211 = vmatpush1.bf16.msra.mxu1 %v6210_v7 }
 0x40a   :  { %6213 = vmatprep.subr.bf16.mxu1 %v6212_v50 }
 0x40d   :  { %6215 = vmatpush1.bf16.msra.mxu1 %v6214_v19 }
 0x40e   :  { %6217 = vmatprep.subr.bf16.mxu1 %v6216_v53 }
 0x411   :  { %6219 = vmatpush1.bf16.msra.mxu1 %v6218_v38 }
 0x412   :  { %6221 = vmatprep.subr.bf16.mxu1 %v6220_v57 }
 0x415   :  { %6223 = vmatpush1.bf16.msra.mxu1 %v6222_v0 }
 0x416   :  { %6225 = vmatprep.subr.bf16.mxu1 %v6224_v1 }
 0x419   :  { %6227 = vmatpush1.bf16.msra.mxu1 %v6226_v12 }
 0x41c   :  { %831 = vmatmul.mubr.f32.vlgmr.msra.gmra.mrb[8].mxu1 %v543_v14 }
 0x41d   :  { %836 = vmatprep.mubr.f32.mxu1 %v548_v16 }
 0x420   :  { %837 = vmatmul.mubr.f32.gmra.mrb[10].mxu1 %v547_v20 }
 0x421   :  { %2154 = vmatprep.mubr.f32.mxu1 %v7522_v49 }
 0x42a   :  { %v929_v22 = vpop.f32.mrb[2].mxu0 }
 0x42b   :  { %v931_v24 = vpop.f32.mrb[3].mxu0 }
 0x42c   :  { %v936_v36 = vrot.slane %v931_v24, 2 }
 0x4ef   :  { %v832_v4 = vpop.f32.mrb[8].mxu1 }
 0x4f0   :  { %v7961_v33 = vadd.f32 %v832_v4, %v682_v29  ;;  %v834_v15 = vpop.f32.mrb[9].mxu1 }
 0x4f1   :  { %v7963_v34 = vadd.f32 %v834_v15, %v686_v31 }
 0x4f2   :  { %v934_v25 = vadd.f32 %v7961_v33, %v929_v22 }
 0x4f3   :  { %v838_v35 = vpop.f32.mrb[10].mxu1 }
 0x4f4   :  { %7056 = vtanh.f32 %v934_v25  ;;  %v7966_v37 = vadd.f32 %v838_v35, %v682_v29  ;;  %v840_v39 = vpop.f32.mrb[11].mxu1  ;;  %v939_v45 = vsub.f32 0.0, %v934_v25 }
 0x4f5   :  { %v7968_v40 = vadd.f32 %v840_v39, %v686_v31 }
 0x4f6   :  { %v940_v8 = vmul.f32 1.442695, %v939_v45 }
 0x4f7   :  { %v938_v41 = vadd.f32 %v7968_v40, %v936_v36 }
 0x4f9   :  { %7058 = vtanh.f32 %v938_v41  ;;  %v946_v44 = vsub.f32 0.0, %v938_v41 }
 0x4fb   :  { %v947_v46 = vmul.f32 1.442695, %v946_v44 }
 0x4fd   :  { %7060 = vpow2.f32 %v947_v46 }
 0x4fe   :  { %v7057_v42 = vpop.eup %7056  ;;  %7062 = vpow2.f32 %v940_v8 }
 0x4ff   :  { %955 = vrot.lane.b32.xlu1 %v7057_v42, %s7524_s8 }
 0x503   :  { %v7059_v43 = vpop.eup %7058 }
 0x504   :  { %966 = vrot.lane.b32.xlu0 %v7059_v43, %s7524_s8 }
 0x507   :  { %v7061_v47 = vpop.eup %7060 }
 0x508   :  { %v949_v48 = vadd.f32 1.0, %v7061_v47  ;;  %v7063_v7 = vpop.eup %7062 }
 0x509   :  { %v942_v50 = vadd.f32 1.0, %v7063_v7 }
 0x50a   :  { %7064 = vrcp.f32 %v949_v48 }
 0x50b   :  { %7066 = vrcp.f32 %v942_v50 }
 0x514   :  { %v7065_v26 = vpop.eup %7064 }
 0x515   :  { %v7067_v19 = vpop.eup %7066  ;;  %v964_v54 = vmul.f32 0.0, %v7065_v26 }
 0x516   :  { %v953_v56 = vmul.f32 0.0, %v7067_v19 }
 0x571   :  { %v956_v52 = vpop.permute.xlu1 %955 }
 0x572   :  { %v958_v53 = vmul.f32 %v7067_v19, %v956_v52 }
 0x576   :  { %v967_v51 = vpop.permute.xlu0 %966 }
 0x577   :  { %v969_v21 = vmul.f32 %v7065_v26, %v967_v51 }
 0x579   :  { %971 = vrot.lane.b32.xlu0 %v969_v21, %s7525_s22 }
 0x57d   :  { %960 = vrot.lane.b32.xlu0 %v958_v53, %s7525_s22 }
 0x5eb   :  { %v972_v55 = vpop.permute.xlu0 %971 }
 0x5ec   :  { %v7975_v17 = vadd.f32 %v972_v55, %v964_v54 }
 0x5ee   :  { %7068 = vtanh.f32 %v7975_v17  ;;  %v1108_v50 = vrot.slane %v7975_v17, 2 }
 0x5ef   :  { %v961_v38 = vpop.permute.xlu0 %960 }
 0x5f0   :  { %v963_v57 = vadd.f32 %v961_v38, %v953_v56 }
 0x5f2   :  { %7070 = vtanh.f32 %v963_v57  ;;  %v1094_v7 = vrot.slane %v963_v57, 6 }
 0x5f8   :  { %v7069_v32 = vpop.eup %7068 }
 0x5f9   :  { %983 = vrot.lane.b32.xlu0 %v7069_v32, %s7524_s8 }
 0x5fc   :  { %v7071_v58 = vpop.eup %7070 }
 0x5fd   :  { %977 = vrot.lane.b32.xlu0 %v7071_v58, %s7524_s8 }
 0x66b   :  { %v984_v59 = vpop.permute.xlu0 %983 }
 0x66c   :  { %v7980_v60 = vmul.f32 %v7065_v26, %v984_v59 }
 0x66e   :  { %v992_v0 = vrot.slane %v7980_v60, 6 }
 0x66f   :  { %v978_v1 = vpop.permute.xlu0 %977 }
 0x670   :  { %v980_v9 = vmul.f32 %v7067_v19, %v978_v1  ;;  %993 = vrot.lane.b32.xlu0 %v992_v0, %s7524_s8 }
 0x672   :  { %988 = vrot.lane.b32.xlu1 %v980_v9, %s7525_s22 }
 0x6e2   :  { %v994_v11 = vpop.permute.xlu0 %993 }
 0x6e4   :  { %v7985_v12 = vpop.permute.xlu1 %988 }
 0x6e5   :  { %v996_v14 = vsel %vm291_vm2, %v7985_v12, %v994_v11 }
 0x6e6   :  { %5702 = vmatmul.mubr.msk.f32.vlgmr.msra.gmra.mrb[4].mxu0 %vm859_vm3, %v996_v14 }
 0x6e7   :  { %6263 = vmatpush1.bf16.msra.mxu0 %v7904_v3  ;;  %1211 = vmatprep.mubr.f32.mxu0 %v7522_v49 }
 0x6e8   :  { %6265 = vmatprep.subr.bf16.mxu0 %v7908_v10 }
 0x6eb   :  { %6267 = vmatpush1.bf16.msra.mxu0 %v7910_v13 }
 0x6ec   :  { %6269 = vmatprep.subr.bf16.mxu0 %v7914_v18 }
 0x6ef   :  { %6271 = vmatpush1.bf16.msra.mxu0 %v7916_v23 }
 0x6f0   :  { %6273 = vmatprep.subr.bf16.mxu0 %v7920_v27 }
 0x6f3   :  { %6275 = vmatpush1.bf16.msra.mxu0 %v7922_v30 }
 0x6f4   :  { %6277 = vmatprep.subr.bf16.mxu0 %v7902_v2 }
 0x7b9   :  { %v1066_v16 = vpop.f32.mrb[4].mxu0 }
 0x7ba   :  { %v1072_v20 = vrot.slane %v1066_v16, 6  ;;  %v1068_v22 = vpop.f32.mrb[5].mxu0 }
 0x7bb   :  { %v1076_v24 = vrot.slane %v1068_v22, 4 }
 0x7bc   :  { %v1074_v28 = vadd.f32 %v7961_v33, %v1072_v20 }
 0x7bd   :  { %v1078_v29 = vadd.f32 %v7968_v40, %v1076_v24 }
 0x7be   :  { %7072 = vtanh.f32 %v1074_v28  ;;  %v1079_v15 = vsub.f32 0.0, %v1074_v28 }
 0x7bf   :  { %7074 = vtanh.f32 %v1078_v29  ;;  %v1086_v25 = vsub.f32 0.0, %v1078_v29 }
 0x7c0   :  { %v1080_v35 = vmul.f32 1.442695, %v1079_v15 }
 0x7c1   :  { %v1087_v36 = vmul.f32 1.442695, %v1086_v25 }
 0x7c2   :  { %7076 = vpow2.f32 %v1080_v35 }
 0x7c3   :  { %7078 = vpow2.f32 %v1087_v36 }
 0x7c8   :  { %v7073_v31 = vpop.eup %7072 }
 0x7c9   :  { %v7075_v4 = vpop.eup %7074  ;;  %1098 = vrot.lane.b32.xlu0 %v7073_v31, %s7524_s8 }
 0x7ca   :  { %1112 = vrot.lane.b32.xlu1 %v7075_v4, %s7524_s8 }
 0x7cc   :  { %v7077_v39 = vpop.eup %7076 }
 0x7cd   :  { %v7079_v41 = vpop.eup %7078  ;;  %v1082_v42 = vadd.f32 1.0, %v7077_v39 }
 0x7ce   :  { %v1089_v43 = vadd.f32 1.0, %v7079_v41 }
 0x7cf   :  { %7080 = vrcp.f32 %v1082_v42 }
 0x7d0   :  { %7082 = vrcp.f32 %v1089_v43 }
 0x7d9   :  { %v7081_v44 = vpop.eup %7080 }
 0x7da   :  { %v7083_v46 = vpop.eup %7082  ;;  %v1096_v26 = vmul.f32 %v7081_v44, %v1094_v7 }
 0x7db   :  { %v1110_v21 = vmul.f32 %v7083_v46, %v1108_v50 }
 0x83b   :  { %v1099_v45 = vpop.permute.xlu0 %1098 }
 0x83c   :  { %v1101_v8 = vmul.f32 %v7081_v44, %v1099_v45  ;;  %v1113_v47 = vpop.permute.xlu1 %1112 }
 0x83d   :  { %v1115_v48 = vmul.f32 %v7083_v46, %v1113_v47 }
 0x83e   :  { %1103 = vrot.lane.b32.xlu0 %v1101_v8, %s7525_s22 }
 0x83f   :  { %1117 = vrot.lane.b32.xlu1 %v1115_v48, %s7525_s22 }
 0x8b0   :  { %v1104_v51 = vpop.permute.xlu0 %1103 }
 0x8b1   :  { %v8006_v52 = vadd.f32 %v1104_v51, %v1096_v26  ;;  %v1118_v19 = vpop.permute.xlu1 %1117 }
 0x8b2   :  { %v8008_v53 = vadd.f32 %v1118_v19, %v1110_v21 }
 0x8b3   :  { %7084 = vtanh.f32 %v8006_v52  ;;  %v1241_v8 = vrot.slane %v8006_v52, 6 }
 0x8b4   :  { %7086 = vtanh.f32 %v8008_v53  ;;  %v1255_v47 = vrot.slane %v8008_v53, 2 }
 0x8bd   :  { %v7085_v54 = vpop.eup %7084 }
 0x8be   :  { %v7087_v55 = vpop.eup %7086  ;;  %1123 = vrot.lane.b32.xlu0 %v7085_v54, %s7524_s8 }
 0x8bf   :  { %1129 = vrot.lane.b32.xlu1 %v7087_v55, %s7524_s8 }
 0x930   :  { %v1124_v56 = vpop.permute.xlu0 %1123 }
 0x931   :  { %v1126_v17 = vmul.f32 %v7081_v44, %v1124_v56  ;;  %v1130_v38 = vpop.permute.xlu1 %1129 }
 0x932   :  { %v8014_v57 = vmul.f32 %v7083_v46, %v1130_v38 }
 0x933   :  { %1134 = vrot.lane.b32.xlu1 %v1126_v17, %s7525_s22 }
 0x934   :  { %v1138_v32 = vrot.slane %v8014_v57, 2 }
 0x936   :  { %1139 = vrot.lane.b32.xlu0 %v1138_v32, %s7524_s8 }
 0x9a5   :  { %v8019_v58 = vpop.permute.xlu1 %1134 }
 0x9a8   :  { %v1140_v59 = vpop.permute.xlu0 %1139 }
 0x9a9   :  { %v1142_v0 = vsel %vm291_vm2, %v8019_v58, %v1140_v59 }
 0x9aa   :  { %v1144_v1 = vrot.slane %v1142_v0, 2 }
 0x9ac   :  { %5703 = vmatmul.mubr.msk.f32.vlgmr.msra.gmra.mrb[6].mxu0 %vm859_vm3, %v1144_v1 }
 0x9ad   :  { %6279 = vmatpush1.bf16.msra.mxu0 %v7904_v3  ;;  %1358 = vmatprep.mubr.f32.mxu0 %v7522_v49 }
 0x9ae   :  { %6281 = vmatprep.subr.bf16.mxu0 %v7908_v10 }
 0x9b1   :  { %6283 = vmatpush1.bf16.msra.mxu0 %v7910_v13 }
 0x9b2   :  { %6285 = vmatprep.subr.bf16.mxu0 %v7914_v18 }
 0x9b5   :  { %6287 = vmatpush1.bf16.msra.mxu0 %v7916_v23 }
 0x9b6   :  { %6289 = vmatprep.subr.bf16.mxu0 %v7920_v27 }
 0x9b9   :  { %6291 = vmatpush1.bf16.msra.mxu0 %v7922_v30 }
 0x9ba   :  { %6293 = vmatprep.subr.bf16.mxu0 %v7902_v2 }
 0xa7f   :  { %v1213_v9 = vpop.f32.mrb[6].mxu0 }
 0xa80   :  { %v1219_v11 = vrot.slane %v1213_v9, 4  ;;  %v1215_v14 = vpop.f32.mrb[7].mxu0 }
 0xa81   :  { %v1223_v16 = vrot.slane %v1215_v14, 6 }
 0xa82   :  { %v1221_v20 = vadd.f32 %v7961_v33, %v1219_v11 }
 0xa83   :  { %v1225_v22 = vadd.f32 %v7968_v40, %v1223_v16 }
 0xa84   :  { %7088 = vtanh.f32 %v1221_v20  ;;  %v1226_v29 = vsub.f32 0.0, %v1221_v20 }
 0xa85   :  { %7090 = vtanh.f32 %v1225_v22  ;;  %v1233_v31 = vsub.f32 0.0, %v1225_v22 }
 0xa86   :  { %v1227_v4 = vmul.f32 1.442695, %v1226_v29 }
 0xa87   :  { %v1234_v15 = vmul.f32 1.442695, %v1233_v31 }
 0xa88   :  { %7092 = vpow2.f32 %v1227_v4 }
 0xa89   :  { %7094 = vpow2.f32 %v1234_v15 }
 0xa8e   :  { %v7089_v24 = vpop.eup %7088 }
 0xa8f   :  { %v7091_v28 = vpop.eup %7090  ;;  %1245 = vrot.lane.b32.xlu0 %v7089_v24, %s7524_s8 }
 0xa90   :  { %1259 = vrot.lane.b32.xlu1 %v7091_v28, %s7524_s8 }
 0xa92   :  { %v7093_v25 = vpop.eup %7092 }
 0xa93   :  { %v7095_v35 = vpop.eup %7094  ;;  %v1229_v36 = vadd.f32 1.0, %v7093_v25 }
 0xa94   :  { %v1236_v39 = vadd.f32 1.0, %v7095_v35 }
 0xa95   :  { %7096 = vrcp.f32 %v1229_v36 }
 0xa96   :  { %7098 = vrcp.f32 %v1236_v39 }
 0xa9f   :  { %v7097_v41 = vpop.eup %7096 }
 0xaa0   :  { %v7099_v43 = vpop.eup %7098  ;;  %v1243_v48 = vmul.f32 %v7097_v41, %v1241_v8 }
 0xaa1   :  { %v1257_v50 = vmul.f32 %v7099_v43, %v1255_v47 }
 0xb01   :  { %v1246_v42 = vpop.permute.xlu0 %1245 }
 0xb02   :  { %v1248_v44 = vmul.f32 %v7097_v41, %v1246_v42  ;;  %v1260_v45 = vpop.permute.xlu1 %1259 }
 0xb03   :  { %v1262_v46 = vmul.f32 %v7099_v43, %v1260_v45 }
 0xb04   :  { %1250 = vrot.lane.b32.xlu0 %v1248_v44, %s7525_s22 }
 0xb05   :  { %1264 = vrot.lane.b32.xlu1 %v1262_v46, %s7525_s22 }
 0xb76   :  { %v1251_v7 = vpop.permute.xlu0 %1250 }
 0xb77   :  { %v8041_v26 = vadd.f32 %v1251_v7, %v1243_v48  ;;  %v1265_v51 = vpop.permute.xlu1 %1264 }
 0xb78   :  { %v1267_v21 = vadd.f32 %v1265_v51, %v1257_v50 }
 0xb79   :  { %7100 = vtanh.f32 %v8041_v26  ;;  %v1385_v44 = vrot.slane %v8041_v26, 6 }
 0xb7a   :  { %7102 = vtanh.f32 %v1267_v21 }
 0xb83   :  { %v7101_v19 = vpop.eup %7100 }
 0xb84   :  { %v7103_v54 = vpop.eup %7102  ;;  %1270 = vrot.lane.b32.xlu0 %v7101_v19, %s7524_s8 }
 0xb85   :  { %1276 = vrot.lane.b32.xlu1 %v7103_v54, %s7524_s8 }
 0xbf6   :  { %v1271_v55 = vpop.permute.xlu0 %1270 }
 0xbf7   :  { %v1273_v52 = vmul.f32 %v7097_v41, %v1271_v55  ;;  %v1277_v56 = vpop.permute.xlu1 %1276 }
 0xbf8   :  { %v8046_v53 = vmul.f32 %v7099_v43, %v1277_v56  ;;  %v1399_v43 = vrot.slane %v1267_v21, 2 }
 0xbf9   :  { %1281 = vrot.lane.b32.xlu1 %v1273_v52, %s7525_s22 }
 0xbfa   :  { %v1285_v17 = vrot.slane %v8046_v53, 6 }
 0xbfc   :  { %1286 = vrot.lane.b32.xlu0 %v1285_v17, %s7524_s8 }
 0xc6b   :  { %v8051_v38 = vpop.permute.xlu1 %1281 }
 0xc6e   :  { %v1287_v32 = vpop.permute.xlu0 %1286 }
 0xc6f   :  { %v1289_v59 = vsel %vm291_vm2, %v8051_v38, %v1287_v32 }
 0xc70   :  { %v1291_v0 = vrot.slane %v1289_v59, 4 }
 0xc72   :  { %5704 = vmatmul.mubr.msk.f32.vlgmr.msra.gmra.mrb[8].mxu0 %vm859_vm3, %v1291_v0 }
 0xc73   :  { %6295 = vmatpush1.bf16.msra.mxu0 %v7904_v3  ;;  %1502 = vmatprep.mubr.f32.mxu0 %v7522_v49 }
 0xc74   :  { %6297 = vmatprep.subr.bf16.mxu0 %v7908_v10 }
 0xc77   :  { %6299 = vmatpush1.bf16.msra.mxu0 %v7910_v13 }
 0xc78   :  { %6301 = vmatprep.subr.bf16.mxu0 %v7914_v18 }
 0xc7b   :  { %6303 = vmatpush1.bf16.msra.mxu0 %v7916_v23 }
 0xc7c   :  { %6305 = vmatprep.subr.bf16.mxu0 %v7920_v27 }
 0xc7f   :  { %6307 = vmatpush1.bf16.msra.mxu0 %v7922_v30 }
 0xc80   :  { %6309 = vmatprep.subr.bf16.mxu0 %v7902_v2 }
 0xd45   :  { %v1360_v1 = vpop.f32.mrb[8].mxu0 }
 0xd46   :  { %v1366_v9 = vrot.slane %v1360_v1, 2  ;;  %v1362_v11 = vpop.f32.mrb[9].mxu0 }
 0xd47   :  { %v1369_v14 = vadd.f32 %v7968_v40, %v1362_v11 }
 0xd48   :  { %v1368_v16 = vadd.f32 %v7961_v33, %v1366_v9 }
 0xd49   :  { %7104 = vtanh.f32 %v1369_v14  ;;  %v1377_v24 = vsub.f32 0.0, %v1369_v14 }
 0xd4a   :  { %7106 = vtanh.f32 %v1368_v16  ;;  %v1370_v28 = vsub.f32 0.0, %v1368_v16 }
 0xd4b   :  { %v1378_v29 = vmul.f32 1.442695, %v1377_v24 }
 0xd4c   :  { %v1371_v31 = vmul.f32 1.442695, %v1370_v28 }
 0xd4d   :  { %7108 = vpow2.f32 %v1378_v29 }
 0xd4e   :  { %7110 = vpow2.f32 %v1371_v31 }
 0xd53   :  { %v7105_v20 = vpop.eup %7104 }
 0xd54   :  { %v7107_v22 = vpop.eup %7106  ;;  %1403 = vrot.lane.b32.xlu1 %v7105_v20, %s7524_s8 }
 0xd55   :  { %1389 = vrot.lane.b32.xlu0 %v7107_v22, %s7524_s8 }
 0xd57   :  { %v7109_v4 = vpop.eup %7108 }
 0xd58   :  { %v7111_v15 = vpop.eup %7110  ;;  %v1380_v25 = vadd.f32 1.0, %v7109_v4 }
 0xd59   :  { %v1373_v40 = vadd.f32 1.0, %v7111_v15 }
 0xd5a   :  { %7112 = vrcp.f32 %v1380_v25 }
 0xd5b   :  { %7114 = vrcp.f32 %v1373_v40 }
 0xd64   :  { %v7113_v33 = vpop.eup %7112 }
 0xd65   :  { %v7115_v36 = vpop.eup %7114  ;;  %v1401_v45 = vmul.f32 %v7113_v33, %v1399_v43 }
 0xd66   :  { %v1387_v8 = vmul.f32 %v7115_v36, %v1385_v44 }
 0xdc6   :  { %v1404_v35 = vpop.permute.xlu1 %1403 }
 0xdc7   :  { %v1406_v39 = vmul.f32 %v7113_v33, %v1404_v35  ;;  %v1390_v41 = vpop.permute.xlu0 %1389 }
 0xdc8   :  { %v1392_v42 = vmul.f32 %v7115_v36, %v1390_v41 }
 0xdc9   :  { %1408 = vrot.lane.b32.xlu1 %v1406_v39, %s7525_s22 }
 0xdca   :  { %1394 = vrot.lane.b32.xlu0 %v1392_v42, %s7525_s22 }
 0xe3b   :  { %v1409_v46 = vpop.permute.xlu1 %1408 }
 0xe3c   :  { %v8072_v47 = vadd.f32 %v1409_v46, %v1401_v45  ;;  %v1395_v48 = vpop.permute.xlu0 %1394 }
 0xe3d   :  { %v1397_v7 = vadd.f32 %v1395_v48, %v1387_v8 }
 0xe3e   :  { %7116 = vtanh.f32 %v8072_v47  ;;  %v1543_v43 = vrot.slane %v8072_v47, 2 }
 0xe3f   :  { %7118 = vtanh.f32 %v1397_v7  ;;  %v1529_v41 = vrot.slane %v1397_v7, 6 }
 0xe48   :  { %v7117_v50 = vpop.eup %7116 }
 0xe49   :  { %v7119_v51 = vpop.eup %7118  ;;  %1420 = vrot.lane.b32.xlu1 %v7117_v50, %s7524_s8 }
 0xe4a   :  { %1414 = vrot.lane.b32.xlu0 %v7119_v51, %s7524_s8 }
 0xebb   :  { %v1421_v19 = vpop.permute.xlu1 %1420 }
 0xebc   :  { %v8077_v21 = vmul.f32 %v7113_v33, %v1421_v19  ;;  %v1415_v26 = vpop.permute.xlu0 %1414 }
 0xebd   :  { %v1417_v54 = vmul.f32 %v7115_v36, %v1415_v26 }
 0xebe   :  { %v1429_v55 = vrot.slane %v8077_v21, 2 }
 0xebf   :  { %1425 = vrot.lane.b32.xlu1 %v1417_v54, %s7525_s22 }
 0xec0   :  { %1430 = vrot.lane.b32.xlu0 %v1429_v55, %s7524_s8 }
 0xf31   :  { %v8082_v52 = vpop.permute.xlu1 %1425 }
 0xf32   :  { %v1431_v56 = vpop.permute.xlu0 %1430 }
 0xf33   :  { %v1433_v17 = vsel %vm291_vm2, %v8082_v52, %v1431_v56 }
 0xf34   :  { %v1435_v32 = vrot.slane %v1433_v17, 6 }
 0xf36   :  { %5705 = vmatmul.mubr.msk.f32.vlgmr.msra.gmra.mrb[10].mxu0 %vm859_vm3, %v1435_v32 }
 0xf37   :  { %6311 = vmatpush1.bf16.msra.mxu0 %v7904_v3  ;;  %1645 = vmatprep.mubr.f32.mxu0 %v7522_v49 }
 0xf38   :  { %6313 = vmatprep.subr.bf16.mxu0 %v7908_v10 }
 0xf3b   :  { %6315 = vmatpush1.bf16.msra.mxu0 %v7910_v13 }
 0xf3c   :  { %6317 = vmatprep.subr.bf16.mxu0 %v7914_v18 }
 0xf3f   :  { %6319 = vmatpush1.bf16.msra.mxu0 %v7916_v23 }
 0xf40   :  { %6321 = vmatprep.subr.bf16.mxu0 %v7920_v27 }
 0xf43   :  { %6323 = vmatpush1.bf16.msra.mxu0 %v7922_v30 }
 0xf44   :  { %6325 = vmatprep.subr.bf16.mxu0 %v7902_v2 }
0x1009   :  { %v1504_v59 = vpop.f32.mrb[10].mxu0 }
0x100a   :  { %v1509_v0 = vadd.f32 %v7966_v37, %v1504_v59  ;;  %v1506_v1 = vpop.f32.mrb[11].mxu0 }
0x100b   :  { %v1511_v9 = vrot.slane %v1506_v1, 2 }
0x100c   :  { %7120 = vtanh.f32 %v1509_v0  ;;  %v1514_v20 = vsub.f32 0.0, %v1509_v0 }
0x100d   :  { %v1513_v11 = vadd.f32 %v7963_v34, %v1511_v9 }
0x100e   :  { %v1515_v24 = vmul.f32 1.442695, %v1514_v20 }
0x100f   :  { %7122 = vtanh.f32 %v1513_v11  ;;  %v1521_v22 = vsub.f32 0.0, %v1513_v11 }
0x1010   :  { %7124 = vpow2.f32 %v1515_v24 }
0x1011   :  { %v1522_v28 = vmul.f32 1.442695, %v1521_v22 }
0x1013   :  { %7126 = vpow2.f32 %v1522_v28 }
0x1016   :  { %v7121_v14 = vpop.eup %7120 }
0x1017   :  { %1533 = vrot.lane.b32.xlu0 %v7121_v14, %s7524_s8 }
0x1019   :  { %v7123_v16 = vpop.eup %7122 }
0x101a   :  { %1547 = vrot.lane.b32.xlu1 %v7123_v16, %s7524_s8  ;;  %v7125_v29 = vpop.eup %7124 }
0x101b   :  { %v1517_v4 = vadd.f32 1.0, %v7125_v29 }
0x101d   :  { %v7127_v31 = vpop.eup %7126  ;;  %7128 = vrcp.f32 %v1517_v4 }
0x101e   :  { %v1524_v15 = vadd.f32 1.0, %v7127_v31 }
0x1020   :  { %7130 = vrcp.f32 %v1524_v15 }
0x1027   :  { %v7129_v25 = vpop.eup %7128 }
0x1028   :  { %v1531_v42 = vmul.f32 %v7129_v25, %v1529_v41 }
0x102a   :  { %v7131_v35 = vpop.eup %7130 }
0x102b   :  { %v1545_v46 = vmul.f32 %v7131_v35, %v1543_v43 }
0x1089   :  { %v1534_v40 = vpop.permute.xlu0 %1533 }
0x108a   :  { %v1536_v33 = vmul.f32 %v7129_v25, %v1534_v40 }
0x108c   :  { %1538 = vrot.lane.b32.xlu0 %v1536_v33, %s7525_s22  ;;  %v1548_v36 = vpop.permute.xlu1 %1547 }
0x108d   :  { %v1550_v39 = vmul.f32 %v7131_v35, %v1548_v36 }
0x108f   :  { %1552 = vrot.lane.b32.xlu1 %v1550_v39, %s7525_s22 }
0x10fe   :  { %v1539_v44 = vpop.permute.xlu0 %1538 }
0x10ff   :  { %v8103_v45 = vadd.f32 %v1539_v44, %v1531_v42 }
0x1101   :  { %7132 = vtanh.f32 %v8103_v45  ;;  %v1553_v8 = vpop.permute.xlu1 %1552  ;;  %v1675_v39 = vrot.slane %v8103_v45, 6 }
0x1102   :  { %v8106_v48 = vadd.f32 %v1553_v8, %v1545_v46 }
0x1104   :  { %7134 = vtanh.f32 %v8106_v48  ;;  %v1689_v41 = vrot.slane %v8106_v48, 2 }
0x110b   :  { %v7133_v50 = vpop.eup %7132 }
0x110c   :  { %1558 = vrot.lane.b32.xlu0 %v7133_v50, %s7524_s8 }
0x110e   :  { %v7135_v51 = vpop.eup %7134 }
0x110f   :  { %1564 = vrot.lane.b32.xlu1 %v7135_v51, %s7524_s8 }
0x117e   :  { %v1559_v7 = vpop.permute.xlu0 %1558 }
0x117f   :  { %v1561_v19 = vmul.f32 %v7129_v25, %v1559_v7 }
0x1181   :  { %1569 = vrot.lane.b32.xlu1 %v1561_v19, %s7525_s22  ;;  %v1565_v47 = vpop.permute.xlu1 %1564 }
0x1182   :  { %v8112_v26 = vmul.f32 %v7131_v35, %v1565_v47 }
0x1184   :  { %v1573_v54 = vrot.slane %v8112_v26, 6 }
0x1186   :  { %1574 = vrot.lane.b32.xlu0 %v1573_v54, %s7524_s8 }
0x11f3   :  { %v8116_v55 = vpop.permute.xlu1 %1569 }
0x11f8   :  { %v1575_v56 = vpop.permute.xlu0 %1574 }
0x11f9   :  { %v1577_v17 = vsel %vm291_vm2, %v8116_v55, %v1575_v56 }
0x11fa   :  { %5706 = vmatmul.mubr.msk.f32.vlgmr.msra.gmra.mrb[12].mxu0 %vm859_vm3, %v1577_v17 }
0x11fb   :  { %6327 = vmatpush1.bf16.msra.mxu0 %v7904_v3  ;;  %1792 = vmatprep.mubr.f32.mxu0 %v7522_v49 }
0x11fc   :  { %6329 = vmatprep.subr.bf16.mxu0 %v7908_v10 }
0x11ff   :  { %6331 = vmatpush1.bf16.msra.mxu0 %v7910_v13 }
0x1200   :  { %6333 = vmatprep.subr.bf16.mxu0 %v7914_v18 }
0x1203   :  { %6335 = vmatpush1.bf16.msra.mxu0 %v7916_v23 }
0x1204   :  { %6337 = vmatprep.subr.bf16.mxu0 %v7920_v27 }
0x1207   :  { %6339 = vmatpush1.bf16.msra.mxu0 %v7922_v30 }
0x1208   :  { %6341 = vmatprep.subr.bf16.mxu0 %v7902_v2 }
0x12cd   :  { %v1647_v32 = vpop.f32.mrb[12].mxu0 }
0x12ce   :  { %v1653_v59 = vrot.slane %v1647_v32, 6  ;;  %v1649_v0 = vpop.f32.mrb[13].mxu0 }
0x12cf   :  { %v1657_v1 = vrot.slane %v1649_v0, 4 }
0x12d0   :  { %v1655_v9 = vadd.f32 %v7966_v37, %v1653_v59 }
0x12d1   :  { %v1659_v11 = vadd.f32 %v7963_v34, %v1657_v1 }
0x12d2   :  { %7136 = vtanh.f32 %v1655_v9  ;;  %v1660_v20 = vsub.f32 0.0, %v1655_v9 }
0x12d3   :  { %7138 = vtanh.f32 %v1659_v11  ;;  %v1667_v22 = vsub.f32 0.0, %v1659_v11 }
0x12d4   :  { %v1661_v24 = vmul.f32 1.442695, %v1660_v20 }
0x12d5   :  { %v1668_v2 = vmul.f32 1.442695, %v1667_v22 }
0x12d6   :  { %7140 = vpow2.f32 %v1661_v24 }
0x12d7   :  { %7142 = vpow2.f32 %v1668_v2 }
0x12dc   :  { %v7137_v14 = vpop.eup %7136 }
0x12dd   :  { %v7139_v16 = vpop.eup %7138  ;;  %1679 = vrot.lane.b32.xlu0 %v7137_v14, %s7524_s8 }
0x12de   :  { %1693 = vrot.lane.b32.xlu1 %v7139_v16, %s7524_s8 }
0x12e0   :  { %v7141_v28 = vpop.eup %7140 }
0x12e1   :  { %v7143_v29 = vpop.eup %7142  ;;  %v1663_v31 = vadd.f32 1.0, %v7141_v28 }
0x12e2   :  { %v1670_v4 = vadd.f32 1.0, %v7143_v29 }
0x12e3   :  { %7144 = vrcp.f32 %v1663_v31 }
0x12e4   :  { %7146 = vrcp.f32 %v1670_v4 }
0x12ed   :  { %v7145_v15 = vpop.eup %7144 }
0x12ee   :  { %v7147_v40 = vpop.eup %7146  ;;  %v1677_v42 = vmul.f32 %v7145_v15, %v1675_v39 }
0x12ef   :  { %v1691_v44 = vmul.f32 %v7147_v40, %v1689_v41 }
0x134f   :  { %v1680_v25 = vpop.permute.xlu0 %1679 }
0x1350   :  { %v1682_v33 = vmul.f32 %v7145_v15, %v1680_v25  ;;  %v1694_v35 = vpop.permute.xlu1 %1693 }
0x1351   :  { %v1696_v36 = vmul.f32 %v7147_v40, %v1694_v35 }
0x1352   :  { %1684 = vrot.lane.b32.xlu0 %v1682_v33, %s7525_s22 }
0x1353   :  { %1698 = vrot.lane.b32.xlu1 %v1696_v36, %s7525_s22 }
0x13c4   :  { %v1685_v43 = vpop.permute.xlu0 %1684 }
0x13c5   :  { %v8138_v46 = vadd.f32 %v1685_v43, %v1677_v42  ;;  %v1699_v8 = vpop.permute.xlu1 %1698 }
0x13c6   :  { %v8140_v50 = vadd.f32 %v1699_v8, %v1691_v44 }
0x13c7   :  { %7148 = vtanh.f32 %v8138_v46  ;;  %v1822_v25 = vrot.slane %v8138_v46, 6 }
0x13c8   :  { %7150 = vtanh.f32 %v8140_v50 }
0x13d1   :  { %v7149_v51 = vpop.eup %7148 }
0x13d2   :  { %v7151_v7 = vpop.eup %7150  ;;  %1704 = vrot.lane.b32.xlu0 %v7149_v51, %s7524_s8 }
0x13d3   :  { %1710 = vrot.lane.b32.xlu1 %v7151_v7, %s7524_s8 }
0x1444   :  { %v1705_v45 = vpop.permute.xlu0 %1704 }
0x1445   :  { %v1707_v48 = vmul.f32 %v7145_v15, %v1705_v45  ;;  %v1711_v19 = vpop.permute.xlu1 %1710 }
0x1446   :  { %v8146_v47 = vmul.f32 %v7147_v40, %v1711_v19  ;;  %v1836_v40 = vrot.slane %v8140_v50, 2 }
0x1447   :  { %1715 = vrot.lane.b32.xlu1 %v1707_v48, %s7525_s22 }
0x1448   :  { %v1719_v54 = vrot.slane %v8146_v47, 2 }
0x144a   :  { %1720 = vrot.lane.b32.xlu0 %v1719_v54, %s7524_s8 }
0x14b9   :  { %v8151_v56 = vpop.permute.xlu1 %1715 }
0x14bc   :  { %v1721_v17 = vpop.permute.xlu0 %1720 }
0x14bd   :  { %v1723_v32 = vsel %vm291_vm2, %v8151_v56, %v1721_v17 }
0x14be   :  { %v1725_v59 = vrot.slane %v1723_v32, 2 }
0x14c0   :  { %5707 = vmatmul.mubr.msk.f32.vlgmr.msra.gmra.mrb[14].mxu0 %vm859_vm3, %v1725_v59 }
0x14c1   :  { %6343 = vmatpush1.bf16.msra.mxu0 %v7904_v3  ;;  %1939 = vmatprep.mubr.f32.mxu0 %v7522_v49 }
0x14c2   :  { %6345 = vmatprep.subr.bf16.mxu0 %v7908_v10 }
0x14c5   :  { %6347 = vmatpush1.bf16.msra.mxu0 %v7910_v13 }
0x14c6   :  { %6349 = vmatprep.subr.bf16.mxu0 %v7914_v18 }
0x14c9   :  { %6351 = vmatpush1.bf16.msra.mxu0 %v7916_v23 }
0x14ca   :  { %6353 = vmatprep.subr.bf16.mxu0 %v7920_v27 }
0x14cd   :  { %6355 = vmatpush1.bf16.msra.mxu0 %v7922_v30 }
0x1593   :  { %v1794_v0 = vpop.f32.mrb[14].mxu0 }
0x1594   :  { %v1800_v1 = vrot.slane %v1794_v0, 4  ;;  %v1796_v9 = vpop.f32.mrb[15].mxu0 }
0x1595   :  { %v1804_v11 = vrot.slane %v1796_v9, 6 }
0x1596   :  { %v1802_v3 = vadd.f32 %v7966_v37, %v1800_v1 }
0x1597   :  { %v1806_v14 = vadd.f32 %v7963_v34, %v1804_v11 }
0x1598   :  { %7152 = vtanh.f32 %v1802_v3  ;;  %v1807_v18 = vsub.f32 0.0, %v1802_v3 }
0x1599   :  { %7154 = vtanh.f32 %v1806_v14  ;;  %v1814_v23 = vsub.f32 0.0, %v1806_v14 }
0x159a   :  { %v1808_v27 = vmul.f32 1.442695, %v1807_v18 }
0x159b   :  { %v1815_v30 = vmul.f32 1.442695, %v1814_v23 }
0x159c   :  { %7156 = vpow2.f32 %v1808_v27 }
0x159d   :  { %7158 = vpow2.f32 %v1815_v30 }
0x15a2   :  { %v7153_v10 = vpop.eup %7152 }
0x15a3   :  { %v7155_v13 = vpop.eup %7154  ;;  %1826 = vrot.lane.b32.xlu0 %v7153_v10, %s7524_s8 }
0x15a4   :  { %1840 = vrot.lane.b32.xlu1 %v7155_v13, %s7524_s8 }
0x15a6   :  { %v7157_v16 = vpop.eup %7156 }
0x15a7   :  { %v7159_v20 = vpop.eup %7158  ;;  %v1810_v22 = vadd.f32 1.0, %v7157_v16 }
0x15a8   :  { %v1817_v24 = vadd.f32 1.0, %v7159_v20 }
0x15a9   :  { %7160 = vrcp.f32 %v1810_v22 }
0x15aa   :  { %7162 = vrcp.f32 %v1817_v24 }
0x15b3   :  { %v7161_v2 = vpop.eup %7160 }
0x15b4   :  { %v7163_v29 = vpop.eup %7162  ;;  %v1824_v33 = vmul.f32 %v7161_v2, %v1822_v25 }
0x15b5   :  { %v1838_v36 = vmul.f32 %v7163_v29, %v1836_v40 }
0x1615   :  { %v1827_v28 = vpop.permute.xlu0 %1826 }
0x1616   :  { %v1829_v31 = vmul.f32 %v7161_v2, %v1827_v28  ;;  %v1841_v4 = vpop.permute.xlu1 %1840 }
0x1617   :  { %v1843_v15 = vmul.f32 %v7163_v29, %v1841_v4 }
0x1618   :  { %1831 = vrot.lane.b32.xlu0 %v1829_v31, %s7525_s22 }
0x1619   :  { %1845 = vrot.lane.b32.xlu1 %v1843_v15, %s7525_s22 }
0x168a   :  { %v1832_v35 = vpop.permute.xlu0 %1831 }
0x168b   :  { %v1834_v39 = vadd.f32 %v1832_v35, %v1824_v33  ;;  %v1846_v41 = vpop.permute.xlu1 %1845 }
0x168c   :  { %v1848_v42 = vadd.f32 %v1846_v41, %v1838_v36  ;;  %v2057_v36 = vld [vmem:[#allocation9 + $0x8] sm:$0xff]  ;;  %v2059_v41 = vld [vmem:[#allocation9 + $0x18] sm:$0xff] }
0x168d   :  { %7164 = vtanh.f32 %v1834_v39  ;;  %v1966_v28 = vrot.slane %v1834_v39, 6  ;;  %v6356_v39 = vpack.c.bf16 %v2059_v41, %v2057_v36  ;;  %v2181_v36 = vld [vmem:[#allocation10 + $0x70] sm:$0xff] }
0x168e   :  { %7166 = vtanh.f32 %v1848_v42 }
0x168f   :  { %6357 = vmatprep.subr.bf16.mxu1 %v6356_v39 }
0x1697   :  { %v7165_v43 = vpop.eup %7164 }
0x1698   :  { %v7167_v44 = vpop.eup %7166  ;;  %1851 = vrot.lane.b32.xlu0 %v7165_v43, %s7524_s8  ;;  %v2058_v43 = vld [vmem:[#allocation9 + $0x10] sm:$0xff] }
0x1699   :  { %1857 = vrot.lane.b32.xlu1 %v7167_v44, %s7524_s8  ;;  %v2168_v44 = vld [vmem:[#allocation10 + $0x8] sm:$0xff] }
0x170a   :  { %v1852_v8 = vpop.permute.xlu0 %1851 }
0x170b   :  { %v1854_v51 = vmul.f32 %v7161_v2, %v1852_v8  ;;  %v1858_v7 = vpop.permute.xlu1 %1857  ;;  %v1980_v2 = vrot.slane %v1848_v42, 2  ;;  %v2056_v42 = vld [vmem:[#allocation9] sm:$0xff]  ;;  %v2170_v8 = vld [vmem:[#allocation10 + $0x18] sm:$0xff] }
0x170c   :  { %v8174_v46 = vmul.f32 %v7163_v29, %v1858_v7  ;;  %v8201_v7 = vpack.c.bf16 %v2170_v8, %v2168_v44 }
0x170d   :  { %1862 = vrot.lane.b32.xlu1 %v1854_v51, %s7525_s22  ;;  %v6358_v51 = vpack.c.bf16 %v2058_v43, %v2056_v42 }
0x170e   :  { %v1866_v50 = vrot.slane %v8174_v46, 6  ;;  %6373 = vmatprep.subr.bf16.mxu0 %v8201_v7 }
0x170f   :  { %6359 = vmatpush1.bf16.msra.mxu1 %v6358_v51 }
0x1710   :  { %1867 = vrot.lane.b32.xlu0 %v1866_v50, %s7524_s8  ;;  %v2167_v50 = vld [vmem:[#allocation10] sm:$0xff] }
0x177f   :  { %v8179_v45 = vpop.permute.xlu1 %1862 }
0x1782   :  { %v1868_v48 = vpop.permute.xlu0 %1867 }
0x1783   :  { %v1870_v19 = vsel %vm291_vm2, %v8179_v45, %v1868_v48  ;;  %v2169_v48 = vld [vmem:[#allocation10 + $0x10] sm:$0xff] }
0x1784   :  { %v1872_v54 = vrot.slane %v1870_v19, 4  ;;  %v2061_v19 = vld [vmem:[#allocation9 + $0x28] sm:$0xff] }
0x1786   :  { %5708 = vmatmul.mubr.msk.f32.vlgmr.msra.gmra.mrb[16].mxu0 %vm859_vm3, %v1872_v54  ;;  %v8205_v54 = vpack.c.bf16 %v2169_v48, %v2167_v50 }
0x1787   :  { %2247 = vmatprep.mubr.f32.mxu0 %v7522_v49 }
0x1788   :  { %6375 = vmatpush1.bf16.msra.mxu0 %v8205_v54 }
0x1859   :  { %v1941_v17 = vpop.f32.mrb[16].mxu0 }
0x185a   :  { %v1947_v32 = vrot.slane %v1941_v17, 2  ;;  %v1943_v59 = vpop.f32.mrb[17].mxu0  ;;  %v2063_v17 = vld [vmem:[#allocation9 + $0x38] sm:$0xff] }
0x185b   :  { %v1950_v0 = vadd.f32 %v7963_v34, %v1943_v59  ;;  %v2062_v59 = vld [vmem:[#allocation9 + $0x30] sm:$0xff] }
0x185c   :  { %v1949_v1 = vadd.f32 %v7966_v37, %v1947_v32  ;;  %v2060_v32 = vld [vmem:[#allocation9 + $0x20] sm:$0xff] }
0x185d   :  { %7168 = vtanh.f32 %v1950_v0  ;;  %v1958_v3 = vsub.f32 0.0, %v1950_v0  ;;  %v6360_v0 = vpack.c.bf16 %v2063_v17, %v2061_v19 }
0x185e   :  { %7170 = vtanh.f32 %v1949_v1  ;;  %v1951_v14 = vsub.f32 0.0, %v1949_v1  ;;  %v6362_v1 = vpack.c.bf16 %v2062_v59, %v2060_v32 }
0x185f   :  { %v1959_v10 = vmul.f32 1.442695, %v1958_v3  ;;  %v2171_v3 = vld [vmem:[#allocation10 + $0x20] sm:$0xff]  ;;  %6361 = vmatprep.subr.bf16.mxu1 %v6360_v0 }
0x1860   :  { %v1952_v13 = vmul.f32 1.442695, %v1951_v14  ;;  %6363 = vmatpush1.bf16.msra.mxu1 %v6362_v1 }
0x1861   :  { %7172 = vpow2.f32 %v1959_v10  ;;  %v2065_v10 = vld [vmem:[#allocation9 + $0x48] sm:$0xff] }
0x1862   :  { %7174 = vpow2.f32 %v1952_v13  ;;  %v2067_v13 = vld [vmem:[#allocation9 + $0x58] sm:$0xff] }
0x1867   :  { %v7169_v9 = vpop.eup %7168 }
0x1868   :  { %v7171_v11 = vpop.eup %7170  ;;  %1984 = vrot.lane.b32.xlu1 %v7169_v9, %s7524_s8  ;;  %v2172_v9 = vld [vmem:[#allocation10 + $0x28] sm:$0xff] }
0x1869   :  { %1970 = vrot.lane.b32.xlu0 %v7171_v11, %s7524_s8  ;;  %v2174_v11 = vld [vmem:[#allocation10 + $0x38] sm:$0xff] }
0x186a   :  { %v8210_v14 = vpack.c.bf16 %v2174_v11, %v2172_v9 }
0x186b   :  { %v7173_v18 = vpop.eup %7172 }
0x186c   :  { %v7175_v23 = vpop.eup %7174  ;;  %v1961_v27 = vadd.f32 1.0, %v7173_v18  ;;  %6377 = vmatprep.subr.bf16.mxu0 %v8210_v14 }
0x186d   :  { %v1954_v34 = vadd.f32 1.0, %v7175_v23  ;;  %v6364_v23 = vpack.c.bf16 %v2067_v13, %v2065_v10 }
0x186e   :  { %7176 = vrcp.f32 %v1961_v27  ;;  %v2066_v27 = vld [vmem:[#allocation9 + $0x50] sm:$0xff] }
0x186f   :  { %7178 = vrcp.f32 %v1954_v34  ;;  %v2176_v34 = vld [vmem:[#allocation10 + $0x48] sm:$0xff]  ;;  %6365 = vmatprep.subr.bf16.mxu1 %v6364_v23 }
0x1878   :  { %v8189_v37 = vpop.eup %7176 }
0x1879   :  { %v8191_v16 = vpop.eup %7178  ;;  %v1982_v29 = vmul.f32 %v8189_v37, %v1980_v2 }
0x187a   :  { %v1968_v4 = vmul.f32 %v8191_v16, %v1966_v28 }
0x18da   :  { %v1985_v30 = vpop.permute.xlu1 %1984 }
0x18db   :  { %v1987_v20 = vmul.f32 %v8189_v37, %v1985_v30  ;;  %v1971_v22 = vpop.permute.xlu0 %1970  ;;  %v2178_v30 = vld [vmem:[#allocation10 + $0x58] sm:$0xff] }
0x18dc   :  { %v1973_v24 = vmul.f32 %v8191_v16, %v1971_v22  ;;  %v2177_v22 = vld [vmem:[#allocation10 + $0x50] sm:$0xff]  ;;  %v8220_v2 = vpack.c.bf16 %v2178_v30, %v2176_v34 }
0x18dd   :  { %1989 = vrot.lane.b32.xlu1 %v1987_v20, %s7525_s22  ;;  %v2175_v20 = vld [vmem:[#allocation10 + $0x40] sm:$0xff] }
0x18de   :  { %1975 = vrot.lane.b32.xlu0 %v1973_v24, %s7525_s22  ;;  %v8223_v28 = vpack.c.bf16 %v2177_v22, %v2175_v20 }
0x194f   :  { %v1990_v31 = vpop.permute.xlu1 %1989 }
0x1950   :  { %v1992_v15 = vadd.f32 %v1990_v31, %v1982_v29  ;;  %v1976_v25 = vpop.permute.xlu0 %1975  ;;  %v2071_v29 = vld [vmem:[#allocation9 + $0x78] sm:$0xff]  ;;  %v2068_v31 = vld [vmem:[#allocation9 + $0x60] sm:$0xff] }
0x1951   :  { %v1978_v40 = vadd.f32 %v1976_v25, %v1968_v4  ;;  %v2070_v4 = vld [vmem:[#allocation9 + $0x70] sm:$0xff]  ;;  %v2180_v25 = vld [vmem:[#allocation10 + $0x68] sm:$0xff] }
0x1952   :  { %7180 = vtanh.f32 %v1992_v15  ;;  %v6370_v15 = vpack.c.bf16 %v2070_v4, %v2068_v31 }
0x1953   :  { %7182 = vtanh.f32 %v1978_v40  ;;  %v2182_v40 = vld [vmem:[#allocation10 + $0x78] sm:$0xff] }
0x195c   :  { %v7181_v33 = vpop.eup %7180 }
0x195d   :  { %v7183_v35 = vpop.eup %7182  ;;  %2001 = vrot.lane.b32.xlu1 %v7181_v33, %s7524_s8  ;;  %v8229_v33 = vpack.c.bf16 %v2182_v40, %v2180_v25 }
0x195e   :  { %1995 = vrot.lane.b32.xlu0 %v7183_v35, %s7524_s8  ;;  %v2179_v35 = vld [vmem:[#allocation10 + $0x60] sm:$0xff] }
0x195f   :  { %v8231_v41 = vpack.c.bf16 %v2181_v36, %v2179_v35 }
0x1961   :  { %2023 = vrot.lane.b32.xlu1 %v8146_v47, %s7524_s8  ;;  %v2173_v47 = vld [vmem:[#allocation10 + $0x30] sm:$0xff] }
0x1962   :  { %2019 = vrot.lane.b32.xlu0 %v8174_v46, %s7524_s8  ;;  %v8213_v18 = vpack.c.bf16 %v2173_v47, %v2171_v3  ;;  %v2064_v46 = vld [vmem:[#allocation9 + $0x40] sm:$0xff]  ;;  %v2072_v47 = vld [vmem:[%s9547_s11] sm:$0x3] }
0x1963   :  { %v6366_v24 = vpack.c.bf16 %v2066_v27, %v2064_v46  ;;  %v2077_v10 = vrot.slane %v2072_v47, %v7840_v62  ;;  %v2081_v13 = vrot.slane %v2072_v47, %v7843_v63 }
0x1964   :  { %6379 = vmatpush1.bf16.msra.mxu0 %v8213_v18 }
0x1965   :  { %2031 = vrot.lane.b32.xlu1 %v8077_v21, %s7524_s8  ;;  %6381 = vmatprep.subr.bf16.mxu0 %v8220_v2  ;;  %v2069_v21 = vld [vmem:[#allocation9 + $0x68] sm:$0xff] }
0x1966   :  { %2027 = vrot.lane.b32.xlu0 %v8112_v26, %s7524_s8  ;;  %6367 = vmatpush1.bf16.msra.mxu1 %v6366_v24  ;;  %v6368_v26 = vpack.c.bf16 %v2071_v29, %v2069_v21 }
0x1968   :  { %6383 = vmatpush1.bf16.msra.mxu0 %v8223_v28  ;;  %6369 = vmatprep.subr.bf16.mxu1 %v6368_v26 }
0x1969   :  { %6385 = vmatprep.subr.bf16.mxu0 %v8229_v33 }
0x196a   :  { %2035 = vrot.lane.b32.xlu0 %v8046_v53, %s7524_s8  ;;  %6371 = vmatpush1.bf16.msra.mxu1 %v6370_v15 }
0x196b   :  { %6389 = vmatprep.subr.bf16.mxu1 %v8201_v7 }
0x196c   :  { %6387 = vmatpush1.bf16.msra.mxu0 %v8231_v41 }
0x196d   :  { %6405 = vmatprep.subr.bf16.mxu0 %v8201_v7 }
0x196f   :  { %2248 = vmatmul.mubr.f32.vlgmr.msra.gmra.mrb[18].mxu0 %v7522_v49 }
0x1970   :  { %6407 = vmatpush1.bf16.msra.mxu0 %v8205_v54  ;;  %2531 = vmatprep.mubr.f32.mxu0 %v7522_v49 }
0x1971   :  { %6409 = vmatprep.subr.bf16.mxu0 %v8210_v14 }
0x1974   :  { %6411 = vmatpush1.bf16.msra.mxu0 %v8213_v18 }
0x1975   :  { %6413 = vmatprep.subr.bf16.mxu0 %v8220_v2 }
0x1978   :  { %6415 = vmatpush1.bf16.msra.mxu0 %v8223_v28 }
0x1979   :  { %6417 = vmatprep.subr.bf16.mxu0 %v8229_v33 }
0x197c   :  { %6419 = vmatpush1.bf16.msra.mxu0 %v8231_v41 }
0x197d   :  { %6437 = vmatprep.subr.bf16.mxu0 %v8201_v7 }
0x19cf   :  { %v2002_v53 = vpop.permute.xlu1 %2001 }
0x19d0   :  { %v8242_v42 = vmul.f32 %v8189_v37, %v2002_v53  ;;  %v1996_v39 = vpop.permute.xlu0 %1995 }
0x19d1   :  { %v1998_v43 = vmul.f32 %v8191_v16, %v1996_v39 }
0x19d2   :  { %2015 = vrot.lane.b32.xlu1 %v8242_v42, %s7524_s8 }
0x19d3   :  { %2006 = vrot.lane.b32.xlu0 %v1998_v43, %s7525_s22  ;;  %v2024_v37 = vpop.permute.xlu1 %2023 }
0x19d4   :  { %v2020_v16 = vpop.permute.xlu0 %2019 }
0x19d6   :  { %2039 = vrot.lane.b32.xlu1 %v8014_v57, %s7524_s8  ;;  %v2022_v57 = vsel %vm291_vm2, %v8019_v58, %v2020_v16 }
0x19d7   :  { %v2032_v44 = vpop.permute.xlu1 %2031 }
0x19d8   :  { %v2028_v8 = vpop.permute.xlu0 %2027 }
0x19d9   :  { %v2030_v17 = vsel %vm291_vm2, %v8082_v52, %v2028_v8 }
0x19da   :  { %2043 = vrot.lane.b32.xlu1 %v7980_v60, %s7524_s8  ;;  %v2026_v60 = vsel %vm291_vm2, %v8051_v38, %v2024_v37  ;;  %v2034_v38 = vsel %vm291_vm2, %v8116_v55, %v2032_v44 }
0x19dc   :  { %v2036_v48 = vpop.permute.xlu0 %2035 }
0x19dd   :  { %v2038_v58 = vsel %vm291_vm2, %v8151_v56, %v2036_v48 }
0x19de   :  { %v2053_v52 = vsel %vm2047_vm5, %v2034_v38, %v2038_v58 }
0x1a42   :  { %v2249_v55 = vpop.f32.mrb[18].mxu0 }
0x1a43   :  { %v2251_v3 = vpop.f32.mrb[19].mxu0 }
0x1a44   :  { %v2016_v51 = vpop.permute.xlu1 %2015  ;;  %v2256_v22 = vrot.slane %v2251_v3, 2 }
0x1a45   :  { %v2018_v50 = vsel %vm291_vm2, %v7985_v12, %v2016_v51  ;;  %v8280_v1 = vpop.permute.xlu0 %2006 }
0x1a46   :  { %v2048_v19 = vsel %vm2047_vm5, %v2018_v50, %v2022_v57 }
0x1a47   :  { %v2050_v32 = vsel %vm2049_vm4, %v2048_v19, %v2026_v60 }
0x1a48   :  { %v2040_v59 = vpop.permute.xlu1 %2039  ;;  %v2052_v0 = vsel %vm2051_vm6, %v2050_v32, %v2030_v17 }
0x1a49   :  { %5709 = vmatmul.mubr.msk.f32.vlgmr.msra.gmra.mrb[12].mxu1 %vm859_vm3, %v2052_v0  ;;  %v2042_v12 = vsel %vm291_vm2, %v8179_v45, %v2040_v59 }
0x1a4a   :  { %2160 = vmatprep.mubr.f32.mxu1 %v7522_v49  ;;  %6391 = vmatpush1.bf16.msra.mxu1 %v8205_v54  ;;  %v2054_v56 = vsel %vm2049_vm4, %v2053_v52, %v2042_v12 }
0x1a4b   :  { %6393 = vmatprep.subr.bf16.mxu1 %v8210_v14 }
0x1a4c   :  { %v2044_v9 = vpop.permute.xlu1 %2043 }
0x1a4d   :  { %v2046_v11 = vsel %vm291_vm2, %v8280_v1, %v2044_v9 }
0x1a4e   :  { %v2055_v45 = vsel %vm2051_vm6, %v2054_v56, %v2046_v11  ;;  %6395 = vmatpush1.bf16.msra.mxu1 %v8213_v18 }
0x1a4f   :  { %5710 = vmatmul.mubr.msk.f32.gmra.mrb[14].mxu1 %vm859_vm3, %v2055_v45  ;;  %6397 = vmatprep.subr.bf16.mxu1 %v8220_v2 }
0x1a50   :  { %2384 = vmatprep.mubr.f32.mxu1 %v7522_v49 }
0x1a52   :  { %6399 = vmatpush1.bf16.msra.mxu1 %v8223_v28 }
0x1a53   :  { %6401 = vmatprep.subr.bf16.mxu1 %v8229_v33 }
0x1a56   :  { %6403 = vmatpush1.bf16.msra.mxu1 %v8231_v41 }
0x1a57   :  { %6421 = vmatprep.subr.bf16.mxu1 %v8201_v7 }
0x1b1c   :  { %v2156_v23 = vpop.f32.mrb[12].mxu1 }
0x1b1d   :  { %v8299_v46 = vadd.f32 %v2156_v23, %v2077_v10  ;;  %v2158_v27 = vpop.f32.mrb[13].mxu1 }
0x1b1e   :  { %v8301_v34 = vadd.f32 %v2158_v27, %v2081_v13 }
0x1b1f   :  { %v2254_v30 = vadd.f32 %v2249_v55, %v8299_v46 }
0x1b21   :  { %7184 = vtanh.f32 %v2254_v30  ;;  %v2259_v15 = vsub.f32 0.0, %v2254_v30 }
0x1b22   :  { %v2162_v20 = vpop.f32.mrb[14].mxu1 }
0x1b23   :  { %v8304_v24 = vadd.f32 %v2162_v20, %v2077_v10  ;;  %v2164_v21 = vpop.f32.mrb[15].mxu1  ;;  %v2260_v25 = vmul.f32 1.442695, %v2259_v15 }
0x1b24   :  { %v8306_v29 = vadd.f32 %v2164_v21, %v2081_v13 }
0x1b26   :  { %v2258_v26 = vadd.f32 %v2256_v22, %v8306_v29 }
0x1b28   :  { %7186 = vtanh.f32 %v2258_v26  ;;  %v2266_v40 = vsub.f32 0.0, %v2258_v26 }
0x1b29   :  { %7188 = vpow2.f32 %v2260_v25 }
0x1b2a   :  { %v2267_v35 = vmul.f32 1.442695, %v2266_v40 }
0x1b2b   :  { %v7185_v31 = vpop.eup %7184 }
0x1b2c   :  { %2275 = vrot.lane.b32.xlu1 %v7185_v31, %s7524_s8  ;;  %7190 = vpow2.f32 %v2267_v35 }
0x1b32   :  { %v7187_v4 = vpop.eup %7186 }
0x1b33   :  { %2286 = vrot.lane.b32.xlu0 %v7187_v4, %s7524_s8  ;;  %v7189_v36 = vpop.eup %7188 }
0x1b34   :  { %v2262_v53 = vadd.f32 1.0, %v7189_v36 }
0x1b36   :  { %v7191_v39 = vpop.eup %7190  ;;  %7192 = vrcp.f32 %v2262_v53 }
0x1b37   :  { %v2269_v43 = vadd.f32 1.0, %v7191_v39 }
0x1b39   :  { %7194 = vrcp.f32 %v2269_v43 }
0x1b40   :  { %v7193_v37 = vpop.eup %7192 }
0x1b41   :  { %v2273_v50 = vmul.f32 0.0, %v7193_v37 }
0x1b43   :  { %v7195_v8 = vpop.eup %7194 }
0x1b44   :  { %v2284_v19 = vmul.f32 0.0, %v7195_v8 }
0x1b9e   :  { %v2276_v16 = vpop.permute.xlu1 %2275 }
0x1b9f   :  { %v2278_v44 = vmul.f32 %v7193_v37, %v2276_v16 }
0x1ba1   :  { %2280 = vrot.lane.b32.xlu1 %v2278_v44, %s7525_s22 }
0x1ba5   :  { %v2287_v51 = vpop.permute.xlu0 %2286 }
0x1ba6   :  { %v2289_v57 = vmul.f32 %v7195_v8, %v2287_v51 }
0x1ba8   :  { %2291 = vrot.lane.b32.xlu0 %v2289_v57, %s7525_s22 }
0x1c13   :  { %v2281_v60 = vpop.permute.xlu1 %2280 }
0x1c14   :  { %v8313_v48 = vadd.f32 %v2281_v60, %v2273_v50 }
0x1c16   :  { %7196 = vtanh.f32 %v8313_v48 }
0x1c1a   :  { %v2292_v17 = vpop.permute.xlu0 %2291 }
0x1c1b   :  { %v8316_v32 = vadd.f32 %v2292_v17, %v2284_v19 }
0x1c1d   :  { %7198 = vtanh.f32 %v8316_v32  ;;  %v2428_v16 = vrot.slane %v8316_v32, 2 }
0x1c20   :  { %v7197_v59 = vpop.eup %7196 }
0x1c21   :  { %2297 = vrot.lane.b32.xlu1 %v7197_v59, %s7524_s8 }
0x1c27   :  { %v7199_v0 = vpop.eup %7198 }
0x1c28   :  { %2303 = vrot.lane.b32.xlu0 %v7199_v0, %s7524_s8 }
0x1c93   :  { %v2298_v58 = vpop.permute.xlu1 %2297 }
0x1c94   :  { %v2300_v12 = vmul.f32 %v7193_v37, %v2298_v58  ;;  %v2414_v37 = vrot.slane %v8313_v48, 6 }
0x1c96   :  { %2308 = vrot.lane.b32.xlu0 %v2300_v12, %s7525_s22 }
0x1c9a   :  { %v2304_v38 = vpop.permute.xlu0 %2303 }
0x1c9b   :  { %v2306_v52 = vmul.f32 %v7195_v8, %v2304_v38 }
0x1c9d   :  { %v2312_v9 = vrot.slane %v2306_v52, 6 }
0x1c9f   :  { %2313 = vrot.lane.b32.xlu1 %v2312_v9, %s7524_s8 }
0x1d08   :  { %v2309_v56 = vpop.permute.xlu0 %2308 }
0x1d11   :  { %v2314_v11 = vpop.permute.xlu1 %2313 }
0x1d12   :  { %v2316_v45 = vsel %vm291_vm2, %v2309_v56, %v2314_v11 }
0x1d13   :  { %5711 = vmatmul.mubr.msk.f32.vlgmr.msra.gmra.mrb[16].mxu1 %vm859_vm3, %v2316_v45 }
0x1d14   :  { %6423 = vmatpush1.bf16.msra.mxu1 %v8205_v54  ;;  %2678 = vmatprep.mubr.f32.mxu1 %v7522_v49 }
0x1d15   :  { %6425 = vmatprep.subr.bf16.mxu1 %v8210_v14 }
0x1d18   :  { %6427 = vmatpush1.bf16.msra.mxu1 %v8213_v18 }
0x1d19   :  { %6429 = vmatprep.subr.bf16.mxu1 %v8220_v2 }
0x1d1c   :  { %6431 = vmatpush1.bf16.msra.mxu1 %v8223_v28 }
0x1d1d   :  { %6433 = vmatprep.subr.bf16.mxu1 %v8229_v33 }
0x1d20   :  { %6435 = vmatpush1.bf16.msra.mxu1 %v8231_v41 }
0x1d21   :  { %6453 = vmatprep.subr.bf16.mxu1 %v8201_v7 }
0x1de6   :  { %v2386_v55 = vpop.f32.mrb[16].mxu1 }
0x1de7   :  { %v2392_v3 = vrot.slane %v2386_v55, 6  ;;  %v2388_v47 = vpop.f32.mrb[17].mxu1 }
0x1de8   :  { %v2396_v10 = vrot.slane %v2388_v47, 4 }
0x1de9   :  { %v2394_v13 = vadd.f32 %v2392_v3, %v8299_v46 }
0x1dea   :  { %v2398_v23 = vadd.f32 %v2396_v10, %v8306_v29 }
0x1deb   :  { %7200 = vtanh.f32 %v2394_v13  ;;  %v2399_v20 = vsub.f32 0.0, %v2394_v13 }
0x1dec   :  { %7202 = vtanh.f32 %v2398_v23  ;;  %v2406_v22 = vsub.f32 0.0, %v2398_v23 }
0x1ded   :  { %v2400_v21 = vmul.f32 1.442695, %v2399_v20 }
0x1dee   :  { %v2407_v26 = vmul.f32 1.442695, %v2406_v22 }
0x1def   :  { %7204 = vpow2.f32 %v2400_v21 }
0x1df0   :  { %7206 = vpow2.f32 %v2407_v26 }
0x1df5   :  { %v7201_v27 = vpop.eup %7200 }
0x1df6   :  { %v7203_v30 = vpop.eup %7202  ;;  %2418 = vrot.lane.b32.xlu1 %v7201_v27, %s7524_s8 }
0x1df7   :  { %2432 = vrot.lane.b32.xlu0 %v7203_v30, %s7524_s8 }
0x1df9   :  { %v7205_v31 = vpop.eup %7204 }
0x1dfa   :  { %v7207_v4 = vpop.eup %7206  ;;  %v2402_v15 = vadd.f32 1.0, %v7205_v31 }
0x1dfb   :  { %v2409_v25 = vadd.f32 1.0, %v7207_v4 }
0x1dfc   :  { %7208 = vrcp.f32 %v2402_v15 }
0x1dfd   :  { %7210 = vrcp.f32 %v2409_v25 }
0x1e06   :  { %v7209_v40 = vpop.eup %7208 }
0x1e07   :  { %v7211_v36 = vpop.eup %7210  ;;  %v2416_v44 = vmul.f32 %v7209_v40, %v2414_v37 }
0x1e08   :  { %v2430_v51 = vmul.f32 %v7211_v36, %v2428_v16 }
0x1e68   :  { %v2419_v35 = vpop.permute.xlu1 %2418 }
0x1e69   :  { %v2421_v53 = vmul.f32 %v7209_v40, %v2419_v35  ;;  %v2433_v39 = vpop.permute.xlu0 %2432 }
0x1e6a   :  { %v2435_v43 = vmul.f32 %v7211_v36, %v2433_v39 }
0x1e6b   :  { %2423 = vrot.lane.b32.xlu1 %v2421_v53, %s7525_s22 }
0x1e6c   :  { %2437 = vrot.lane.b32.xlu0 %v2435_v43, %s7525_s22 }
0x1edd   :  { %v2424_v8 = vpop.permute.xlu1 %2423 }
0x1ede   :  { %v8342_v57 = vadd.f32 %v2424_v8, %v2416_v44  ;;  %v2438_v50 = vpop.permute.xlu0 %2437 }
0x1edf   :  { %v8344_v60 = vadd.f32 %v2438_v50, %v2430_v51 }
0x1ee0   :  { %7212 = vtanh.f32 %v8342_v57  ;;  %v2561_v53 = vrot.slane %v8342_v57, 6 }
0x1ee1   :  { %7214 = vtanh.f32 %v8344_v60  ;;  %v2575_v39 = vrot.slane %v8344_v60, 2 }
0x1eea   :  { %v7213_v19 = vpop.eup %7212 }
0x1eeb   :  { %v7215_v17 = vpop.eup %7214  ;;  %2443 = vrot.lane.b32.xlu1 %v7213_v19, %s7524_s8 }
0x1eec   :  { %2449 = vrot.lane.b32.xlu0 %v7215_v17, %s7524_s8 }
0x1f5d   :  { %v2444_v48 = vpop.permute.xlu1 %2443 }
0x1f5e   :  { %v2446_v32 = vmul.f32 %v7209_v40, %v2444_v48  ;;  %v2450_v59 = vpop.permute.xlu0 %2449 }
0x1f5f   :  { %v2452_v0 = vmul.f32 %v7211_v36, %v2450_v59 }
0x1f60   :  { %2454 = vrot.lane.b32.xlu0 %v2446_v32, %s7525_s22 }
0x1f61   :  { %v2458_v58 = vrot.slane %v2452_v0, 2 }
0x1f63   :  { %2459 = vrot.lane.b32.xlu1 %v2458_v58, %s7524_s8 }
0x1fd2   :  { %v2455_v12 = vpop.permute.xlu0 %2454 }
0x1fd5   :  { %v2460_v38 = vpop.permute.xlu1 %2459 }
0x1fd6   :  { %v2462_v52 = vsel %vm291_vm2, %v2455_v12, %v2460_v38 }
0x1fd7   :  { %v2464_v9 = vrot.slane %v2462_v52, 2 }
0x1fd9   :  { %5712 = vmatmul.mubr.msk.f32.vlgmr.msra.gmra.mrb[20].mxu0 %vm859_vm3, %v2464_v9 }
0x1fda   :  { %6439 = vmatpush1.bf16.msra.mxu0 %v8205_v54  ;;  %2822 = vmatprep.mubr.f32.mxu0 %v7522_v49 }
0x1fdb   :  { %6441 = vmatprep.subr.bf16.mxu0 %v8210_v14 }
0x1fde   :  { %6443 = vmatpush1.bf16.msra.mxu0 %v8213_v18 }
0x1fdf   :  { %6445 = vmatprep.subr.bf16.mxu0 %v8220_v2 }
0x1fe2   :  { %6447 = vmatpush1.bf16.msra.mxu0 %v8223_v28 }
0x1fe3   :  { %6449 = vmatprep.subr.bf16.mxu0 %v8229_v33 }
0x1fe6   :  { %6451 = vmatpush1.bf16.msra.mxu0 %v8231_v41 }
0x1fe7   :  { %6469 = vmatprep.subr.bf16.mxu0 %v8201_v7 }
0x20ac   :  { %v2533_v56 = vpop.f32.mrb[20].mxu0 }
0x20ad   :  { %v2539_v11 = vrot.slane %v2533_v56, 4  ;;  %v2535_v45 = vpop.f32.mrb[21].mxu0 }
0x20ae   :  { %v2543_v55 = vrot.slane %v2535_v45, 6 }
0x20af   :  { %v2541_v3 = vadd.f32 %v2539_v11, %v8299_v46 }
0x20b0   :  { %v2545_v47 = vadd.f32 %v2543_v55, %v8306_v29 }
0x20b1   :  { %7216 = vtanh.f32 %v2541_v3  ;;  %v2546_v23 = vsub.f32 0.0, %v2541_v3 }
0x20b2   :  { %7218 = vtanh.f32 %v2545_v47  ;;  %v2553_v27 = vsub.f32 0.0, %v2545_v47 }
0x20b3   :  { %v2547_v30 = vmul.f32 1.442695, %v2546_v23 }
0x20b4   :  { %v2554_v20 = vmul.f32 1.442695, %v2553_v27 }
0x20b5   :  { %7220 = vpow2.f32 %v2547_v30 }
0x20b6   :  { %7222 = vpow2.f32 %v2554_v20 }
0x20bb   :  { %v7217_v10 = vpop.eup %7216 }
0x20bc   :  { %v7219_v13 = vpop.eup %7218  ;;  %2565 = vrot.lane.b32.xlu1 %v7217_v10, %s7524_s8 }
0x20bd   :  { %2579 = vrot.lane.b32.xlu0 %v7219_v13, %s7524_s8 }
0x20bf   :  { %v7221_v22 = vpop.eup %7220 }
0x20c0   :  { %v7223_v21 = vpop.eup %7222  ;;  %v2549_v26 = vadd.f32 1.0, %v7221_v22 }
0x20c1   :  { %v2556_v31 = vadd.f32 1.0, %v7223_v21 }
0x20c2   :  { %7224 = vrcp.f32 %v2549_v26 }
0x20c3   :  { %7226 = vrcp.f32 %v2556_v31 }
0x20cc   :  { %v7225_v4 = vpop.eup %7224 }
0x20cd   :  { %v7227_v25 = vpop.eup %7226  ;;  %v2563_v43 = vmul.f32 %v7225_v4, %v2561_v53 }
0x20ce   :  { %v2577_v16 = vmul.f32 %v7227_v25, %v2575_v39 }
0x212e   :  { %v2566_v15 = vpop.permute.xlu1 %2565 }
0x212f   :  { %v2568_v40 = vmul.f32 %v7225_v4, %v2566_v15  ;;  %v2580_v35 = vpop.permute.xlu0 %2579 }
0x2130   :  { %v2582_v36 = vmul.f32 %v7227_v25, %v2580_v35 }
0x2131   :  { %2570 = vrot.lane.b32.xlu1 %v2568_v40, %s7525_s22 }
0x2132   :  { %2584 = vrot.lane.b32.xlu0 %v2582_v36, %s7525_s22 }
0x21a3   :  { %v2571_v37 = vpop.permute.xlu1 %2570 }
0x21a4   :  { %v8371_v44 = vadd.f32 %v2571_v37, %v2563_v43  ;;  %v2585_v8 = vpop.permute.xlu0 %2584 }
0x21a5   :  { %v2587_v51 = vadd.f32 %v2585_v8, %v2577_v16 }
0x21a6   :  { %7228 = vtanh.f32 %v8371_v44 }
0x21a7   :  { %7230 = vtanh.f32 %v2587_v51  ;;  %v2719_v31 = vrot.slane %v2587_v51, 2 }
0x21b0   :  { %v7229_v50 = vpop.eup %7228 }
0x21b1   :  { %v7231_v19 = vpop.eup %7230  ;;  %2590 = vrot.lane.b32.xlu1 %v7229_v50, %s7524_s8 }
0x21b2   :  { %2596 = vrot.lane.b32.xlu0 %v7231_v19, %s7524_s8 }
0x2223   :  { %v2591_v17 = vpop.permute.xlu1 %2590 }
0x2224   :  { %v2593_v57 = vmul.f32 %v7225_v4, %v2591_v17  ;;  %v2597_v48 = vpop.permute.xlu0 %2596  ;;  %v2705_v4 = vrot.slane %v8371_v44, 6 }
0x2225   :  { %v2599_v60 = vmul.f32 %v7227_v25, %v2597_v48 }
0x2226   :  { %2601 = vrot.lane.b32.xlu0 %v2593_v57, %s7525_s22 }
0x2227   :  { %v2605_v32 = vrot.slane %v2599_v60, 6 }
0x2229   :  { %2606 = vrot.lane.b32.xlu1 %v2605_v32, %s7524_s8 }
0x2298   :  { %v2602_v59 = vpop.permute.xlu0 %2601 }
0x229b   :  { %v2607_v0 = vpop.permute.xlu1 %2606 }
0x229c   :  { %v2609_v58 = vsel %vm291_vm2, %v2602_v59, %v2607_v0 }
0x229d   :  { %v2611_v12 = vrot.slane %v2609_v58, 4 }
0x229f   :  { %5713 = vmatmul.mubr.msk.f32.vlgmr.msra.gmra.mrb[18].mxu1 %vm859_vm3, %v2611_v12 }
0x22a0   :  { %6455 = vmatpush1.bf16.msra.mxu1 %v8205_v54  ;;  %2965 = vmatprep.mubr.f32.mxu1 %v7522_v49 }
0x22a1   :  { %6457 = vmatprep.subr.bf16.mxu1 %v8210_v14 }
0x22a4   :  { %6459 = vmatpush1.bf16.msra.mxu1 %v8213_v18 }
0x22a5   :  { %6461 = vmatprep.subr.bf16.mxu1 %v8220_v2 }
0x22a8   :  { %6463 = vmatpush1.bf16.msra.mxu1 %v8223_v28 }
0x22a9   :  { %6465 = vmatprep.subr.bf16.mxu1 %v8229_v33 }
0x22ac   :  { %6467 = vmatpush1.bf16.msra.mxu1 %v8231_v41 }
0x22ad   :  { %6485 = vmatprep.subr.bf16.mxu1 %v8201_v7 }
0x2372   :  { %v2680_v38 = vpop.f32.mrb[18].mxu1 }
0x2373   :  { %v2686_v52 = vrot.slane %v2680_v38, 2  ;;  %v2682_v9 = vpop.f32.mrb[19].mxu1 }
0x2374   :  { %v2689_v56 = vadd.f32 %v2682_v9, %v8306_v29 }
0x2375   :  { %v2688_v11 = vadd.f32 %v2686_v52, %v8299_v46 }
0x2376   :  { %7232 = vtanh.f32 %v2689_v56  ;;  %v2697_v3 = vsub.f32 0.0, %v2689_v56 }
0x2377   :  { %7234 = vtanh.f32 %v2688_v11  ;;  %v2690_v47 = vsub.f32 0.0, %v2688_v11 }
0x2378   :  { %v2698_v10 = vmul.f32 1.442695, %v2697_v3 }
0x2379   :  { %v2691_v13 = vmul.f32 1.442695, %v2690_v47 }
0x237a   :  { %7236 = vpow2.f32 %v2698_v10 }
0x237b   :  { %7238 = vpow2.f32 %v2691_v13 }
0x2380   :  { %v7233_v45 = vpop.eup %7232 }
0x2381   :  { %v7235_v55 = vpop.eup %7234  ;;  %2723 = vrot.lane.b32.xlu0 %v7233_v45, %s7524_s8 }
0x2382   :  { %2709 = vrot.lane.b32.xlu1 %v7235_v55, %s7524_s8 }
0x2384   :  { %v7237_v7 = vpop.eup %7236 }
0x2385   :  { %v7239_v23 = vpop.eup %7238  ;;  %v2700_v27 = vadd.f32 1.0, %v7237_v7 }
0x2386   :  { %v2693_v29 = vadd.f32 1.0, %v7239_v23 }
0x2387   :  { %7240 = vrcp.f32 %v2700_v27 }
0x2388   :  { %7242 = vrcp.f32 %v2693_v29 }
0x2391   :  { %v7241_v46 = vpop.eup %7240 }
0x2392   :  { %v7243_v20 = vpop.eup %7242  ;;  %v2721_v15 = vmul.f32 %v7241_v46, %v2719_v31 }
0x2393   :  { %v2707_v40 = vmul.f32 %v7243_v20, %v2705_v4 }
0x23f3   :  { %v2724_v30 = vpop.permute.xlu0 %2723 }
0x23f4   :  { %v2726_v22 = vmul.f32 %v7241_v46, %v2724_v30  ;;  %v2710_v21 = vpop.permute.xlu1 %2709 }
0x23f5   :  { %v2712_v26 = vmul.f32 %v7243_v20, %v2710_v21 }
0x23f6   :  { %2728 = vrot.lane.b32.xlu0 %v2726_v22, %s7525_s22 }
0x23f7   :  { %2714 = vrot.lane.b32.xlu1 %v2712_v26, %s7525_s22 }
0x2468   :  { %v2729_v25 = vpop.permute.xlu0 %2728 }
0x2469   :  { %v8396_v35 = vadd.f32 %v2729_v25, %v2721_v15  ;;  %v2715_v36 = vpop.permute.xlu1 %2714 }
0x246a   :  { %v2717_v53 = vadd.f32 %v2715_v36, %v2707_v40 }
0x246b   :  { %7244 = vtanh.f32 %v8396_v35  ;;  %v2863_v30 = vrot.slane %v8396_v35, 2 }
0x246c   :  { %7246 = vtanh.f32 %v2717_v53  ;;  %v2849_v29 = vrot.slane %v2717_v53, 6 }
0x2475   :  { %v7245_v39 = vpop.eup %7244 }
0x2476   :  { %v7247_v43 = vpop.eup %7246  ;;  %2740 = vrot.lane.b32.xlu0 %v7245_v39, %s7524_s8 }
0x2477   :  { %2734 = vrot.lane.b32.xlu1 %v7247_v43, %s7524_s8 }
0x24e8   :  { %v2741_v37 = vpop.permute.xlu0 %2740 }
0x24e9   :  { %v2743_v16 = vmul.f32 %v7241_v46, %v2741_v37  ;;  %v2735_v8 = vpop.permute.xlu1 %2734 }
0x24ea   :  { %v2737_v44 = vmul.f32 %v7243_v20, %v2735_v8 }
0x24eb   :  { %v2749_v51 = vrot.slane %v2743_v16, 2 }
0x24ec   :  { %2745 = vrot.lane.b32.xlu0 %v2737_v44, %s7525_s22 }
0x24ed   :  { %2750 = vrot.lane.b32.xlu1 %v2749_v51, %s7524_s8 }
0x255e   :  { %v2746_v50 = vpop.permute.xlu0 %2745 }
0x255f   :  { %v2751_v19 = vpop.permute.xlu1 %2750 }
0x2560   :  { %v2753_v17 = vsel %vm291_vm2, %v2746_v50, %v2751_v19 }
0x2561   :  { %v2755_v57 = vrot.slane %v2753_v17, 6 }
0x2563   :  { %5714 = vmatmul.mubr.msk.f32.vlgmr.msra.gmra.mrb[22].mxu0 %vm859_vm3, %v2755_v57 }
0x2564   :  { %6471 = vmatpush1.bf16.msra.mxu0 %v8205_v54  ;;  %3112 = vmatprep.mubr.f32.mxu0 %v7522_v49 }
0x2565   :  { %6473 = vmatprep.subr.bf16.mxu0 %v8210_v14 }
0x2568   :  { %6475 = vmatpush1.bf16.msra.mxu0 %v8213_v18 }
0x2569   :  { %6477 = vmatprep.subr.bf16.mxu0 %v8220_v2 }
0x256c   :  { %6479 = vmatpush1.bf16.msra.mxu0 %v8223_v28 }
0x256d   :  { %6481 = vmatprep.subr.bf16.mxu0 %v8229_v33 }
0x2570   :  { %6483 = vmatpush1.bf16.msra.mxu0 %v8231_v41 }
0x2636   :  { %v2824_v48 = vpop.f32.mrb[22].mxu0 }
0x2637   :  { %v2829_v60 = vadd.f32 %v2824_v48, %v8304_v24  ;;  %v2826_v32 = vpop.f32.mrb[23].mxu0 }
0x2638   :  { %v2831_v59 = vrot.slane %v2826_v32, 2 }
0x2639   :  { %7248 = vtanh.f32 %v2829_v60  ;;  %v2834_v38 = vsub.f32 0.0, %v2829_v60 }
0x263a   :  { %v2833_v0 = vadd.f32 %v2831_v59, %v8301_v34 }
0x263b   :  { %v2835_v9 = vmul.f32 1.442695, %v2834_v38 }
0x263c   :  { %7250 = vtanh.f32 %v2833_v0  ;;  %v2841_v52 = vsub.f32 0.0, %v2833_v0 }
0x263d   :  { %7252 = vpow2.f32 %v2835_v9 }
0x263e   :  { %v2842_v56 = vmul.f32 1.442695, %v2841_v52 }
0x2640   :  { %7254 = vpow2.f32 %v2842_v56 }
0x2643   :  { %v7249_v58 = vpop.eup %7248 }
0x2644   :  { %2853 = vrot.lane.b32.xlu1 %v7249_v58, %s7524_s8 }
0x2646   :  { %v7251_v12 = vpop.eup %7250 }
0x2647   :  { %2867 = vrot.lane.b32.xlu0 %v7251_v12, %s7524_s8  ;;  %v7253_v11 = vpop.eup %7252 }
0x2648   :  { %v2837_v55 = vadd.f32 1.0, %v7253_v11 }
0x264a   :  { %v7255_v45 = vpop.eup %7254  ;;  %7256 = vrcp.f32 %v2837_v55 }
0x264b   :  { %v2844_v3 = vadd.f32 1.0, %v7255_v45 }
0x264d   :  { %7258 = vrcp.f32 %v2844_v3 }
0x2654   :  { %v7257_v47 = vpop.eup %7256 }
0x2655   :  { %v2851_v46 = vmul.f32 %v7257_v47, %v2849_v29 }
0x2657   :  { %v7259_v7 = vpop.eup %7258 }
0x2658   :  { %v2865_v21 = vmul.f32 %v7259_v7, %v2863_v30 }
0x26b6   :  { %v2854_v10 = vpop.permute.xlu1 %2853 }
0x26b7   :  { %v2856_v13 = vmul.f32 %v7257_v47, %v2854_v10 }
0x26b9   :  { %2858 = vrot.lane.b32.xlu1 %v2856_v13, %s7525_s22  ;;  %v2868_v23 = vpop.permute.xlu0 %2867 }
0x26ba   :  { %v2870_v27 = vmul.f32 %v7259_v7, %v2868_v23 }
0x26bc   :  { %2872 = vrot.lane.b32.xlu0 %v2870_v27, %s7525_s22 }
0x272b   :  { %v2859_v20 = vpop.permute.xlu1 %2858 }
0x272c   :  { %v8420_v22 = vadd.f32 %v2859_v20, %v2851_v46 }
0x272e   :  { %7260 = vtanh.f32 %v8420_v22  ;;  %v2873_v26 = vpop.permute.xlu0 %2872  ;;  %v2995_v38 = vrot.slane %v8420_v22, 6 }
0x272f   :  { %v2875_v31 = vadd.f32 %v2873_v26, %v2865_v21 }
0x2731   :  { %7262 = vtanh.f32 %v2875_v31  ;;  %v3009_v52 = vrot.slane %v2875_v31, 2 }
0x2738   :  { %v7261_v4 = vpop.eup %7260 }
0x2739   :  { %2878 = vrot.lane.b32.xlu1 %v7261_v4, %s7524_s8 }
0x273b   :  { %v7263_v15 = vpop.eup %7262 }
0x273c   :  { %2884 = vrot.lane.b32.xlu0 %v7263_v15, %s7524_s8 }
0x27ab   :  { %v2879_v25 = vpop.permute.xlu1 %2878 }
0x27ac   :  { %v2881_v40 = vmul.f32 %v7257_v47, %v2879_v25 }
0x27ae   :  { %2889 = vrot.lane.b32.xlu0 %v2881_v40, %s7525_s22  ;;  %v2885_v35 = vpop.permute.xlu0 %2884 }
0x27af   :  { %v2887_v36 = vmul.f32 %v7259_v7, %v2885_v35 }
0x27b1   :  { %v2893_v53 = vrot.slane %v2887_v36, 6 }
0x27b3   :  { %2894 = vrot.lane.b32.xlu1 %v2893_v53, %s7524_s8 }
0x2820   :  { %v2890_v39 = vpop.permute.xlu0 %2889 }
0x2825   :  { %v2895_v43 = vpop.permute.xlu1 %2894 }
0x2826   :  { %v2897_v37 = vsel %vm291_vm2, %v2890_v39, %v2895_v43 }
0x2827   :  { %5715 = vmatmul.mubr.msk.f32.vlgmr.msra.gmra.mrb[20].mxu1 %vm859_vm3, %v2897_v37 }
0x2828   :  { %6487 = vmatpush1.bf16.msra.mxu1 %v8205_v54  ;;  %3259 = vmatprep.mubr.f32.mxu1 %v7522_v49 }
0x2829   :  { %6489 = vmatprep.subr.bf16.mxu1 %v8210_v14 }
0x282c   :  { %6491 = vmatpush1.bf16.msra.mxu1 %v8213_v18 }
0x282d   :  { %6493 = vmatprep.subr.bf16.mxu1 %v8220_v2 }
0x2830   :  { %6495 = vmatpush1.bf16.msra.mxu1 %v8223_v28 }
0x2831   :  { %6497 = vmatprep.subr.bf16.mxu1 %v8229_v33 }
0x2834   :  { %6499 = vmatpush1.bf16.msra.mxu1 %v8231_v41 }
0x28fa   :  { %v2967_v16 = vpop.f32.mrb[20].mxu1 }
0x28fb   :  { %v2973_v8 = vrot.slane %v2967_v16, 6  ;;  %v2969_v44 = vpop.f32.mrb[21].mxu1 }
0x28fc   :  { %v2977_v51 = vrot.slane %v2969_v44, 4 }
0x28fd   :  { %v2975_v54 = vadd.f32 %v2973_v8, %v8304_v24 }
0x28fe   :  { %v2979_v50 = vadd.f32 %v2977_v51, %v8301_v34 }
0x28ff   :  { %7264 = vtanh.f32 %v2975_v54  ;;  %v2980_v2 = vsub.f32 0.0, %v2975_v54 }
0x2900   :  { %7266 = vtanh.f32 %v2979_v50  ;;  %v2987_v28 = vsub.f32 0.0, %v2979_v50 }
0x2901   :  { %v2981_v33 = vmul.f32 1.442695, %v2980_v2 }
0x2902   :  { %v2988_v41 = vmul.f32 1.442695, %v2987_v28 }
0x2903   :  { %7268 = vpow2.f32 %v2981_v33 }
0x2904   :  { %7270 = vpow2.f32 %v2988_v41 }
0x2909   :  { %v7265_v14 = vpop.eup %7264 }
0x290a   :  { %v7267_v18 = vpop.eup %7266  ;;  %2999 = vrot.lane.b32.xlu1 %v7265_v14, %s7524_s8 }
0x290b   :  { %3013 = vrot.lane.b32.xlu0 %v7267_v18, %s7524_s8 }
0x290d   :  { %v7269_v19 = vpop.eup %7268 }
0x290e   :  { %v7271_v17 = vpop.eup %7270  ;;  %v2983_v57 = vadd.f32 1.0, %v7269_v19 }
0x290f   :  { %v2990_v48 = vadd.f32 1.0, %v7271_v17 }
0x2910   :  { %7272 = vrcp.f32 %v2983_v57 }
0x2911   :  { %7274 = vrcp.f32 %v2990_v48 }
0x291a   :  { %v7273_v60 = vpop.eup %7272 }
0x291b   :  { %v7275_v59 = vpop.eup %7274  ;;  %v2997_v9 = vmul.f32 %v7273_v60, %v2995_v38 }
0x291c   :  { %v3011_v11 = vmul.f32 %v7275_v59, %v3009_v52 }
0x297c   :  { %v3000_v32 = vpop.permute.xlu1 %2999 }
0x297d   :  { %v3002_v0 = vmul.f32 %v7273_v60, %v3000_v32  ;;  %v3014_v58 = vpop.permute.xlu0 %3013 }
0x297e   :  { %v3016_v12 = vmul.f32 %v7275_v59, %v3014_v58 }
0x297f   :  { %3004 = vrot.lane.b32.xlu1 %v3002_v0, %s7525_s22 }
0x2980   :  { %3018 = vrot.lane.b32.xlu0 %v3016_v12, %s7525_s22 }
0x29f1   :  { %v3005_v56 = vpop.permute.xlu1 %3004 }
0x29f2   :  { %v3007_v45 = vadd.f32 %v3005_v56, %v2997_v9  ;;  %v3019_v55 = vpop.permute.xlu0 %3018 }
0x29f3   :  { %v3021_v3 = vadd.f32 %v3019_v55, %v3011_v11 }
0x29f4   :  { %7276 = vtanh.f32 %v3007_v45  ;;  %v3142_v28 = vrot.slane %v3007_v45, 6 }
0x29f5   :  { %7278 = vtanh.f32 %v3021_v3  ;;  %v3156_v33 = vrot.slane %v3021_v3, 2 }
0x29fe   :  { %v7277_v47 = vpop.eup %7276 }
0x29ff   :  { %v7279_v10 = vpop.eup %7278  ;;  %3024 = vrot.lane.b32.xlu1 %v7277_v47, %s7524_s8 }
0x2a00   :  { %3030 = vrot.lane.b32.xlu0 %v7279_v10, %s7524_s8 }
0x2a71   :  { %v3025_v13 = vpop.permute.xlu1 %3024 }
0x2a72   :  { %v3027_v7 = vmul.f32 %v7273_v60, %v3025_v13  ;;  %v3031_v23 = vpop.permute.xlu0 %3030 }
0x2a73   :  { %v3033_v27 = vmul.f32 %v7275_v59, %v3031_v23 }
0x2a74   :  { %3035 = vrot.lane.b32.xlu0 %v3027_v7, %s7525_s22 }
0x2a75   :  { %v3039_v29 = vrot.slane %v3033_v27, 2 }
0x2a77   :  { %3040 = vrot.lane.b32.xlu1 %v3039_v29, %s7524_s8 }
0x2ae6   :  { %v3036_v46 = vpop.permute.xlu0 %3035 }
0x2ae9   :  { %v3041_v30 = vpop.permute.xlu1 %3040 }
0x2aea   :  { %v3043_v20 = vsel %vm291_vm2, %v3036_v46, %v3041_v30 }
0x2aeb   :  { %v3045_v22 = vrot.slane %v3043_v20, 2 }
0x2aed   :  { %5716 = vmatmul.mubr.msk.f32.vlgmr.msra.gmra.mrb[24].mxu0 %vm859_vm3, %v3045_v22 }
0x2aee   :  { %3747 = vmatprep.mubr.f32.mxu0 %v7522_v49 }
0x2bc0   :  { %v3114_v21 = vpop.f32.mrb[24].mxu0 }
0x2bc1   :  { %v3120_v26 = vrot.slane %v3114_v21, 4  ;;  %v3116_v31 = vpop.f32.mrb[25].mxu0 }
0x2bc2   :  { %v3124_v4 = vrot.slane %v3116_v31, 6 }
0x2bc3   :  { %v3122_v15 = vadd.f32 %v3120_v26, %v8304_v24 }
0x2bc4   :  { %v3126_v25 = vadd.f32 %v3124_v4, %v8301_v34 }
0x2bc5   :  { %7280 = vtanh.f32 %v3122_v15  ;;  %v3127_v36 = vsub.f32 0.0, %v3122_v15 }
0x2bc6   :  { %7282 = vtanh.f32 %v3126_v25  ;;  %v3134_v53 = vsub.f32 0.0, %v3126_v25 }
0x2bc7   :  { %v3128_v39 = vmul.f32 1.442695, %v3127_v36 }
0x2bc8   :  { %v3135_v43 = vmul.f32 1.442695, %v3134_v53 }
0x2bc9   :  { %7284 = vpow2.f32 %v3128_v39 }
0x2bca   :  { %7286 = vpow2.f32 %v3135_v43 }
0x2bcf   :  { %v7281_v40 = vpop.eup %7280 }
0x2bd0   :  { %v7283_v35 = vpop.eup %7282  ;;  %3146 = vrot.lane.b32.xlu1 %v7281_v40, %s7524_s8 }
0x2bd1   :  { %3160 = vrot.lane.b32.xlu0 %v7283_v35, %s7524_s8 }
0x2bd3   :  { %v7285_v37 = vpop.eup %7284 }
0x2bd4   :  { %v7287_v16 = vpop.eup %7286  ;;  %v3130_v8 = vadd.f32 1.0, %v7285_v37 }
0x2bd5   :  { %v3137_v44 = vadd.f32 1.0, %v7287_v16 }
0x2bd6   :  { %7288 = vrcp.f32 %v3130_v8 }
0x2bd7   :  { %7290 = vrcp.f32 %v3137_v44 }
0x2be0   :  { %v7289_v51 = vpop.eup %7288 }
0x2be1   :  { %v7291_v50 = vpop.eup %7290  ;;  %v3144_v41 = vmul.f32 %v7289_v51, %v3142_v28  ;;  %v3356_v28 = vld [vmem:[#allocation12 + $0x80] sm:$0xff] }
0x2be2   :  { %v3158_v17 = vmul.f32 %v7291_v50, %v3156_v33 }
0x2c42   :  { %v3147_v54 = vpop.permute.xlu1 %3146 }
0x2c43   :  { %v3149_v14 = vmul.f32 %v7289_v51, %v3147_v54  ;;  %v3161_v18 = vpop.permute.xlu0 %3160  ;;  %v3357_v54 = vld [vmem:[#allocation12 + $0x88] sm:$0xff] }
0x2c44   :  { %v3163_v2 = vmul.f32 %v7291_v50, %v3161_v18  ;;  %v3359_v18 = vld [vmem:[#allocation12 + $0x98] sm:$0xff] }
0x2c45   :  { %3151 = vrot.lane.b32.xlu1 %v3149_v14, %s7525_s22 }
0x2c46   :  { %3165 = vrot.lane.b32.xlu0 %v3163_v2, %s7525_s22  ;;  %v3340_v2 = vld [vmem:[#allocation12] sm:$0xff] }
0x2cb7   :  { %v3152_v19 = vpop.permute.xlu1 %3151 }
0x2cb8   :  { %v3154_v57 = vadd.f32 %v3152_v19, %v3144_v41  ;;  %v3166_v48 = vpop.permute.xlu0 %3165  ;;  %v6502_v41 = vpack.c.bf16 %v3356_v28, %v3340_v2  ;;  %v3342_v19 = vld [vmem:[#allocation12 + $0x10] sm:$0xff] }
0x2cb9   :  { %v3168_v60 = vadd.f32 %v3166_v48, %v3158_v17  ;;  %v3358_v17 = vld [vmem:[#allocation12 + $0x90] sm:$0xff] }
0x2cba   :  { %7292 = vtanh.f32 %v3154_v57  ;;  %v3286_v35 = vrot.slane %v3154_v57, 6  ;;  %v3373_v57 = vld [vmem:[#allocation12 + $0x108] sm:$0xff]  ;;  %v6534_v48 = vpack.c.bf16 %v3358_v17, %v3342_v19  ;;  %v3486_v28 = vld [vmem:[#allocation12 + $0x490] sm:$0xff]  ;;  %v3503_v19 = vld [vmem:[#allocation12 + $0x518] sm:$0xff] }
0x2cbb   :  { %7294 = vtanh.f32 %v3168_v60  ;;  %v3300_v40 = vrot.slane %v3168_v60, 2  ;;  %v3389_v60 = vld [vmem:[#allocation12 + $0x188] sm:$0xff]  ;;  %v3519_v17 = vld [vmem:[#allocation12 + $0x598] sm:$0xff] }
0x2cc4   :  { %v7293_v32 = vpop.eup %7292 }
0x2cc5   :  { %v7295_v59 = vpop.eup %7294  ;;  %3171 = vrot.lane.b32.xlu1 %v7293_v32, %s7524_s8  ;;  %v3375_v32 = vld [vmem:[#allocation12 + $0x118] sm:$0xff] }
0x2cc6   :  { %3177 = vrot.lane.b32.xlu0 %v7295_v59, %s7524_s8  ;;  %v3391_v59 = vld [vmem:[#allocation12 + $0x198] sm:$0xff] }
0x2d37   :  { %v3172_v0 = vpop.permute.xlu1 %3171 }
0x2d38   :  { %v3174_v58 = vmul.f32 %v7289_v51, %v3172_v0  ;;  %v3178_v12 = vpop.permute.xlu0 %3177  ;;  %v3341_v51 = vld [vmem:[#allocation12 + $0x8] sm:$0xff]  ;;  %v6504_v0 = vpack.c.bf16 %v3389_v60, %v3373_v57 }
0x2d39   :  { %v3180_v38 = vmul.f32 %v7291_v50, %v3178_v12  ;;  %v3343_v50 = vld [vmem:[#allocation12 + $0x18] sm:$0xff]  ;;  %v6500_v14 = vpack.c.bf16 %v3357_v54, %v3341_v51  ;;  %v3372_v12 = vld [vmem:[#allocation12 + $0x100] sm:$0xff] }
0x2d3a   :  { %3182 = vrot.lane.b32.xlu0 %v3174_v58, %s7525_s22  ;;  %v6532_v33 = vpack.c.bf16 %v3359_v18, %v3343_v50  ;;  %v6536_v58 = vpack.c.bf16 %v3391_v59, %v3375_v32  ;;  %v3468_v50 = vld [vmem:[#allocation12 + $0x400] sm:$0xff]  ;;  %v3470_v18 = vld [vmem:[#allocation12 + $0x410] sm:$0xff] }
0x2d3b   :  { %v3186_v52 = vrot.slane %v3180_v38, 6  ;;  %6501 = vmatprep.subr.bf16.mxu0 %v6500_v14  ;;  %v3388_v38 = vld [vmem:[#allocation12 + $0x180] sm:$0xff] }
0x2d3c   :  { %6533 = vmatprep.subr.bf16.mxu1 %v6532_v33  ;;  %6503 = vmatpush1.bf16.msra.mxu0 %v6502_v41  ;;  %v3484_v14 = vld [vmem:[#allocation12 + $0x480] sm:$0xff]  ;;  %v3501_v33 = vld [vmem:[#allocation12 + $0x508] sm:$0xff] }
0x2d3d   :  { %3187 = vrot.lane.b32.xlu1 %v3186_v52, %s7524_s8  ;;  %v3374_v52 = vld [vmem:[#allocation12 + $0x110] sm:$0xff]  ;;  %6505 = vmatprep.subr.bf16.mxu0 %v6504_v0  ;;  %v3517_v41 = vld [vmem:[#allocation12 + $0x588] sm:$0xff]  ;;  %v6518_v57 = vpack.c.bf16 %v3484_v14, %v3468_v50  ;;  %v3500_v32 = vld [vmem:[#allocation12 + $0x500] sm:$0xff] }
0x2d3e   :  { %v6520_v60 = vpack.c.bf16 %v3517_v41, %v3501_v33  ;;  %v3516_v59 = vld [vmem:[#allocation12 + $0x580] sm:$0xff]  ;;  %v3502_v0 = vld [vmem:[#allocation12 + $0x510] sm:$0xff]  ;;  %v3377_v33 = vld [vmem:[#allocation12 + $0x128] sm:$0xff] }
0x2d3f   :  { %v3360_v50 = vld [vmem:[#allocation12 + $0xa0] sm:$0xff]  ;;  %v3393_v41 = vld [vmem:[#allocation12 + $0x1a8] sm:$0xff] }
0x2dac   :  { %v3183_v9 = vpop.permute.xlu0 %3182 }
0x2daf   :  { %v3188_v56 = vpop.permute.xlu1 %3187 }
0x2db0   :  { %v3190_v11 = vsel %vm291_vm2, %v3183_v9, %v3188_v56  ;;  %v6506_v56 = vpack.c.bf16 %v3388_v38, %v3372_v12  ;;  %v3518_v12 = vld [vmem:[#allocation12 + $0x590] sm:$0xff]  ;;  %v3533_v38 = vld [vmem:[#allocation12 + $0x608] sm:$0xff] }
0x2db1   :  { %v3192_v45 = vrot.slane %v3190_v11, 4  ;;  %v3390_v11 = vld [vmem:[#allocation12 + $0x190] sm:$0xff] }
0x2db2   :  { %6507 = vmatpush1.bf16.msra.mxu0 %v6506_v56  ;;  %v3551_v56 = vld [vmem:[#allocation12 + $0x698] sm:$0xff] }
0x2db3   :  { %5717 = vmatmul.mubr.msk.f32.vlgmr.msra.gmra.mrb[22].mxu1 %vm859_vm3, %v3192_v45  ;;  %v3405_v45 = vld [vmem:[#allocation12 + $0x208] sm:$0xff] }
0x2db4   :  { %3818 = vmatprep.mubr.f32.mxu1 %v7522_v49  ;;  %6535 = vmatpush1.bf16.msra.mxu1 %v6534_v48  ;;  %v6550_v48 = vpack.c.bf16 %v3486_v28, %v3470_v18  ;;  %v3362_v28 = vld [vmem:[#allocation12 + $0xb0] sm:$0xff] }
0x2db5   :  { %6537 = vmatprep.subr.bf16.mxu1 %v6536_v58  ;;  %v6552_v58 = vpack.c.bf16 %v3519_v17, %v3503_v19  ;;  %v3379_v19 = vld [vmem:[#allocation12 + $0x138] sm:$0xff] }
0x2db6   :  { %v3395_v17 = vld [vmem:[#allocation12 + $0x1b8] sm:$0xff] }
0x2e86   :  { %v3261_v55 = vpop.f32.mrb[22].mxu1 }
0x2e87   :  { %v3267_v3 = vrot.slane %v3261_v55, 2  ;;  %v3263_v47 = vpop.f32.mrb[23].mxu1  ;;  %v3421_v55 = vld [vmem:[#allocation12 + $0x288] sm:$0xff] }
0x2e88   :  { %v3270_v10 = vadd.f32 %v3263_v47, %v8301_v34 }
0x2e89   :  { %v3269_v13 = vadd.f32 %v3267_v3, %v8304_v24 }
0x2e8a   :  { %7296 = vtanh.f32 %v3270_v10  ;;  %v3278_v27 = vsub.f32 0.0, %v3270_v10  ;;  %v6538_v10 = vpack.c.bf16 %v3390_v11, %v3374_v52  ;;  %v3549_v52 = vld [vmem:[#allocation12 + $0x688] sm:$0xff]  ;;  %v6522_v11 = vpack.c.bf16 %v3516_v59, %v3500_v32  ;;  %v3376_v32 = vld [vmem:[#allocation12 + $0x120] sm:$0xff] }
0x2e8b   :  { %7298 = vtanh.f32 %v3269_v13  ;;  %v3271_v29 = vsub.f32 0.0, %v3269_v13  ;;  %v6508_v13 = vpack.c.bf16 %v3421_v55, %v3405_v45  ;;  %v6554_v45 = vpack.c.bf16 %v3518_v12, %v3502_v0  ;;  %v3392_v59 = vld [vmem:[#allocation12 + $0x1a0] sm:$0xff] }
0x2e8c   :  { %v3279_v46 = vmul.f32 1.442695, %v3278_v27  ;;  %v3404_v27 = vld [vmem:[#allocation12 + $0x200] sm:$0xff]  ;;  %6539 = vmatpush1.bf16.msra.mxu1 %v6538_v10  ;;  %v6524_v55 = vpack.c.bf16 %v3549_v52, %v3533_v38  ;;  %v6600_v12 = vpack.c.bf16 %v3395_v17, %v3379_v19  ;;  %v3378_v38 = vld [vmem:[#allocation12 + $0x130] sm:$0xff] }
0x2e8d   :  { %v3272_v30 = vmul.f32 1.442695, %v3271_v29  ;;  %6509 = vmatprep.subr.bf16.mxu0 %v6508_v13  ;;  %v3534_v13 = vld [vmem:[#allocation12 + $0x610] sm:$0xff] }
0x2e8e   :  { %7300 = vpow2.f32 %v3279_v46  ;;  %v3394_v52 = vld [vmem:[#allocation12 + $0x1b0] sm:$0xff] }
0x2e8f   :  { %7302 = vpow2.f32 %v3272_v30  ;;  %v3420_v30 = vld [vmem:[#allocation12 + $0x280] sm:$0xff]  ;;  %v3506_v17 = vld [vmem:[#allocation12 + $0x530] sm:$0xff] }
0x2e94   :  { %v7297_v7 = vpop.eup %7296 }
0x2e95   :  { %v7299_v23 = vpop.eup %7298  ;;  %3304 = vrot.lane.b32.xlu0 %v7297_v7, %s7524_s8  ;;  %v3407_v7 = vld [vmem:[#allocation12 + $0x218] sm:$0xff] }
0x2e96   :  { %3290 = vrot.lane.b32.xlu1 %v7299_v23, %s7524_s8  ;;  %v3423_v23 = vld [vmem:[#allocation12 + $0x298] sm:$0xff] }
0x2e97   :  { %v6540_v46 = vpack.c.bf16 %v3423_v23, %v3407_v7  ;;  %v3550_v7 = vld [vmem:[#allocation12 + $0x690] sm:$0xff] }
0x2e98   :  { %v7301_v20 = vpop.eup %7300 }
0x2e99   :  { %v7303_v22 = vpop.eup %7302  ;;  %v3281_v21 = vadd.f32 1.0, %v7301_v20  ;;  %v3406_v20 = vld [vmem:[#allocation12 + $0x210] sm:$0xff]  ;;  %6541 = vmatprep.subr.bf16.mxu1 %v6540_v46  ;;  %v3581_v46 = vld [vmem:[#allocation12 + $0x788] sm:$0xff] }
0x2e9a   :  { %v3274_v34 = vadd.f32 1.0, %v7303_v22  ;;  %v3422_v22 = vld [vmem:[#allocation12 + $0x290] sm:$0xff] }
0x2e9b   :  { %7304 = vrcp.f32 %v3281_v21 }
0x2e9c   :  { %7306 = vrcp.f32 %v3274_v34  ;;  %v6510_v34 = vpack.c.bf16 %v3420_v30, %v3404_v27  ;;  %v6558_v27 = vpack.c.bf16 %v3550_v7, %v3534_v13  ;;  %v3567_v30 = vld [vmem:[#allocation12 + $0x718] sm:$0xff]  ;;  %v3410_v7 = vld [vmem:[#allocation12 + $0x230] sm:$0xff] }
0x2e9e   :  { %6511 = vmatpush1.bf16.msra.mxu0 %v6510_v34  ;;  %v3580_v34 = vld [vmem:[#allocation12 + $0x780] sm:$0xff] }
0x2ea5   :  { %v7305_v24 = vpop.eup %7304 }
0x2ea6   :  { %v7307_v31 = vpop.eup %7306  ;;  %v3302_v36 = vmul.f32 %v7305_v24, %v3300_v40  ;;  %v3455_v40 = vld [vmem:[#allocation12 + $0x398] sm:$0xff] }
0x2ea7   :  { %v3288_v39 = vmul.f32 %v7307_v31, %v3286_v35  ;;  %v3436_v35 = vld [vmem:[#allocation12 + $0x300] sm:$0xff] }
0x2f07   :  { %v3305_v26 = vpop.permute.xlu0 %3304 }
0x2f08   :  { %v3307_v4 = vmul.f32 %v7305_v24, %v3305_v26  ;;  %v3291_v15 = vpop.permute.xlu1 %3290  ;;  %v3437_v26 = vld [vmem:[#allocation12 + $0x308] sm:$0xff] }
0x2f09   :  { %v3293_v25 = vmul.f32 %v7307_v31, %v3291_v15  ;;  %v3439_v15 = vld [vmem:[#allocation12 + $0x318] sm:$0xff] }
0x2f0a   :  { %3309 = vrot.lane.b32.xlu0 %v3307_v4, %s7525_s22  ;;  %v3453_v4 = vld [vmem:[#allocation12 + $0x388] sm:$0xff] }
0x2f0b   :  { %3295 = vrot.lane.b32.xlu1 %v3293_v25, %s7525_s22  ;;  %v6512_v25 = vpack.c.bf16 %v3453_v4, %v3437_v26 }
0x2f0d   :  { %6513 = vmatprep.subr.bf16.mxu0 %v6512_v25 }
0x2f7c   :  { %v3310_v53 = vpop.permute.xlu0 %3309 }
0x2f7d   :  { %v3312_v43 = vadd.f32 %v3310_v53, %v3302_v36  ;;  %v3296_v37 = vpop.permute.xlu1 %3295  ;;  %v3452_v36 = vld [vmem:[#allocation12 + $0x380] sm:$0xff]  ;;  %v3438_v53 = vld [vmem:[#allocation12 + $0x310] sm:$0xff] }
0x2f7e   :  { %v3298_v16 = vadd.f32 %v3296_v37, %v3288_v39  ;;  %v3454_v39 = vld [vmem:[#allocation12 + $0x390] sm:$0xff]  ;;  %v3485_v37 = vld [vmem:[#allocation12 + $0x488] sm:$0xff] }
0x2f7f   :  { %7308 = vtanh.f32 %v3312_v43  ;;  %v3469_v43 = vld [vmem:[#allocation12 + $0x408] sm:$0xff]  ;;  %v6546_v51 = vpack.c.bf16 %v3454_v39, %v3438_v53  ;;  %v3363_v53 = vld [vmem:[#allocation12 + $0xb8] sm:$0xff] }
0x2f80   :  { %7310 = vtanh.f32 %v3298_v16  ;;  %v3471_v16 = vld [vmem:[#allocation12 + $0x418] sm:$0xff]  ;;  %v6516_v54 = vpack.c.bf16 %v3485_v37, %v3469_v43  ;;  %v2010_v37 = vrot.slane %v8242_v42, 2 }
0x2f89   :  { %v7309_v8 = vpop.eup %7308 }
0x2f8a   :  { %v7311_v44 = vpop.eup %7310  ;;  %3321 = vrot.lane.b32.xlu0 %v7309_v8, %s7524_s8  ;;  %v3487_v8 = vld [vmem:[#allocation12 + $0x498] sm:$0xff] }
0x2f8b   :  { %3315 = vrot.lane.b32.xlu1 %v7311_v44, %s7524_s8  ;;  %v6514_v44 = vpack.c.bf16 %v3452_v36, %v3436_v35  ;;  %v6548_v2 = vpack.c.bf16 %v3487_v8, %v3471_v16  ;;  %v3361_v35 = vld [vmem:[#allocation12 + $0xa8] sm:$0xff]  ;;  %v3347_v36 = vld [vmem:[#allocation12 + $0x38] sm:$0xff] }
0x2f8c   :  { %v6596_v39 = vpack.c.bf16 %v3363_v53, %v3347_v36  ;;  %v3491_v36 = vld [vmem:[#allocation12 + $0x4b8] sm:$0xff] }
0x2f8d   :  { %6515 = vmatpush1.bf16.msra.mxu0 %v6514_v44 }
0x2f8e   :  { %6517 = vmatprep.subr.bf16.mxu0 %v6516_v54  ;;  %v3344_v54 = vld [vmem:[#allocation12 + $0x20] sm:$0xff] }
0x2f91   :  { %6519 = vmatpush1.bf16.msra.mxu0 %v6518_v57 }
0x2f92   :  { %6521 = vmatprep.subr.bf16.mxu0 %v6520_v60 }
0x2f95   :  { %6523 = vmatpush1.bf16.msra.mxu0 %v6522_v11  ;;  %v3411_v11 = vld [vmem:[#allocation12 + $0x238] sm:$0xff] }
0x2f96   :  { %6525 = vmatprep.subr.bf16.mxu0 %v6524_v55  ;;  %v6602_v55 = vpack.c.bf16 %v3394_v52, %v3378_v38  ;;  %v3552_v38 = vld [vmem:[#allocation12 + $0x6a0] sm:$0xff] }
0x2ffc   :  { %v3322_v9 = vpop.permute.xlu0 %3321 }
0x2ffd   :  { %v3324_v3 = vmul.f32 %v7305_v24, %v3322_v9  ;;  %v3316_v47 = vpop.permute.xlu1 %3315  ;;  %v6542_v24 = vpack.c.bf16 %v3422_v22, %v3406_v20  ;;  %v3535_v9 = vld [vmem:[#allocation12 + $0x618] sm:$0xff] }
0x2ffe   :  { %v3318_v29 = vmul.f32 %v7307_v31, %v3316_v47  ;;  %v6544_v31 = vpack.c.bf16 %v3455_v40, %v3439_v15  ;;  %v3548_v47 = vld [vmem:[#allocation12 + $0x680] sm:$0xff]  ;;  %v6556_v10 = vpack.c.bf16 %v3551_v56, %v3535_v9  ;;  %v3583_v22 = vld [vmem:[#allocation12 + $0x798] sm:$0xff]  ;;  %v3566_v15 = vld [vmem:[#allocation12 + $0x710] sm:$0xff] }
0x2fff   :  { %v3330_v21 = vrot.slane %v3324_v3, 2  ;;  %6543 = vmatpush1.bf16.msra.mxu1 %v6542_v24  ;;  %v3532_v3 = vld [vmem:[#allocation12 + $0x600] sm:$0xff]  ;;  %v6560_v26 = vpack.c.bf16 %v3583_v22, %v3567_v30  ;;  %v3582_v24 = vld [vmem:[#allocation12 + $0x790] sm:$0xff]  ;;  %v3345_v40 = vld [vmem:[#allocation12 + $0x28] sm:$0xff] }
0x3000   :  { %3326 = vrot.lane.b32.xlu0 %v3318_v29, %s7525_s22  ;;  %6545 = vmatprep.subr.bf16.mxu1 %v6544_v31  ;;  %v6526_v23 = vpack.c.bf16 %v3548_v47, %v3532_v3  ;;  %v3565_v29 = vld [vmem:[#allocation12 + $0x708] sm:$0xff]  ;;  %v6562_v25 = vpack.c.bf16 %v3582_v24, %v3566_v15  ;;  %v6564_v31 = vpack.c.bf16 %v3361_v35, %v3345_v40  ;;  %v3408_v3 = vld [vmem:[#allocation12 + $0x220] sm:$0xff]  ;;  %v3459_v30 = vld [vmem:[#allocation12 + $0x3b8] sm:$0xff] }
0x3001   :  { %3331 = vrot.lane.b32.xlu1 %v3330_v21, %s7524_s8  ;;  %v6528_v20 = vpack.c.bf16 %v3581_v46, %v3565_v29  ;;  %v3564_v21 = vld [vmem:[#allocation12 + $0x700] sm:$0xff]  ;;  %v3409_v9 = vld [vmem:[#allocation12 + $0x228] sm:$0xff]  ;;  %v3443_v46 = vld [vmem:[#allocation12 + $0x338] sm:$0xff] }
0x3002   :  { %6527 = vmatpush1.bf16.msra.mxu0 %v6526_v23  ;;  %v6530_v4 = vpack.c.bf16 %v3580_v34, %v3564_v21  ;;  %v3425_v56 = vld [vmem:[#allocation12 + $0x2a8] sm:$0xff]  ;;  %v3424_v47 = vld [vmem:[#allocation12 + $0x2a0] sm:$0xff]  ;;  %v3426_v23 = vld [vmem:[#allocation12 + $0x2b0] sm:$0xff] }
0x3003   :  { %6547 = vmatpush1.bf16.msra.mxu1 %v6546_v51  ;;  %6529 = vmatprep.subr.bf16.mxu0 %v6528_v20  ;;  %v3457_v29 = vld [vmem:[#allocation12 + $0x3a8] sm:$0xff]  ;;  %v6574_v20 = vpack.c.bf16 %v3424_v47, %v3408_v3  ;;  %v6606_v22 = vpack.c.bf16 %v3426_v23, %v3410_v7  ;;  %v3440_v21 = vld [vmem:[#allocation12 + $0x320] sm:$0xff]  ;;  %v3442_v15 = vld [vmem:[#allocation12 + $0x330] sm:$0xff] }
0x3004   :  { %6549 = vmatprep.subr.bf16.mxu1 %v6548_v2  ;;  %v3346_v2 = vld [vmem:[#allocation12 + $0x30] sm:$0xff]  ;;  %v3456_v34 = vld [vmem:[#allocation12 + $0x3a0] sm:$0xff]  ;;  %v3489_v40 = vld [vmem:[#allocation12 + $0x4a8] sm:$0xff] }
0x3005   :  { %v6598_v60 = vpack.c.bf16 %v3362_v28, %v3346_v2  ;;  %v3458_v24 = vld [vmem:[#allocation12 + $0x3b0] sm:$0xff]  ;;  %v3475_v35 = vld [vmem:[#allocation12 + $0x438] sm:$0xff]  ;;  %v3504_v28 = vld [vmem:[#allocation12 + $0x520] sm:$0xff] }
0x3006   :  { %6531 = vmatpush1.bf16.msra.mxu0 %v6530_v4  ;;  %v6608_v4 = vpack.c.bf16 %v3459_v30, %v3443_v46  ;;  %v6610_v53 = vpack.c.bf16 %v3458_v24, %v3442_v15  ;;  %v3587_v3 = vld [vmem:[#allocation12 + $0x7b8] sm:$0xff]  ;;  %v3584_v7 = vld [vmem:[#allocation12 + $0x7a0] sm:$0xff]  ;;  %v3586_v46 = vld [vmem:[#allocation12 + $0x7b0] sm:$0xff] }
0x3007   :  { %6551 = vmatpush1.bf16.msra.mxu1 %v6550_v48  ;;  %6565 = vmatprep.subr.bf16.mxu0 %v6564_v31  ;;  %v6566_v48 = vpack.c.bf16 %v3360_v50, %v3344_v54  ;;  %v6578_v31 = vpack.c.bf16 %v3456_v34, %v3440_v21  ;;  %v3521_v54 = vld [vmem:[#allocation12 + $0x5a8] sm:$0xff]  ;;  %v3507_v50 = vld [vmem:[#allocation12 + $0x538] sm:$0xff]  ;;  %v3364_v15 = vld [vmem:[#allocation12 + $0xc0] sm:$0xff] }
0x3008   :  { %6553 = vmatprep.subr.bf16.mxu1 %v6552_v58  ;;  %v6568_v58 = vpack.c.bf16 %v3393_v41, %v3377_v33  ;;  %v3520_v33 = vld [vmem:[#allocation12 + $0x5a0] sm:$0xff]  ;;  %v3349_v30 = vld [vmem:[#allocation12 + $0x48] sm:$0xff]  ;;  %v3367_v21 = vld [vmem:[#allocation12 + $0xd8] sm:$0xff] }
0x300b   :  { %6555 = vmatpush1.bf16.msra.mxu1 %v6554_v45  ;;  %v3427_v45 = vld [vmem:[#allocation12 + $0x2b8] sm:$0xff] }
0x300c   :  { %6557 = vmatprep.subr.bf16.mxu1 %v6556_v10  ;;  %v6572_v10 = vpack.c.bf16 %v3425_v56, %v3409_v9  ;;  %v6604_v13 = vpack.c.bf16 %v3427_v45, %v3411_v11  ;;  %v3538_v56 = vld [vmem:[#allocation12 + $0x630] sm:$0xff]  ;;  %v3569_v45 = vld [vmem:[#allocation12 + $0x728] sm:$0xff] }
0x300d   :  { %v3554_v11 = vld [vmem:[#allocation12 + $0x6b0] sm:$0xff] }
0x300f   :  { %6559 = vmatpush1.bf16.msra.mxu1 %v6558_v27  ;;  %v3441_v27 = vld [vmem:[#allocation12 + $0x328] sm:$0xff] }
0x3010   :  { %6561 = vmatprep.subr.bf16.mxu1 %v6560_v26  ;;  %v6576_v26 = vpack.c.bf16 %v3457_v29, %v3441_v27  ;;  %v3570_v29 = vld [vmem:[#allocation12 + $0x730] sm:$0xff] }
0x3013   :  { %6563 = vmatpush1.bf16.msra.mxu1 %v6562_v25  ;;  %v3473_v25 = vld [vmem:[#allocation12 + $0x428] sm:$0xff] }
0x3014   :  { %6597 = vmatprep.subr.bf16.mxu1 %v6596_v39  ;;  %v3472_v39 = vld [vmem:[#allocation12 + $0x420] sm:$0xff] }
0x3072   :  { %v3327_v43 = vpop.permute.xlu0 %3326 }
0x3073   :  { %v3332_v16 = vpop.permute.xlu1 %3331 }
0x3074   :  { %v3334_v8 = vsel %vm291_vm2, %v3327_v43, %v3332_v16  ;;  %v3488_v43 = vld [vmem:[#allocation12 + $0x4a0] sm:$0xff]  ;;  %v6612_v16 = vpack.c.bf16 %v3491_v36, %v3475_v35  ;;  %v3366_v35 = vld [vmem:[#allocation12 + $0xd0] sm:$0xff]  ;;  %v3381_v36 = vld [vmem:[#allocation12 + $0x148] sm:$0xff] }
0x3075   :  { %v7049_v44 = vpack.i.bf16 %v3334_v8, %v2010_v37  ;;  %v6580_v37 = vpack.c.bf16 %v3489_v40, %v3473_v25  ;;  %v3474_v8 = vld [vmem:[#allocation12 + $0x430] sm:$0xff] }
0x3076   :  { %v3350_v40 = vld [vmem:[#allocation12 + $0x50] sm:$0xff] }
0x3077   :  { %7050 = vrot.lane.b32.xlu0 %v7049_v44, %s7524_s8  ;;  %v3490_v44 = vld [vmem:[#allocation12 + $0x4b0] sm:$0xff] }
0x3078   :  { %v6614_v2 = vpack.c.bf16 %v3490_v44, %v3474_v8  ;;  %v3396_v8 = vld [vmem:[#allocation12 + $0x1c0] sm:$0xff] }
0x30e9   :  { %v7051_v51 = vpop.permute.xlu0 %7050 }
0x30ea   :  { %v7053_v14 = vunpack.i.h.bf16 %v7051_v51  ;;  %v7052_v18 = vunpack.i.l.bf16 %v7051_v51  ;;  %v3505_v51 = vld [vmem:[#allocation12 + $0x528] sm:$0xff] }
0x30eb   :  { %v6584_v41 = vpack.c.bf16 %v3521_v54, %v3505_v51  ;;  %v3382_v54 = vld [vmem:[#allocation12 + $0x150] sm:$0xff] }
0x30ec   :  { %v2014_v42 = vsel %vm291_vm2, %v8280_v1, %v7052_v18  ;;  %v6570_v1 = vpack.c.bf16 %v3392_v59, %v3376_v32  ;;  %v6582_v18 = vpack.c.bf16 %v3488_v43, %v3472_v39  ;;  %v3555_v32 = vld [vmem:[#allocation12 + $0x6b8] sm:$0xff]  ;;  %v6586_v59 = vpack.c.bf16 %v3520_v33, %v3504_v28 }
0x30ed   :  { %v3339_v57 = vsel %vm859_vm3, %v2014_v42, %v7053_v14  ;;  %v3523_v14 = vld [vmem:[#allocation12 + $0x5b8] sm:$0xff]  ;;  %v3522_v42 = vld [vmem:[#allocation12 + $0x5b0] sm:$0xff] }
0x30ee   :  { %v8480_v0 = vrot.slane %v3339_v57, 6  ;;  %v6616_v19 = vpack.c.bf16 %v3523_v14, %v3507_v50  ;;  %v3537_v57 = vld [vmem:[#allocation12 + $0x628] sm:$0xff]  ;;  %v3399_v39 = vld [vmem:[#allocation12 + $0x1d8] sm:$0xff]  ;;  %v3398_v50 = vld [vmem:[#allocation12 + $0x1d0] sm:$0xff] }
0x30ef   :  { %v3413_v14 = vld [vmem:[#allocation12 + $0x248] sm:$0xff]  ;;  %v3431_v28 = vld [vmem:[#allocation12 + $0x2d8] sm:$0xff] }
0x30f0   :  { %3748 = vmatmul.mubr.f32.vlgmr.msra.gmra.mrb[26].mxu0 %v8480_v0  ;;  %3819 = vmatmul.mubr.f32.vlgmr.msra.gmra.mrb[24].mxu1 %v8480_v0 }
0x30f1   :  { %6567 = vmatpush1.bf16.msra.mxu0 %v6566_v48  ;;  %6599 = vmatpush1.bf16.msra.mxu1 %v6598_v60  ;;  %v3553_v48 = vld [vmem:[#allocation12 + $0x6a8] sm:$0xff]  ;;  %v3539_v60 = vld [vmem:[#allocation12 + $0x638] sm:$0xff] }
0x30f2   :  { %6569 = vmatprep.subr.bf16.mxu0 %v6568_v58  ;;  %6601 = vmatprep.subr.bf16.mxu1 %v6600_v12  ;;  %v6618_v58 = vpack.c.bf16 %v3522_v42, %v3506_v17  ;;  %v3536_v12 = vld [vmem:[#allocation12 + $0x620] sm:$0xff]  ;;  %v6588_v52 = vpack.c.bf16 %v3553_v48, %v3537_v57  ;;  %v6620_v9 = vpack.c.bf16 %v3555_v32, %v3539_v60  ;;  %v3414_v48 = vld [vmem:[#allocation12 + $0x250] sm:$0xff]  ;;  %v3445_v32 = vld [vmem:[#allocation12 + $0x348] sm:$0xff] }
0x30f3   :  { %3889 = vmatprep.mubr.f32.mxu0 %v7522_v49  ;;  %3960 = vmatprep.mubr.f32.mxu1 %v7522_v49  ;;  %v6590_v47 = vpack.c.bf16 %v3552_v38, %v3536_v12  ;;  %v3428_v17 = vld [vmem:[#allocation12 + $0x2c0] sm:$0xff]  ;;  %v3430_v60 = vld [vmem:[#allocation12 + $0x2d0] sm:$0xff]  ;;  %v3463_v12 = vld [vmem:[#allocation12 + $0x3d8] sm:$0xff] }
0x30f5   :  { %6571 = vmatpush1.bf16.msra.mxu0 %v6570_v1  ;;  %6603 = vmatpush1.bf16.msra.mxu1 %v6602_v55  ;;  %v3585_v1 = vld [vmem:[#allocation12 + $0x7a8] sm:$0xff]  ;;  %v3571_v55 = vld [vmem:[#allocation12 + $0x738] sm:$0xff] }
0x30f6   :  { %6573 = vmatprep.subr.bf16.mxu0 %v6572_v10  ;;  %6605 = vmatprep.subr.bf16.mxu1 %v6604_v13  ;;  %v6622_v10 = vpack.c.bf16 %v3554_v11, %v3538_v56  ;;  %v3568_v13 = vld [vmem:[#allocation12 + $0x720] sm:$0xff]  ;;  %v6592_v23 = vpack.c.bf16 %v3585_v1, %v3569_v45  ;;  %v6624_v27 = vpack.c.bf16 %v3587_v3, %v3571_v55  ;;  %v3446_v1 = vld [vmem:[#allocation12 + $0x350] sm:$0xff]  ;;  %v3477_v3 = vld [vmem:[#allocation12 + $0x448] sm:$0xff] }
0x30f7   :  { %v6594_v34 = vpack.c.bf16 %v3584_v7, %v3568_v13  ;;  %v3460_v56 = vld [vmem:[#allocation12 + $0x3c0] sm:$0xff]  ;;  %v3462_v55 = vld [vmem:[#allocation12 + $0x3d0] sm:$0xff]  ;;  %v3495_v13 = vld [vmem:[#allocation12 + $0x4d8] sm:$0xff] }
0x30f9   :  { %6575 = vmatpush1.bf16.msra.mxu0 %v6574_v20  ;;  %6607 = vmatpush1.bf16.msra.mxu1 %v6606_v22  ;;  %v3365_v20 = vld [vmem:[#allocation12 + $0xc8] sm:$0xff]  ;;  %v3351_v22 = vld [vmem:[#allocation12 + $0x58] sm:$0xff] }
0x30fa   :  { %6577 = vmatprep.subr.bf16.mxu0 %v6576_v26  ;;  %6609 = vmatprep.subr.bf16.mxu1 %v6608_v4  ;;  %v6626_v26 = vpack.c.bf16 %v3586_v46, %v3570_v29  ;;  %v3348_v4 = vld [vmem:[#allocation12 + $0x40] sm:$0xff]  ;;  %v6628_v24 = vpack.c.bf16 %v3365_v20, %v3349_v30  ;;  %v6660_v25 = vpack.c.bf16 %v3367_v21, %v3351_v22  ;;  %v3478_v20 = vld [vmem:[#allocation12 + $0x450] sm:$0xff]  ;;  %v3509_v21 = vld [vmem:[#allocation12 + $0x548] sm:$0xff] }
0x30fb   :  { %v6630_v43 = vpack.c.bf16 %v3364_v15, %v3348_v4  ;;  %v3492_v29 = vld [vmem:[#allocation12 + $0x4c0] sm:$0xff]  ;;  %v3494_v22 = vld [vmem:[#allocation12 + $0x4d0] sm:$0xff]  ;;  %v3527_v4 = vld [vmem:[#allocation12 + $0x5d8] sm:$0xff] }
0x30fd   :  { %6579 = vmatpush1.bf16.msra.mxu0 %v6578_v31  ;;  %6611 = vmatpush1.bf16.msra.mxu1 %v6610_v53  ;;  %v3397_v31 = vld [vmem:[#allocation12 + $0x1c8] sm:$0xff]  ;;  %v3383_v53 = vld [vmem:[#allocation12 + $0x158] sm:$0xff] }
0x30fe   :  { %6581 = vmatprep.subr.bf16.mxu0 %v6580_v37  ;;  %6613 = vmatprep.subr.bf16.mxu1 %v6612_v16  ;;  %v6662_v37 = vpack.c.bf16 %v3366_v35, %v3350_v40  ;;  %v3380_v16 = vld [vmem:[#allocation12 + $0x140] sm:$0xff]  ;;  %v6632_v44 = vpack.c.bf16 %v3397_v31, %v3381_v36  ;;  %v6664_v51 = vpack.c.bf16 %v3399_v39, %v3383_v53  ;;  %v3510_v31 = vld [vmem:[#allocation12 + $0x550] sm:$0xff]  ;;  %v3541_v39 = vld [vmem:[#allocation12 + $0x648] sm:$0xff] }
0x30ff   :  { %v6634_v33 = vpack.c.bf16 %v3396_v8, %v3380_v16  ;;  %v3524_v40 = vld [vmem:[#allocation12 + $0x5c0] sm:$0xff]  ;;  %v3526_v53 = vld [vmem:[#allocation12 + $0x5d0] sm:$0xff]  ;;  %v3559_v16 = vld [vmem:[#allocation12 + $0x6d8] sm:$0xff] }
0x3101   :  { %6583 = vmatpush1.bf16.msra.mxu0 %v6582_v18  ;;  %6615 = vmatpush1.bf16.msra.mxu1 %v6614_v2  ;;  %v3429_v18 = vld [vmem:[#allocation12 + $0x2c8] sm:$0xff]  ;;  %v3415_v2 = vld [vmem:[#allocation12 + $0x258] sm:$0xff] }
0x3102   :  { %6585 = vmatprep.subr.bf16.mxu0 %v6584_v41  ;;  %6617 = vmatprep.subr.bf16.mxu1 %v6616_v19  ;;  %v6666_v41 = vpack.c.bf16 %v3398_v50, %v3382_v54  ;;  %v3412_v19 = vld [vmem:[#allocation12 + $0x240] sm:$0xff]  ;;  %v6636_v42 = vpack.c.bf16 %v3429_v18, %v3413_v14  ;;  %v6668_v57 = vpack.c.bf16 %v3431_v28, %v3415_v2  ;;  %v3542_v18 = vld [vmem:[#allocation12 + $0x650] sm:$0xff]  ;;  %v3573_v28 = vld [vmem:[#allocation12 + $0x748] sm:$0xff] }
0x3103   :  { %v6638_v38 = vpack.c.bf16 %v3428_v17, %v3412_v19  ;;  %v3556_v54 = vld [vmem:[#allocation12 + $0x6c0] sm:$0xff]  ;;  %v3558_v2 = vld [vmem:[#allocation12 + $0x6d0] sm:$0xff]  ;;  %v3591_v19 = vld [vmem:[#allocation12 + $0x7d8] sm:$0xff] }
0x3105   :  { %6587 = vmatpush1.bf16.msra.mxu0 %v6586_v59  ;;  %6619 = vmatpush1.bf16.msra.mxu1 %v6618_v58  ;;  %v3461_v59 = vld [vmem:[#allocation12 + $0x3c8] sm:$0xff]  ;;  %v3447_v58 = vld [vmem:[#allocation12 + $0x358] sm:$0xff] }
0x3106   :  { %6589 = vmatprep.subr.bf16.mxu0 %v6588_v52  ;;  %6621 = vmatprep.subr.bf16.mxu1 %v6620_v9  ;;  %v6670_v52 = vpack.c.bf16 %v3430_v60, %v3414_v48  ;;  %v3444_v9 = vld [vmem:[#allocation12 + $0x340] sm:$0xff]  ;;  %v6640_v11 = vpack.c.bf16 %v3461_v59, %v3445_v32  ;;  %v6672_v45 = vpack.c.bf16 %v3463_v12, %v3447_v58  ;;  %v3574_v59 = vld [vmem:[#allocation12 + $0x750] sm:$0xff]  ;;  %v3353_v12 = vld [vmem:[#allocation12 + $0x68] sm:$0xff] }
0x3107   :  { %v6642_v7 = vpack.c.bf16 %v3460_v56, %v3444_v9  ;;  %v3588_v48 = vld [vmem:[#allocation12 + $0x7c0] sm:$0xff]  ;;  %v3590_v58 = vld [vmem:[#allocation12 + $0x7d0] sm:$0xff]  ;;  %v3371_v9 = vld [vmem:[#allocation12 + $0xf8] sm:$0xff] }
0x3109   :  { %6591 = vmatpush1.bf16.msra.mxu0 %v6590_v47  ;;  %6623 = vmatpush1.bf16.msra.mxu1 %v6622_v10  ;;  %v3493_v47 = vld [vmem:[#allocation12 + $0x4c8] sm:$0xff]  ;;  %v3479_v10 = vld [vmem:[#allocation12 + $0x458] sm:$0xff] }
0x310a   :  { %6593 = vmatprep.subr.bf16.mxu0 %v6592_v23  ;;  %6625 = vmatprep.subr.bf16.mxu1 %v6624_v27  ;;  %v6674_v23 = vpack.c.bf16 %v3462_v55, %v3446_v1  ;;  %v3476_v27 = vld [vmem:[#allocation12 + $0x440] sm:$0xff]  ;;  %v6644_v46 = vpack.c.bf16 %v3493_v47, %v3477_v3  ;;  %v6676_v30 = vpack.c.bf16 %v3495_v13, %v3479_v10  ;;  %v3354_v47 = vld [vmem:[#allocation12 + $0x70] sm:$0xff]  ;;  %v3385_v13 = vld [vmem:[#allocation12 + $0x168] sm:$0xff] }
0x310b   :  { %v6646_v15 = vpack.c.bf16 %v3492_v29, %v3476_v27  ;;  %v3368_v1 = vld [vmem:[#allocation12 + $0xe0] sm:$0xff]  ;;  %v3370_v10 = vld [vmem:[#allocation12 + $0xf0] sm:$0xff]  ;;  %v3403_v27 = vld [vmem:[#allocation12 + $0x1f8] sm:$0xff] }
0x310d   :  { %6595 = vmatpush1.bf16.msra.mxu0 %v6594_v34  ;;  %6627 = vmatpush1.bf16.msra.mxu1 %v6626_v26  ;;  %v3525_v34 = vld [vmem:[#allocation12 + $0x5c8] sm:$0xff]  ;;  %v3511_v26 = vld [vmem:[#allocation12 + $0x558] sm:$0xff] }
0x310e   :  { %6629 = vmatprep.subr.bf16.mxu0 %v6628_v24  ;;  %6661 = vmatprep.subr.bf16.mxu1 %v6660_v25  ;;  %v6678_v24 = vpack.c.bf16 %v3494_v22, %v3478_v20  ;;  %v3508_v25 = vld [vmem:[#allocation12 + $0x540] sm:$0xff]  ;;  %v6648_v35 = vpack.c.bf16 %v3525_v34, %v3509_v21  ;;  %v6680_v36 = vpack.c.bf16 %v3527_v4, %v3511_v26  ;;  %v3386_v34 = vld [vmem:[#allocation12 + $0x170] sm:$0xff]  ;;  %v3417_v4 = vld [vmem:[#allocation12 + $0x268] sm:$0xff] }
0x310f   :  { %v6650_v8 = vpack.c.bf16 %v3524_v40, %v3508_v25  ;;  %v3400_v20 = vld [vmem:[#allocation12 + $0x1e0] sm:$0xff]  ;;  %v3402_v26 = vld [vmem:[#allocation12 + $0x1f0] sm:$0xff]  ;;  %v3435_v25 = vld [vmem:[#allocation12 + $0x2f8] sm:$0xff] }
0x3110   :  { %3890 = vmatmul.mubr.f32.vlgmr.msra.gmra.mrb[28].mxu0 %v8480_v0  ;;  %3961 = vmatmul.mubr.f32.vlgmr.msra.gmra.mrb[26].mxu1 %v8480_v0 }
0x3111   :  { %6631 = vmatpush1.bf16.msra.mxu0 %v6630_v43  ;;  %6663 = vmatpush1.bf16.msra.mxu1 %v6662_v37  ;;  %v3557_v43 = vld [vmem:[#allocation12 + $0x6c8] sm:$0xff]  ;;  %v3543_v37 = vld [vmem:[#allocation12 + $0x658] sm:$0xff] }
0x3112   :  { %6633 = vmatprep.subr.bf16.mxu0 %v6632_v44  ;;  %6665 = vmatprep.subr.bf16.mxu1 %v6664_v51  ;;  %v6682_v44 = vpack.c.bf16 %v3526_v53, %v3510_v31  ;;  %v3540_v51 = vld [vmem:[#allocation12 + $0x640] sm:$0xff]  ;;  %v6652_v50 = vpack.c.bf16 %v3557_v43, %v3541_v39  ;;  %v6684_v14 = vpack.c.bf16 %v3559_v16, %v3543_v37  ;;  %v3418_v43 = vld [vmem:[#allocation12 + $0x270] sm:$0xff]  ;;  %v3449_v16 = vld [vmem:[#allocation12 + $0x368] sm:$0xff] }
0x3113   :  { %4031 = vmatprep.mubr.f32.mxu0 %v7522_v49  ;;  %4102 = vmatprep.mubr.f32.mxu1 %v7522_v49  ;;  %v6654_v17 = vpack.c.bf16 %v3556_v54, %v3540_v51  ;;  %v3432_v31 = vld [vmem:[#allocation12 + $0x2e0] sm:$0xff]  ;;  %v3434_v37 = vld [vmem:[#allocation12 + $0x2f0] sm:$0xff]  ;;  %v3467_v51 = vld [vmem:[#allocation12 + $0x3f8] sm:$0xff] }
0x3115   :  { %6635 = vmatpush1.bf16.msra.mxu0 %v6634_v33  ;;  %6667 = vmatpush1.bf16.msra.mxu1 %v6666_v41  ;;  %v3589_v33 = vld [vmem:[#allocation12 + $0x7c8] sm:$0xff]  ;;  %v3575_v41 = vld [vmem:[#allocation12 + $0x758] sm:$0xff] }
0x3116   :  { %6637 = vmatprep.subr.bf16.mxu0 %v6636_v42  ;;  %6669 = vmatprep.subr.bf16.mxu1 %v6668_v57  ;;  %v6686_v42 = vpack.c.bf16 %v3558_v2, %v3542_v18  ;;  %v3572_v57 = vld [vmem:[#allocation12 + $0x740] sm:$0xff]  ;;  %v6656_v60 = vpack.c.bf16 %v3589_v33, %v3573_v28  ;;  %v6688_v32 = vpack.c.bf16 %v3591_v19, %v3575_v41  ;;  %v3450_v33 = vld [vmem:[#allocation12 + $0x370] sm:$0xff]  ;;  %v3481_v19 = vld [vmem:[#allocation12 + $0x468] sm:$0xff] }
0x3117   :  { %v6658_v56 = vpack.c.bf16 %v3588_v48, %v3572_v57  ;;  %v3464_v18 = vld [vmem:[#allocation12 + $0x3e0] sm:$0xff]  ;;  %v3466_v41 = vld [vmem:[#allocation12 + $0x3f0] sm:$0xff]  ;;  %v3499_v57 = vld [vmem:[#allocation12 + $0x4f8] sm:$0xff] }
0x3119   :  { %6639 = vmatpush1.bf16.msra.mxu0 %v6638_v38  ;;  %6671 = vmatpush1.bf16.msra.mxu1 %v6670_v52  ;;  %v3369_v38 = vld [vmem:[#allocation12 + $0xe8] sm:$0xff]  ;;  %v3355_v52 = vld [vmem:[#allocation12 + $0x78] sm:$0xff] }
0x311a   :  { %6641 = vmatprep.subr.bf16.mxu0 %v6640_v11  ;;  %6673 = vmatprep.subr.bf16.mxu1 %v6672_v45  ;;  %v6690_v11 = vpack.c.bf16 %v3590_v58, %v3574_v59  ;;  %v3352_v45 = vld [vmem:[#allocation12 + $0x60] sm:$0xff]  ;;  %v6692_v55 = vpack.c.bf16 %v3369_v38, %v3353_v12  ;;  %v6724_v3 = vpack.c.bf16 %v3371_v9, %v3355_v52  ;;  %v3482_v12 = vld [vmem:[#allocation12 + $0x470] sm:$0xff]  ;;  %v3513_v52 = vld [vmem:[#allocation12 + $0x568] sm:$0xff] }
0x311b   :  { %v6694_v29 = vpack.c.bf16 %v3368_v1, %v3352_v45  ;;  %v3498_v38 = vld [vmem:[#allocation12 + $0x4f0] sm:$0xff]  ;;  %v3529_v9 = vld [vmem:[#allocation12 + $0x5e8] sm:$0xff] }
0x311c   :  { %v6742_v1 = vpack.c.bf16 %v3498_v38, %v3482_v12 }
0x311d   :  { %6643 = vmatpush1.bf16.msra.mxu0 %v6642_v7  ;;  %6675 = vmatpush1.bf16.msra.mxu1 %v6674_v23  ;;  %v3401_v7 = vld [vmem:[#allocation12 + $0x1e8] sm:$0xff]  ;;  %v3387_v23 = vld [vmem:[#allocation12 + $0x178] sm:$0xff] }
0x311e   :  { %6645 = vmatprep.subr.bf16.mxu0 %v6644_v46  ;;  %6677 = vmatprep.subr.bf16.mxu1 %v6676_v30  ;;  %v6726_v46 = vpack.c.bf16 %v3370_v10, %v3354_v47  ;;  %v3384_v30 = vld [vmem:[#allocation12 + $0x160] sm:$0xff]  ;;  %v6696_v22 = vpack.c.bf16 %v3401_v7, %v3385_v13  ;;  %v6728_v21 = vpack.c.bf16 %v3403_v27, %v3387_v23  ;;  %v3514_v13 = vld [vmem:[#allocation12 + $0x570] sm:$0xff]  ;;  %v3545_v23 = vld [vmem:[#allocation12 + $0x668] sm:$0xff] }
0x311f   :  { %v6698_v40 = vpack.c.bf16 %v3400_v20, %v3384_v30  ;;  %v6712_v47 = vpack.c.bf16 %v3529_v9, %v3513_v52  ;;  %v3530_v7 = vld [vmem:[#allocation12 + $0x5f0] sm:$0xff]  ;;  %v3561_v27 = vld [vmem:[#allocation12 + $0x6e8] sm:$0xff]  ;;  %v4887_v9 = vld [vmem:[#allocation13 + $0x118] sm:$0xff] }
0x3120   :  { %v6746_v20 = vpack.c.bf16 %v3530_v7, %v3514_v13  ;;  %v4886_v52 = vld [vmem:[#allocation13 + $0x110] sm:$0xff] }
0x3121   :  { %6647 = vmatpush1.bf16.msra.mxu0 %v6646_v15  ;;  %6679 = vmatpush1.bf16.msra.mxu1 %v6678_v24  ;;  %v3433_v15 = vld [vmem:[#allocation12 + $0x2e8] sm:$0xff]  ;;  %v3419_v24 = vld [vmem:[#allocation12 + $0x278] sm:$0xff] }
0x3122   :  { %6649 = vmatprep.subr.bf16.mxu0 %v6648_v35  ;;  %6681 = vmatprep.subr.bf16.mxu1 %v6680_v36  ;;  %v6730_v35 = vpack.c.bf16 %v3402_v26, %v3386_v34  ;;  %v3416_v36 = vld [vmem:[#allocation12 + $0x260] sm:$0xff]  ;;  %v6700_v53 = vpack.c.bf16 %v3433_v15, %v3417_v4  ;;  %v6732_v39 = vpack.c.bf16 %v3435_v25, %v3419_v24  ;;  %v3546_v4 = vld [vmem:[#allocation12 + $0x670] sm:$0xff]  ;;  %v3577_v24 = vld [vmem:[#allocation12 + $0x768] sm:$0xff] }
0x3123   :  { %v6702_v54 = vpack.c.bf16 %v3432_v31, %v3416_v36  ;;  %v6716_v34 = vpack.c.bf16 %v3561_v27, %v3545_v23  ;;  %v3562_v15 = vld [vmem:[#allocation12 + $0x6f0] sm:$0xff]  ;;  %v3593_v25 = vld [vmem:[#allocation12 + $0x7e8] sm:$0xff]  ;;  %v4888_v23 = vld [vmem:[#allocation13 + $0x120] sm:$0xff] }
0x3124   :  { %v6750_v31 = vpack.c.bf16 %v3562_v15, %v3546_v4  ;;  %v4889_v27 = vld [vmem:[#allocation13 + $0x128] sm:$0xff] }
0x3125   :  { %6651 = vmatpush1.bf16.msra.mxu0 %v6650_v8  ;;  %6683 = vmatpush1.bf16.msra.mxu1 %v6682_v44  ;;  %v3465_v8 = vld [vmem:[#allocation12 + $0x3e8] sm:$0xff]  ;;  %v3451_v44 = vld [vmem:[#allocation12 + $0x378] sm:$0xff] }
0x3126   :  { %6653 = vmatprep.subr.bf16.mxu0 %v6652_v50  ;;  %6685 = vmatprep.subr.bf16.mxu1 %v6684_v14  ;;  %v6734_v50 = vpack.c.bf16 %v3434_v37, %v3418_v43  ;;  %v3448_v14 = vld [vmem:[#allocation12 + $0x360] sm:$0xff]  ;;  %v6704_v2 = vpack.c.bf16 %v3465_v8, %v3449_v16  ;;  %v6736_v28 = vpack.c.bf16 %v3467_v51, %v3451_v44  ;;  %v3578_v16 = vld [vmem:[#allocation12 + $0x770] sm:$0xff] }
0x3127   :  { %v6706_v48 = vpack.c.bf16 %v3464_v18, %v3448_v14  ;;  %v3592_v37 = vld [vmem:[#allocation12 + $0x7e0] sm:$0xff]  ;;  %v3594_v8 = vld [vmem:[#allocation12 + $0x7f0] sm:$0xff] }
0x3128   :  { %v6754_v51 = vpack.c.bf16 %v3594_v8, %v3578_v16  ;;  %v4900_v14 = vld [vmem:[#allocation13 + $0x180] sm:$0xff] }
0x3129   :  { %6655 = vmatpush1.bf16.msra.mxu0 %v6654_v17  ;;  %6687 = vmatpush1.bf16.msra.mxu1 %v6686_v42  ;;  %v3497_v17 = vld [vmem:[#allocation12 + $0x4e8] sm:$0xff]  ;;  %v3483_v42 = vld [vmem:[#allocation12 + $0x478] sm:$0xff] }
0x312a   :  { %6657 = vmatprep.subr.bf16.mxu0 %v6656_v60  ;;  %6689 = vmatprep.subr.bf16.mxu1 %v6688_v32  ;;  %v3480_v60 = vld [vmem:[#allocation12 + $0x460] sm:$0xff]  ;;  %v6708_v59 = vpack.c.bf16 %v3497_v17, %v3481_v19  ;;  %v6740_v58 = vpack.c.bf16 %v3499_v57, %v3483_v42  ;;  %v4885_v42 = vld [vmem:[#allocation13 + $0x108] sm:$0xff] }
0x312b   :  { %v3496_v32 = vld [vmem:[#allocation12 + $0x4e0] sm:$0xff] }
0x312c   :  { %v6710_v45 = vpack.c.bf16 %v3496_v32, %v3480_v60  ;;  %v4884_v17 = vld [vmem:[#allocation13 + $0x100] sm:$0xff]  ;;  %v4902_v60 = vld [vmem:[#allocation13 + $0x190] sm:$0xff]  ;;  %v4903_v32 = vld [vmem:[#allocation13 + $0x198] sm:$0xff] }
0x312d   :  { %6659 = vmatpush1.bf16.msra.mxu0 %v6658_v56  ;;  %6691 = vmatpush1.bf16.msra.mxu1 %v6690_v11  ;;  %v3515_v56 = vld [vmem:[#allocation12 + $0x578] sm:$0xff]  ;;  %v6790_v57 = vpack.c.bf16 %v4885_v42, %v4884_v17  ;;  %v6792_v12 = vpack.c.bf16 %v4903_v32, %v4902_v60  ;;  %v4894_v42 = vld [vmem:[#allocation13 + $0x150] sm:$0xff]  ;;  %v4881_v60 = vld [vmem:[#allocation13 + $0xe8] sm:$0xff] }
0x312e   :  { %6693 = vmatprep.subr.bf16.mxu0 %v6692_v55  ;;  %6725 = vmatprep.subr.bf16.mxu1 %v6724_v3  ;;  %v3531_v11 = vld [vmem:[#allocation12 + $0x5f8] sm:$0xff]  ;;  %v3512_v55 = vld [vmem:[#allocation12 + $0x560] sm:$0xff] }
0x312f   :  { %v3528_v3 = vld [vmem:[#allocation12 + $0x5e0] sm:$0xff]  ;;  %v6744_v10 = vpack.c.bf16 %v3531_v11, %v3515_v56  ;;  %v6794_v56 = vpack.c.bf16 %v4887_v9, %v4886_v52 }
0x3130   :  { %4032 = vmatmul.mubr.f32.vlgmr.msra.gmra.mrb[30].mxu0 %v8480_v0  ;;  %4103 = vmatmul.mubr.f32.vlgmr.msra.gmra.mrb[28].mxu1 %v8480_v0  ;;  %v6714_v30 = vpack.c.bf16 %v3528_v3, %v3512_v55  ;;  %v4872_v11 = vld [vmem:[#allocation13 + $0xa0] sm:$0xff]  ;;  %v4905_v3 = vld [vmem:[#allocation13 + $0x1a8] sm:$0xff] }
0x3131   :  { %6695 = vmatpush1.bf16.msra.mxu0 %v6694_v29  ;;  %6727 = vmatpush1.bf16.msra.mxu1 %v6726_v46  ;;  %v3547_v29 = vld [vmem:[#allocation12 + $0x678] sm:$0xff]  ;;  %v4896_v9 = vld [vmem:[#allocation13 + $0x160] sm:$0xff] }
0x3132   :  { %6697 = vmatprep.subr.bf16.mxu0 %v6696_v22  ;;  %6729 = vmatprep.subr.bf16.mxu1 %v6728_v21  ;;  %v3563_v46 = vld [vmem:[#allocation12 + $0x6f8] sm:$0xff]  ;;  %v3544_v22 = vld [vmem:[#allocation12 + $0x660] sm:$0xff] }
0x3133   :  { %4173 = vmatprep.mubr.f32.mxu0 %v7522_v49  ;;  %4244 = vmatprep.mubr.f32.mxu1 %v7522_v49  ;;  %v6738_v49 = vpack.c.bf16 %v3466_v41, %v3450_v33  ;;  %v3560_v21 = vld [vmem:[#allocation12 + $0x6e0] sm:$0xff]  ;;  %v6748_v26 = vpack.c.bf16 %v3563_v46, %v3547_v29  ;;  %v4853_v33 = vld [vmem:[#allocation13 + $0x8] sm:$0xff]  ;;  %v6798_v29 = vpack.c.bf16 %v4889_v27, %v4888_v23  ;;  %v4874_v46 = vld [vmem:[#allocation13 + $0xb0] sm:$0xff] }
0x3134   :  { %v6718_v36 = vpack.c.bf16 %v3560_v21, %v3544_v22  ;;  %v4907_v21 = vld [vmem:[#allocation13 + $0x1b8] sm:$0xff]  ;;  %v4898_v27 = vld [vmem:[#allocation13 + $0x170] sm:$0xff] }
0x3135   :  { %6699 = vmatpush1.bf16.msra.mxu0 %v6698_v40  ;;  %6731 = vmatpush1.bf16.msra.mxu1 %v6730_v35  ;;  %v3579_v40 = vld [vmem:[#allocation12 + $0x778] sm:$0xff] }
0x3136   :  { %6701 = vmatprep.subr.bf16.mxu0 %v6700_v53  ;;  %6733 = vmatprep.subr.bf16.mxu1 %v6732_v39  ;;  %v3595_v35 = vld [vmem:[#allocation12 + $0x7f8] sm:$0xff]  ;;  %v3576_v53 = vld [vmem:[#allocation12 + $0x760] sm:$0xff]  ;;  %v6720_v39 = vpack.c.bf16 %v3593_v25, %v3577_v24  ;;  %v4890_v24 = vld [vmem:[#allocation13 + $0x130] sm:$0xff] }
0x3137   :  { %v6752_v43 = vpack.c.bf16 %v3595_v35, %v3579_v40  ;;  %v6722_v44 = vpack.c.bf16 %v3592_v37, %v3576_v53  ;;  %v4891_v25 = vld [vmem:[#allocation13 + $0x138] sm:$0xff]  ;;  %v4876_v35 = vld [vmem:[#allocation13 + $0xc0] sm:$0xff]  ;;  %v4861_v37 = vld [vmem:[#allocation13 + $0x48] sm:$0xff] }
0x3138   :  { %v6802_v40 = vpack.c.bf16 %v4891_v25, %v4890_v24  ;;  %v8507_v24 = vld [vmem:[%s9550_s14] sm:$0xff]  ;;  %v8510_v25 = vsub.s32 6, %v7837_v61 }
0x3139   :  { %6703 = vmatpush1.bf16.msra.mxu0 %v6702_v54  ;;  %6735 = vmatpush1.bf16.msra.mxu1 %v6734_v50  ;;  %v4868_v54 = vld [vmem:[#allocation13 + $0x80] sm:$0xff]  ;;  %v4869_v50 = vld [vmem:[#allocation13 + $0x88] sm:$0xff] }
0x313a   :  { %6705 = vmatprep.subr.bf16.mxu0 %v6704_v2  ;;  %6737 = vmatprep.subr.bf16.mxu1 %v6736_v28  ;;  %v6756_v18 = vpack.c.bf16 %v4869_v50, %v4868_v54  ;;  %v4901_v2 = vld [vmem:[#allocation13 + $0x188] sm:$0xff]  ;;  %v4852_v28 = vld [vmem:[#allocation13] sm:$0xff]  ;;  %v4878_v50 = vld [vmem:[#allocation13 + $0xd0] sm:$0xff]  ;;  %9649 = vst [vmem:[#allocation21_spill] sm:$0xff] %v8510_v25 }
0x313b   :  { %v6788_v41 = vpack.c.bf16 %v4901_v2, %v4900_v14  ;;  %v6758_v19 = vpack.c.bf16 %v4853_v33, %v4852_v28  ;;  %v4879_v14 = vld [vmem:[#allocation13 + $0xd8] sm:$0xff]  ;;  %v4862_v33 = vld [vmem:[#allocation13 + $0x50] sm:$0xff] }
0x313c   :  { %v6776_v2 = vpack.c.bf16 %v4879_v14, %v4878_v50  ;;  %v4911_v28 = vld [vmem:[#allocation13 + $0x1d8] sm:$0xff] }
0x313d   :  { %6707 = vmatpush1.bf16.msra.mxu0 %v6706_v48  ;;  %6739 = vmatpush1.bf16.msra.mxu1 %v6738_v49  ;;  %v4870_v48 = vld [vmem:[#allocation13 + $0x90] sm:$0xff]  ;;  %v4871_v49 = vld [vmem:[#allocation13 + $0x98] sm:$0xff] }
0x313e   :  { %6709 = vmatprep.subr.bf16.mxu0 %v6708_v59  ;;  %6741 = vmatprep.subr.bf16.mxu1 %v6740_v58  ;;  %v4854_v59 = vld [vmem:[#allocation13 + $0x10] sm:$0xff]  ;;  %v4855_v58 = vld [vmem:[#allocation13 + $0x18] sm:$0xff] }
0x313f   :  { %v6762_v38 = vpack.c.bf16 %v4855_v58, %v4854_v59  ;;  %v4913_v59 = vld [vmem:[#allocation13 + $0x1e8] sm:$0xff]  ;;  %v4864_v58 = vld [vmem:[#allocation13 + $0x60] sm:$0xff] }
0x3141   :  { %6711 = vmatpush1.bf16.msra.mxu0 %v6710_v45  ;;  %6743 = vmatpush1.bf16.msra.mxu1 %v6742_v1  ;;  %v4873_v45 = vld [vmem:[#allocation13 + $0xa8] sm:$0xff]  ;;  %v4904_v1 = vld [vmem:[#allocation13 + $0x1a0] sm:$0xff] }
0x3142   :  { %6713 = vmatprep.subr.bf16.mxu0 %v6712_v47  ;;  %6745 = vmatprep.subr.bf16.mxu1 %v6744_v10  ;;  %v6764_v55 = vpack.c.bf16 %v4873_v45, %v4872_v11  ;;  %v4856_v47 = vld [vmem:[#allocation13 + $0x20] sm:$0xff]  ;;  %v4857_v10 = vld [vmem:[#allocation13 + $0x28] sm:$0xff]  ;;  %v6796_v13 = vpack.c.bf16 %v4905_v3, %v4904_v1  ;;  %v4882_v45 = vld [vmem:[#allocation13 + $0xf0] sm:$0xff] }
0x3143   :  { %v6766_v7 = vpack.c.bf16 %v4857_v10, %v4856_v47  ;;  %v4883_v1 = vld [vmem:[#allocation13 + $0xf8] sm:$0xff]  ;;  %v4866_v10 = vld [vmem:[#allocation13 + $0x70] sm:$0xff] }
0x3144   :  { %v6784_v3 = vpack.c.bf16 %v4883_v1, %v4882_v45  ;;  %v4915_v47 = vld [vmem:[#allocation13 + $0x1f8] sm:$0xff] }
0x3145   :  { %6715 = vmatpush1.bf16.msra.mxu0 %v6714_v30  ;;  %6747 = vmatpush1.bf16.msra.mxu1 %v6746_v20  ;;  %v4875_v30 = vld [vmem:[#allocation13 + $0xb8] sm:$0xff]  ;;  %v4906_v20 = vld [vmem:[#allocation13 + $0x1b0] sm:$0xff] }
0x3146   :  { %6717 = vmatprep.subr.bf16.mxu0 %v6716_v34  ;;  %6749 = vmatprep.subr.bf16.mxu1 %v6748_v26  ;;  %v6768_v22 = vpack.c.bf16 %v4875_v30, %v4874_v46  ;;  %v4858_v34 = vld [vmem:[#allocation13 + $0x30] sm:$0xff]  ;;  %v4859_v26 = vld [vmem:[#allocation13 + $0x38] sm:$0xff]  ;;  %v6800_v4 = vpack.c.bf16 %v4907_v21, %v4906_v20  ;;  %v4932_v30 = vld [vmem:[#allocation13 + $0x280] sm:$0xff] }
0x3147   :  { %v6770_v15 = vpack.c.bf16 %v4859_v26, %v4858_v34  ;;  %v4933_v20 = vld [vmem:[#allocation13 + $0x288] sm:$0xff] }
0x3148   :  { %v6820_v21 = vpack.c.bf16 %v4933_v20, %v4932_v30  ;;  %v4965_v34 = vld [vmem:[#allocation13 + $0x388] sm:$0xff]  ;;  %v8617_v30 = vld [vmem:[#allocation13 + $0x330] sm:$0xff] }
0x3149   :  { %6719 = vmatpush1.bf16.msra.mxu0 %v6718_v36  ;;  %6751 = vmatpush1.bf16.msra.mxu1 %v6750_v31  ;;  %v4877_v36 = vld [vmem:[#allocation13 + $0xc8] sm:$0xff]  ;;  %v4908_v31 = vld [vmem:[#allocation13 + $0x1c0] sm:$0xff]  ;;  %9664 = vst [vmem:[#allocation36_spill] sm:$0xff] %v8617_v30 }
0x314a   :  { %6721 = vmatprep.subr.bf16.mxu0 %v6720_v39  ;;  %6753 = vmatprep.subr.bf16.mxu1 %v6752_v43  ;;  %v6772_v53 = vpack.c.bf16 %v4877_v36, %v4876_v35  ;;  %v4909_v39 = vld [vmem:[#allocation13 + $0x1c8] sm:$0xff]  ;;  %v4860_v43 = vld [vmem:[#allocation13 + $0x40] sm:$0xff]  ;;  %v8516_v35 = vsub.s32 7, %v7837_v61 }
0x314b   :  { %v6804_v16 = vpack.c.bf16 %v4909_v39, %v4908_v31  ;;  %v6774_v8 = vpack.c.bf16 %v4861_v37, %v4860_v43  ;;  %v8521_v36 = vld [vmem:[%s9551_s15] sm:$0xff]  ;;  %v8531_v37 = vld [vmem:[#allocation13 + $0x308] sm:$0xff] }
0x314c   :  { %9650 = vst [vmem:[#allocation22_spill] sm:$0xff] %v8516_v35  ;;  %v8523_v31 = vld [vmem:[#allocation13 + $0x200] sm:$0xff] }
0x314d   :  { %6723 = vmatpush1.bf16.msra.mxu0 %v6722_v44  ;;  %6755 = vmatpush1.bf16.msra.mxu1 %v6754_v51  ;;  %v4892_v44 = vld [vmem:[#allocation13 + $0x140] sm:$0xff]  ;;  %v4893_v51 = vld [vmem:[#allocation13 + $0x148] sm:$0xff] }
0x314e   :  { %6757 = vmatprep.subr.bf16.mxu0 %v6756_v18  ;;  %6789 = vmatprep.subr.bf16.mxu1 %v6788_v41  ;;  %v6806_v54 = vpack.c.bf16 %v4893_v51, %v4892_v44  ;;  %v4910_v18 = vld [vmem:[#allocation13 + $0x1d0] sm:$0xff]  ;;  %v4863_v41 = vld [vmem:[#allocation13 + $0x58] sm:$0xff]  ;;  %v8529_v43 = vld [vmem:[#allocation13 + $0x300] sm:$0xff] }
0x314f   :  { %v6778_v17 = vpack.c.bf16 %v4863_v41, %v4862_v33  ;;  %v8539_v44 = vld [vmem:[#allocation13 + $0x398] sm:$0xff]  ;;  %v8541_v51 = vld [vmem:[#allocation13 + $0x210] sm:$0xff]  ;;  %v8557_v41 = vld [vmem:[#allocation13 + $0x2a0] sm:$0xff] }
0x3150   :  { %4174 = vmatmul.mubr.f32.vlgmr.msra.gmra.mrb[32].mxu0 %v8480_v0  ;;  %4245 = vmatmul.mubr.f32.vlgmr.msra.gmra.mrb[30].mxu1 %v8480_v0  ;;  %v6760_v0 = vpack.c.bf16 %v4871_v49, %v4870_v48  ;;  %v4880_v49 = vld [vmem:[#allocation13 + $0xe0] sm:$0xff]  ;;  %v8555_v33 = vld [vmem:[#allocation13 + $0x318] sm:$0xff] }
0x3151   :  { %6759 = vmatpush3.bf16.msra.mxu0 %v6758_v19  ;;  %6791 = vmatpush3.bf16.msra.mxu1 %v6790_v57  ;;  %v6808_v19 = vpack.c.bf16 %v4911_v28, %v4910_v18  ;;  %v4895_v57 = vld [vmem:[#allocation13 + $0x158] sm:$0xff]  ;;  %v6780_v32 = vpack.c.bf16 %v4881_v60, %v4880_v49  ;;  %v8553_v28 = vld [vmem:[#allocation13 + $0x310] sm:$0xff]  ;;  %v8571_v60 = vld [vmem:[#allocation13 + $0x3a8] sm:$0xff] }
0x3152   :  { %6761 = vmatprep.subr.bf16.mxu0 %v6760_v0  ;;  %6793 = vmatprep.subr.bf16.mxu1 %v6792_v12  ;;  %v6810_v48 = vpack.c.bf16 %v4895_v57, %v4894_v42  ;;  %v4912_v0 = vld [vmem:[#allocation13 + $0x1e0] sm:$0xff]  ;;  %v4865_v12 = vld [vmem:[#allocation13 + $0x68] sm:$0xff]  ;;  %9651 = vst [vmem:[#allocation23_spill] sm:$0xff] %v8553_v28  ;;  %9653 = vst [vmem:[#allocation25_spill] sm:$0xff] %v8571_v60 }
0x3153   :  { %v6782_v52 = vpack.c.bf16 %v4865_v12, %v4864_v58 }
0x3155   :  { %6763 = vmatpush3.bf16.msra.mxu0 %v6762_v38  ;;  %6795 = vmatpush3.bf16.msra.mxu1 %v6794_v56  ;;  %v6812_v38 = vpack.c.bf16 %v4913_v59, %v4912_v0  ;;  %v4897_v56 = vld [vmem:[#allocation13 + $0x168] sm:$0xff]  ;;  %v8573_v0 = vld [vmem:[#allocation13 + $0x220] sm:$0xff] }
0x3156   :  { %6765 = vmatprep.subr.bf16.mxu0 %v6764_v55  ;;  %6797 = vmatprep.subr.bf16.mxu1 %v6796_v13  ;;  %v6814_v11 = vpack.c.bf16 %v4897_v56, %v4896_v9  ;;  %v4914_v55 = vld [vmem:[#allocation13 + $0x1f0] sm:$0xff]  ;;  %v4867_v13 = vld [vmem:[#allocation13 + $0x78] sm:$0xff]  ;;  %9654 = vst [vmem:[#allocation26_spill] sm:$0xff] %v8573_v0  ;;  %v8587_v9 = vld [vmem:[#allocation13 + $0x328] sm:$0xff] }
0x3157   :  { %v6786_v23 = vpack.c.bf16 %v4867_v13, %v4866_v10  ;;  %9657 = vst [vmem:[#allocation29_spill] sm:$0xff] %v8587_v9  ;;  %v8589_v56 = vld [vmem:[#allocation13 + $0x2b0] sm:$0xff]  ;;  %v8603_v10 = vld [vmem:[#allocation13 + $0x3b8] sm:$0xff] }
0x3158   :  { %9658 = vst [vmem:[#allocation30_spill] sm:$0xff] %v8589_v56  ;;  %9661 = vst [vmem:[#allocation33_spill] sm:$0xff] %v8603_v10 }
0x3159   :  { %6767 = vmatpush3.bf16.msra.mxu0 %v6766_v7  ;;  %6799 = vmatpush3.bf16.msra.mxu1 %v6798_v29  ;;  %v6816_v7 = vpack.c.bf16 %v4915_v47, %v4914_v55  ;;  %v4899_v29 = vld [vmem:[#allocation13 + $0x178] sm:$0xff]  ;;  %v8601_v47 = vld [vmem:[#allocation13 + $0x3b0] sm:$0xff] }
0x315a   :  { %6769 = vmatprep.subr.bf16.mxu0 %v6768_v22  ;;  %6801 = vmatprep.subr.bf16.mxu1 %v6800_v4  ;;  %v6818_v46 = vpack.c.bf16 %v4899_v29, %v4898_v27  ;;  %v4964_v22 = vld [vmem:[#allocation13 + $0x380] sm:$0xff]  ;;  %9660 = vst [vmem:[#allocation32_spill] sm:$0xff] %v8601_v47  ;;  %v8613_v29 = vld [vmem:[#allocation13 + $0x230] sm:$0xff] }
0x315b   :  { %v6852_v26 = vpack.c.bf16 %v4965_v34, %v4964_v22  ;;  %v8499_v4 = vld [vmem:[%s9549_s13] sm:$0xff]  ;;  %9662 = vst [vmem:[#allocation34_spill] sm:$0xff] %v8613_v29 }
0x315c   :  { %v3603_v39 = vrot.slane %v8499_v4, %v7840_v62  ;;  %v3611_v50 = vrot.slane %v8499_v4, %v7851_v5  ;;  %v3607_v14 = vrot.slane %v8499_v4, %v7843_v63  ;;  %v3615_v18 = vrot.slane %v8499_v4, %v7854_v6  ;;  %v8629_v27 = vld [vmem:[#allocation13 + $0x2c0] sm:$0xff] }
0x315d   :  { %6771 = vmatpush3.bf16.msra.mxu0 %v6770_v15  ;;  %6803 = vmatpush3.bf16.msra.mxu1 %v6802_v40  ;;  %v8502_v15 = vsub.s32 4, %v7837_v61  ;;  %v8513_v40 = vsub.s32 5, %v7837_v61  ;;  %v8535_v61 = vld [vmem:[#allocation13 + $0x298] sm:$0xff]  ;;  %9666 = vst [vmem:[#allocation38_spill] sm:$0xff] %v8629_v27 }
0x315e   :  { %6773 = vmatprep.subr.bf16.mxu0 %v6772_v53  ;;  %6805 = vmatprep.subr.bf16.mxu1 %v6804_v16  ;;  %v8525_v53 = vld [vmem:[#allocation13 + $0x208] sm:$0xff]  ;;  %v8533_v16 = vld [vmem:[#allocation13 + $0x290] sm:$0xff] }
0x3161   :  { %6775 = vmatpush3.bf16.msra.mxu0 %v6774_v8  ;;  %6807 = vmatpush3.bf16.msra.mxu1 %v6806_v54  ;;  %v8537_v8 = vld [vmem:[#allocation13 + $0x390] sm:$0xff]  ;;  %v8543_v54 = vld [vmem:[#allocation13 + $0x218] sm:$0xff] }
0x3162   :  { %6777 = vmatprep.subr.bf16.mxu0 %v6776_v2  ;;  %6809 = vmatprep.subr.bf16.mxu1 %v6808_v19  ;;  %v8559_v19 = vld [vmem:[#allocation13 + $0x2a8] sm:$0xff] }
0x3165   :  { %6779 = vmatpush3.bf16.msra.mxu0 %v6778_v17  ;;  %6811 = vmatpush3.bf16.msra.mxu1 %v6810_v48  ;;  %v8561_v17 = vld [vmem:[#allocation13 + $0x3a0] sm:$0xff] }
0x3166   :  { %6781 = vmatprep.subr.bf16.mxu0 %v6780_v32  ;;  %6813 = vmatprep.subr.bf16.mxu1 %v6812_v38  ;;  %9652 = vst [vmem:[#allocation24_spill] sm:$0xff] %v8561_v17  ;;  %v8575_v32 = vld [vmem:[#allocation13 + $0x228] sm:$0xff]  ;;  %v9714_v17 = vrot.slane %v8499_v4, %v8502_v15 }
0x3167   :  { %9655 = vst [vmem:[#allocation27_spill] sm:$0xff] %v8575_v32  ;;  %v8772_v32 = vld [vmem:[#allocation13 + $0x3f8] sm:$0xff] }
0x3168   :  { %9693 = vst [vmem:[#allocation65_spill] sm:$0xff] %v8772_v32 }
0x3169   :  { %6783 = vmatpush3.bf16.msra.mxu0 %v6782_v52  ;;  %6815 = vmatpush3.bf16.msra.mxu1 %v6814_v11  ;;  %v8585_v52 = vld [vmem:[#allocation13 + $0x320] sm:$0xff] }
0x316a   :  { %6785 = vmatprep.subr.bf16.mxu0 %v6784_v3  ;;  %6817 = vmatprep.subr.bf16.mxu1 %v6816_v7  ;;  %9656 = vst [vmem:[#allocation28_spill] sm:$0xff] %v8585_v52  ;;  %v8599_v3 = vld [vmem:[#allocation13 + $0x2b8] sm:$0xff] }
0x316b   :  { %9659 = vst [vmem:[#allocation31_spill] sm:$0xff] %v8599_v3 }
0x316d   :  { %6787 = vmatpush3.bf16.msra.mxu0 %v6786_v23  ;;  %6819 = vmatpush3.bf16.msra.mxu1 %v6818_v46  ;;  %v8615_v46 = vld [vmem:[#allocation13 + $0x238] sm:$0xff]  ;;  %v8631_v23 = vld [vmem:[#allocation13 + $0x2c8] sm:$0xff] }
0x316e   :  { %6821 = vmatprep.subr.bf16.mxu0 %v6820_v21  ;;  %6853 = vmatprep.subr.bf16.mxu1 %v6852_v26  ;;  %9663 = vst [vmem:[#allocation35_spill] sm:$0xff] %v8615_v46  ;;  %v8627_v26 = vld [vmem:[#allocation13 + $0x338] sm:$0xff]  ;;  %9667 = vst [vmem:[#allocation39_spill] sm:$0xff] %v8631_v23 }
0x316f   :  { %9665 = vst [vmem:[#allocation37_spill] sm:$0xff] %v8627_v26 }
0x31c3   :  { %v3749_v13 = vpop.f32.mrb[26].mxu0  ;;  %v3820_v7 = vpop.f32.mrb[24].mxu1 }
0x31c4   :  { %v8641_v55 = vadd.f32 %v3749_v13, %v3603_v39  ;;  %v8643_v1 = vadd.f32 %v3820_v7, %v3611_v50  ;;  %v3751_v11 = vpop.f32.mrb[27].mxu0  ;;  %v3822_v12 = vpop.f32.mrb[25].mxu1 }
0x31c5   :  { %v8649_v38 = vadd.f32 %v3751_v11, %v3607_v14  ;;  %v8651_v22 = vadd.f32 %v3822_v12, %v3615_v18 }
0x31c6   :  { %v4251_v50 = vsel %vm2047_vm5, %v8641_v55, 0.0  ;;  %v4380_v13 = vmul.f32 %v8641_v55, %v8641_v55  ;;  %v4265_v7 = vsel %vm2047_vm5, %v8643_v1, 0.0  ;;  %v4382_v14 = vmul.f32 %v8643_v1, %v8643_v1 }
0x31c7   :  { %v4252_v18 = vrot.slane %v4251_v50, 4  ;;  %v4266_v12 = vrot.slane %v4265_v7, 4  ;;  %v4258_v11 = vsel %vm2047_vm5, %v8649_v38, 0.0  ;;  %v4381_v21 = vmul.f32 %v8649_v38, %v8649_v38 }
0x31c8   :  { %v4396_v39 = vsel %vm2047_vm5, %v4380_v13, 0.0  ;;  %v4410_v20 = vsel %vm2047_vm5, %v4382_v14, 0.0  ;;  %v4259_v45 = vrot.slane %v4258_v11, 4  ;;  %v4272_v34 = vsel %vm2047_vm5, %v8651_v22, 0.0 }
0x31c9   :  { %v4253_v58 = vadd.f32 %v4252_v18, %v4251_v50  ;;  %v4397_v59 = vrot.slane %v4396_v39, 4  ;;  %v4267_v42 = vadd.f32 %v4266_v12, %v4265_v7  ;;  %v4411_v49 = vrot.slane %v4410_v20, 4 }
0x31ca   :  { %v4260_v48 = vadd.f32 %v4259_v45, %v4258_v11  ;;  %v4403_v57 = vsel %vm2047_vm5, %v4381_v21, 0.0  ;;  %v4273_v2 = vrot.slane %v4272_v34, 4  ;;  %v4383_v30 = vmul.f32 %v8651_v22, %v8651_v22 }
0x31cb   :  { %v4254_v26 = vrot.slane %v4253_v58, 2  ;;  %v4398_v27 = vadd.f32 %v4397_v59, %v4396_v39  ;;  %v4268_v13 = vrot.slane %v4267_v42, 2  ;;  %v4412_v23 = vadd.f32 %v4411_v49, %v4410_v20 }
0x31cc   :  { %v4261_v14 = vrot.slane %v4260_v48, 2  ;;  %v4404_v29 = vrot.slane %v4403_v57, 4  ;;  %v4274_v46 = vadd.f32 %v4273_v2, %v4272_v34  ;;  %v4417_v47 = vsel %vm2047_vm5, %v4383_v30, 0.0 }
0x31cd   :  { %v4255_v50 = vadd.f32 %v4254_v26, %v4253_v58  ;;  %v4399_v18 = vrot.slane %v4398_v27, 2  ;;  %v4269_v7 = vadd.f32 %v4268_v13, %v4267_v42  ;;  %v4413_v12 = vrot.slane %v4412_v23, 2 }
0x31ce   :  { %v4262_v45 = vadd.f32 %v4261_v14, %v4260_v48  ;;  %v4405_v11 = vadd.f32 %v4404_v29, %v4403_v57  ;;  %v4275_v21 = vrot.slane %v4274_v46, 2  ;;  %v4418_v10 = vrot.slane %v4417_v47, 4  ;;  %v8677_v48 = vld [vmem:[#allocation13 + $0x3c0] sm:$0xff]  ;;  %v8679_v57 = vld [vmem:[#allocation13 + $0x3c8] sm:$0xff] }
0x31cf   :  { %v4256_v52 = vrot.slane %v4255_v50, 1  ;;  %v4400_v9 = vadd.f32 %v4399_v18, %v4398_v27  ;;  %v4270_v56 = vrot.slane %v4269_v7, 1  ;;  %v4414_v3 = vadd.f32 %v4413_v12, %v4412_v23  ;;  %9668 = vst [vmem:[#allocation40_spill] sm:$0xff] %v8677_v48  ;;  %9669 = vst [vmem:[#allocation41_spill] sm:$0xff] %v8679_v57  ;;  %v8694_v18 = vld [vmem:[%s9549_s13 + $0x8] sm:$0xff] }
0x31d0   :  { %v4263_v59 = vrot.slane %v4262_v45, 1  ;;  %v4406_v39 = vrot.slane %v4405_v11, 2  ;;  %v4276_v49 = vadd.f32 %v4275_v21, %v4274_v46  ;;  %v4419_v20 = vadd.f32 %v4418_v10, %v4417_v47  ;;  %v8685_v46 = vld [vmem:[#allocation13 + $0x240] sm:$0xff] }
0x31d1   :  { %v4257_v0 = vadd.f32 %v4256_v52, %v4255_v50  ;;  %v4401_v2 = vrot.slane %v4400_v9, 1  ;;  %v4271_v34 = vadd.f32 %v4270_v56, %v4269_v7  ;;  %v4415_v30 = vrot.slane %v4414_v3, 1  ;;  %9670 = vst [vmem:[#allocation42_spill] sm:$0xff] %v8685_v46  ;;  %v8687_v52 = vld [vmem:[#allocation13 + $0x248] sm:$0xff]  ;;  %v8700_v12 = vld [vmem:[#allocation13 + $0x340] sm:$0xff] }
0x31d2   :  { %v4264_v58 = vadd.f32 %v4263_v59, %v4262_v45  ;;  %v4407_v26 = vadd.f32 %v4406_v39, %v4405_v11  ;;  %v4277_v42 = vrot.slane %v4276_v49, 1  ;;  %v4420_v13 = vrot.slane %v4419_v20, 2  ;;  %9671 = vst [vmem:[#allocation43_spill] sm:$0xff] %v8687_v52  ;;  %9672 = vst [vmem:[#allocation44_spill] sm:$0xff] %v8700_v12  ;;  %v8702_v45 = vld [vmem:[#allocation13 + $0x348] sm:$0xff]  ;;  %v8754_v48 = vld [vmem:[#allocation13 + $0x360] sm:$0xff] }
0x31d3   :  { %v8681_v29 = vmul.f32 0.5, %v4257_v0  ;;  %v4402_v27 = vadd.f32 %v4401_v2, %v4400_v9  ;;  %v8683_v23 = vmul.f32 0.5, %v4271_v34  ;;  %v4416_v14 = vadd.f32 %v4415_v30, %v4414_v3  ;;  %9673 = vst [vmem:[#allocation45_spill] sm:$0xff] %v8702_v45  ;;  %v8714_v2 = vld [vmem:[#allocation13 + $0x3d0] sm:$0xff]  ;;  %v8734_v3 = vld [vmem:[#allocation13 + $0x2e0] sm:$0xff]  ;;  %v8744_v39 = vld [vmem:[#allocation13 + $0x3e8] sm:$0xff] }
0x31d4   :  { %v8689_v56 = vmul.f32 0.5, %v4264_v58  ;;  %v4408_v47 = vrot.slane %v4407_v26, 1  ;;  %v4278_v10 = vadd.f32 %v4277_v42, %v4276_v49  ;;  %v4421_v50 = vadd.f32 %v4420_v13, %v4419_v20  ;;  %v8710_v49 = vld [vmem:[#allocation13 + $0x2d0] sm:$0xff]  ;;  %v8712_v20 = vld [vmem:[#allocation13 + $0x2d8] sm:$0xff]  ;;  %9676 = vst [vmem:[#allocation48_spill] sm:$0xff] %v8714_v2  ;;  %9682 = vst [vmem:[#allocation54_spill] sm:$0xff] %v8734_v3 }
0x31d5   :  { %v4508_v0 = vmul.f32 0.5, %v4402_v27  ;;  %v4524_v9 = vmul.f32 %v8681_v29, %v8681_v29  ;;  %v4510_v7 = vmul.f32 0.5, %v4416_v14  ;;  %v4526_v11 = vmul.f32 %v8683_v23, %v8683_v23  ;;  %9674 = vst [vmem:[#allocation46_spill] sm:$0xff] %v8710_v49  ;;  %9675 = vst [vmem:[#allocation47_spill] sm:$0xff] %v8712_v20  ;;  %v8722_v13 = vld [vmem:[#allocation13 + $0x250] sm:$0xff]  ;;  %v8724_v27 = vld [vmem:[#allocation13 + $0x258] sm:$0xff] }
0x31d6   :  { %v4409_v21 = vadd.f32 %v4408_v47, %v4407_v26  ;;  %v4525_v59 = vmul.f32 %v8689_v56, %v8689_v56  ;;  %v8716_v30 = vmul.f32 0.5, %v4278_v10  ;;  %v4422_v58 = vrot.slane %v4421_v50, 1  ;;  %v8720_v26 = vld [vmem:[#allocation13 + $0x3d8] sm:$0xff]  ;;  %9678 = vst [vmem:[#allocation50_spill] sm:$0xff] %v8722_v13  ;;  %9679 = vst [vmem:[#allocation51_spill] sm:$0xff] %v8724_v27  ;;  %v8730_v10 = vld [vmem:[#allocation13 + $0x350] sm:$0xff] }
0x31d7   :  { %v4540_v34 = vsub.f32 %v4508_v0, %v4524_v9  ;;  %9677 = vst [vmem:[#allocation49_spill] sm:$0xff] %v8720_v26  ;;  %v4542_v14 = vsub.f32 %v4510_v7, %v4526_v11  ;;  %9680 = vst [vmem:[#allocation52_spill] sm:$0xff] %v8730_v10  ;;  %v8732_v9 = vld [vmem:[#allocation13 + $0x358] sm:$0xff]  ;;  %v8740_v11 = vld [vmem:[#allocation13 + $0x2e8] sm:$0xff] }
0x31d8   :  { %v4509_v47 = vmul.f32 0.5, %v4409_v21  ;;  %9681 = vst [vmem:[#allocation53_spill] sm:$0xff] %v8732_v9  ;;  %v4423_v46 = vadd.f32 %v4422_v58, %v4421_v50  ;;  %v4527_v52 = vmul.f32 %v8716_v30, %v8716_v30  ;;  %9683 = vst [vmem:[#allocation55_spill] sm:$0xff] %v8740_v11  ;;  %v8742_v21 = vld [vmem:[#allocation13 + $0x3e0] sm:$0xff]  ;;  %v8752_v58 = vld [vmem:[#allocation13 + $0x268] sm:$0xff] }
0x31d9   :  { %v4556_v42 = vmax.f32 %v4540_v34, 0.0  ;;  %9684 = vst [vmem:[#allocation56_spill] sm:$0xff] %v8742_v21  ;;  %9685 = vst [vmem:[#allocation57_spill] sm:$0xff] %v8744_v39  ;;  %v4558_v0 = vmax.f32 %v4542_v14, 0.0  ;;  %v8750_v34 = vld [vmem:[#allocation13 + $0x260] sm:$0xff]  ;;  %v8760_v14 = vld [vmem:[#allocation13 + $0x368] sm:$0xff]  ;;  %v9715_v39 = vrot.slane %v8499_v4, %v8510_v25 }
0x31da   :  { %v4541_v12 = vsub.f32 %v4509_v47, %v4525_v59  ;;  %9686 = vst [vmem:[#allocation58_spill] sm:$0xff] %v8750_v34  ;;  %9687 = vst [vmem:[#allocation59_spill] sm:$0xff] %v8752_v58  ;;  %v4511_v57 = vmul.f32 0.5, %v4423_v46  ;;  %v8762_v47 = vld [vmem:[#allocation13 + $0x2f0] sm:$0xff]  ;;  %v8764_v45 = vld [vmem:[#allocation13 + $0x2f8] sm:$0xff] }
0x31db   :  { %9688 = vst [vmem:[#allocation60_spill] sm:$0xff] %v8754_v48  ;;  %v4588_v7 = vadd.f32 1e-05, %v4556_v42  ;;  %9689 = vst [vmem:[#allocation61_spill] sm:$0xff] %v8760_v14  ;;  %v4590_v50 = vadd.f32 1e-05, %v4558_v0 }
0x31dc   :  { %9690 = vst [vmem:[#allocation62_spill] sm:$0xff] %v8762_v47  ;;  %9691 = vst [vmem:[#allocation63_spill] sm:$0xff] %v8764_v45  ;;  %v4557_v49 = vmax.f32 %v4541_v12, 0.0  ;;  %v8770_v42 = vld [vmem:[#allocation13 + $0x3f0] sm:$0xff]  ;;  %v8776_v59 = vld [vmem:[#allocation13 + $0x278] sm:$0xff]  ;;  %v4543_v12 = vsub.f32 %v4511_v57, %v4527_v52 }
0x31dd   :  { %9692 = vst [vmem:[#allocation64_spill] sm:$0xff] %v8770_v42  ;;  %v8774_v2 = vld [vmem:[#allocation13 + $0x270] sm:$0xff]  ;;  %9695 = vst [vmem:[#allocation67_spill] sm:$0xff] %v8776_v59  ;;  %v8780_v27 = vld [vmem:[#allocation13 + $0x378] sm:$0xff]  ;;  %7312 = vrsqrt.f32 %v4588_v7 }
0x31de   :  { %9694 = vst [vmem:[#allocation66_spill] sm:$0xff] %v8774_v2  ;;  %v8778_v13 = vld [vmem:[#allocation13 + $0x370] sm:$0xff]  ;;  %9697 = vst [vmem:[#allocation69_spill] sm:$0xff] %v8780_v27  ;;  %v8786_v46 = vld [vmem:[#allocation13 + $0x480] sm:$0xff]  ;;  %7314 = vrsqrt.f32 %v4590_v50  ;;  %v4589_v26 = vadd.f32 1e-05, %v4557_v49 }
0x31df   :  { %9696 = vst [vmem:[#allocation68_spill] sm:$0xff] %v8778_v13  ;;  %9698 = vst [vmem:[#allocation70_spill] sm:$0xff] %v8786_v46  ;;  %v8788_v10 = vld [vmem:[#allocation13 + $0x488] sm:$0xff]  ;;  %v8790_v9 = vld [vmem:[#allocation13 + $0x580] sm:$0xff]  ;;  %v4559_v34 = vmax.f32 %v4543_v12, 0.0 }
0x31e0   :  { %9699 = vst [vmem:[#allocation71_spill] sm:$0xff] %v8788_v10  ;;  %9700 = vst [vmem:[#allocation72_spill] sm:$0xff] %v8790_v9  ;;  %v8792_v3 = vld [vmem:[#allocation13 + $0x588] sm:$0xff]  ;;  %v8794_v11 = vld [vmem:[#allocation13 + $0x400] sm:$0xff]  ;;  %7316 = vrsqrt.f32 %v4589_v26 }
0x31e1   :  { %9701 = vst [vmem:[#allocation73_spill] sm:$0xff] %v8792_v3  ;;  %9702 = vst [vmem:[#allocation74_spill] sm:$0xff] %v8794_v11  ;;  %v8800_v7 = vld [vmem:[#allocation13 + $0x408] sm:$0xff]  ;;  %v8802_v20 = vld [vmem:[#allocation13 + $0x500] sm:$0xff]  ;;  %v4591_v14 = vadd.f32 1e-05, %v4559_v34  ;;  %v4572_v34 = vsub.f32 %v8641_v55, %v8681_v29 }
0x31e2   :  { %9703 = vst [vmem:[#allocation75_spill] sm:$0xff] %v8800_v7  ;;  %9704 = vst [vmem:[#allocation76_spill] sm:$0xff] %v8802_v20  ;;  %v8804_v0 = vld [vmem:[#allocation13 + $0x508] sm:$0xff]  ;;  %v8812_v57 = vld [vmem:[#allocation13 + $0x490] sm:$0xff] }
0x31e3   :  { %9705 = vst [vmem:[#allocation77_spill] sm:$0xff] %v8804_v0  ;;  %9706 = vst [vmem:[#allocation78_spill] sm:$0xff] %v8812_v57  ;;  %v8814_v21 = vld [vmem:[#allocation13 + $0x498] sm:$0xff]  ;;  %v8816_v52 = vld [vmem:[#allocation13 + $0x590] sm:$0xff]  ;;  %7318 = vrsqrt.f32 %v4591_v14  ;;  %v3891_v12 = vpop.f32.mrb[28].mxu0  ;;  %v3962_v2 = vpop.f32.mrb[26].mxu1  ;;  %v9717_v57 = vrot.slane %v8499_v4, %v8516_v35 }
0x31e4   :  { %9707 = vst [vmem:[#allocation79_spill] sm:$0xff] %v8814_v21  ;;  %9708 = vst [vmem:[#allocation80_spill] sm:$0xff] %v8816_v52  ;;  %v8824_v50 = vld [vmem:[#allocation13 + $0x598] sm:$0xff]  ;;  %v8826_v48 = vld [vmem:[#allocation13 + $0x410] sm:$0xff]  ;;  %v8862_v9 = vadd.f32 %v3891_v12, %v9714_v17  ;;  %v8867_v14 = vadd.f32 %v3962_v2, %v9715_v39  ;;  %v3893_v60 = vpop.f32.mrb[29].mxu0  ;;  %v3964_v20 = vpop.f32.mrb[27].mxu1  ;;  %v4574_v17 = vsub.f32 %v8643_v1, %v8683_v23 }
0x31e5   :  { %9709 = vst [vmem:[#allocation81_spill] sm:$0xff] %v8824_v50  ;;  %9710 = vst [vmem:[#allocation82_spill] sm:$0xff] %v8826_v48  ;;  %v8828_v49 = vld [vmem:[#allocation13 + $0x418] sm:$0xff]  ;;  %v8833_v26 = vld [vmem:[%s9550_s14 + $0x8] sm:$0xff]  ;;  %v4573_v12 = vsub.f32 %v8649_v38, %v8689_v56  ;;  %v9716_v39 = vrot.slane %v8499_v4, %v8513_v40  ;;  %v8903_v21 = vadd.f32 %v3964_v20, %v9717_v57 }
0x31e6   :  { %9711 = vst [vmem:[#allocation83_spill] sm:$0xff] %v8828_v49  ;;  %v8841_v47 = vld [vmem:[#allocation13 + $0x510] sm:$0xff]  ;;  %v8843_v45 = vld [vmem:[#allocation13 + $0x518] sm:$0xff]  ;;  %v4279_v58 = vsel %vm2047_vm5, %v8862_v9, 0.0  ;;  %v4384_v13 = vmul.f32 %v8862_v9, %v8862_v9  ;;  %v4293_v55 = vsel %vm2047_vm5, %v8867_v14, 0.0  ;;  %v4386_v1 = vmul.f32 %v8867_v14, %v8867_v14 }
0x31e7   :  { %9712 = vst [vmem:[#allocation84_spill] sm:$0xff] %v8841_v47  ;;  %9713 = vst [vmem:[#allocation85_spill] sm:$0xff] %v8843_v45  ;;  %v8882_v2 = vadd.f32 %v3893_v60, %v9716_v39  ;;  %v7313_v29 = vpop.eup %7312  ;;  %v4280_v23 = vrot.slane %v4279_v58, 4  ;;  %v4294_v38 = vrot.slane %v4293_v55, 4  ;;  %v4575_v47 = vsub.f32 %v8651_v22, %v8716_v30 }
0x31e8   :  { %v7315_v39 = vpop.eup %7314  ;;  %v4424_v45 = vsel %vm2047_vm5, %v4384_v13, 0.0  ;;  %v4438_v48 = vsel %vm2047_vm5, %v4386_v1, 0.0  ;;  %9718 = vst [vmem:[#allocation86_spill] sm:$0xff] %v8903_v21  ;;  %v4620_v7 = vmul.f32 %v7313_v29, %v4572_v34  ;;  %v4300_v4 = vsel %vm2047_vm5, %v8903_v21, 0.0 }
0x31e9   :  { %v4286_v56 = vsel %vm2047_vm5, %v8882_v2, 0.0  ;;  %v4385_v60 = vmul.f32 %v8882_v2, %v8882_v2  ;;  %v4281_v52 = vadd.f32 %v4280_v23, %v4279_v58  ;;  %v4425_v50 = vrot.slane %v4424_v45, 4 }
0x31ea   :  { %v4287_v49 = vrot.slane %v4286_v56, 4  ;;  %v4295_v0 = vadd.f32 %v4294_v38, %v4293_v55  ;;  %v7317_v11 = vpop.eup %7316  ;;  %v4439_v3 = vrot.slane %v4438_v48, 4  ;;  %v4622_v22 = vmul.f32 %v7315_v39, %v4574_v17 }
0x31eb   :  { %v4431_v46 = vsel %vm2047_vm5, %v4385_v60, 0.0  ;;  %v4621_v30 = vmul.f32 %v7317_v11, %v4573_v12  ;;  %v4282_v13 = vrot.slane %v4281_v52, 2  ;;  %v4426_v10 = vadd.f32 %v4425_v50, %v4424_v45 }
0x31ec   :  { %v4288_v27 = vadd.f32 %v4287_v49, %v4286_v56  ;;  %v4296_v1 = vrot.slane %v4295_v0, 2  ;;  %v4440_v59 = vadd.f32 %v4439_v3, %v4438_v48  ;;  %v4432_v23 = vrot.slane %v4431_v46, 4 }
0x31ed   :  { %v7319_v55 = vpop.eup %7318  ;;  %v4283_v38 = vadd.f32 %v4282_v13, %v4281_v52  ;;  %v4427_v42 = vrot.slane %v4426_v10, 2  ;;  %v4387_v20 = vmul.f32 %v8903_v21, %v8903_v21  ;;  %v4301_v50 = vrot.slane %v4300_v4, 4 }
0x31ee   :  { %v4289_v58 = vrot.slane %v4288_v27, 2  ;;  %v4623_v57 = vmul.f32 %v7319_v55, %v4575_v47  ;;  %v4297_v49 = vadd.f32 %v4296_v1, %v4295_v0  ;;  %v4441_v34 = vrot.slane %v4440_v59, 2 }
0x31ef   :  { %v4284_v11 = vrot.slane %v4283_v38, 1  ;;  %v4428_v12 = vadd.f32 %v4427_v42, %v4426_v10  ;;  %v4433_v45 = vadd.f32 %v4432_v23, %v4431_v46  ;;  %v4445_v52 = vsel %vm2047_vm5, %v4387_v20, 0.0  ;;  %v8913_v46 = vld [vmem:[#allocation13 + $0x4a0] sm:$0xff]  ;;  %v8915_v42 = vld [vmem:[#allocation13 + $0x4a8] sm:$0xff] }
0x31f0   :  { %v4290_v17 = vadd.f32 %v4289_v58, %v4288_v27  ;;  %v4298_v48 = vrot.slane %v4297_v49, 1  ;;  %v4442_v3 = vadd.f32 %v4441_v34, %v4440_v59  ;;  %v4302_v13 = vadd.f32 %v4301_v50, %v4300_v4 }
0x31f1   :  { %v4285_v56 = vadd.f32 %v4284_v11, %v4283_v38  ;;  %v4429_v60 = vrot.slane %v4428_v12, 1  ;;  %v4434_v39 = vrot.slane %v4433_v45, 2  ;;  %v4446_v47 = vrot.slane %v4445_v52, 4 }
0x31f2   :  { %v4291_v29 = vrot.slane %v4290_v17, 1  ;;  %v4299_v32 = vadd.f32 %v4298_v48, %v4297_v49  ;;  %v4443_v28 = vrot.slane %v4442_v3, 1  ;;  %v4303_v10 = vrot.slane %v4302_v13, 2 }
0x31f3   :  { %v8911_v0 = vmul.f32 0.5, %v4285_v56  ;;  %v4430_v27 = vadd.f32 %v4429_v60, %v4428_v12  ;;  %v4435_v1 = vadd.f32 %v4434_v39, %v4433_v45  ;;  %v4447_v55 = vadd.f32 %v4446_v47, %v4445_v52 }
0x31f4   :  { %v4292_v21 = vadd.f32 %v4291_v29, %v4290_v17  ;;  %v8917_v59 = vmul.f32 0.5, %v4299_v32  ;;  %v4444_v58 = vadd.f32 %v4443_v28, %v4442_v3  ;;  %v9719_v38 = vrot.slane %v8507_v24, %v7840_v62  ;;  %v8981_v32 = vld [vmem:[#allocation13 + $0x538] sm:$0xff] }
0x31f5   :  { %v4512_v20 = vmul.f32 0.5, %v4430_v27  ;;  %v4528_v49 = vmul.f32 %v8911_v0, %v8911_v0  ;;  %v4436_v34 = vrot.slane %v4435_v1, 1  ;;  %v9720_v17 = vrot.slane %v8507_v24, %v7851_v5  ;;  %9729 = vst [vmem:[#allocation89_spill] sm:$0xff] %v8981_v32  ;;  %v9782_v32 = vld [vmem:[#allocation47_spill] sm:$0xff] }
0x31f6   :  { %v8919_v23 = vmul.f32 0.5, %v4292_v21  ;;  %v4720_v4 = vmul.f32 %v9719_v38, %v4620_v7  ;;  %v4514_v12 = vmul.f32 0.5, %v4444_v58  ;;  %v4530_v28 = vmul.f32 %v8917_v59, %v8917_v59  ;;  %v8944_v58 = vld [vmem:[#allocation13 + $0x5a0] sm:$0xff] }
0x31f7   :  { %v4722_v11 = vmul.f32 %v9720_v17, %v4622_v22  ;;  %v4544_v21 = vsub.f32 %v4512_v20, %v4528_v49  ;;  %v4437_v45 = vadd.f32 %v4436_v34, %v4435_v1  ;;  %v4304_v50 = vadd.f32 %v4303_v10, %v4302_v13  ;;  %v8954_v34 = vld [vmem:[#allocation13 + $0x420] sm:$0xff]  ;;  %v8956_v17 = vld [vmem:[#allocation13 + $0x428] sm:$0xff] }
0x31f8   :  { %v4529_v7 = vmul.f32 %v8919_v23, %v8919_v23  ;;  %v4546_v48 = vsub.f32 %v4514_v12, %v4530_v28  ;;  %v4448_v3 = vrot.slane %v4447_v55, 2  ;;  %v9721_v29 = vrot.slane %v8507_v24, %v7843_v63  ;;  %9726 = vst [vmem:[#allocation87_spill] sm:$0xff] %v8954_v34  ;;  %v9014_v34 = vld [vmem:[#allocation13 + $0x548] sm:$0xff] }
0x31f9   :  { %v9722_v22 = vrot.slane %v8507_v24, %v7854_v6  ;;  %v4560_v60 = vmax.f32 %v4544_v21, 0.0  ;;  %v4513_v39 = vmul.f32 0.5, %v4437_v45  ;;  %v4305_v47 = vrot.slane %v4304_v50, 1  ;;  %v8958_v45 = vld [vmem:[#allocation13 + $0x520] sm:$0xff]  ;;  %9737 = vst [vmem:[#allocation96_spill] sm:$0xff] %v9014_v34 }
0x31fa   :  { %v4721_v52 = vmul.f32 %v9721_v29, %v4621_v30  ;;  %v9723_v27 = vrot.slane %v8521_v36, %v7840_v62  ;;  %v4562_v13 = vmax.f32 %v4546_v48, 0.0  ;;  %v4449_v10 = vadd.f32 %v4448_v3, %v4447_v55  ;;  %v8960_v55 = vld [vmem:[#allocation13 + $0x528] sm:$0xff]  ;;  %v8962_v48 = vld [vmem:[#allocation13 + $0x4b0] sm:$0xff]  ;;  %v8964_v3 = vld [vmem:[#allocation13 + $0x4b8] sm:$0xff] }
0x31fb   :  { %v4723_v56 = vmul.f32 %v9722_v22, %v4623_v57  ;;  %v9724_v38 = vrot.slane %v8521_v36, %v7843_v63  ;;  %v9725_v30 = vrot.slane %v8521_v36, %v7854_v6  ;;  %v8952_v57 = vld [vmem:[#allocation13 + $0x5a8] sm:$0xff]  ;;  %v4592_v12 = vadd.f32 1e-05, %v4560_v60  ;;  %v8966_v29 = vld [vmem:[#allocation13 + $0x5b0] sm:$0xff] }
0x31fc   :  { %v4820_v1 = vadd.f32 %v9723_v27, %v4720_v4  ;;  %v4545_v4 = vsub.f32 %v4513_v39, %v4529_v7  ;;  %v4306_v28 = vadd.f32 %v4305_v47, %v4304_v50  ;;  %v4594_v22 = vadd.f32 1e-05, %v4562_v13  ;;  %v8970_v60 = vld [vmem:[#allocation13 + $0x430] sm:$0xff] }
0x31fd   :  { %v4821_v20 = vadd.f32 %v9724_v38, %v4721_v52  ;;  %v4823_v49 = vadd.f32 %v9725_v30, %v4723_v56  ;;  %v8968_v52 = vld [vmem:[#allocation13 + $0x5b8] sm:$0xff]  ;;  %v4450_v56 = vrot.slane %v4449_v10, 1  ;;  %7320 = vrsqrt.f32 %v4592_v12  ;;  %v8979_v30 = vld [vmem:[#allocation13 + $0x530] sm:$0xff]  ;;  %v8987_v12 = vld [vmem:[#allocation13 + $0x4c0] sm:$0xff] }
0x31fe   :  { %v4836_v21 = vmax.f32 %v4820_v1, 0.0  ;;  %v4561_v7 = vmax.f32 %v4545_v4, 0.0  ;;  %v8972_v50 = vmul.f32 0.5, %v4306_v28  ;;  %v9727_v39 = vrot.slane %v8521_v36, %v7851_v5  ;;  %v8977_v1 = vld [vmem:[#allocation13 + $0x438] sm:$0xff]  ;;  %9728 = vst [vmem:[#allocation88_spill] sm:$0xff] %v8979_v30  ;;  %9730 = vst [vmem:[#allocation90_spill] sm:$0xff] %v8987_v12 }
0x31ff   :  { %v4837_v27 = vmax.f32 %v4821_v20, 0.0  ;;  %v4839_v38 = vmax.f32 %v4823_v49, 0.0  ;;  %7322 = vrsqrt.f32 %v4594_v22  ;;  %v4451_v13 = vadd.f32 %v4450_v56, %v4449_v10  ;;  %v8989_v4 = vld [vmem:[#allocation13 + $0x4c8] sm:$0xff]  ;;  %v9012_v22 = vld [vmem:[#allocation13 + $0x540] sm:$0xff]  ;;  %v9146_v12 = vld [vmem:[#allocation13 + $0x5d0] sm:$0xff] }
0x3200   :  { %v4822_v47 = vadd.f32 %v9727_v39, %v4722_v11  ;;  %v8991_v11 = vld [vmem:[#allocation13 + $0x5c0] sm:$0xff]  ;;  %v4593_v28 = vadd.f32 1e-05, %v4561_v7  ;;  %v4531_v39 = vmul.f32 %v8972_v50, %v8972_v50  ;;  %v8997_v56 = vld [vmem:[#allocation13 + $0x5c8] sm:$0xff]  ;;  %v9735_v49 = vpack.c.bf16 %v8525_v53, %v8523_v31  ;;  %9736 = vst [vmem:[#allocation95_spill] sm:$0xff] %v9012_v22  ;;  %v9027_v7 = vld [vmem:[#allocation13 + $0x4d8] sm:$0xff] }
0x3201   :  { %5179 = vmatprep.mubr.f32.mxu0 %v4837_v27  ;;  %5249 = vmatprep.mubr.f32.mxu1 %v4839_v38  ;;  %9731 = vst [vmem:[#allocation91_spill] sm:$0xff] %v8991_v11  ;;  %9732 = vst [vmem:[#allocation92_spill] sm:$0xff] %v8997_v56  ;;  %v8999_v27 = vld [vmem:[#allocation13 + $0x440] sm:$0xff]  ;;  %v9001_v38 = vld [vmem:[#allocation13 + $0x448] sm:$0xff]  ;;  %v4515_v20 = vmul.f32 0.5, %v4451_v13  ;;  %v9738_v13 = vpack.c.bf16 %v8535_v61, %v8533_v16 }
0x3202   :  { %5180 = vmatmul.mubr.f32.vlgmr.msra.gmra.mrb[34].mxu0 %v4836_v21  ;;  %v4838_v10 = vmax.f32 %v4822_v47, 0.0  ;;  %9733 = vst [vmem:[#allocation93_spill] sm:$0xff] %v8999_v27  ;;  %9734 = vst [vmem:[#allocation94_spill] sm:$0xff] %v9001_v38  ;;  %7324 = vrsqrt.f32 %v4593_v28  ;;  %v9025_v47 = vld [vmem:[#allocation13 + $0x4d0] sm:$0xff]  ;;  %v9741_v28 = vpack.c.bf16 %v8531_v37, %v8529_v43  ;;  %v9760_v27 = vrot.slane %v8694_v18, %v7854_v6 }
0x3203   :  { %6823 = vmatpush3.bf16.msra.mxu0 %v9735_v49  ;;  %9739 = vst [vmem:[#allocation97_spill] sm:$0xff] %v9025_v47  ;;  %9740 = vst [vmem:[#allocation98_spill] sm:$0xff] %v9027_v7  ;;  %v4547_v21 = vsub.f32 %v4515_v20, %v4531_v39  ;;  %v4033_v53 = vpop.f32.mrb[30].mxu0  ;;  %v4104_v49 = vpop.f32.mrb[28].mxu1  ;;  %v9755_v37 = vld [vmem:[#allocation26_spill] sm:$0xff] }
0x3204   :  { %5250 = vmatmul.mubr.f32.vlgmr.msra.gmra.mrb[32].mxu1 %v4838_v10  ;;  %6825 = vmatprep.subr.bf16.mxu0 %v9738_v13  ;;  %v9742_v13 = vpack.c.bf16 %v8539_v44, %v8537_v8  ;;  %v9743_v10 = vpack.c.bf16 %v8543_v54, %v8541_v51  ;;  %v9744_v8 = vrot.slane %v8694_v18, %v7840_v62  ;;  %v4035_v16 = vpop.f32.mrb[31].mxu0  ;;  %v4106_v31 = vpop.f32.mrb[29].mxu1  ;;  %v9758_v61 = vld [vmem:[#allocation30_spill] sm:$0xff] }
0x3205   :  { %6855 = vmatpush3.bf16.msra.mxu1 %v9741_v28  ;;  %v4563_v28 = vmax.f32 %v4547_v21, 0.0  ;;  %v4576_v21 = vsub.f32 %v8862_v9, %v8911_v0  ;;  %v4578_v51 = vsub.f32 %v8867_v14, %v8917_v59  ;;  %v4577_v54 = vsub.f32 %v8882_v2, %v8919_v23  ;;  %v9750_v2 = vld [vmem:[#allocation25_spill] sm:$0xff]  ;;  %v9751_v0 = vld [vmem:[#allocation24_spill] sm:$0xff] }
0x3206   :  { %6857 = vmatprep.subr.bf16.mxu1 %v9742_v13  ;;  %v9055_v44 = vadd.f32 %v4033_v53, %v9744_v8  ;;  %v9745_v13 = vrot.slane %v8694_v18, %v7851_v5  ;;  %v9746_v53 = vpack.c.bf16 %v8559_v19, %v8557_v41  ;;  %v9752_v59 = vpack.c.bf16 %v9750_v2, %v9751_v0 }
0x3207   :  { %6827 = vmatpush3.bf16.msra.mxu0 %v9743_v10  ;;  %v4595_v8 = vadd.f32 1e-05, %v4563_v28  ;;  %v7321_v19 = vpop.eup %7320  ;;  %v9106_v38 = vadd.f32 %v4106_v31, %v9760_v27 }
0x3208   :  { %v9060_v43 = vadd.f32 %v4104_v49, %v9745_v13  ;;  %6829 = vmatprep.subr.bf16.mxu0 %v9746_v53  ;;  %v9747_v49 = vrot.slane %v8694_v18, %v7843_v63  ;;  %v9748_v13 = vld [vmem:[#allocation23_spill] sm:$0xff]  ;;  %v4307_v9 = vsel %vm2047_vm5, %v9055_v44, 0.0  ;;  %v4388_v14 = vmul.f32 %v9055_v44, %v9055_v44  ;;  %v9753_v53 = vld [vmem:[#allocation86_spill] sm:$0xff] }
0x3209   :  { %v9749_v39 = vpack.c.bf16 %v8555_v33, %v9748_v13  ;;  %v4308_v23 = vrot.slane %v4307_v9, 4  ;;  %v7323_v28 = vpop.eup %7322  ;;  %7326 = vrsqrt.f32 %v4595_v8  ;;  %v9754_v13 = vld [vmem:[#allocation27_spill] sm:$0xff]  ;;  %v9761_v8 = vld [vmem:[#allocation29_spill] sm:$0xff] }
0x320a   :  { %v9076_v10 = vadd.f32 %v4035_v16, %v9747_v49  ;;  %v4321_v41 = vsel %vm2047_vm5, %v9060_v43, 0.0  ;;  %v4390_v33 = vmul.f32 %v9060_v43, %v9060_v43  ;;  %v4579_v49 = vsub.f32 %v9753_v53, %v8972_v50  ;;  %v9762_v53 = vld [vmem:[#allocation28_spill] sm:$0xff] }
0x320b   :  { %6859 = vmatpush3.bf16.msra.mxu1 %v9749_v39  ;;  %v4322_v16 = vrot.slane %v4321_v41, 4  ;;  %v9756_v20 = vpack.c.bf16 %v9754_v13, %v9755_v37  ;;  %v4452_v2 = vsel %vm2047_vm5, %v4388_v14, 0.0  ;;  %v4309_v34 = vadd.f32 %v4308_v23, %v4307_v9  ;;  %v9764_v23 = vld [vmem:[#allocation33_spill] sm:$0xff] }
0x320c   :  { %6861 = vmatprep.subr.bf16.mxu1 %v9752_v59  ;;  %v4314_v39 = vsel %vm2047_vm5, %v9076_v10, 0.0  ;;  %v9757_v59 = vld [vmem:[#allocation31_spill] sm:$0xff]  ;;  %v4453_v47 = vrot.slane %v4452_v2, 4  ;;  %v4624_v50 = vmul.f32 %v7321_v19, %v4576_v21  ;;  %v9763_v37 = vpack.c.bf16 %v9761_v8, %v9762_v53 }
0x320d   :  { %6831 = vmatpush3.bf16.msra.mxu0 %v9756_v20  ;;  %v4315_v0 = vrot.slane %v4314_v39, 4  ;;  %v9759_v22 = vpack.c.bf16 %v9757_v59, %v9758_v61  ;;  %v4323_v7 = vadd.f32 %v4322_v16, %v4321_v41  ;;  %v4466_v20 = vsel %vm2047_vm5, %v4390_v33, 0.0  ;;  %v9765_v41 = vld [vmem:[#allocation32_spill] sm:$0xff]  ;;  %v9767_v19 = vld [vmem:[#allocation35_spill] sm:$0xff]  ;;  %v9768_v59 = vld [vmem:[#allocation34_spill] sm:$0xff] }
0x320e   :  { %v4389_v61 = vmul.f32 %v9076_v10, %v9076_v10  ;;  %v4626_v9 = vmul.f32 %v7323_v28, %v4578_v51  ;;  %v9766_v16 = vpack.c.bf16 %v9764_v23, %v9765_v41  ;;  %v4310_v13 = vrot.slane %v4309_v34, 2  ;;  %v9770_v53 = vld [vmem:[#allocation39_spill] sm:$0xff] }
0x320f   :  { %6833 = vmatprep.subr.bf16.mxu0 %v9759_v22  ;;  %6863 = vmatpush3.bf16.msra.mxu1 %v9763_v37  ;;  %v4316_v14 = vadd.f32 %v4315_v0, %v4314_v39  ;;  %v7325_v22 = vpop.eup %7324  ;;  %v4454_v27 = vadd.f32 %v4453_v47, %v4452_v2  ;;  %v4324_v31 = vrot.slane %v4323_v7, 2  ;;  %v9769_v8 = vpack.c.bf16 %v9767_v19, %v9768_v59  ;;  %v9771_v37 = vld [vmem:[#allocation38_spill] sm:$0xff]  ;;  %v9773_v47 = vld [vmem:[#allocation37_spill] sm:$0xff]  ;;  %v9774_v2 = vld [vmem:[#allocation36_spill] sm:$0xff] }
0x3210   :  { %6865 = vmatprep.subr.bf16.mxu1 %v9766_v16  ;;  %v9117_v21 = vmul.f32 %v7325_v22, %v4577_v54  ;;  %v4467_v33 = vrot.slane %v4466_v20, 4  ;;  %v4459_v0 = vsel %vm2047_vm5, %v4389_v61, 0.0  ;;  %v9772_v51 = vpack.c.bf16 %v9770_v53, %v9771_v37  ;;  %v9776_v59 = vld [vmem:[#allocation41_spill] sm:$0xff] }
0x3211   :  { %6835 = vmatpush3.bf16.msra.mxu0 %v9769_v8  ;;  %v4317_v39 = vrot.slane %v4316_v14, 2  ;;  %v4311_v28 = vadd.f32 %v4310_v13, %v4309_v34  ;;  %v4455_v23 = vrot.slane %v4454_v27, 2  ;;  %v4325_v41 = vadd.f32 %v4324_v31, %v4323_v7  ;;  %v9777_v8 = vld [vmem:[#allocation40_spill] sm:$0xff] }
0x3212   :  { %6837 = vmatprep.subr.bf16.mxu0 %v9772_v51  ;;  %v4460_v16 = vrot.slane %v4459_v0, 4  ;;  %v9775_v54 = vpack.c.bf16 %v9773_v47, %v9774_v2  ;;  %v4468_v22 = vadd.f32 %v4467_v33, %v4466_v20  ;;  %v4328_v19 = vsel %vm2047_vm5, %v9106_v38, 0.0  ;;  %v9779_v51 = vld [vmem:[#allocation43_spill] sm:$0xff]  ;;  %v9780_v47 = vld [vmem:[#allocation42_spill] sm:$0xff] }
0x3213   :  { %v4318_v11 = vadd.f32 %v4317_v39, %v4316_v14  ;;  %v4391_v61 = vmul.f32 %v9106_v38, %v9106_v38  ;;  %v9778_v53 = vpack.c.bf16 %v9776_v59, %v9777_v8  ;;  %v4312_v34 = vrot.slane %v4311_v28, 1  ;;  %v9783_v59 = vld [vmem:[#allocation46_spill] sm:$0xff] }
0x3214   :  { %6867 = vmatpush3.bf16.msra.mxu1 %v9775_v54  ;;  %v4456_v13 = vadd.f32 %v4455_v23, %v4454_v27  ;;  %v4326_v7 = vrot.slane %v4325_v41, 1  ;;  %v4461_v31 = vadd.f32 %v4460_v16, %v4459_v0  ;;  %v4469_v37 = vrot.slane %v4468_v22, 2  ;;  %v7327_v27 = vpop.eup %7326  ;;  %v9785_v0 = vld [vmem:[#allocation45_spill] sm:$0xff]  ;;  %v9786_v16 = vld [vmem:[#allocation44_spill] sm:$0xff] }
0x3215   :  { %6869 = vmatprep.subr.bf16.mxu1 %v9778_v53  ;;  %v9781_v2 = vpack.c.bf16 %v9779_v51, %v9780_v47  ;;  %v4319_v20 = vrot.slane %v4318_v11, 1  ;;  %v4329_v14 = vrot.slane %v4328_v19, 4  ;;  %v4473_v33 = vsel %vm2047_vm5, %v4391_v61, 0.0  ;;  %v9148_v61 = vld [vmem:[#allocation13 + $0x5d8] sm:$0xff] }
0x3216   :  { %v4313_v39 = vadd.f32 %v4312_v34, %v4311_v28  ;;  %v4457_v54 = vrot.slane %v4456_v13, 1  ;;  %v4327_v56 = vadd.f32 %v4326_v7, %v4325_v41  ;;  %v4462_v30 = vrot.slane %v4461_v31, 2 }
0x3217   :  { %6839 = vmatpush3.bf16.msra.mxu0 %v9781_v2  ;;  %v9784_v8 = vpack.c.bf16 %v9782_v32, %v9783_v59  ;;  %v4470_v23 = vadd.f32 %v4469_v37, %v4468_v22  ;;  %v9787_v53 = vpack.c.bf16 %v9785_v0, %v9786_v16  ;;  %v4320_v51 = vadd.f32 %v4319_v20, %v4318_v11  ;;  %v9788_v32 = vld [vmem:[#allocation49_spill] sm:$0xff]  ;;  %v9789_v59 = vld [vmem:[#allocation48_spill] sm:$0xff]  ;;  %v9791_v20 = vld [vmem:[#allocation51_spill] sm:$0xff] }
0x3218   :  { %v4330_v47 = vadd.f32 %v4329_v14, %v4328_v19  ;;  %v4474_v2 = vrot.slane %v4473_v33, 4  ;;  %v4627_v28 = vmul.f32 %v7327_v27, %v4579_v49  ;;  %v9150_v41 = vmul.f32 0.5, %v4313_v39  ;;  %v9792_v14 = vld [vmem:[#allocation50_spill] sm:$0xff] }
0x3219   :  { %6841 = vmatprep.subr.bf16.mxu0 %v9784_v8  ;;  %6871 = vmatpush3.bf16.msra.mxu1 %v9787_v53  ;;  %v4458_v34 = vadd.f32 %v4457_v54, %v4456_v13  ;;  %v9152_v7 = vmul.f32 0.5, %v4327_v56  ;;  %v9790_v22 = vpack.c.bf16 %v9788_v32, %v9789_v59  ;;  %v4471_v37 = vrot.slane %v4470_v23, 1  ;;  %v9795_v54 = vld [vmem:[#allocation55_spill] sm:$0xff]  ;;  %v9796_v27 = vld [vmem:[#allocation54_spill] sm:$0xff]  ;;  %v9800_v59 = vld [vmem:[#allocation52_spill] sm:$0xff] }
0x321a   :  { %v9157_v8 = vmul.f32 0.5, %v4320_v51  ;;  %v4463_v11 = vadd.f32 %v4462_v30, %v4461_v31  ;;  %v4331_v19 = vrot.slane %v4330_v47, 2  ;;  %v9793_v0 = vpack.c.bf16 %v9791_v20, %v9792_v14 }
0x321b   :  { %6873 = vmatprep.subr.bf16.mxu1 %v9790_v22  ;;  %v9794_v49 = vrot.slane %v8507_v24, %v8502_v15  ;;  %v4516_v13 = vmul.f32 0.5, %v4458_v34  ;;  %v4532_v56 = vmul.f32 %v9150_v41, %v9150_v41  ;;  %v9797_v16 = vpack.c.bf16 %v9795_v54, %v9796_v27  ;;  %v9799_v34 = vld [vmem:[#allocation53_spill] sm:$0xff]  ;;  %v9803_v27 = vld [vmem:[#allocation56_spill] sm:$0xff] }
0x321c   :  { %6843 = vmatpush3.bf16.msra.mxu0 %v9793_v0  ;;  %v9798_v31 = vrot.slane %v8507_v24, %v8510_v25  ;;  %v4472_v51 = vadd.f32 %v4471_v37, %v4470_v23  ;;  %v4534_v32 = vmul.f32 %v9152_v7, %v9152_v7  ;;  %v9801_v22 = vpack.c.bf16 %v9799_v34, %v9800_v59  ;;  %v9802_v54 = vld [vmem:[#allocation57_spill] sm:$0xff]  ;;  %v9805_v37 = vld [vmem:[#allocation59_spill] sm:$0xff] }
0x321d   :  { %v4724_v39 = vmul.f32 %v9794_v49, %v4624_v50  ;;  %6845 = vmatprep.subr.bf16.mxu0 %v9797_v16  ;;  %v4464_v50 = vrot.slane %v4463_v11, 1  ;;  %v4548_v20 = vsub.f32 %v4516_v13, %v4532_v56  ;;  %v4533_v14 = vmul.f32 %v9157_v8, %v9157_v8  ;;  %v9810_v59 = vld [vmem:[#allocation63_spill] sm:$0xff] }
0x321e   :  { %v4726_v53 = vmul.f32 %v9798_v31, %v4626_v9  ;;  %6875 = vmatpush3.bf16.msra.mxu1 %v9801_v22  ;;  %v4332_v0 = vadd.f32 %v4331_v19, %v4330_v47  ;;  %v4475_v49 = vadd.f32 %v4474_v2, %v4473_v33  ;;  %v9804_v16 = vpack.c.bf16 %v9802_v54, %v9803_v27  ;;  %v9806_v31 = vld [vmem:[#allocation58_spill] sm:$0xff]  ;;  %v9814_v27 = vld [vmem:[#allocation61_spill] sm:$0xff] }
0x321f   :  { %v4518_v9 = vmul.f32 0.5, %v4472_v51  ;;  %v4465_v23 = vadd.f32 %v4464_v50, %v4463_v11  ;;  %v9807_v30 = vpack.c.bf16 %v9805_v37, %v9806_v31  ;;  %v9808_v34 = vrot.slane %v8507_v24, %v8513_v40  ;;  %v9811_v22 = vld [vmem:[#allocation62_spill] sm:$0xff] }
0x3220   :  { %6877 = vmatprep.subr.bf16.mxu1 %v9804_v16  ;;  %v9809_v56 = vrot.slane %v8507_v24, %v8516_v35  ;;  %v4564_v33 = vmax.f32 %v4548_v20, 0.0  ;;  %v4333_v2 = vrot.slane %v4332_v0, 1  ;;  %v4476_v19 = vrot.slane %v4475_v49, 2  ;;  %v9815_v16 = vld [vmem:[#allocation60_spill] sm:$0xff]  ;;  %v9210_v31 = vld [vmem:[#allocation13 + $0x450] sm:$0xff] }
0x3221   :  { %6847 = vmatpush3.bf16.msra.mxu0 %v9807_v30  ;;  %v4725_v13 = vmul.f32 %v9808_v34, %v9117_v21  ;;  %v9812_v51 = vpack.c.bf16 %v9810_v59, %v9811_v22  ;;  %v9813_v11 = vrot.slane %v8521_v36, %v8502_v15  ;;  %v4550_v50 = vsub.f32 %v4518_v9, %v4534_v32  ;;  %v9820_v32 = vld [vmem:[#allocation64_spill] sm:$0xff] }
0x3222   :  { %v4727_v47 = vmul.f32 %v9809_v56, %v4627_v28  ;;  %v4517_v54 = vmul.f32 0.5, %v4465_v23  ;;  %v9816_v21 = vpack.c.bf16 %v9814_v27, %v9815_v16  ;;  %v9817_v24 = vrot.slane %v8521_v36, %v8513_v40  ;;  %v9215_v22 = vld [vmem:[#allocation13 + $0x458] sm:$0xff] }
0x3223   :  { %6849 = vmatprep.subr.bf16.mxu0 %v9812_v51  ;;  %v4824_v30 = vadd.f32 %v9813_v11, %v4724_v39  ;;  %v9818_v20 = vrot.slane %v8521_v36, %v8516_v35  ;;  %v4596_v34 = vadd.f32 1e-05, %v4564_v33  ;;  %v4334_v56 = vadd.f32 %v4333_v2, %v4332_v0  ;;  %v9819_v39 = vld [vmem:[#allocation65_spill] sm:$0xff]  ;;  %v9217_v51 = vld [vmem:[#allocation13 + $0x550] sm:$0xff]  ;;  %v9219_v11 = vld [vmem:[#allocation13 + $0x558] sm:$0xff] }
0x3224   :  { %6879 = vmatpush3.bf16.msra.mxu1 %v9816_v21  ;;  %v4825_v28 = vadd.f32 %v9817_v24, %v4725_v13  ;;  %v4477_v59 = vadd.f32 %v4476_v19, %v4475_v49  ;;  %v9821_v9 = vpack.c.bf16 %v9819_v39, %v9820_v32  ;;  %9822 = vst [vmem:[#allocation23_spill] sm:$0xff] %v9217_v51  ;;  %9823 = vst [vmem:[#allocation25_spill] sm:$0xff] %v9219_v11  ;;  %v9824_v16 = vld [vmem:[#allocation67_spill] sm:$0xff]  ;;  %v9224_v49 = vld [vmem:[#allocation13 + $0x4e0] sm:$0xff] }
0x3225   :  { %v4827_v37 = vadd.f32 %v9818_v20, %v4727_v47  ;;  %v4840_v23 = vmax.f32 %v4824_v30, 0.0  ;;  %v4566_v13 = vmax.f32 %v4550_v50, 0.0  ;;  %v4549_v27 = vsub.f32 %v4517_v54, %v4533_v14  ;;  %v9825_v47 = vld [vmem:[#allocation66_spill] sm:$0xff]  ;;  %v9228_v19 = vld [vmem:[#allocation13 + $0x5e0] sm:$0xff]  ;;  %v9828_v54 = vld [vmem:[#allocation71_spill] sm:$0xff] }
0x3226   :  { %6881 = vmatprep.subr.bf16.mxu1 %v9821_v9  ;;  %v9826_v21 = vpack.c.bf16 %v9824_v16, %v9825_v47  ;;  %v4841_v33 = vmax.f32 %v4825_v28, 0.0  ;;  %v9226_v2 = vld [vmem:[#allocation13 + $0x4e8] sm:$0xff]  ;;  %7328 = vrsqrt.f32 %v4596_v34  ;;  %v9230_v30 = vmul.f32 0.5, %v4334_v56  ;;  %v9834_v56 = vld [vmem:[#allocation68_spill] sm:$0xff] }
0x3227   :  { %v4843_v0 = vmax.f32 %v4827_v37, 0.0  ;;  %v4478_v24 = vrot.slane %v4477_v59, 1  ;;  %v9827_v50 = vrot.slane %v8521_v36, %v8510_v25  ;;  %v9829_v20 = vld [vmem:[#allocation70_spill] sm:$0xff]  ;;  %v9240_v37 = vld [vmem:[#allocation13 + $0x460] sm:$0xff]  ;;  %v4598_v9 = vadd.f32 1e-05, %v4566_v13 }
0x3228   :  { %6851 = vmatpush3.bf16.msra.mxu0 %v9826_v21  ;;  %v9830_v39 = vpack.c.bf16 %v9828_v54, %v9829_v20  ;;  %v9238_v28 = vld [vmem:[#allocation13 + $0x5e8] sm:$0xff]  ;;  %9831 = vst [vmem:[#allocation24_spill] sm:$0xff] %v9240_v37  ;;  %v4565_v16 = vmax.f32 %v4549_v27, 0.0  ;;  %5319 = vmatprep.mubr.f32.mxu0 %v4841_v33  ;;  %v9251_v21 = vld [vmem:[#allocation13 + $0x560] sm:$0xff]  ;;  %v4535_v54 = vmul.f32 %v9230_v30, %v9230_v30  ;;  %v9282_v20 = vld [vmem:[#allocation13 + $0x470] sm:$0xff] }
0x3229   :  { %v4826_v14 = vadd.f32 %v9827_v50, %v4726_v53  ;;  %v9242_v32 = vld [vmem:[#allocation13 + $0x468] sm:$0xff]  ;;  %v4479_v27 = vadd.f32 %v4478_v24, %v4477_v59  ;;  %5389 = vmatprep.mubr.f32.mxu1 %v4843_v0  ;;  %7330 = vrsqrt.f32 %v4598_v9  ;;  %v9837_v53 = vld [vmem:[#allocation72_spill] sm:$0xff]  ;;  %v9839_v59 = vld [vmem:[#allocation75_spill] sm:$0xff]  ;;  %v4175_v0 = vpop.f32.mrb[32].mxu0  ;;  %v4580_v9 = vsub.f32 %v9055_v44, %v9150_v41 }
0x322a   :  { %6885 = vmatprep.subr.bf16.mxu0 %v9830_v39  ;;  %9832 = vst [vmem:[#allocation86_spill] sm:$0xff] %v9242_v32  ;;  %v9833_v34 = vld [vmem:[#allocation69_spill] sm:$0xff]  ;;  %v9264_v39 = vld [vmem:[#allocation13 + $0x4f0] sm:$0xff]  ;;  %v9284_v11 = vld [vmem:[#allocation13 + $0x478] sm:$0xff]  ;;  %v9857_v41 = vrot.slane %v8694_v18, %v8513_v40 }
0x322b   :  { %v9835_v47 = vpack.c.bf16 %v9833_v34, %v9834_v56  ;;  %v9253_v50 = vld [vmem:[#allocation13 + $0x568] sm:$0xff]  ;;  %5320 = vmatmul.mubr.f32.vlgmr.msra.gmra.mrb[36].mxu0 %v4840_v23  ;;  %v4842_v33 = vmax.f32 %v4826_v14, 0.0  ;;  %v9266_v34 = vld [vmem:[#allocation13 + $0x4f8] sm:$0xff]  ;;  %v9268_v56 = vld [vmem:[#allocation13 + $0x5f0] sm:$0xff] }
0x322c   :  { %v9258_v13 = vld [vmem:[%s9551_s15 + $0x8] sm:$0xff]  ;;  %v9280_v14 = vld [vmem:[#allocation13 + $0x5f8] sm:$0xff] }
0x322d   :  { %6883 = vmatpush3.bf16.msra.mxu1 %v9835_v47  ;;  %v9836_v47 = vld [vmem:[#allocation73_spill] sm:$0xff]  ;;  %v9840_v24 = vld [vmem:[#allocation74_spill] sm:$0xff]  ;;  %v9846_v37 = vld [vmem:[#allocation76_spill] sm:$0xff] }
0x322e   :  { %v9838_v36 = vpack.c.bf16 %v9836_v47, %v9837_v53  ;;  %v9841_v51 = vpack.c.bf16 %v9839_v59, %v9840_v24  ;;  %v4519_v53 = vmul.f32 0.5, %v4479_v27  ;;  %v9842_v47 = vld [vmem:[#allocation79_spill] sm:$0xff]  ;;  %v9845_v23 = vld [vmem:[#allocation77_spill] sm:$0xff] }
0x322f   :  { %v9847_v32 = vpack.c.bf16 %v9845_v23, %v9846_v37  ;;  %v4246_v37 = vpop.f32.mrb[30].mxu1  ;;  %v9855_v23 = vrot.slane %v8694_v18, %v8510_v25 }
0x3230   :  { %6917 = vmatprep.subr.bf16.mxu1 %v9838_v36  ;;  %6887 = vmatpush3.bf16.msra.mxu0 %v9841_v51  ;;  %v4597_v36 = vadd.f32 1e-05, %v4565_v16  ;;  %v9843_v51 = vld [vmem:[#allocation78_spill] sm:$0xff]  ;;  %v4177_v16 = vpop.f32.mrb[33].mxu0 }
0x3231   :  { %5390 = vmatmul.mubr.f32.vlgmr.msra.gmra.mrb[34].mxu1 %v4842_v33  ;;  %v9844_v59 = vpack.c.bf16 %v9842_v47, %v9843_v51  ;;  %v4551_v47 = vsub.f32 %v4519_v53, %v4535_v54  ;;  %v9848_v51 = vld [vmem:[#allocation81_spill] sm:$0xff]  ;;  %v4582_v54 = vsub.f32 %v9060_v43, %v9152_v7  ;;  %v9851_v53 = vld [vmem:[#allocation83_spill] sm:$0xff]  ;;  %v9330_v27 = vadd.f32 %v4246_v37, %v9855_v23  ;;  %v9860_v23 = vld [vmem:[#allocation84_spill] sm:$0xff] }
0x3232   :  { %6919 = vmatpush3.bf16.msra.mxu1 %v9847_v32  ;;  %v4248_v32 = vpop.f32.mrb[31].mxu1  ;;  %7332 = vrsqrt.f32 %v4597_v36  ;;  %v9856_v43 = vpack.c.bf16 %v8915_v42, %v8913_v46  ;;  %v9338_v7 = vadd.f32 %v4177_v16, %v9857_v41  ;;  %v9859_v37 = vld [vmem:[#allocation85_spill] sm:$0xff] }
0x3233   :  { %6889 = vmatprep.subr.bf16.mxu0 %v9844_v59  ;;  %v9849_v59 = vld [vmem:[#allocation80_spill] sm:$0xff]  ;;  %v4567_v44 = vmax.f32 %v4551_v47, 0.0  ;;  %v4349_v42 = vsel %vm2047_vm5, %v9330_v27, 0.0  ;;  %v4394_v16 = vmul.f32 %v9330_v27, %v9330_v27  ;;  %v7329_v47 = vpop.eup %7328 }
0x3234   :  { %v9850_v24 = vpack.c.bf16 %v9848_v51, %v9849_v59  ;;  %v9852_v51 = vld [vmem:[#allocation82_spill] sm:$0xff]  ;;  %v9854_v59 = vrot.slane %v8694_v18, %v8502_v15  ;;  %v4628_v41 = vmul.f32 %v7329_v47, %v4580_v9  ;;  %v7331_v25 = vpop.eup %7330  ;;  %v4581_v9 = vsub.f32 %v9076_v10, %v9157_v8 }
0x3235   :  { %v9868_v10 = vpack.c.bf16 %v8977_v1, %v8970_v60  ;;  %v9872_v1 = vld [vmem:[#allocation89_spill] sm:$0xff] }
0x3236   :  { %6921 = vmatprep.subr.bf16.mxu1 %v9850_v24  ;;  %v9853_v24 = vpack.c.bf16 %v9851_v53, %v9852_v51  ;;  %v9325_v33 = vadd.f32 %v4175_v0, %v9854_v59  ;;  %v9858_v0 = vrot.slane %v8694_v18, %v8516_v35  ;;  %v9861_v51 = vpack.c.bf16 %v9859_v37, %v9860_v23 }
0x3237   :  { %v4599_v18 = vadd.f32 1e-05, %v4567_v44  ;;  %v4350_v59 = vrot.slane %v4349_v42, 4 }
0x3238   :  { %6891 = vmatpush3.bf16.msra.mxu0 %v9853_v24  ;;  %v9343_v53 = vadd.f32 %v4248_v32, %v9858_v0  ;;  %6923 = vmatpush3.bf16.msra.mxu1 %v9861_v51  ;;  %v4335_v36 = vsel %vm2047_vm5, %v9325_v33, 0.0  ;;  %v4392_v46 = vmul.f32 %v9325_v33, %v9325_v33  ;;  %v9862_v32 = vpack.c.bf16 %v8952_v57, %v8944_v58  ;;  %v9863_v0 = vld [vmem:[#allocation87_spill] sm:$0xff] }
0x3239   :  { %6893 = vmatprep.subr.bf16.mxu0 %v9856_v43  ;;  %v4336_v24 = vrot.slane %v4335_v36, 4  ;;  %v4342_v43 = vsel %vm2047_vm5, %v9338_v7, 0.0  ;;  %v9864_v37 = vpack.c.bf16 %v8956_v17, %v9863_v0  ;;  %v4494_v51 = vsel %vm2047_vm5, %v4394_v16, 0.0 }
0x323a   :  { %6925 = vmatprep.subr.bf16.mxu1 %v9862_v32  ;;  %v4480_v23 = vsel %vm2047_vm5, %v4392_v46, 0.0  ;;  %v4343_v35 = vrot.slane %v4342_v43, 4  ;;  %7334 = vrsqrt.f32 %v4599_v18  ;;  %v9865_v58 = vpack.c.bf16 %v8964_v3, %v8962_v48 }
0x323b   :  { %v4337_v57 = vadd.f32 %v4336_v24, %v4335_v36  ;;  %v4481_v44 = vrot.slane %v4480_v23, 4  ;;  %v4351_v32 = vadd.f32 %v4350_v59, %v4349_v42  ;;  %v9866_v17 = vpack.c.bf16 %v8960_v55, %v8958_v45 }
0x323c   :  { %6895 = vmatpush3.bf16.msra.mxu0 %v9864_v37  ;;  %v4495_v46 = vrot.slane %v4494_v51, 4  ;;  %v4344_v47 = vadd.f32 %v4343_v35, %v4342_v43  ;;  %v4393_v16 = vmul.f32 %v9338_v7, %v9338_v7  ;;  %v4583_v48 = vsub.f32 %v9106_v38, %v9230_v30  ;;  %v9873_v43 = vld [vmem:[#allocation88_spill] sm:$0xff] }
0x323d   :  { %6897 = vmatprep.subr.bf16.mxu0 %v9865_v58  ;;  %6927 = vmatpush3.bf16.msra.mxu1 %v9866_v17  ;;  %v9867_v3 = vpack.c.bf16 %v8968_v52, %v8966_v29  ;;  %v4338_v36 = vrot.slane %v4337_v57, 2  ;;  %v4482_v42 = vadd.f32 %v4481_v44, %v4480_v23  ;;  %v4352_v18 = vrot.slane %v4351_v32, 2  ;;  %v9870_v52 = vld [vmem:[#allocation90_spill] sm:$0xff]  ;;  %v7333_v44 = vpop.eup %7332  ;;  %v9875_v17 = vld [vmem:[#allocation92_spill] sm:$0xff] }
0x323e   :  { %v4496_v45 = vadd.f32 %v4495_v46, %v4494_v51  ;;  %v4345_v55 = vrot.slane %v4344_v47, 2  ;;  %v4487_v35 = vsel %vm2047_vm5, %v4393_v16, 0.0  ;;  %v4356_v8 = vsel %vm2047_vm5, %v9343_v53, 0.0  ;;  %v9876_v46 = vld [vmem:[#allocation91_spill] sm:$0xff] }
0x323f   :  { %6929 = vmatprep.subr.bf16.mxu1 %v9867_v3  ;;  %v9869_v38 = vrot.slane %v8833_v26, %v7840_v62  ;;  %v4630_v29 = vmul.f32 %v7331_v25, %v4582_v54  ;;  %v9871_v24 = vpack.c.bf16 %v8989_v4, %v9870_v52  ;;  %v4339_v59 = vadd.f32 %v4338_v36, %v4337_v57  ;;  %v9878_v36 = vld [vmem:[#allocation94_spill] sm:$0xff] }
0x3240   :  { %6899 = vmatpush3.bf16.msra.mxu0 %v9868_v10  ;;  %v4483_v60 = vrot.slane %v4482_v42, 2  ;;  %v9874_v0 = vpack.c.bf16 %v9872_v1, %v9873_v43  ;;  %v4353_v37 = vadd.f32 %v4352_v18, %v4351_v32  ;;  %v4497_v23 = vrot.slane %v4496_v45, 2  ;;  %v9879_v10 = vld [vmem:[#allocation93_spill] sm:$0xff]  ;;  %v9881_v1 = vld [vmem:[#allocation98_spill] sm:$0xff] }
0x3241   :  { %v9390_v30 = vmul.f32 %v9869_v38, %v4628_v41  ;;  %6901 = vmatprep.subr.bf16.mxu0 %v9871_v24  ;;  %v4346_v51 = vadd.f32 %v4345_v55, %v4344_v47  ;;  %v4488_v58 = vrot.slane %v4487_v35, 4  ;;  %v9877_v41 = vpack.c.bf16 %v9875_v17, %v9876_v46  ;;  %v9882_v43 = vld [vmem:[#allocation97_spill] sm:$0xff]  ;;  %v9884_v17 = vld [vmem:[#allocation96_spill] sm:$0xff]  ;;  %v9885_v46 = vld [vmem:[#allocation95_spill] sm:$0xff] }
0x3242   :  { %6931 = vmatpush3.bf16.msra.mxu1 %v9874_v0  ;;  %v4340_v25 = vrot.slane %v4339_v59, 1  ;;  %v4484_v54 = vadd.f32 %v4483_v60, %v4482_v42  ;;  %v4357_v16 = vrot.slane %v4356_v8, 4  ;;  %v4395_v4 = vmul.f32 %v9343_v53, %v9343_v53 }
0x3243   :  { %6933 = vmatprep.subr.bf16.mxu1 %v9877_v41  ;;  %v4354_v57 = vrot.slane %v4353_v37, 1  ;;  %v4498_v3 = vadd.f32 %v4497_v23, %v4496_v45  ;;  %v9880_v38 = vpack.c.bf16 %v9878_v36, %v9879_v10  ;;  %v4347_v32 = vrot.slane %v4346_v51, 1  ;;  %v9413_v36 = vld [vmem:[#allocation13 + $0x570] sm:$0xff] }
0x3244   :  { %v4489_v47 = vadd.f32 %v4488_v58, %v4487_v35  ;;  %v4341_v18 = vadd.f32 %v4340_v25, %v4339_v59  ;;  %v4485_v55 = vrot.slane %v4484_v54, 1  ;;  %v4358_v52 = vadd.f32 %v4357_v16, %v4356_v8  ;;  %v7335_v35 = vpop.eup %7334 }
0x3245   :  { %6903 = vmatpush3.bf16.msra.mxu0 %v9880_v38  ;;  %v4501_v24 = vsel %vm2047_vm5, %v4395_v4, 0.0  ;;  %v9883_v42 = vpack.c.bf16 %v9881_v1, %v9882_v43  ;;  %v4355_v60 = vadd.f32 %v4354_v57, %v4353_v37  ;;  %v4499_v0 = vrot.slane %v4498_v3, 1  ;;  %v9420_v37 = vld [vmem:[#allocation13 + $0x578] sm:$0xff]  ;;  %v5060_v4 = vld [vmem:[#allocation13 + $0x680] sm:$0xff]  ;;  %v5061_v57 = vld [vmem:[#allocation13 + $0x688] sm:$0xff] }
0x3246   :  { %v9886_v45 = vpack.c.bf16 %v9884_v17, %v9885_v46  ;;  %v4348_v23 = vadd.f32 %v4347_v32, %v4346_v51  ;;  %v4490_v41 = vrot.slane %v4489_v47, 2  ;;  %v4629_v59 = vmul.f32 %v7333_v44, %v4581_v9  ;;  %v9427_v44 = vld [vmem:[#allocation13 + $0x780] sm:$0xff]  ;;  %v9891_v1 = vld [vmem:[#allocation23_spill] sm:$0xff] }
0x3247   :  { %6905 = vmatprep.subr.bf16.mxu0 %v9883_v42  ;;  %v9415_v58 = vmul.f32 0.5, %v4341_v18  ;;  %v4486_v8 = vadd.f32 %v4485_v55, %v4484_v54  ;;  %v4359_v25 = vrot.slane %v4358_v52, 2  ;;  %v9887_v16 = vpack.c.bf16 %v9148_v61, %v9146_v12  ;;  %v9429_v54 = vld [vmem:[#allocation13 + $0x788] sm:$0xff] }
0x3248   :  { %6935 = vmatpush3.bf16.msra.mxu1 %v9886_v45  ;;  %v4631_v10 = vmul.f32 %v7335_v35, %v4583_v48  ;;  %v9422_v38 = vmul.f32 0.5, %v4355_v60  ;;  %v4500_v51 = vadd.f32 %v4499_v0, %v4498_v3  ;;  %v4502_v32 = vrot.slane %v4501_v24, 4  ;;  %v5044_v45 = vld [vmem:[#allocation13 + $0x600] sm:$0xff]  ;;  %v9895_v35 = vld [vmem:[#allocation86_spill] sm:$0xff] }
0x3249   :  { %6937 = vmatprep.subr.bf16.mxu1 %v9887_v16  ;;  %v9888_v9 = vpack.c.bf16 %v9215_v22, %v9210_v31  ;;  %v4520_v18 = vmul.f32 0.5, %v4486_v8  ;;  %v4536_v12 = vmul.f32 %v9415_v58, %v9415_v58  ;;  %v9433_v61 = vmul.f32 0.5, %v4348_v23  ;;  %v9890_v22 = vld [vmem:[#allocation25_spill] sm:$0xff]  ;;  %v9896_v8 = vld [vmem:[#allocation24_spill] sm:$0xff] }
0x324a   :  { %v4491_v55 = vadd.f32 %v4490_v41, %v4489_v47  ;;  %v9889_v48 = vpack.c.bf16 %v9226_v2, %v9224_v49  ;;  %v4522_v3 = vmul.f32 0.5, %v4500_v51  ;;  %v4538_v31 = vmul.f32 %v9422_v38, %v9422_v38 }
0x324b   :  { %6907 = vmatpush3.bf16.msra.mxu0 %v9888_v9  ;;  %v9892_v43 = vpack.c.bf16 %v9890_v22, %v9891_v1  ;;  %v6946_v42 = vpack.c.bf16 %v9420_v37, %v9413_v36  ;;  %v6948_v60 = vpack.c.bf16 %v5061_v57, %v5060_v4  ;;  %v9893_v0 = vrot.slane %v8833_v26, %v7851_v5  ;;  %v5063_v37 = vld [vmem:[#allocation13 + $0x698] sm:$0xff] }
0x324c   :  { %6909 = vmatprep.subr.bf16.mxu0 %v9889_v48  ;;  %v4492_v17 = vrot.slane %v4491_v55, 1  ;;  %v4360_v46 = vadd.f32 %v4359_v25, %v4358_v52  ;;  %v9894_v49 = vpack.c.bf16 %v9238_v28, %v9228_v19  ;;  %v6980_v2 = vpack.c.bf16 %v9429_v54, %v9427_v44  ;;  %v5045_v19 = vld [vmem:[#allocation13 + $0x608] sm:$0xff]  ;;  %v5062_v28 = vld [vmem:[#allocation13 + $0x690] sm:$0xff]  ;;  %v5095_v1 = vld [vmem:[#allocation13 + $0x798] sm:$0xff] }
0x324d   :  { %6939 = vmatpush3.bf16.msra.mxu1 %v9892_v43  ;;  %v4730_v47 = vmul.f32 %v9893_v0, %v4630_v29  ;;  %v4552_v23 = vsub.f32 %v4520_v18, %v4536_v12  ;;  %v4503_v41 = vadd.f32 %v4502_v32, %v4501_v24  ;;  %v9897_v36 = vpack.c.bf16 %v9895_v35, %v9896_v8  ;;  %v5077_v48 = vld [vmem:[#allocation13 + $0x708] sm:$0xff] }
0x324e   :  { %6941 = vmatprep.subr.bf16.mxu1 %v9894_v49  ;;  %v9898_v16 = vrot.slane %v8833_v26, %v7843_v63  ;;  %v9899_v52 = vrot.slane %v8833_v26, %v7854_v6  ;;  %v4493_v4 = vadd.f32 %v4492_v17, %v4491_v55  ;;  %v4537_v57 = vmul.f32 %v9433_v61, %v9433_v61  ;;  %v5076_v55 = vld [vmem:[#allocation13 + $0x700] sm:$0xff]  ;;  %v5047_v49 = vld [vmem:[#allocation13 + $0x618] sm:$0xff] }
0x324f   :  { %6911 = vmatpush3.bf16.msra.mxu0 %v9897_v36  ;;  %v4361_v24 = vrot.slane %v4360_v46, 1  ;;  %v9900_v51 = vpack.c.bf16 %v9266_v34, %v9264_v39  ;;  %v4554_v9 = vsub.f32 %v4522_v3, %v4538_v31  ;;  %v4504_v26 = vrot.slane %v4503_v41, 2 }
0x3250   :  { %v4729_v29 = vmul.f32 %v9898_v16, %v4629_v59  ;;  %v4731_v25 = vmul.f32 %v9899_v52, %v4631_v10  ;;  %v9901_v59 = vrot.slane %v9258_v13, %v7840_v62  ;;  %v9902_v10 = vpack.c.bf16 %v9253_v50, %v9251_v21  ;;  %v5078_v16 = vld [vmem:[#allocation13 + $0x710] sm:$0xff] }
0x3251   :  { %6913 = vmatprep.subr.bf16.mxu0 %v9900_v51  ;;  %v9903_v44 = vrot.slane %v9258_v13, %v7843_v63  ;;  %v9904_v18 = vrot.slane %v9258_v13, %v7854_v6  ;;  %v4521_v34 = vmul.f32 0.5, %v4493_v4  ;;  %v4362_v12 = vadd.f32 %v4361_v24, %v4360_v46  ;;  %v5094_v6 = vld [vmem:[#allocation13 + $0x790] sm:$0xff]  ;;  %v5049_v4 = vld [vmem:[#allocation13 + $0x628] sm:$0xff] }
0x3252   :  { %v4828_v32 = vadd.f32 %v9901_v59, %v9390_v30  ;;  %6943 = vmatpush3.bf16.msra.mxu1 %v9902_v10  ;;  %v9905_v62 = vpack.c.bf16 %v9280_v14, %v9268_v56  ;;  %v6950_v30 = vpack.c.bf16 %v5045_v19, %v5044_v45  ;;  %v6952_v3 = vpack.c.bf16 %v5063_v37, %v5062_v28  ;;  %v5046_v46 = vld [vmem:[#allocation13 + $0x610] sm:$0xff]  ;;  %v5048_v37 = vld [vmem:[#allocation13 + $0x620] sm:$0xff] }
0x3253   :  { %v4829_v54 = vadd.f32 %v9903_v44, %v4729_v29  ;;  %v4831_v39 = vadd.f32 %v9904_v18, %v4731_v25  ;;  %v4568_v21 = vmax.f32 %v4552_v23, 0.0  ;;  %v4505_v50 = vadd.f32 %v4504_v26, %v4503_v41  ;;  %v5065_v41 = vld [vmem:[#allocation13 + $0x6a8] sm:$0xff]  ;;  %v5079_v29 = vld [vmem:[#allocation13 + $0x718] sm:$0xff]  ;;  %v5066_v59 = vld [vmem:[#allocation13 + $0x6b0] sm:$0xff] }
0x3254   :  { %6945 = vmatprep.subr.bf16.mxu1 %v9905_v62  ;;  %v9906_v63 = vpack.c.bf16 %v9284_v11, %v9282_v20  ;;  %v4553_v43 = vsub.f32 %v4521_v34, %v4537_v57  ;;  %v9486_v0 = vmul.f32 0.5, %v4362_v12  ;;  %v4844_v17 = vmax.f32 %v4828_v32, 0.0  ;;  %v5064_v20 = vld [vmem:[#allocation13 + $0x6a0] sm:$0xff]  ;;  %v5097_v25 = vld [vmem:[#allocation13 + $0x7a8] sm:$0xff]  ;;  %v5067_v32 = vld [vmem:[#allocation13 + $0x6b8] sm:$0xff] }
0x3255   :  { %v4845_v31 = vmax.f32 %v4829_v54, 0.0  ;;  %v4847_v22 = vmax.f32 %v4831_v39, 0.0  ;;  %v9907_v56 = vrot.slane %v9258_v13, %v7851_v5  ;;  %v4570_v45 = vmax.f32 %v4554_v9, 0.0  ;;  %v5081_v26 = vld [vmem:[#allocation13 + $0x728] sm:$0xff]  ;;  %v5098_v54 = vld [vmem:[#allocation13 + $0x7b0] sm:$0xff]  ;;  %v5099_v18 = vld [vmem:[#allocation13 + $0x7b8] sm:$0xff] }
0x3256   :  { %6915 = vmatpush3.bf16.msra.mxu0 %v9906_v63  ;;  %v4506_v23 = vrot.slane %v4505_v50, 1  ;;  %6947 = vmatpush3.bf16.msra.mxu1 %v6946_v42  ;;  %v6982_v11 = vpack.c.bf16 %v5077_v48, %v5076_v55  ;;  %v4569_v35 = vmax.f32 %v4553_v43, 0.0  ;;  %v6984_v36 = vpack.c.bf16 %v5095_v1, %v5094_v6  ;;  %v5096_v42 = vld [vmem:[#allocation13 + $0x7a0] sm:$0xff]  ;;  %v5050_v34 = vld [vmem:[#allocation13 + $0x630] sm:$0xff]  ;;  %v5051_v12 = vld [vmem:[#allocation13 + $0x638] sm:$0xff] }
0x3257   :  { %v4830_v14 = vadd.f32 %v9907_v56, %v4730_v47  ;;  %6949 = vmatprep.subr.bf16.mxu0 %v6948_v60  ;;  %5459 = vmatprep.mubr.f32.mxu0 %v4845_v31  ;;  %v4600_v52 = vadd.f32 1e-05, %v4568_v21  ;;  %v4539_v60 = vmul.f32 %v9486_v0, %v9486_v0  ;;  %v6954_v47 = vpack.c.bf16 %v5047_v49, %v5046_v46  ;;  %v5068_v55 = vld [vmem:[#allocation13 + $0x6c0] sm:$0xff]  ;;  %v5069_v48 = vld [vmem:[#allocation13 + $0x6c8] sm:$0xff]  ;;  %v5082_v21 = vld [vmem:[#allocation13 + $0x730] sm:$0xff] }
0x3258   :  { %5529 = vmatprep.mubr.f32.mxu1 %v4847_v22  ;;  %v4507_v5 = vadd.f32 %v4506_v23, %v4505_v50  ;;  %6981 = vmatprep.subr.bf16.mxu1 %v6980_v2  ;;  %v4601_v19 = vadd.f32 1e-05, %v4569_v35  ;;  %v6956_v28 = vpack.c.bf16 %v5065_v41, %v5064_v20  ;;  %v4602_v57 = vadd.f32 1e-05, %v4570_v45  ;;  %v5080_v2 = vld [vmem:[#allocation13 + $0x720] sm:$0xff]  ;;  %v5083_v50 = vld [vmem:[#allocation13 + $0x738] sm:$0xff] }
0x3259   :  { %5460 = vmatmul.mubr.f32.vlgmr.msra.gmra.mrb[38].mxu0 %v4844_v17  ;;  %v4846_v8 = vmax.f32 %v4830_v14, 0.0  ;;  %v6986_v51 = vpack.c.bf16 %v5079_v29, %v5078_v16  ;;  %v6988_v9 = vpack.c.bf16 %v5097_v25, %v5096_v42  ;;  %v6958_v44 = vpack.c.bf16 %v5049_v4, %v5048_v37  ;;  %v5100_v22 = vld [vmem:[#allocation13 + $0x7c0] sm:$0xff]  ;;  %v5101_v6 = vld [vmem:[#allocation13 + $0x7c8] sm:$0xff]  ;;  %v5070_v14 = vld [vmem:[#allocation13 + $0x6d0] sm:$0xff] }
0x325a   :  { %6951 = vmatpush3.bf16.msra.mxu0 %v6950_v30  ;;  %v4523_v24 = vmul.f32 0.5, %v4507_v5  ;;  %7336 = vrsqrt.f32 %v4601_v19  ;;  %v6960_v39 = vpack.c.bf16 %v5067_v32, %v5066_v59  ;;  %v6990_v30 = vpack.c.bf16 %v5081_v26, %v5080_v2  ;;  %v5052_v43 = vld [vmem:[#allocation13 + $0x640] sm:$0xff]  ;;  %v5053_v17 = vld [vmem:[#allocation13 + $0x648] sm:$0xff]  ;;  %v5071_v46 = vld [vmem:[#allocation13 + $0x6d8] sm:$0xff] }
0x325b   :  { %5530 = vmatmul.mubr.f32.vlgmr.msra.gmra.mrb[36].mxu1 %v4846_v8  ;;  %6953 = vmatprep.subr.bf16.mxu0 %v6952_v3  ;;  %7338 = vrsqrt.f32 %v4600_v52  ;;  %v6992_v3 = vpack.c.bf16 %v5099_v18, %v5098_v54  ;;  %v6962_v31 = vpack.c.bf16 %v5051_v12, %v5050_v34  ;;  %v6964_v1 = vpack.c.bf16 %v5069_v48, %v5068_v55  ;;  %v5084_v45 = vld [vmem:[#allocation13 + $0x740] sm:$0xff]  ;;  %v5085_v23 = vld [vmem:[#allocation13 + $0x748] sm:$0xff]  ;;  %v5102_v41 = vld [vmem:[#allocation13 + $0x7d0] sm:$0xff] }
0x325c   :  { %6983 = vmatpush3.bf16.msra.mxu1 %v6982_v11  ;;  %v4555_v10 = vsub.f32 %v4523_v24, %v4539_v60  ;;  %7340 = vrsqrt.f32 %v4602_v57  ;;  %v6994_v56 = vpack.c.bf16 %v5083_v50, %v5082_v21  ;;  %v6996_v49 = vpack.c.bf16 %v5101_v6, %v5100_v22  ;;  %v5103_v35 = vld [vmem:[#allocation13 + $0x7d8] sm:$0xff]  ;;  %v9498_v8 = vld [vmem:[%s9550_s14 + $0x8] sm:$0xff]  ;;  %v5054_v52 = vld [vmem:[#allocation13 + $0x650] sm:$0xff] }
0x325d   :  { %6985 = vmatprep.subr.bf16.mxu1 %v6984_v36  ;;  %v4585_v11 = vsub.f32 %v9338_v7, %v9433_v61  ;;  %v6966_v20 = vpack.c.bf16 %v5053_v17, %v5052_v43  ;;  %v4695_v36 = vrot.slane %v9498_v8, %v8513_v40  ;;  %v6968_v29 = vpack.c.bf16 %v5071_v46, %v5070_v14  ;;  %v5055_v5 = vld [vmem:[#allocation13 + $0x658] sm:$0xff]  ;;  %v5072_v61 = vld [vmem:[#allocation13 + $0x6e0] sm:$0xff]  ;;  %v5073_v42 = vld [vmem:[#allocation13 + $0x6e8] sm:$0xff] }
0x325e   :  { %6955 = vmatpush3.bf16.msra.mxu0 %v6954_v47  ;;  %v4571_v62 = vmax.f32 %v4555_v10, 0.0  ;;  %v6998_v7 = vpack.c.bf16 %v5085_v23, %v5084_v45  ;;  %v4795_v25 = vrot.slane %v9258_v13, %v8513_v40  ;;  %v4584_v19 = vsub.f32 %v9325_v33, %v9415_v58  ;;  %v5086_v37 = vld [vmem:[#allocation13 + $0x750] sm:$0xff]  ;;  %v5087_v4 = vld [vmem:[#allocation13 + $0x758] sm:$0xff]  ;;  %v5105_v59 = vld [vmem:[#allocation13 + $0x7e8] sm:$0xff] }
0x325f   :  { %6957 = vmatprep.subr.bf16.mxu0 %v6956_v28  ;;  %v7000_v28 = vpack.c.bf16 %v5103_v35, %v5102_v41  ;;  %v6970_v24 = vpack.c.bf16 %v5055_v5, %v5054_v52  ;;  %v5056_v32 = vld [vmem:[#allocation13 + $0x660] sm:$0xff]  ;;  %v4691_v26 = vrot.slane %v9498_v8, %v8502_v15  ;;  %v4586_v40 = vsub.f32 %v9330_v27, %v9422_v38  ;;  %v5057_v58 = vld [vmem:[#allocation13 + $0x668] sm:$0xff]  ;;  %v5074_v10 = vld [vmem:[#allocation13 + $0x6f0] sm:$0xff] }
0x3260   :  { %6987 = vmatpush3.bf16.msra.mxu1 %v6986_v51  ;;  %v4603_v63 = vadd.f32 1e-05, %v4571_v62  ;;  %v5104_v51 = vld [vmem:[#allocation13 + $0x7e0] sm:$0xff]  ;;  %v6972_v33 = vpack.c.bf16 %v5073_v42, %v5072_v61  ;;  %v4587_v62 = vsub.f32 %v9343_v53, %v9486_v0  ;;  %v5089_v48 = vld [vmem:[#allocation13 + $0x768] sm:$0xff]  ;;  %v6974_v21 = vpack.c.bf16 %v5057_v58, %v5056_v32  ;;  %v5058_v43 = vld [vmem:[#allocation13 + $0x670] sm:$0xff] }
0x3261   :  { %6989 = vmatprep.subr.bf16.mxu1 %v6988_v9  ;;  %v9908_v54 = vld [vmem:[#allocation21_spill] sm:$0xff]  ;;  %v9909_v27 = vld [vmem:[#allocation22_spill] sm:$0xff]  ;;  %v5059_v17 = vld [vmem:[#allocation13 + $0x678] sm:$0xff]  ;;  %v4791_v0 = vrot.slane %v9258_v13, %v8502_v15 }
0x3262   :  { %6959 = vmatpush3.bf16.msra.mxu0 %v6958_v44  ;;  %7342 = vrsqrt.f32 %v4603_v63  ;;  %v5075_v44 = vld [vmem:[#allocation13 + $0x6f8] sm:$0xff]  ;;  %v4699_v18 = vrot.slane %v9498_v8, %v9908_v54  ;;  %v5088_v55 = vld [vmem:[#allocation13 + $0x760] sm:$0xff]  ;;  %v4703_v38 = vrot.slane %v9498_v8, %v9909_v27  ;;  %v5106_v63 = vld [vmem:[#allocation13 + $0x7f0] sm:$0xff]  ;;  %v4803_v53 = vrot.slane %v9258_v13, %v9909_v27 }
0x3263   :  { %6961 = vmatprep.subr.bf16.mxu0 %v6960_v39  ;;  %v7002_v39 = vpack.c.bf16 %v5087_v4, %v5086_v37  ;;  %v6976_v50 = vpack.c.bf16 %v5075_v44, %v5074_v10  ;;  %v5091_v45 = vld [vmem:[#allocation13 + $0x778] sm:$0xff] }
0x3264   :  { %6991 = vmatpush3.bf16.msra.mxu1 %v6990_v30  ;;  %v7337_v16 = vpop.eup %7336  ;;  %v7004_v30 = vpack.c.bf16 %v5105_v59, %v5104_v51 }
0x3265   :  { %6993 = vmatprep.subr.bf16.mxu1 %v6992_v3  ;;  %v7339_v60 = vpop.eup %7338  ;;  %v4633_v47 = vmul.f32 %v7337_v16, %v4585_v11  ;;  %v4799_v11 = vrot.slane %v9258_v13, %v9908_v54  ;;  %v5718_v13 = vld [vmem:[%s9553_s17] ss:$0 sm:$0xff]  ;;  %s7526_s17 = smov [#allocation15]  }
0x3266   :  { %6963 = vmatpush3.bf16.msra.mxu0 %v6962_v31  ;;  %v7341_v57 = vpop.eup %7340  ;;  %v4632_v2 = vmul.f32 %v7339_v60, %v4584_v19  ;;  %v5107_v31 = vld [vmem:[#allocation13 + $0x7f8] sm:$0xff]  ;;  %s5682_s25 = sshll.u32 %s7526_s17, 4  ;;  %s5683_s25 = int_to_ptr.vmem [resolvable:$true] %s5682_s25 }
0x3267   :  { %6965 = vmatprep.subr.bf16.mxu0 %v6964_v1  ;;  %v4733_v9 = vmul.f32 %v4695_v36, %v4633_v47  ;;  %v4634_v12 = vmul.f32 %v7341_v57, %v4586_v40  ;;  %v7008_v46 = vpack.c.bf16 %v5107_v31, %v5106_v63  ;;  %s7477_s29 = scalar_lea.vmem %s5683_s25, 32  ;;  %p7482_p7 = scmp.lt.s32.totalorder %s5683_s25, %s5683_s25 }
0x3268   :  { %6995 = vmatpush3.bf16.msra.mxu1 %v6994_v56  ;;  %v4732_v6 = vmul.f32 %v4691_v26, %v4632_v2  ;;  %v7006_v56 = vpack.c.bf16 %v5089_v48, %v5088_v55  ;;  %p7478_p6 = scmp.ne.s32.totalorder %s5683_s25, %s7477_s29  ;;  %p7483_p8 = scmp.lt.s32.totalorder %s7477_s29, %s7477_s29 }
0x3269   :  { %6997 = vmatprep.subr.bf16.mxu1 %v6996_v49  ;;  %v4833_v34 = vadd.f32 %v4795_v25, %v4733_v9  ;;  %v4734_v14 = vmul.f32 %v4699_v18, %v4634_v12  ;;  %v5090_v49 = vld [vmem:[#allocation13 + $0x770] sm:$0xff] }
0x326a   :  { %6967 = vmatpush3.bf16.msra.mxu0 %v6966_v20  ;;  %v6978_v20 = vpack.c.bf16 %v5059_v17, %v5058_v43  ;;  %v4832_v35 = vadd.f32 %v4791_v0, %v4732_v6  ;;  %v7010_v8 = vpack.c.bf16 %v5091_v45, %v5090_v49  ;;  %p7484_p9 = por %p7483_p8, %p7482_p7 }
0x326b   :  { %6969 = vmatprep.subr.bf16.mxu0 %v6968_v29  ;;  %v4849_v22 = vmax.f32 %v4833_v34, 0.0  ;;  %v4834_v36 = vadd.f32 %v4799_v11, %v4734_v14 }
0x326c   :  { %6999 = vmatpush3.bf16.msra.mxu1 %v6998_v7  ;;  %v7343_v3 = vpop.eup %7342  ;;  %v4848_v16 = vmax.f32 %v4832_v35, 0.0  ;;  %p7485_p10 = pnand %p7484_p9, %p7478_p6 }
0x326d   :  { %7001 = vmatprep.subr.bf16.mxu1 %v7000_v28  ;;  %v4635_v1 = vmul.f32 %v7343_v3, %v4587_v62  ;;  %5599 = vmatprep.mubr.f32.mxu0 %v4849_v22  ;;  %v4850_v29 = vmax.f32 %v4834_v36, 0.0 }
0x326e   :  { %6971 = vmatpush3.bf16.msra.mxu0 %v6970_v24 }
0x326f   :  { %6973 = vmatprep.subr.bf16.mxu0 %v6972_v33  ;;  %v4735_v23 = vmul.f32 %v4703_v38, %v4635_v1 }
0x3270   :  { %7003 = vmatpush3.bf16.msra.mxu1 %v7002_v39 }
0x3271   :  { %7005 = vmatprep.subr.bf16.mxu1 %v7004_v30  ;;  %v4835_v41 = vadd.f32 %v4803_v53, %v4735_v23 }
0x3272   :  { %6975 = vmatpush3.bf16.msra.mxu0 %v6974_v21 }
0x3273   :  { %6977 = vmatprep.subr.bf16.mxu0 %v6976_v50  ;;  %v4851_v15 = vmax.f32 %v4835_v41, 0.0 }
0x3274   :  { %7007 = vmatpush3.bf16.msra.mxu1 %v7006_v56 }
0x3275   :  { %7009 = vmatprep.subr.bf16.mxu1 %v7008_v46  ;;  %5669 = vmatprep.mubr.f32.mxu1 %v4851_v15 }
0x3276   :  { %6979 = vmatpush3.bf16.msra.mxu0 %v6978_v20 }
0x3278   :  { %7011 = vmatpush3.bf16.msra.mxu1 %v7010_v8 }
0x3279   :  { %5600 = vmatmul.mubr.f32.vlgmr.msra.gmra.mrb[40].mxu0 %v4848_v16 }
0x327b   :  { %5670 = vmatmul.mubr.f32.vlgmr.msra.gmra.mrb[38].mxu1 %v4850_v29 }
0x32d5   :  { %v5769_v52 = vpop.f32.mrb[34].mxu0 }
0x32d6   :  { %v5770_v5 = vpop.f32.mrb[35].mxu0 }
0x32d7   :  { %v5804_v60 = vpop.f32.mrb[32].mxu1  ;;  %v5771_v47 = vadd.f32 %v5770_v5, %v5769_v52 }
0x32d8   :  { %v5805_v7 = vpop.f32.mrb[33].mxu1 }
0x32d9   :  { %v5182_v61 = vadd.f32 %v5771_v47, %v5718_v13  ;;  %v5806_v42 = vadd.f32 %v5805_v7, %v5804_v60 }
0x32db   :  { %v5252_v25 = vadd.f32 %v5806_v42, %v5182_v61 }
0x32fe   :  { %v5839_v19 = vpop.f32.mrb[36].mxu0 }
0x32ff   :  { %v5840_v28 = vpop.f32.mrb[37].mxu0 }
0x3300   :  { %v5841_v4 = vadd.f32 %v5840_v28, %v5839_v19 }
0x3302   :  { %v5322_v24 = vadd.f32 %v5841_v4, %v5252_v25 }
0x3304   :  { %v5874_v37 = vpop.f32.mrb[34].mxu1 }
0x3305   :  { %v5875_v57 = vpop.f32.mrb[35].mxu1 }
0x3306   :  { %v5876_v51 = vadd.f32 %v5875_v57, %v5874_v37 }
0x3308   :  { %v5392_v59 = vadd.f32 %v5876_v51, %v5322_v24 }
0x332c   :  { %v5909_v32 = vpop.f32.mrb[38].mxu0 }
0x332d   :  { %v5910_v9 = vpop.f32.mrb[39].mxu0 }
0x332e   :  { %v5944_v2 = vpop.f32.mrb[36].mxu1  ;;  %v5911_v26 = vadd.f32 %v5910_v9, %v5909_v32 }
0x332f   :  { %v5945_v40 = vpop.f32.mrb[37].mxu1 }
0x3330   :  { %v5462_v33 = vadd.f32 %v5911_v26, %v5392_v59  ;;  %v5946_v58 = vadd.f32 %v5945_v40, %v5944_v2 }
0x3332   :  { %v5532_v10 = vadd.f32 %v5946_v58, %v5462_v33 }
0x334c   :  { %v5979_v44 = vpop.f32.mrb[40].mxu0 }
0x334d   :  { %v5980_v54 = vpop.f32.mrb[41].mxu0 }
0x334e   :  { %v6014_v18 = vpop.f32.mrb[38].mxu1  ;;  %v5981_v39 = vadd.f32 %v5980_v54, %v5979_v44 }
0x334f   :  { %v6015_v34 = vpop.f32.mrb[39].mxu1 }
0x3350   :  { %v5602_v12 = vadd.f32 %v5981_v39, %v5532_v10  ;;  %v6016_v62 = vadd.f32 %v6015_v34, %v6014_v18 }
0x3352   :  { %v5672_v30 = vadd.f32 %v6016_v62, %v5602_v12 }
0x3354   :  { %5675 = vst [vmem:[#allocation15] sm:$0x3] %v5672_v30 }
0x3355   :  { %7488 = shalt.err (!%p7485_p10)
}
0x3356   :  { %s7489_s0 = scalar_lea.hbm %s9554_s18, 32 }
0x3357   :  { %p7490_p11 = scmp.ne.s32.totalorder %s9554_s18, %s7489_s0  ;;  %p7493_p12 = scmp.lt.u32.totalorder %s7489_s0, %s9554_s18 }
0x3359   :  { %p7495_p13 = pnand %p7493_p12, %p7490_p11 }
0x335b   :  { %7498 = shalt.err (!%p7495_p13)
}
0x335c   :  { %5685 = dma.vmem_to_hbm [thread:$0]  %s5683_s25, 32, %s9554_s18, [#allocation6]  }
0x335d   :  { %7507 = dma.done.wait [#allocation6], 32  }
0x335e   :  { %7508 = vsyncadd [#allocation6], 4294967264 }
0x335f   :  { %5689 = vsyncpa [#allocation5], 1 }
0x3360   :  { %5690 = vsyncpa [#allocation8], 1 }
0x3361   :  { %5691 = vsyncpa [#allocation11], 1 }
0x3362   :  { %5692 = vsyncpa [#allocation14], 1 }
0x3363   :  { %5693 = vsyncpa [#allocation6], 1 }

</bundles_post_ra>
